<compile_context>
chip_gen: v6e
topology: v6e:2x2x1
jax: 0.10.0
libtpu: 0.0.40
codegen_flags: <defaults>
</compile_context>

<pallas_src>
import jax
import jax.numpy as jnp
from jax.experimental import pallas as pl
from jax.experimental.pallas import tpu as pltpu


# ------------------------------ small helpers -------------------------------

_VMEM_LIMIT = 48 * 1024 * 1024          # reviewed as safe on v5e/v6e/v7x


def _round_up(n, m):
    return ((n + m - 1) // m) * m


def _pad_rows(x, target_rows):
    m = x.shape[0]
    if target_rows == m:
        return x
    return jnp.pad(x, ((0, target_rows - m),) + ((0, 0),) * (x.ndim - 1))


def _choose_row_tile(rows, group, max_tile=512, min_grid=2):
    """Row tile (in un-grouped rows): multiple of 8*group so the lane-packed
    output block keeps 8-aligned sublanes; prefers a tile that divides `rows`
    exactly AND yields >= min_grid grid steps (keeps both v7x cores busy at
    small batch with zero padding); otherwise falls back to ~rows/min_grid."""
    base = 8 * group
    best = None
    t = base
    while t <= min(max_tile, rows):
        if rows % t == 0 and rows // t >= min_grid:
            best = t
        t += base
    if best is None:
        target = -(-rows // min_grid)                      # ceil(rows/min_grid)
        best = min(max(base, _round_up(target, base)), _round_up(rows, base))
    return best


# ----------------------------- Pallas kernels ------------------------------

def _matmul_bias_relu_kernel(x_ref, w_ref, b_ref, o_ref):
    # bf16 x bf16 -> f32 accumulate on the MXU; bias + ReLU in f32; store bf16.
    acc = jnp.dot(x_ref[...], w_ref[...], preferred_element_type=jnp.float32)
    o_ref[...] = jnp.maximum(acc + b_ref[...], 0.0).astype(o_ref.dtype)


def _fc_dueling_kernel(x_ref, w1_ref, b1_ref, w2_ref, b2_ref, o_ref):
    # One value/advantage half per grid step: FC1 half (bf16 MXU, f32 acc) +
    # ReLU, then its head in f32.  Hidden activations never leave VMEM.
    h = jnp.dot(x_ref[...], w1_ref[...], preferred_element_type=jnp.float32)
    h = jnp.maximum(h + b1_ref[0], 0.0)                     # (tb, 512) f32
    o_ref[0] = jnp.dot(h, w2_ref[0],
                       preferred_element_type=jnp.float32) + b2_ref[0]


# ------------------------------- conv layer ---------------------------------

def _im2col(x_nhwc, k, stride):
    """kxk stride-`stride` patches -> (B*Ho*Wo, k*k*C), cols ordered (dy,dx,c)."""
    B, H, W, C = x_nhwc.shape
    Ho = (H - k) // stride + 1
    Wo = (W - k) // stride + 1
    cols = []
    for dy in range(k):
        for dx in range(k):
            cols.append(
                x_nhwc[:,
                       dy:dy + (Ho - 1) * stride + 1:stride,
                       dx:dx + (Wo - 1) * stride + 1:stride,
                       :])
    p = jnp.stack(cols, axis=3)                             # (B, Ho, Wo, k*k, C)
    return p.reshape(B * Ho * Wo, k * k * C), Ho, Wo


def conv2d_relu(x_nhwc, w_wide, b_wide, k, stride, cout):
    """PyTorch Conv2d (valid) + ReLU as a lane-dense, row-tiled Pallas matmul.

    g = 128 // cout consecutive output pixels share one 128-lane output row:
    patches (M, K) are viewed as (M/g, g*K) and multiplied by the prepared
    block-diagonal (g*K, g*cout) weight."""
    B = x_nhwc.shape[0]
    patches, Ho, Wo = _im2col(x_nhwc, k, stride)            # (M, K) bf16
    M, K = patches.shape
    g = w_wide.shape[1] // cout
    tm = _choose_row_tile(M, g)
    Mp = _round_up(M, tm)
    patches = _pad_rows(patches, Mp)
    xw = patches.reshape(Mp // g, g * K)                    # free row-major view
    nl = g * cout                                           # 128 lanes
    out = pl.pallas_call(
        _matmul_bias_relu_kernel,
        out_shape=jax.ShapeDtypeStruct((Mp // g, nl), jnp.bfloat16),
        grid=(Mp // tm,),
        in_specs=[
            pl.BlockSpec((tm // g, g * K), lambda i: (i, 0)),   # pipelined rows
            pl.BlockSpec((g * K, nl), lambda i: (0, 0)),        # resident weight
            pl.BlockSpec((1, nl), lambda i: (0, 0)),            # resident bias
        ],
        out_specs=pl.BlockSpec((tm // g, nl), lambda i: (i, 0)),
        compiler_params=pltpu.CompilerParams(
            dimension_semantics=("parallel",),
            vmem_limit_bytes=_VMEM_LIMIT),
    )(xw, w_wide, b_wide)
    return out.reshape(Mp, cout)[:M].reshape(B, Ho, Wo, cout)


# --------------------------- fused FC + dueling ------------------------------

def fc_dueling(flat, w1, b1, w2, b2, num_actions, tb=128):
    """Fused FC1(value||advantage) + heads, gridded (half, batch-tile)."""
    B, K = flat.shape
    half = w1.shape[1] // 2                                 # 512
    head = w2.shape[-1]                                     # 128 (padded heads)
    tb = min(tb, _round_up(B, 8))
    Bp = _round_up(B, tb)
    flat_p = _pad_rows(flat, Bp)
    out = pl.pallas_call(
        _fc_dueling_kernel,
        out_shape=jax.ShapeDtypeStruct((2, Bp, head), jnp.float32),
        grid=(2, Bp // tb),                 # halves outer -> w1 half stays resident
        in_specs=[
            pl.BlockSpec((tb, K), lambda h, i: (i, 0)),
            pl.BlockSpec((K, half), lambda h, i: (0, h)),
            pl.BlockSpec((1, 1, half), lambda h, i: (h, 0, 0)),
            pl.BlockSpec((1, half, head), lambda h, i: (h, 0, 0)),
            pl.BlockSpec((1, 1, head), lambda h, i: (h, 0, 0)),
        ],
        out_specs=pl.BlockSpec((1, tb, head), lambda h, i: (h, i, 0)),
        compiler_params=pltpu.CompilerParams(
            dimension_semantics=("parallel", "parallel"),
            vmem_limit_bytes=_VMEM_LIMIT),
    )(flat_p, w1, b1, w2, b2)
    value = out[0, :B, :1]                                  # (B, 1)
    adv = out[1, :B, :num_actions]                          # (B, A)
    return value + adv - jnp.mean(adv, axis=-1, keepdims=True)


# ------------------------------ full forward ---------------------------------

def dqn_forward(prepared, x_nchw, num_actions):
    x = jnp.transpose(x_nchw, (0, 2, 3, 1)).astype(jnp.bfloat16)      # NHWC
    x = conv2d_relu(x, prepared["c1_w"], prepared["c1_b"], k=8, stride=4, cout=32)
    x = conv2d_relu(x, prepared["c2_w"], prepared["c2_b"], k=4, stride=2, cout=64)
    x = conv2d_relu(x, prepared["c3_w"], prepared["c3_b"], k=3, stride=1, cout=64)
    flat = x.reshape(x.shape[0], -1)        # NHWC flatten; FC1 rows permuted
    return fc_dueling(flat, prepared["w1"], prepared["b1"],
                      prepared["w2"], prepared["b2"], num_actions)


# --------------------------- parameter preparation --------------------------

def prepare_params(params):
    """One-time host-side: reorder / widen / fuse / cast PyTorch-layout params."""

    def conv_wide(w_oihw, b):
        cout, cin, kh, kw = w_oihw.shape
        mat = (jnp.transpose(w_oihw, (2, 3, 1, 0))          # (kh, kw, cin, cout)
               .reshape(kh * kw * cin, cout))
        g = max(1, 128 // cout)
        K = kh * kw * cin
        wbd = jnp.zeros((g * K, g * cout), jnp.float32)     # block-diagonal
        for j in range(g):
            wbd = wbd.at[j * K:(j + 1) * K, j * cout:(j + 1) * cout].set(mat)
        bb = jnp.tile(b.astype(jnp.float32), g).reshape(1, g * cout)
        return wbd.astype(jnp.bfloat16), bb

    c1_w, c1_b = conv_wide(params["c1_w"], params["c1_b"])
    c2_w, c2_b = conv_wide(params["c2_w"], params["c2_b"])
    c3_w, c3_b = conv_wide(params["c3_w"], params["c3_b"])

    # NCHW-flatten -> NHWC-flatten row permutation for FC1 weights
    # (conv3 output here is (B, 7, 7, 64) NHWC vs (B, 64, 7, 7) in PyTorch).
    C, H, W = params["c3_w"].shape[0], 7, 7
    hh, ww, cc = jnp.meshgrid(jnp.arange(H), jnp.arange(W), jnp.arange(C),
                              indexing="ij")
    nchw_idx = (cc * (H * W) + hh * W + ww).reshape(-1)
    v1 = params["v1_w"][nchw_idx, :]
    a1 = params["a1_w"][nchw_idx, :]
    w1 = jnp.concatenate([v1, a1], axis=1).astype(jnp.bfloat16)       # (3136,1024)
    b1 = jnp.stack([params["v1_b"], params["a1_b"]])[:, None, :].astype(jnp.float32)

    # Heads kept f32 (tiny), padded to 128 lanes: index 0 = value, 1 = advantage.
    Hd = params["v1_w"].shape[1]                                      # 512
    A = params["a2_w"].shape[1]
    head = max(128, _round_up(A, 128))
    w2 = jnp.zeros((2, Hd, head), jnp.float32)
    w2 = w2.at[0, :, :1].set(params["v2_w"])
    w2 = w2.at[1, :, :A].set(params["a2_w"])
    b2 = jnp.zeros((2, 1, head), jnp.float32)
    b2 = b2.at[0, 0, 0].set(params["v2_b"][0])
    b2 = b2.at[1, 0, :A].set(params["a2_b"])

    return {"c1_w": c1_w, "c1_b": c1_b, "c2_w": c2_w, "c2_b": c2_b,
            "c3_w": c3_w, "c3_b": c3_b, "w1": w1, "b1": b1, "w2": w2, "b2": b2}


def init_params(key, in_channels=4, num_actions=4):
    ks = jax.random.split(key, 14)
    f32 = jnp.float32

    def rnd(k, shape, fan_in):
        return jax.random.normal(k, shape, f32) * (1.0 / jnp.sqrt(f32(fan_in)))

    return {
        "c1_w": rnd(ks[0], (32, in_channels, 8, 8), in_channels * 64),
        "c1_b": rnd(ks[1], (32,), in_channels * 64),
        "c2_w": rnd(ks[2], (64, 32, 4, 4), 32 * 16),
        "c2_b": rnd(ks[3], (64,), 32 * 16),
        "c3_w": rnd(ks[4], (64, 64, 3, 3), 64 * 9),
        "c3_b": rnd(ks[5], (64,), 64 * 9),
        # linear weights stored as (in, out)
        "v1_w": rnd(ks[6], (64 * 7 * 7, 512), 64 * 7 * 7),
        "v1_b": rnd(ks[7], (512,), 64 * 7 * 7),
        "v2_w": rnd(ks[8], (512, 1), 512),
        "v2_b": rnd(ks[9], (1,), 512),
        "a1_w": rnd(ks[10], (64 * 7 * 7, 512), 64 * 7 * 7),
        "a1_b": rnd(ks[11], (512,), 64 * 7 * 7),
        "a2_w": rnd(ks[12], (512, num_actions), 512),
        "a2_b": rnd(ks[13], (num_actions,), 512),
    }


# Pure-JAX f32 reference (PyTorch semantics, no Pallas) for correctness check.
def dqn_forward_ref(params, x_nchw):
    def conv(x, w, b, s):
        y = jax.lax.conv_general_dilated(
            x, w, window_strides=(s, s), padding="VALID",
            dimension_numbers=("NCHW", "OIHW", "NCHW"))
        return jnp.maximum(y + b[None, :, None, None], 0.0)

    x = conv(x_nchw, params["c1_w"], params["c1_b"], 4)
    x = conv(x, params["c2_w"], params["c2_b"], 2)
    x = conv(x, params["c3_w"], params["c3_b"], 1)
    flat = x.reshape(x.shape[0], -1)
    hv = jnp.maximum(flat @ params["v1_w"] + params["v1_b"], 0.0)
    ha = jnp.maximum(flat @ params["a1_w"] + params["a1_b"], 0.0)
    value = hv @ params["v2_w"] + params["v2_b"]
    adv = ha @ params["a2_w"] + params["a2_b"]
    return value + adv - adv.mean(axis=-1, keepdims=True)


if __name__ == "__main__":
    key = jax.random.PRNGKey(0)
    pkey, xkey = jax.random.split(key)
    params = init_params(pkey, in_channels=4, num_actions=4)
    prepared = prepare_params(params)

    # Batch=2 stacked-frame Atari-style input; 84x84 spatial is required by the
    # module's 64*7*7 flatten.
    x = jax.random.uniform(xkey, (2, 4, 84, 84), jnp.float32)

    fwd = jax.jit(dqn_forward, static_argnames=("num_actions",))
    q = fwd(prepared, x, num_actions=4)
    q = jax.block_until_ready(q)

    q_ref = dqn_forward_ref(params, x)
    assert q.shape == (2, 4), q.shape
    max_err = float(jnp.max(jnp.abs(q - q_ref)))
    # bf16 conv trunk + bf16 FC1 (f32 accumulation, f32 heads): an ordering or
    # permutation bug would give O(0.3+) errors; bf16 rounding stays well below.
    assert max_err < 1e-1, f"max abs err {max_err}"

    print("KERNEL_OK")
</pallas_src>

<mosaic_0001>
module attributes {stable_mosaic.version = 11 : i64} {
  func.func @_matmul_bias_relu_kernel(%arg0: i32, %arg1: memref<40x1024xbf16, #tpu.memory_space<vmem>>, %arg2: memref<1024x128xbf16, #tpu.memory_space<vmem>>, %arg3: memref<1x128xf32, #tpu.memory_space<vmem>>, %arg4: memref<40x128xbf16, #tpu.memory_space<vmem>>) attributes {dimension_semantics = [#tpu.dimension_semantics<parallel>], iteration_bounds = array<i64: 5>, scalar_prefetch = 0 : i64, scratch_operands = 0 : i64, tpu.core_type = #tpu.core_type<tc>, window_params = [{transform_indices = @transform_0, window_bounds = array<i64: 40, 1024>}, {pipeline_mode = #tpu.pipeline_mode<synchronous>, transform_indices = @transform_1, window_bounds = array<i64: 1024, 128>}, {pipeline_mode = #tpu.pipeline_mode<synchronous>, transform_indices = @transform_2, window_bounds = array<i64: 1, 128>}, {transform_indices = @transform_3, window_bounds = array<i64: 40, 128>}]} {
    %c0 = arith.constant 0 : index
    %c0_0 = arith.constant 0 : index
    %0 = vector.load %arg1[%c0, %c0_0] : memref<40x1024xbf16, #tpu.memory_space<vmem>>, vector<40x1024xbf16>
    %c0_1 = arith.constant 0 : index
    %c0_2 = arith.constant 0 : index
    %1 = vector.load %arg2[%c0_1, %c0_2] : memref<1024x128xbf16, #tpu.memory_space<vmem>>, vector<1024x128xbf16>
    %cst = arith.constant dense<0.000000e+00> : vector<40x128xf32>
    %2 = tpu.matmul %0, %1, %cst {dimension_numbers = #tpu.dot_dimension_numbers<[1], [0], [0], [1], [0, 0, 1, 1], [], []>} : vector<40x1024xbf16>, vector<1024x128xbf16>, vector<40x128xf32> -> vector<40x128xf32>
    %c0_3 = arith.constant 0 : index
    %c0_4 = arith.constant 0 : index
    %3 = vector.load %arg3[%c0_3, %c0_4] : memref<1x128xf32, #tpu.memory_space<vmem>>, vector<1x128xf32>
    %4 = vector.broadcast %3 : vector<1x128xf32> to vector<40x128xf32>
    %5 = arith.addf %2, %4 : vector<40x128xf32>
    %cst_5 = arith.constant 0.000000e+00 : f32
    %6 = vector.broadcast %cst_5 : f32 to vector<40x128xf32>
    %7 = arith.maximumf %5, %6 : vector<40x128xf32>
    %8 = arith.truncf %7 : vector<40x128xf32> to vector<40x128xbf16>
    %c0_6 = arith.constant 0 : index
    %c0_7 = arith.constant 0 : index
    %9 = vector.load %arg4[%c0_6, %c0_7] : memref<40x128xbf16, #tpu.memory_space<vmem>>, vector<40x128xbf16>
    tpu.vector_store %arg4[%c0_6, %c0_7], %8 {strides = array<i32>} : memref<40x128xbf16, #tpu.memory_space<vmem>>, vector<40x128xbf16>,
    return
  }
  func.func @transform_0(%arg0: i32) -> (i32, i32) {
    %c0_i32 = arith.constant 0 : i32
    %c0_i32_0 = arith.constant 0 : i32
    return %arg0, %c0_i32 : i32, i32
  }
  func.func @transform_1(%arg0: i32) -> (i32, i32) {
    %c0_i32 = arith.constant 0 : i32
    %c0_i32_0 = arith.constant 0 : i32
    %c0_i32_1 = arith.constant 0 : i32
    return %c0_i32, %c0_i32_0 : i32, i32
  }
  func.func @transform_2(%arg0: i32) -> (i32, i32) {
    %c0_i32 = arith.constant 0 : i32
    %c0_i32_0 = arith.constant 0 : i32
    %c0_i32_1 = arith.constant 0 : i32
    return %c0_i32, %c0_i32_0 : i32, i32
  }
  func.func @transform_3(%arg0: i32) -> (i32, i32) {
    %c0_i32 = arith.constant 0 : i32
    %c0_i32_0 = arith.constant 0 : i32
    return %arg0, %c0_i32 : i32, i32
  }
}

module attributes {stable_mosaic.version = 11 : i64} {
  func.func @_matmul_bias_relu_kernel(%arg0: i32, %arg1: memref<48x1024xbf16, #tpu.memory_space<vmem>>, %arg2: memref<1024x128xbf16, #tpu.memory_space<vmem>>, %arg3: memref<1x128xf32, #tpu.memory_space<vmem>>, %arg4: memref<48x128xbf16, #tpu.memory_space<vmem>>) attributes {dimension_semantics = [#tpu.dimension_semantics<parallel>], iteration_bounds = array<i64: 2>, scalar_prefetch = 0 : i64, scratch_operands = 0 : i64, tpu.core_type = #tpu.core_type<tc>, window_params = [{transform_indices = @transform_0, window_bounds = array<i64: 48, 1024>}, {pipeline_mode = #tpu.pipeline_mode<synchronous>, transform_indices = @transform_1, window_bounds = array<i64: 1024, 128>}, {pipeline_mode = #tpu.pipeline_mode<synchronous>, transform_indices = @transform_2, window_bounds = array<i64: 1, 128>}, {transform_indices = @transform_3, window_bounds = array<i64: 48, 128>}]} {
    %c0 = arith.constant 0 : index
    %c0_0 = arith.constant 0 : index
    %0 = vector.load %arg1[%c0, %c0_0] : memref<48x1024xbf16, #tpu.memory_space<vmem>>, vector<48x1024xbf16>
    %c0_1 = arith.constant 0 : index
    %c0_2 = arith.constant 0 : index
    %1 = vector.load %arg2[%c0_1, %c0_2] : memref<1024x128xbf16, #tpu.memory_space<vmem>>, vector<1024x128xbf16>
    %cst = arith.constant dense<0.000000e+00> : vector<48x128xf32>
    %2 = tpu.matmul %0, %1, %cst {dimension_numbers = #tpu.dot_dimension_numbers<[1], [0], [0], [1], [0, 0, 1, 1], [], []>} : vector<48x1024xbf16>, vector<1024x128xbf16>, vector<48x128xf32> -> vector<48x128xf32>
    %c0_3 = arith.constant 0 : index
    %c0_4 = arith.constant 0 : index
    %3 = vector.load %arg3[%c0_3, %c0_4] : memref<1x128xf32, #tpu.memory_space<vmem>>, vector<1x128xf32>
    %4 = vector.broadcast %3 : vector<1x128xf32> to vector<48x128xf32>
    %5 = arith.addf %2, %4 : vector<48x128xf32>
    %cst_5 = arith.constant 0.000000e+00 : f32
    %6 = vector.broadcast %cst_5 : f32 to vector<48x128xf32>
    %7 = arith.maximumf %5, %6 : vector<48x128xf32>
    %8 = arith.truncf %7 : vector<48x128xf32> to vector<48x128xbf16>
    %c0_6 = arith.constant 0 : index
    %c0_7 = arith.constant 0 : index
    %9 = vector.load %arg4[%c0_6, %c0_7] : memref<48x128xbf16, #tpu.memory_space<vmem>>, vector<48x128xbf16>
    tpu.vector_store %arg4[%c0_6, %c0_7], %8 {strides = array<i32>} : memref<48x128xbf16, #tpu.memory_space<vmem>>, vector<48x128xbf16>,
    return
  }
  func.func @transform_0(%arg0: i32) -> (i32, i32) {
    %c0_i32 = arith.constant 0 : i32
    %c0_i32_0 = arith.constant 0 : i32
    return %arg0, %c0_i32 : i32, i32
  }
  func.func @transform_1(%arg0: i32) -> (i32, i32) {
    %c0_i32 = arith.constant 0 : i32
    %c0_i32_0 = arith.constant 0 : i32
    %c0_i32_1 = arith.constant 0 : i32
    return %c0_i32, %c0_i32_0 : i32, i32
  }
  func.func @transform_2(%arg0: i32) -> (i32, i32) {
    %c0_i32 = arith.constant 0 : i32
    %c0_i32_0 = arith.constant 0 : i32
    %c0_i32_1 = arith.constant 0 : i32
    return %c0_i32, %c0_i32_0 : i32, i32
  }
  func.func @transform_3(%arg0: i32) -> (i32, i32) {
    %c0_i32 = arith.constant 0 : i32
    %c0_i32_0 = arith.constant 0 : i32
    return %arg0, %c0_i32 : i32, i32
  }
}

module attributes {stable_mosaic.version = 11 : i64} {
  func.func @_matmul_bias_relu_kernel(%arg0: i32, %arg1: memref<32x1152xbf16, #tpu.memory_space<vmem>>, %arg2: memref<1152x128xbf16, #tpu.memory_space<vmem>>, %arg3: memref<1x128xf32, #tpu.memory_space<vmem>>, %arg4: memref<32x128xbf16, #tpu.memory_space<vmem>>) attributes {dimension_semantics = [#tpu.dimension_semantics<parallel>], iteration_bounds = array<i64: 2>, scalar_prefetch = 0 : i64, scratch_operands = 0 : i64, tpu.core_type = #tpu.core_type<tc>, window_params = [{transform_indices = @transform_0, window_bounds = array<i64: 32, 1152>}, {pipeline_mode = #tpu.pipeline_mode<synchronous>, transform_indices = @transform_1, window_bounds = array<i64: 1152, 128>}, {pipeline_mode = #tpu.pipeline_mode<synchronous>, transform_indices = @transform_2, window_bounds = array<i64: 1, 128>}, {transform_indices = @transform_3, window_bounds = array<i64: 32, 128>}]} {
    %c0 = arith.constant 0 : index
    %c0_0 = arith.constant 0 : index
    %0 = vector.load %arg1[%c0, %c0_0] : memref<32x1152xbf16, #tpu.memory_space<vmem>>, vector<32x1152xbf16>
    %c0_1 = arith.constant 0 : index
    %c0_2 = arith.constant 0 : index
    %1 = vector.load %arg2[%c0_1, %c0_2] : memref<1152x128xbf16, #tpu.memory_space<vmem>>, vector<1152x128xbf16>
    %cst = arith.constant dense<0.000000e+00> : vector<32x128xf32>
    %2 = tpu.matmul %0, %1, %cst {dimension_numbers = #tpu.dot_dimension_numbers<[1], [0], [0], [1], [0, 0, 1, 1], [], []>} : vector<32x1152xbf16>, vector<1152x128xbf16>, vector<32x128xf32> -> vector<32x128xf32>
    %c0_3 = arith.constant 0 : index
    %c0_4 = arith.constant 0 : index
    %3 = vector.load %arg3[%c0_3, %c0_4] : memref<1x128xf32, #tpu.memory_space<vmem>>, vector<1x128xf32>
    %4 = vector.broadcast %3 : vector<1x128xf32> to vector<32x128xf32>
    %5 = arith.addf %2, %4 : vector<32x128xf32>
    %cst_5 = arith.constant 0.000000e+00 : f32
    %6 = vector.broadcast %cst_5 : f32 to vector<32x128xf32>
    %7 = arith.maximumf %5, %6 : vector<32x128xf32>
    %8 = arith.truncf %7 : vector<32x128xf32> to vector<32x128xbf16>
    %c0_6 = arith.constant 0 : index
    %c0_7 = arith.constant 0 : index
    %9 = vector.load %arg4[%c0_6, %c0_7] : memref<32x128xbf16, #tpu.memory_space<vmem>>, vector<32x128xbf16>
    tpu.vector_store %arg4[%c0_6, %c0_7], %8 {strides = array<i32>} : memref<32x128xbf16, #tpu.memory_space<vmem>>, vector<32x128xbf16>,
    return
  }
  func.func @transform_0(%arg0: i32) -> (i32, i32) {
    %c0_i32 = arith.constant 0 : i32
    %c0_i32_0 = arith.constant 0 : i32
    return %arg0, %c0_i32 : i32, i32
  }
  func.func @transform_1(%arg0: i32) -> (i32, i32) {
    %c0_i32 = arith.constant 0 : i32
    %c0_i32_0 = arith.constant 0 : i32
    %c0_i32_1 = arith.constant 0 : i32
    return %c0_i32, %c0_i32_0 : i32, i32
  }
  func.func @transform_2(%arg0: i32) -> (i32, i32) {
    %c0_i32 = arith.constant 0 : i32
    %c0_i32_0 = arith.constant 0 : i32
    %c0_i32_1 = arith.constant 0 : i32
    return %c0_i32, %c0_i32_0 : i32, i32
  }
  func.func @transform_3(%arg0: i32) -> (i32, i32) {
    %c0_i32 = arith.constant 0 : i32
    %c0_i32_0 = arith.constant 0 : i32
    return %arg0, %c0_i32 : i32, i32
  }
}

module attributes {stable_mosaic.version = 11 : i64} {
  func.func @_fc_dueling_kernel(%arg0: i32, %arg1: i32, %arg2: memref<8x3136xbf16, #tpu.memory_space<vmem>>, %arg3: memref<3136x512xbf16, #tpu.memory_space<vmem>>, %arg4: memref<1x1x512xf32, #tpu.memory_space<vmem>>, %arg5: memref<1x512x128xf32, #tpu.memory_space<vmem>>, %arg6: memref<1x1x128xf32, #tpu.memory_space<vmem>>, %arg7: memref<1x8x128xf32, #tpu.memory_space<vmem>>) attributes {dimension_semantics = [#tpu.dimension_semantics<parallel>, #tpu.dimension_semantics<parallel>], iteration_bounds = array<i64: 2, 1>, scalar_prefetch = 0 : i64, scratch_operands = 0 : i64, tpu.core_type = #tpu.core_type<tc>, window_params = [{transform_indices = @transform_0, window_bounds = array<i64: 8, 3136>}, {transform_indices = @transform_1, window_bounds = array<i64: 3136, 512>}, {transform_indices = @transform_2, window_bounds = array<i64: 1, 1, 512>}, {transform_indices = @transform_3, window_bounds = array<i64: 1, 512, 128>}, {transform_indices = @transform_4, window_bounds = array<i64: 1, 1, 128>}, {transform_indices = @transform_5, window_bounds = array<i64: 1, 8, 128>}]} {
    %c0 = arith.constant 0 : index
    %c0_0 = arith.constant 0 : index
    %0 = vector.load %arg2[%c0, %c0_0] : memref<8x3136xbf16, #tpu.memory_space<vmem>>, vector<8x3136xbf16>
    %c0_1 = arith.constant 0 : index
    %c0_2 = arith.constant 0 : index
    %1 = vector.load %arg3[%c0_1, %c0_2] : memref<3136x512xbf16, #tpu.memory_space<vmem>>, vector<3136x512xbf16>
    %cst = arith.constant dense<0.000000e+00> : vector<8x512xf32>
    %2 = tpu.matmul %0, %1, %cst {dimension_numbers = #tpu.dot_dimension_numbers<[1], [0], [0], [1], [0, 0, 1, 1], [], []>} : vector<8x3136xbf16>, vector<3136x512xbf16>, vector<8x512xf32> -> vector<8x512xf32>
    %c0_3 = arith.constant 0 : index
    %c0_4 = arith.constant 0 : index
    %c0_5 = arith.constant 0 : index
    %3 = vector.load %arg4[%c0_3, %c0_4, %c0_5] : memref<1x1x512xf32, #tpu.memory_space<vmem>>, vector<1x1x512xf32>
    %4 = vector.shape_cast %3 : vector<1x1x512xf32> to vector<1x512xf32>
    %5 = vector.broadcast %4 : vector<1x512xf32> to vector<8x512xf32>
    %6 = arith.addf %2, %5 : vector<8x512xf32>
    %cst_6 = arith.constant 0.000000e+00 : f32
    %7 = vector.broadcast %cst_6 : f32 to vector<8x512xf32>
    %8 = arith.maximumf %6, %7 : vector<8x512xf32>
    %c0_7 = arith.constant 0 : index
    %c0_8 = arith.constant 0 : index
    %c0_9 = arith.constant 0 : index
    %9 = vector.load %arg5[%c0_7, %c0_8, %c0_9] : memref<1x512x128xf32, #tpu.memory_space<vmem>>, vector<1x512x128xf32>
    %10 = vector.shape_cast %9 : vector<1x512x128xf32> to vector<512x128xf32>
    %cst_10 = arith.constant dense<0.000000e+00> : vector<8x128xf32>
    %11 = tpu.matmul %8, %10, %cst_10 {dimension_numbers = #tpu.dot_dimension_numbers<[1], [0], [0], [1], [0, 0, 1, 1], [], []>} : vector<8x512xf32>, vector<512x128xf32>, vector<8x128xf32> -> vector<8x128xf32>
    %c0_11 = arith.constant 0 : index
    %c0_12 = arith.constant 0 : index
    %c0_13 = arith.constant 0 : index
    %12 = vector.load %arg6[%c0_11, %c0_12, %c0_13] : memref<1x1x128xf32, #tpu.memory_space<vmem>>, vector<1x1x128xf32>
    %13 = vector.shape_cast %12 : vector<1x1x128xf32> to vector<1x128xf32>
    %14 = vector.broadcast %13 : vector<1x128xf32> to vector<8x128xf32>
    %15 = arith.addf %11, %14 : vector<8x128xf32>
    %c0_14 = arith.constant 0 : index
    %c0_15 = arith.constant 0 : index
    %c0_16 = arith.constant 0 : index
    %16 = vector.load %arg7[%c0_14, %c0_15, %c0_16] : memref<1x8x128xf32, #tpu.memory_space<vmem>>, vector<1x8x128xf32>
    %17 = vector.shape_cast %16 : vector<1x8x128xf32> to vector<8x128xf32>
    %18 = vector.shape_cast %15 : vector<8x128xf32> to vector<1x8x128xf32>
    tpu.vector_store %arg7[%c0_14, %c0_15, %c0_16], %18 {strides = array<i32>} : memref<1x8x128xf32, #tpu.memory_space<vmem>>, vector<1x8x128xf32>,
    return
  }
  func.func @transform_0(%arg0: i32, %arg1: i32) -> (i32, i32) {
    %c0_i32 = arith.constant 0 : i32
    %c0_i32_0 = arith.constant 0 : i32
    return %arg1, %c0_i32 : i32, i32
  }
  func.func @transform_1(%arg0: i32, %arg1: i32) -> (i32, i32) {
    %c0_i32 = arith.constant 0 : i32
    %c0_i32_0 = arith.constant 0 : i32
    return %c0_i32, %arg0 : i32, i32
  }
  func.func @transform_2(%arg0: i32, %arg1: i32) -> (i32, i32, i32) {
    %c0_i32 = arith.constant 0 : i32
    %c0_i32_0 = arith.constant 0 : i32
    %c0_i32_1 = arith.constant 0 : i32
    return %arg0, %c0_i32, %c0_i32_0 : i32, i32, i32
  }
  func.func @transform_3(%arg0: i32, %arg1: i32) -> (i32, i32, i32) {
    %c0_i32 = arith.constant 0 : i32
    %c0_i32_0 = arith.constant 0 : i32
    %c0_i32_1 = arith.constant 0 : i32
    return %arg0, %c0_i32, %c0_i32_0 : i32, i32, i32
  }
  func.func @transform_4(%arg0: i32, %arg1: i32) -> (i32, i32, i32) {
    %c0_i32 = arith.constant 0 : i32
    %c0_i32_0 = arith.constant 0 : i32
    %c0_i32_1 = arith.constant 0 : i32
    return %arg0, %c0_i32, %c0_i32_0 : i32, i32, i32
  }
  func.func @transform_5(%arg0: i32, %arg1: i32) -> (i32, i32, i32) {
    %c0_i32 = arith.constant 0 : i32
    %c0_i32_0 = arith.constant 0 : i32
    return %arg0, %arg1, %c0_i32 : i32, i32, i32
  }
}

</mosaic_0001>

<bundles_post_ra>
// kernel: dqn_forward.4
= control target key start
LH: loop header
LB: loop body
LE: loop exit
PB: predicated region body
PF: predicated region fallthrough
CT: control target
= control target key end

     0   :  { %s1501_s12 = smov 0   ;;  %s1746_s0 = inlined_call_operand.vmem [shape: bf16[200,1024], index: 0, kind: input, shape index: {}]   ;;  %s1747_s1 = inlined_call_operand.vmem [shape: bf16[1024,128], index: 1, kind: input, shape index: {}]   ;;  %s1748_s2 = inlined_call_operand.vmem [shape: f32[1,128], index: 2, kind: input, shape index: {}]   ;;  %s1749_s3 = inlined_call_operand.vmem [shape: bf16[200,128], index: 3, kind: output, shape index: {}]  }
   0x1 LB: > { %s1136_s13 = sadd.s32 4294967295, %s1479_s12   ;;  %p1140_p0 = scmp.ge.s32.totalorder %s1479_s12, 1  ;;  %s1479_s12 = sphi %s1501_s12, %s13_s12  }
   0x2   : > { %p139_p1 = scmp.lt.s32.totalorder %s1479_s12, 6 }
   0x4   : > { %p140_p2 = pnand %p1140_p0, %p139_p1 }
   0x5   : > { %s164_s19 = smul.u32 (!%p140_p2), 5, %s1136_s13 }
   0x6   : > { %143 = sbr.rel (%p140_p2) target bundleno = 299 (0x12b), region = 32 }
   0x7   : > { %p165_p3 = scmp.lt.s32.totalorder (!%p140_p2), %s164_s19, 24 }
   0xb   : > { %v1401_v0 = vld [vmem:[%s1747_s1 + $0x78] sm:$0xff]   ;;  %v1405_v4 = vld [vmem:[%s1747_s1 + $0x70] sm:$0xff]   ;;  %v1409_v8 = vld [vmem:[%s1747_s1 + $0x68] sm:$0xff]   ;;  %s1751_s19 = smov (!%p165_p3, %s164_s19), 24 }
   0xc   : > { %v1402_v1 = vld [vmem:[%s1747_s1 + $0xf8] sm:$0xff]   ;;  %1257 = vmatprep.subr.bf16.mxu0 %v1401_v0  ;;  %v1406_v5 = vld [vmem:[%s1747_s1 + $0xf0] sm:$0xff]   ;;  %v1410_v9 = vld [vmem:[%s1747_s1 + $0xe8] sm:$0xff]   ;;  %s1240_s18 = sshll.u32 %s1751_s19, 5  ;;  %s1143_s25 = sshll.u32 %s1751_s19, 2 }
   0xd   : > { %v1403_v2 = vld [vmem:[%s1747_s1 + $0x38] sm:$0xff]   ;;  %1291 = vmatprep.subr.bf16.mxu1 %v1402_v1  ;;  %v1407_v6 = vld [vmem:[%s1747_s1 + $0x30] sm:$0xff]   ;;  %v1411_v10 = vld [vmem:[%s1747_s1 + $0x28] sm:$0xff]   ;;  %s1607_s13 = scalar_lea.vmem %s1746_s0, %s1240_s18  ;;  %s1738_s28 = scalar_lea.vmem %s1749_s3, %s1143_s25 }
   0xe   : > { %v1404_v3 = vld [vmem:[%s1747_s1 + $0xb8] sm:$0xff]   ;;  %1258 = vmatpush3.bf16.msra.mxu0 %v1403_v2  ;;  %v1408_v7 = vld [vmem:[%s1747_s1 + $0xb0] sm:$0xff]   ;;  %v1412_v11 = vld [vmem:[%s1747_s1 + $0xa8] sm:$0xff]  }
   0xf   : > { %1292 = vmatpush3.bf16.msra.mxu1 %v1404_v3  ;;  %1259 = vmatprep.subr.bf16.mxu0 %v1405_v4  ;;  %v1413_v12 = vld [vmem:[%s1747_s1 + $0x60] sm:$0xff]   ;;  %v1417_v16 = vld [vmem:[%s1747_s1 + $0x58] sm:$0xff]   ;;  %v1421_v20 = vld [vmem:[%s1747_s1 + $0x50] sm:$0xff]  }
  0x10   : > { %1293 = vmatprep.subr.bf16.mxu1 %v1406_v5  ;;  %v1414_v13 = vld [vmem:[%s1747_s1 + $0xe0] sm:$0xff]   ;;  %v1418_v17 = vld [vmem:[%s1747_s1 + $0xd8] sm:$0xff]   ;;  %v1422_v21 = vld [vmem:[%s1747_s1 + $0xd0] sm:$0xff]  }
  0x11   : > { %v1415_v14 = vld [vmem:[%s1747_s1 + $0x20] sm:$0xff]   ;;  %v1419_v18 = vld [vmem:[%s1747_s1 + $0x18] sm:$0xff]   ;;  %v1423_v22 = vld [vmem:[%s1747_s1 + $0x10] sm:$0xff]  }
  0x12   : > { %1260 = vmatpush3.bf16.msra.mxu0 %v1407_v6  ;;  %v1416_v15 = vld [vmem:[%s1747_s1 + $0xa0] sm:$0xff]   ;;  %v1420_v19 = vld [vmem:[%s1747_s1 + $0x98] sm:$0xff]   ;;  %v1424_v23 = vld [vmem:[%s1747_s1 + $0x90] sm:$0xff]  }
  0x13   : > { %1294 = vmatpush3.bf16.msra.mxu1 %v1408_v7  ;;  %1261 = vmatprep.subr.bf16.mxu0 %v1409_v8  ;;  %v1425_v24 = vld [vmem:[%s1747_s1 + $0x48] sm:$0xff]   ;;  %v1429_v28 = vld [vmem:[%s1747_s1 + $0x40] sm:$0xff]   ;;  %v1433_v40 = vld [vmem:[%s1747_s1 + $0x178] sm:$0xff]  }
  0x14   : > { %1295 = vmatprep.subr.bf16.mxu1 %v1410_v9  ;;  %v1426_v25 = vld [vmem:[%s1747_s1 + $0xc8] sm:$0xff]   ;;  %v1430_v29 = vld [vmem:[%s1747_s1 + $0xc0] sm:$0xff]   ;;  %v1434_v41 = vld [vmem:[%s1747_s1 + $0x1f8] sm:$0xff]  }
  0x15   : > { %v1427_v26 = vld [vmem:[%s1747_s1 + $0x8] sm:$0xff]   ;;  %v1431_v30 = vld [vmem:[%s1747_s1] sm:$0xff]   ;;  %v1435_v42 = vld [vmem:[%s1747_s1 + $0x138] sm:$0xff]  }
  0x16   : > { %1262 = vmatpush3.bf16.msra.mxu0 %v1411_v10  ;;  %v1428_v27 = vld [vmem:[%s1747_s1 + $0x88] sm:$0xff]   ;;  %v1432_v31 = vld [vmem:[%s1747_s1 + $0x80] sm:$0xff]   ;;  %v1436_v43 = vld [vmem:[%s1747_s1 + $0x1b8] sm:$0xff]  }
  0x17   : > { %1296 = vmatpush3.bf16.msra.mxu1 %v1412_v11  ;;  %1263 = vmatprep.subr.bf16.mxu0 %v1413_v12  ;;  %v178_v32 = vld [vmem:[%s1607_s13] sm:$0xff]  ;;  %v179_v34 = vld [vmem:[%s1607_s13 + $0x8] sm:$0xff]  ;;  %v1437_v44 = vld [vmem:[%s1747_s1 + $0x170] sm:$0xff]  }
  0x18   : > { %1297 = vmatprep.subr.bf16.mxu1 %v1414_v13  ;;  %v182_v33 = vld [vmem:[%s1607_s13 + $0x20] sm:$0xff]  ;;  %v183_v37 = vld [vmem:[%s1607_s13 + $0x28] sm:$0xff]  ;;  %v1438_v45 = vld [vmem:[%s1747_s1 + $0x1f0] sm:$0xff]  }
  0x19   : > { %v1145_v35 = vcombine.low %v178_v32, %v182_v33  ;;  %v1146_v36 = vcombine.high %v178_v32, %v182_v33  ;;  %v1147_v38 = vcombine.low %v179_v34, %v183_v37  ;;  %v1148_v39 = vcombine.high %v179_v34, %v183_v37  ;;  %v1439_v46 = vld [vmem:[%s1747_s1 + $0x130] sm:$0xff]   ;;  %v1441_v48 = vld [vmem:[%s1747_s1 + $0x168] sm:$0xff]   ;;  %v186_v50 = vld [vmem:[%s1607_s13 + $0x40] sm:$0xff] }
  0x1a   : > { %1264 = vmatpush3.bf16.msra.mxu0 %v1415_v14  ;;  %v1440_v47 = vld [vmem:[%s1747_s1 + $0x1b0] sm:$0xff]   ;;  %v1442_v49 = vld [vmem:[%s1747_s1 + $0x1e8] sm:$0xff]   ;;  %v190_v51 = vld [vmem:[%s1607_s13 + $0x60] sm:$0xff] }
  0x1b   : > { %1298 = vmatpush3.bf16.msra.mxu1 %v1416_v15  ;;  %1265 = vmatprep.subr.bf16.mxu0 %v1417_v16  ;;  %v1154_v52 = vcombine.high %v186_v50, %v190_v51  ;;  %v1443_v53 = vld [vmem:[%s1747_s1 + $0x128] sm:$0xff]   ;;  %v1153_v54 = vcombine.low %v186_v50, %v190_v51  ;;  %v1445_v60 = vld [vmem:[%s1747_s1 + $0x160] sm:$0xff]   ;;  %v1449_v0 = vld [vmem:[%s1747_s1 + $0x158] sm:$0xff]  }
  0x1c   : > { %1299 = vmatprep.subr.bf16.mxu1 %v1418_v17  ;;  %857 = vmatprep.mubr.bf16.mxu0 %v1146_v36  ;;  %v1444_v55 = vld [vmem:[%s1747_s1 + $0x1a8] sm:$0xff]   ;;  %v1446_v61 = vld [vmem:[%s1747_s1 + $0x1e0] sm:$0xff]   ;;  %v1450_v1 = vld [vmem:[%s1747_s1 + $0x1d8] sm:$0xff]  }
  0x1d   : > { %913 = vmatprep.mubr.bf16.mxu1 %v1148_v39  ;;  %v187_v56 = vld [vmem:[%s1607_s13 + $0x48] sm:$0xff]  ;;  %v1447_v62 = vld [vmem:[%s1747_s1 + $0x120] sm:$0xff]   ;;  %v1452_v4 = vld [vmem:[%s1747_s1 + $0x118] sm:$0xff]  }
  0x1e   : > { %1266 = vmatpush3.bf16.msra.mxu0 %v1419_v18  ;;  %v191_v57 = vld [vmem:[%s1607_s13 + $0x68] sm:$0xff]  ;;  %v1448_v63 = vld [vmem:[%s1747_s1 + $0x1a0] sm:$0xff]   ;;  %v1453_v6 = vld [vmem:[%s1747_s1 + $0x198] sm:$0xff]  }
  0x1f   : > { %1300 = vmatpush3.bf16.msra.mxu1 %v1420_v19  ;;  %1267 = vmatprep.subr.bf16.mxu0 %v1421_v20  ;;  %v1156_v58 = vcombine.high %v187_v56, %v191_v57  ;;  %v1155_v59 = vcombine.low %v187_v56, %v191_v57  ;;  %v194_v2 = vld [vmem:[%s1607_s13 + $0x80] sm:$0xff]  ;;  %v195_v7 = vld [vmem:[%s1607_s13 + $0x88] sm:$0xff]  ;;  %v1457_v10 = vld [vmem:[%s1747_s1 + $0x150] sm:$0xff]  }
  0x20   : > { %1301 = vmatprep.subr.bf16.mxu1 %v1422_v21  ;;  %v1162_v3 = vcombine.high %v194_v2, %v194_v2  ;;  %v1161_v5 = vcombine.low %v194_v2, %v194_v2  ;;  %v1164_v8 = vcombine.high %v195_v7, %v195_v7  ;;  %v1163_v9 = vcombine.low %v195_v7, %v195_v7  ;;  %v1458_v11 = vld [vmem:[%s1747_s1 + $0x1d0] sm:$0xff]   ;;  %v1461_v14 = vld [vmem:[%s1747_s1 + $0x148] sm:$0xff]   ;;  %v1465_v18 = vld [vmem:[%s1747_s1 + $0x140] sm:$0xff]  }
  0x21   : > { %v1459_v12 = vld [vmem:[%s1747_s1 + $0x110] sm:$0xff]   ;;  %v1462_v15 = vld [vmem:[%s1747_s1 + $0x1c8] sm:$0xff]   ;;  %v1466_v19 = vld [vmem:[%s1747_s1 + $0x1c0] sm:$0xff]  }
  0x22   : > { %1268 = vmatpush3.bf16.msra.mxu0 %v1423_v22  ;;  %v1460_v13 = vld [vmem:[%s1747_s1 + $0x190] sm:$0xff]   ;;  %v1463_v16 = vld [vmem:[%s1747_s1 + $0x108] sm:$0xff]   ;;  %v1467_v20 = vld [vmem:[%s1747_s1 + $0x100] sm:$0xff]  }
  0x23   : > { %1302 = vmatpush3.bf16.msra.mxu1 %v1424_v23  ;;  %1269 = vmatprep.subr.bf16.mxu0 %v1425_v24  ;;  %v1464_v17 = vld [vmem:[%s1747_s1 + $0x188] sm:$0xff]   ;;  %v1468_v21 = vld [vmem:[%s1747_s1 + $0x180] sm:$0xff]   ;;  %v180_v22 = vld [vmem:[%s1607_s13 + $0x10] sm:$0xff] }
  0x24   : > { %1303 = vmatprep.subr.bf16.mxu1 %v1426_v25  ;;  %v184_v23 = vld [vmem:[%s1607_s13 + $0x30] sm:$0xff]  ;;  %v189_v32 = vld [vmem:[%s1607_s13 + $0x58] sm:$0xff] }
  0x25   : > { %v1149_v24 = vcombine.low %v180_v22, %v184_v23  ;;  %v1150_v25 = vcombine.high %v180_v22, %v184_v23  ;;  %v193_v33 = vld [vmem:[%s1607_s13 + $0x78] sm:$0xff]  ;;  %v196_v36 = vld [vmem:[%s1607_s13 + $0x90] sm:$0xff] }
  0x26   : > { %1270 = vmatpush3.bf16.msra.mxu0 %v1427_v26  ;;  %v181_v26 = vld [vmem:[%s1607_s13 + $0x18] sm:$0xff]  ;;  %v1159_v39 = vcombine.low %v189_v32, %v193_v33 }
  0x27   : > { %1304 = vmatpush3.bf16.msra.mxu1 %v1428_v27  ;;  %1271 = vmatprep.subr.bf16.mxu0 %v1429_v28  ;;  %v185_v27 = vld [vmem:[%s1607_s13 + $0x38] sm:$0xff]  ;;  %v188_v28 = vld [vmem:[%s1607_s13 + $0x50] sm:$0xff] }
  0x28   : > { %1305 = vmatprep.subr.bf16.mxu1 %v1430_v29  ;;  %v1151_v29 = vcombine.low %v181_v26, %v185_v27  ;;  %v197_v37 = vld [vmem:[%s1607_s13 + $0x98] sm:$0xff] }
  0x2a   : > { %1272 = vmatpush3.bf16.msra.mxu0 %v1431_v30  ;;  %v1152_v30 = vcombine.high %v181_v26, %v185_v27 }
  0x2b   : > { %1306 = vmatpush3.bf16.msra.mxu1 %v1432_v31  ;;  %1325 = vmatprep.subr.bf16.mxu0 %v1433_v40  ;;  %v192_v31 = vld [vmem:[%s1607_s13 + $0x70] sm:$0xff]  ;;  %v1166_v40 = vcombine.high %v196_v36, %v196_v36 }
  0x2c   : > { %1359 = vmatprep.subr.bf16.mxu1 %v1434_v41  ;;  %v1158_v34 = vcombine.high %v188_v28, %v192_v31  ;;  %v1168_v41 = vcombine.high %v197_v37, %v197_v37 }
  0x2d   : > { %858 = vmatmul.mubr.bf16.vlgmr.msra.gmra.mxu0 %v1145_v35  ;;  %v1160_v35 = vcombine.high %v189_v32, %v193_v33 }
  0x2e   : > { %914 = vmatmul.mubr.bf16.vlgmr.msra.gmra.mxu1 %v1147_v38  ;;  %1326 = vmatpush3.bf16.msra.mxu0 %v1435_v42  ;;  %v1157_v38 = vcombine.low %v188_v28, %v192_v31  ;;  %v1165_v42 = vcombine.low %v196_v36, %v196_v36 }
  0x2f   : > { %1360 = vmatpush3.bf16.msra.mxu1 %v1436_v43  ;;  %1327 = vmatprep.subr.bf16.mxu0 %v1437_v44  ;;  %v1167_v43 = vcombine.low %v197_v37, %v197_v37 }
  0x30   : > { %1361 = vmatprep.subr.bf16.mxu1 %v1438_v45  ;;  %865 = vmatprep.mubr.bf16.mxu0 %v1154_v52 }
  0x31   : > { %921 = vmatprep.mubr.bf16.mxu1 %v1156_v58 }
  0x32   : > { %1328 = vmatpush3.bf16.msra.mxu0 %v1439_v46 }
  0x33   : > { %1362 = vmatpush3.bf16.msra.mxu1 %v1440_v47  ;;  %1329 = vmatprep.subr.bf16.mxu0 %v1441_v48 }
  0x34   : > { %1363 = vmatprep.subr.bf16.mxu1 %v1442_v49 }
  0x35   : > { %866 = vmatmul.mubr.bf16.gmra.mxu0 %v1153_v54 }
  0x36   : > { %1330 = vmatpush3.bf16.msra.mxu0 %v1443_v53  ;;  %922 = vmatmul.mubr.bf16.gmra.mxu1 %v1155_v59 }
  0x37   : > { %1364 = vmatpush3.bf16.msra.mxu1 %v1444_v55  ;;  %1331 = vmatprep.subr.bf16.mxu0 %v1445_v60 }
  0x38   : > { %1365 = vmatprep.subr.bf16.mxu1 %v1446_v61  ;;  %873 = vmatprep.mubr.bf16.mxu0 %v1162_v3 }
  0x39   : > { %929 = vmatprep.mubr.bf16.mxu1 %v1164_v8 }
  0x3a   : > { %1332 = vmatpush3.bf16.msra.mxu0 %v1447_v62 }
  0x3b   : > { %1366 = vmatpush3.bf16.msra.mxu1 %v1448_v63  ;;  %1333 = vmatprep.subr.bf16.mxu0 %v1449_v0 }
  0x3c   : > { %1367 = vmatprep.subr.bf16.mxu1 %v1450_v1 }
  0x3d   : > { %874 = vmatmul.mubr.bf16.gmra.mxu0 %v1161_v5  ;;  %v1144_v5 = vld [vmem:[%s1748_s2] ss:$0 sm:$0xff] }
  0x3e   : > { %1334 = vmatpush3.bf16.msra.mxu0 %v1452_v4  ;;  %930 = vmatmul.mubr.bf16.gmra.mxu1 %v1163_v9 }
  0x3f   : > { %1368 = vmatpush3.bf16.msra.mxu1 %v1453_v6  ;;  %1335 = vmatprep.subr.bf16.mxu0 %v1457_v10 }
  0x40   : > { %1369 = vmatprep.subr.bf16.mxu1 %v1458_v11  ;;  %969 = vmatprep.mubr.bf16.mxu0 %v1150_v25 }
  0x41   : > { %1025 = vmatprep.mubr.bf16.mxu1 %v1152_v30 }
  0x42   : > { %1336 = vmatpush3.bf16.msra.mxu0 %v1459_v12 }
  0x43   : > { %1370 = vmatpush3.bf16.msra.mxu1 %v1460_v13  ;;  %1337 = vmatprep.subr.bf16.mxu0 %v1461_v14 }
  0x44   : > { %1371 = vmatprep.subr.bf16.mxu1 %v1462_v15 }
  0x46   : > { %1338 = vmatpush3.bf16.msra.mxu0 %v1463_v16 }
  0x47   : > { %1372 = vmatpush3.bf16.msra.mxu1 %v1464_v17  ;;  %1339 = vmatprep.subr.bf16.mxu0 %v1465_v18 }
  0x48   : > { %1373 = vmatprep.subr.bf16.mxu1 %v1466_v19 }
  0x4a   : > { %1340 = vmatpush3.bf16.msra.mxu0 %v1467_v20 }
  0x4b   : > { %1374 = vmatpush3.bf16.msra.mxu1 %v1468_v21 }
  0x4d   : > { %970 = vmatmul.mubr.bf16.vlgmr.msra.gmra.mxu0 %v1149_v24 }
  0x4e   : > { %1026 = vmatmul.mubr.bf16.vlgmr.msra.gmra.mxu1 %v1151_v29  ;;  %977 = vmatprep.mubr.bf16.mxu0 %v1158_v34 }
  0x4f   : > { %1033 = vmatprep.mubr.bf16.mxu1 %v1160_v35 }
  0x55   : > { %978 = vmatmul.mubr.bf16.gmra.mxu0 %v1157_v38 }
  0x56   : > { %1034 = vmatmul.mubr.bf16.gmra.mxu1 %v1159_v39  ;;  %985 = vmatprep.mubr.bf16.mxu0 %v1166_v40 }
  0x57   : > { %1041 = vmatprep.mubr.bf16.mxu1 %v1168_v41 }
  0x5d   : > { %986 = vmatmul.mubr.bf16.gmra.mxu0 %v1165_v42 }
  0x5e   : > { %1042 = vmatmul.mubr.bf16.gmra.mxu1 %v1167_v43 }
  0xed   : > { %v1273_v44 = vpop.f32.mrf.mxu0 }
  0xee   : > { %v1307_v45 = vpop.f32.mrf.mxu1 }
  0xef   : > { %v1274_v46 = vpop.f32.mrf.mxu0 }
  0xf0   : > { %v1308_v47 = vpop.f32.mrf.mxu1  ;;  %v1275_v4 = vadd.f32 %v1274_v46, %v1273_v44 }
  0xf1   : > { %v1276_v48 = vpop.f32.mrf.mxu0  ;;  %v1309_v8 = vadd.f32 %v1308_v47, %v1307_v45 }
  0xf2   : > { %v1310_v49 = vpop.f32.mrf.mxu1  ;;  %v860_v7 = vadd.f32 %v1275_v4, %v1144_v5 }
  0xf3   : > { %v1277_v50 = vpop.f32.mrf.mxu0 }
  0xf4   : > { %v1311_v52 = vpop.f32.mrf.mxu1  ;;  %v1278_v6 = vadd.f32 %v1277_v50, %v1276_v48  ;;  %v916_v13 = vadd.f32 %v1309_v8, %v860_v7 }
  0xf5   : > { %v1279_v51 = vpop.f32.mrf.mxu0  ;;  %v1312_v17 = vadd.f32 %v1311_v52, %v1310_v49 }
  0xf6   : > { %v1313_v54 = vpop.f32.mrf.mxu1  ;;  %v863_v11 = vadd.f32 %v1278_v6, %v1144_v5 }
  0xf7   : > { %v1280_v53 = vpop.f32.mrf.mxu0 }
  0xf8   : > { %v1314_v56 = vpop.f32.mrf.mxu1  ;;  %v1281_v14 = vadd.f32 %v1280_v53, %v1279_v51  ;;  %v919_v21 = vadd.f32 %v1312_v17, %v863_v11 }
  0xf9   : > { %v1282_v55 = vpop.f32.mrf.mxu0  ;;  %v1315_v25 = vadd.f32 %v1314_v56, %v1313_v54 }
  0xfa   : > { %v1316_v58 = vpop.f32.mrf.mxu1  ;;  %v868_v24 = vadd.f32 %v1281_v14, %v1144_v5 }
  0xfb   : > { %v1283_v57 = vpop.f32.mrf.mxu0 }
  0xfc   : > { %v1317_v60 = vpop.f32.mrf.mxu1  ;;  %v1284_v22 = vadd.f32 %v1283_v57, %v1282_v55  ;;  %v924_v38 = vadd.f32 %v1315_v25, %v868_v24 }
  0xfd   : > { %v1285_v59 = vpop.f32.mrf.mxu0  ;;  %v1318_v35 = vadd.f32 %v1317_v60, %v1316_v58 }
  0xfe   : > { %v1319_v62 = vpop.f32.mrf.mxu1  ;;  %v871_v34 = vadd.f32 %v1284_v22, %v1144_v5 }
  0xff   : > { %v1286_v61 = vpop.f32.mrf.mxu0 }
 0x100   : > { %v1320_v0 = vpop.f32.mrf.mxu1  ;;  %v1287_v36 = vadd.f32 %v1286_v61, %v1285_v59  ;;  %v927_v47 = vadd.f32 %v1318_v35, %v871_v34 }
 0x101   : > { %v1288_v63 = vpop.f32.mrf.mxu0  ;;  %v1321_v50 = vadd.f32 %v1320_v0, %v1319_v62 }
 0x102   : > { %v1322_v2 = vpop.f32.mrf.mxu1  ;;  %v876_v48 = vadd.f32 %v1287_v36, %v1144_v5 }
 0x103   : > { %v1289_v1 = vpop.f32.mrf.mxu0 }
 0x104   : > { %v1323_v3 = vpop.f32.mrf.mxu1  ;;  %v932_v61 = vadd.f32 %v1321_v50, %v876_v48 }
 0x10d   : > { %v1341_v9 = vpop.f32.mrf.mxu0 }
 0x10e   : > { %v1375_v10 = vpop.f32.mrf.mxu1 }
 0x10f   : > { %v1342_v12 = vpop.f32.mrf.mxu0 }
 0x110   : > { %v1343_v15 = vadd.f32 %v1342_v12, %v1341_v9  ;;  %v1376_v16 = vpop.f32.mrf.mxu1 }
 0x111   : > { %v1344_v18 = vpop.f32.mrf.mxu0  ;;  %v1377_v26 = vadd.f32 %v1376_v16, %v1375_v10 }
 0x112   : > { %v972_v19 = vadd.f32 %v1343_v15, %v916_v13  ;;  %v1378_v20 = vpop.f32.mrf.mxu1 }
 0x113   : > { %v1345_v23 = vpop.f32.mrf.mxu0 }
 0x114   : > { %v1346_v27 = vadd.f32 %v1345_v23, %v1344_v18  ;;  %v1379_v28 = vpop.f32.mrf.mxu1  ;;  %v1028_v30 = vadd.f32 %v1377_v26, %v972_v19 }
 0x115   : > { %v1347_v29 = vpop.f32.mrf.mxu0  ;;  %v1380_v32 = vadd.f32 %v1379_v28, %v1378_v20 }
 0x116   : > { %v975_v31 = vadd.f32 %v1346_v27, %v919_v21  ;;  %v1381_v33 = vpop.f32.mrf.mxu1  ;;  %v1049_v43 = vmax.f32 %v1028_v30, 0.0 }
 0x117   : > { %v1348_v37 = vpop.f32.mrf.mxu0 }
 0x118   : > { %v1031_v39 = vadd.f32 %v1380_v32, %v975_v31  ;;  %v1349_v40 = vadd.f32 %v1348_v37, %v1347_v29  ;;  %v1382_v41 = vpop.f32.mrf.mxu1 }
 0x119   : > { %v1350_v42 = vpop.f32.mrf.mxu0  ;;  %v1383_v52 = vadd.f32 %v1382_v41, %v1381_v33 }
 0x11a   : > { %v1050_v44 = vmax.f32 %v1031_v39, 0.0  ;;  %v980_v45 = vadd.f32 %v1349_v40, %v924_v38  ;;  %v1384_v46 = vpop.f32.mrf.mxu1 }
 0x11b   : > { %v1351_v49 = vpop.f32.mrf.mxu0 }
 0x11c   : > { %v1249_v51 = vpack.c.bf16 %v1050_v44, %v1049_v43  ;;  %v1352_v53 = vadd.f32 %v1351_v49, %v1350_v42  ;;  %v1385_v54 = vpop.f32.mrf.mxu1  ;;  %v1036_v56 = vadd.f32 %v1383_v52, %v980_v45 }
 0x11d   : > { %v1353_v55 = vpop.f32.mrf.mxu0  ;;  %v1386_v58 = vadd.f32 %v1385_v54, %v1384_v46 }
 0x11e   : > { %1250 = vst [vmem:[%s1738_s28] sm:$0xff] %v1249_v51   ;;  %v983_v57 = vadd.f32 %v1352_v53, %v927_v47  ;;  %v1387_v59 = vpop.f32.mrf.mxu1  ;;  %v1051_v4 = vmax.f32 %v1036_v56, 0.0 }
 0x11f   : > { %v1354_v60 = vpop.f32.mrf.mxu0 }
 0x120   : > { %v1039_v63 = vadd.f32 %v1386_v58, %v983_v57  ;;  %v1355_v1 = vadd.f32 %v1354_v60, %v1353_v55  ;;  %v1388_v2 = vpop.f32.mrf.mxu1 }
 0x121   : > { %v1356_v3 = vpop.f32.mrf.mxu0  ;;  %v1389_v5 = vadd.f32 %v1388_v2, %v1387_v59 }
 0x122   : > { %v1052_v62 = vmax.f32 %v1039_v63, 0.0  ;;  %v988_v0 = vadd.f32 %v1355_v1, %v932_v61  ;;  %v1390_v6 = vpop.f32.mrf.mxu1 }
 0x123   : > { %v1357_v7 = vpop.f32.mrf.mxu0 }
 0x124   : > { %v1254_v8 = vpack.c.bf16 %v1052_v62, %v1051_v4  ;;  %v1044_v9 = vadd.f32 %v1389_v5, %v988_v0  ;;  %v1391_v10 = vpop.f32.mrf.mxu1 }
 0x126   : > { %1256 = vst [vmem:[%s1738_s28 + $0x8] sm:$0xff] %v1254_v8   ;;  %v1053_v11 = vmax.f32 %v1044_v9, 0.0 }
 0x128   : > { %v1245_v12 = vpack.c.bf16 %v1053_v11, %v1053_v11 }
 0x12a   : > { %1079 = vst [vmem:[%s1738_s28 + $0x10] sm:$0xf] %v1245_v12 }
 0x12b PF: > { %s13_s12 = sadd.s32 1, %s1479_s12  }
 0x12c   : > { %p10_p4 = scmp.ge.s32.totalorder %s13_s12, 7  }
 0x12e   :  { %12 = sbr.rel (!%p10_p4) target bundleno = 1 (0x1), region = 62 }

// kernel: dqn_forward.5
= control target key start
LH: loop header
LB: loop body
LE: loop exit
PB: predicated region body
PF: predicated region fallthrough
CT: control target
= control target key end

     0   :  { %s1526_s12 = smov 0   ;;  %s1786_s0 = inlined_call_operand.vmem [shape: bf16[96,1024], index: 0, kind: input, shape index: {}]   ;;  %s1787_s1 = inlined_call_operand.vmem [shape: bf16[1024,128], index: 1, kind: input, shape index: {}]   ;;  %s1788_s2 = inlined_call_operand.vmem [shape: f32[1,128], index: 2, kind: input, shape index: {}]   ;;  %s1789_s3 = inlined_call_operand.vmem [shape: bf16[96,128], index: 3, kind: output, shape index: {}]  }
   0x1 LB: > { %s1161_s13 = sadd.s32 4294967295, %s1504_s12   ;;  %p1165_p0 = scmp.ge.s32.totalorder %s1504_s12, 1  ;;  %s1504_s12 = sphi %s1526_s12, %s13_s12  }
   0x2   : > { %p139_p1 = scmp.lt.s32.totalorder %s1504_s12, 3 }
   0x4   : > { %p140_p2 = pnand %p1165_p0, %p139_p1 }
   0x5   : > { %s164_s19 = smul.u32 (!%p140_p2), 6, %s1161_s13 }
   0x6   : > { %143 = sbr.rel (%p140_p2) target bundleno = 303 (0x12f), region = 32 }
   0x7   : > { %p165_p3 = scmp.lt.s32.totalorder (!%p140_p2), %s164_s19, 11 }
   0xb   : > { %v1434_v0 = vld [vmem:[%s1787_s1 + $0x78] sm:$0xff]   ;;  %v1438_v4 = vld [vmem:[%s1787_s1 + $0x70] sm:$0xff]   ;;  %v1442_v8 = vld [vmem:[%s1787_s1 + $0x68] sm:$0xff]   ;;  %s1791_s19 = smov (!%p165_p3, %s164_s19), 11 }
   0xc   : > { %v1435_v1 = vld [vmem:[%s1787_s1 + $0xf8] sm:$0xff]   ;;  %1290 = vmatprep.subr.bf16.mxu0 %v1434_v0  ;;  %v1439_v5 = vld [vmem:[%s1787_s1 + $0xf0] sm:$0xff]   ;;  %v1443_v9 = vld [vmem:[%s1787_s1 + $0xe8] sm:$0xff]   ;;  %s1266_s18 = sshll.u32 %s1791_s19, 5  ;;  %s1168_s25 = sshll.u32 %s1791_s19, 2 }
   0xd   : > { %v1436_v2 = vld [vmem:[%s1787_s1 + $0x38] sm:$0xff]   ;;  %1324 = vmatprep.subr.bf16.mxu1 %v1435_v1  ;;  %v1440_v6 = vld [vmem:[%s1787_s1 + $0x30] sm:$0xff]   ;;  %v1444_v10 = vld [vmem:[%s1787_s1 + $0x28] sm:$0xff]   ;;  %s1632_s13 = scalar_lea.vmem %s1786_s0, %s1266_s18  ;;  %s1776_s28 = scalar_lea.vmem %s1789_s3, %s1168_s25 }
   0xe   : > { %v1437_v3 = vld [vmem:[%s1787_s1 + $0xb8] sm:$0xff]   ;;  %1291 = vmatpush3.bf16.msra.mxu0 %v1436_v2  ;;  %v1441_v7 = vld [vmem:[%s1787_s1 + $0xb0] sm:$0xff]   ;;  %v1445_v11 = vld [vmem:[%s1787_s1 + $0xa8] sm:$0xff]  }
   0xf   : > { %1325 = vmatpush3.bf16.msra.mxu1 %v1437_v3  ;;  %1292 = vmatprep.subr.bf16.mxu0 %v1438_v4  ;;  %v1446_v12 = vld [vmem:[%s1787_s1 + $0x60] sm:$0xff]   ;;  %v1450_v16 = vld [vmem:[%s1787_s1 + $0x58] sm:$0xff]   ;;  %v1454_v20 = vld [vmem:[%s1787_s1 + $0x50] sm:$0xff]  }
  0x10   : > { %1326 = vmatprep.subr.bf16.mxu1 %v1439_v5  ;;  %v1447_v13 = vld [vmem:[%s1787_s1 + $0xe0] sm:$0xff]   ;;  %v1451_v17 = vld [vmem:[%s1787_s1 + $0xd8] sm:$0xff]   ;;  %v1455_v21 = vld [vmem:[%s1787_s1 + $0xd0] sm:$0xff]  }
  0x11   : > { %v1448_v14 = vld [vmem:[%s1787_s1 + $0x20] sm:$0xff]   ;;  %v1452_v18 = vld [vmem:[%s1787_s1 + $0x18] sm:$0xff]   ;;  %v1456_v22 = vld [vmem:[%s1787_s1 + $0x10] sm:$0xff]  }
  0x12   : > { %1293 = vmatpush3.bf16.msra.mxu0 %v1440_v6  ;;  %v1449_v15 = vld [vmem:[%s1787_s1 + $0xa0] sm:$0xff]   ;;  %v1453_v19 = vld [vmem:[%s1787_s1 + $0x98] sm:$0xff]   ;;  %v1457_v23 = vld [vmem:[%s1787_s1 + $0x90] sm:$0xff]  }
  0x13   : > { %1327 = vmatpush3.bf16.msra.mxu1 %v1441_v7  ;;  %1294 = vmatprep.subr.bf16.mxu0 %v1442_v8  ;;  %v1458_v24 = vld [vmem:[%s1787_s1 + $0x48] sm:$0xff]   ;;  %v1462_v28 = vld [vmem:[%s1787_s1 + $0x40] sm:$0xff]   ;;  %v1466_v40 = vld [vmem:[%s1787_s1 + $0x178] sm:$0xff]  }
  0x14   : > { %1328 = vmatprep.subr.bf16.mxu1 %v1443_v9  ;;  %v1459_v25 = vld [vmem:[%s1787_s1 + $0xc8] sm:$0xff]   ;;  %v1463_v29 = vld [vmem:[%s1787_s1 + $0xc0] sm:$0xff]   ;;  %v1467_v41 = vld [vmem:[%s1787_s1 + $0x1f8] sm:$0xff]  }
  0x15   : > { %v1460_v26 = vld [vmem:[%s1787_s1 + $0x8] sm:$0xff]   ;;  %v1464_v30 = vld [vmem:[%s1787_s1] sm:$0xff]   ;;  %v1468_v42 = vld [vmem:[%s1787_s1 + $0x138] sm:$0xff]  }
  0x16   : > { %1295 = vmatpush3.bf16.msra.mxu0 %v1444_v10  ;;  %v1461_v27 = vld [vmem:[%s1787_s1 + $0x88] sm:$0xff]   ;;  %v1465_v31 = vld [vmem:[%s1787_s1 + $0x80] sm:$0xff]   ;;  %v1469_v43 = vld [vmem:[%s1787_s1 + $0x1b8] sm:$0xff]  }
  0x17   : > { %1329 = vmatpush3.bf16.msra.mxu1 %v1445_v11  ;;  %1296 = vmatprep.subr.bf16.mxu0 %v1446_v12  ;;  %v178_v32 = vld [vmem:[%s1632_s13] sm:$0xff]  ;;  %v179_v34 = vld [vmem:[%s1632_s13 + $0x8] sm:$0xff]  ;;  %v1470_v44 = vld [vmem:[%s1787_s1 + $0x170] sm:$0xff]  }
  0x18   : > { %1330 = vmatprep.subr.bf16.mxu1 %v1447_v13  ;;  %v182_v33 = vld [vmem:[%s1632_s13 + $0x20] sm:$0xff]  ;;  %v183_v37 = vld [vmem:[%s1632_s13 + $0x28] sm:$0xff]  ;;  %v1471_v45 = vld [vmem:[%s1787_s1 + $0x1f0] sm:$0xff]  }
  0x19   : > { %v1170_v35 = vcombine.low %v178_v32, %v182_v33  ;;  %v1171_v36 = vcombine.high %v178_v32, %v182_v33  ;;  %v1172_v38 = vcombine.low %v179_v34, %v183_v37  ;;  %v1173_v39 = vcombine.high %v179_v34, %v183_v37  ;;  %v1472_v46 = vld [vmem:[%s1787_s1 + $0x130] sm:$0xff]   ;;  %v1474_v48 = vld [vmem:[%s1787_s1 + $0x168] sm:$0xff]   ;;  %v186_v50 = vld [vmem:[%s1632_s13 + $0x40] sm:$0xff] }
  0x1a   : > { %1297 = vmatpush3.bf16.msra.mxu0 %v1448_v14  ;;  %v1473_v47 = vld [vmem:[%s1787_s1 + $0x1b0] sm:$0xff]   ;;  %v1475_v49 = vld [vmem:[%s1787_s1 + $0x1e8] sm:$0xff]   ;;  %v190_v51 = vld [vmem:[%s1632_s13 + $0x60] sm:$0xff] }
  0x1b   : > { %1331 = vmatpush3.bf16.msra.mxu1 %v1449_v15  ;;  %1298 = vmatprep.subr.bf16.mxu0 %v1450_v16  ;;  %v1179_v52 = vcombine.high %v186_v50, %v190_v51  ;;  %v1476_v53 = vld [vmem:[%s1787_s1 + $0x128] sm:$0xff]   ;;  %v1178_v54 = vcombine.low %v186_v50, %v190_v51  ;;  %v1478_v60 = vld [vmem:[%s1787_s1 + $0x160] sm:$0xff]   ;;  %v1482_v0 = vld [vmem:[%s1787_s1 + $0x158] sm:$0xff]  }
  0x1c   : > { %1332 = vmatprep.subr.bf16.mxu1 %v1451_v17  ;;  %873 = vmatprep.mubr.bf16.mxu0 %v1171_v36  ;;  %v1477_v55 = vld [vmem:[%s1787_s1 + $0x1a8] sm:$0xff]   ;;  %v1479_v61 = vld [vmem:[%s1787_s1 + $0x1e0] sm:$0xff]   ;;  %v1483_v1 = vld [vmem:[%s1787_s1 + $0x1d8] sm:$0xff]  }
  0x1d   : > { %930 = vmatprep.mubr.bf16.mxu1 %v1173_v39  ;;  %v187_v56 = vld [vmem:[%s1632_s13 + $0x48] sm:$0xff]  ;;  %v1480_v62 = vld [vmem:[%s1787_s1 + $0x120] sm:$0xff]   ;;  %v1484_v5 = vld [vmem:[%s1787_s1 + $0x118] sm:$0xff]  }
  0x1e   : > { %1299 = vmatpush3.bf16.msra.mxu0 %v1452_v18  ;;  %v191_v57 = vld [vmem:[%s1632_s13 + $0x68] sm:$0xff]  ;;  %v1481_v63 = vld [vmem:[%s1787_s1 + $0x1a0] sm:$0xff]   ;;  %v1485_v7 = vld [vmem:[%s1787_s1 + $0x198] sm:$0xff]  }
  0x1f   : > { %1333 = vmatpush3.bf16.msra.mxu1 %v1453_v19  ;;  %1300 = vmatprep.subr.bf16.mxu0 %v1454_v20  ;;  %v1181_v58 = vcombine.high %v187_v56, %v191_v57  ;;  %v1180_v59 = vcombine.low %v187_v56, %v191_v57  ;;  %v194_v2 = vld [vmem:[%s1632_s13 + $0x80] sm:$0xff]  ;;  %v195_v8 = vld [vmem:[%s1632_s13 + $0x88] sm:$0xff]  ;;  %v1486_v12 = vld [vmem:[%s1787_s1 + $0x150] sm:$0xff]  }
  0x20   : > { %1334 = vmatprep.subr.bf16.mxu1 %v1455_v21  ;;  %v198_v3 = vld [vmem:[%s1632_s13 + $0xa0] sm:$0xff]  ;;  %v199_v9 = vld [vmem:[%s1632_s13 + $0xa8] sm:$0xff]  ;;  %v1487_v13 = vld [vmem:[%s1787_s1 + $0x1d0] sm:$0xff]  }
  0x21   : > { %v1187_v4 = vcombine.high %v194_v2, %v198_v3  ;;  %v1186_v6 = vcombine.low %v194_v2, %v198_v3  ;;  %v1189_v10 = vcombine.high %v195_v8, %v199_v9  ;;  %v1188_v11 = vcombine.low %v195_v8, %v199_v9  ;;  %v1488_v14 = vld [vmem:[%s1787_s1 + $0x110] sm:$0xff]   ;;  %v1490_v16 = vld [vmem:[%s1787_s1 + $0x148] sm:$0xff]   ;;  %v1494_v20 = vld [vmem:[%s1787_s1 + $0x140] sm:$0xff]  }
  0x22   : > { %1301 = vmatpush3.bf16.msra.mxu0 %v1456_v22  ;;  %v1489_v15 = vld [vmem:[%s1787_s1 + $0x190] sm:$0xff]   ;;  %v1491_v17 = vld [vmem:[%s1787_s1 + $0x1c8] sm:$0xff]   ;;  %v1495_v21 = vld [vmem:[%s1787_s1 + $0x1c0] sm:$0xff]  }
  0x23   : > { %1335 = vmatpush3.bf16.msra.mxu1 %v1457_v23  ;;  %1302 = vmatprep.subr.bf16.mxu0 %v1458_v24  ;;  %v1492_v18 = vld [vmem:[%s1787_s1 + $0x108] sm:$0xff]   ;;  %v1496_v22 = vld [vmem:[%s1787_s1 + $0x100] sm:$0xff]   ;;  %v180_v24 = vld [vmem:[%s1632_s13 + $0x10] sm:$0xff] }
  0x24   : > { %1336 = vmatprep.subr.bf16.mxu1 %v1459_v25  ;;  %v1493_v19 = vld [vmem:[%s1787_s1 + $0x188] sm:$0xff]   ;;  %v1497_v23 = vld [vmem:[%s1787_s1 + $0x180] sm:$0xff]   ;;  %v184_v25 = vld [vmem:[%s1632_s13 + $0x30] sm:$0xff] }
  0x25   : > { %v193_v36 = vld [vmem:[%s1632_s13 + $0x78] sm:$0xff]  ;;  %v200_v39 = vld [vmem:[%s1632_s13 + $0xb0] sm:$0xff] }
  0x26   : > { %1303 = vmatpush3.bf16.msra.mxu0 %v1460_v26  ;;  %v181_v26 = vld [vmem:[%s1632_s13 + $0x18] sm:$0xff] }
  0x27   : > { %1337 = vmatpush3.bf16.msra.mxu1 %v1461_v27  ;;  %1304 = vmatprep.subr.bf16.mxu0 %v1462_v28  ;;  %v1174_v27 = vcombine.low %v180_v24, %v184_v25  ;;  %v1175_v28 = vcombine.high %v180_v24, %v184_v25 }
  0x28   : > { %1338 = vmatprep.subr.bf16.mxu1 %v1463_v29  ;;  %v185_v29 = vld [vmem:[%s1632_s13 + $0x38] sm:$0xff] }
  0x29   : > { %v1176_v32 = vcombine.low %v181_v26, %v185_v29  ;;  %v1177_v33 = vcombine.high %v181_v26, %v185_v29 }
  0x2a   : > { %1305 = vmatpush3.bf16.msra.mxu0 %v1464_v30  ;;  %v188_v30 = vld [vmem:[%s1632_s13 + $0x50] sm:$0xff] }
  0x2b   : > { %1339 = vmatpush3.bf16.msra.mxu1 %v1465_v31  ;;  %1358 = vmatprep.subr.bf16.mxu0 %v1466_v40  ;;  %v192_v31 = vld [vmem:[%s1632_s13 + $0x70] sm:$0xff]  ;;  %v197_v40 = vld [vmem:[%s1632_s13 + $0x98] sm:$0xff] }
  0x2c   : > { %1392 = vmatprep.subr.bf16.mxu1 %v1467_v41  ;;  %v1183_v34 = vcombine.high %v188_v30, %v192_v31  ;;  %v201_v41 = vld [vmem:[%s1632_s13 + $0xb8] sm:$0xff] }
  0x2d   : > { %874 = vmatmul.mubr.bf16.vlgmr.msra.gmra.mxu0 %v1170_v35  ;;  %v189_v35 = vld [vmem:[%s1632_s13 + $0x58] sm:$0xff] }
  0x2e   : > { %931 = vmatmul.mubr.bf16.vlgmr.msra.gmra.mxu1 %v1172_v38  ;;  %1359 = vmatpush3.bf16.msra.mxu0 %v1468_v42  ;;  %v1185_v37 = vcombine.high %v189_v35, %v193_v36  ;;  %v196_v38 = vld [vmem:[%s1632_s13 + $0x90] sm:$0xff]  ;;  %v1182_v42 = vcombine.low %v188_v30, %v192_v31 }
  0x2f   : > { %1393 = vmatpush3.bf16.msra.mxu1 %v1469_v43  ;;  %1360 = vmatprep.subr.bf16.mxu0 %v1470_v44  ;;  %v1184_v43 = vcombine.low %v189_v35, %v193_v36  ;;  %v1191_v44 = vcombine.high %v196_v38, %v200_v39 }
  0x30   : > { %1394 = vmatprep.subr.bf16.mxu1 %v1471_v45  ;;  %881 = vmatprep.mubr.bf16.mxu0 %v1179_v52  ;;  %v1193_v45 = vcombine.high %v197_v40, %v201_v41 }
  0x31   : > { %938 = vmatprep.mubr.bf16.mxu1 %v1181_v58 }
  0x32   : > { %1361 = vmatpush3.bf16.msra.mxu0 %v1472_v46  ;;  %v1190_v46 = vcombine.low %v196_v38, %v200_v39 }
  0x33   : > { %1395 = vmatpush3.bf16.msra.mxu1 %v1473_v47  ;;  %1362 = vmatprep.subr.bf16.mxu0 %v1474_v48  ;;  %v1192_v47 = vcombine.low %v197_v40, %v201_v41 }
  0x34   : > { %1396 = vmatprep.subr.bf16.mxu1 %v1475_v49 }
  0x35   : > { %882 = vmatmul.mubr.bf16.gmra.mxu0 %v1178_v54 }
  0x36   : > { %1363 = vmatpush3.bf16.msra.mxu0 %v1476_v53  ;;  %939 = vmatmul.mubr.bf16.gmra.mxu1 %v1180_v59 }
  0x37   : > { %1397 = vmatpush3.bf16.msra.mxu1 %v1477_v55  ;;  %1364 = vmatprep.subr.bf16.mxu0 %v1478_v60 }
  0x38   : > { %1398 = vmatprep.subr.bf16.mxu1 %v1479_v61  ;;  %889 = vmatprep.mubr.bf16.mxu0 %v1187_v4 }
  0x39   : > { %946 = vmatprep.mubr.bf16.mxu1 %v1189_v10 }
  0x3a   : > { %1365 = vmatpush3.bf16.msra.mxu0 %v1480_v62 }
  0x3b   : > { %1399 = vmatpush3.bf16.msra.mxu1 %v1481_v63  ;;  %1366 = vmatprep.subr.bf16.mxu0 %v1482_v0 }
  0x3c   : > { %1400 = vmatprep.subr.bf16.mxu1 %v1483_v1 }
  0x3d   : > { %890 = vmatmul.mubr.bf16.gmra.mxu0 %v1186_v6 }
  0x3e   : > { %1367 = vmatpush3.bf16.msra.mxu0 %v1484_v5  ;;  %947 = vmatmul.mubr.bf16.gmra.mxu1 %v1188_v11 }
  0x3f   : > { %1401 = vmatpush3.bf16.msra.mxu1 %v1485_v7  ;;  %1368 = vmatprep.subr.bf16.mxu0 %v1486_v12  ;;  %v1765_v7 = vld [vmem:[%s1788_s2] ss:$0 sm:$0xff] }
  0x40   : > { %1402 = vmatprep.subr.bf16.mxu1 %v1487_v13  ;;  %987 = vmatprep.mubr.bf16.mxu0 %v1175_v28 }
  0x41   : > { %1044 = vmatprep.mubr.bf16.mxu1 %v1177_v33 }
  0x42   : > { %1369 = vmatpush3.bf16.msra.mxu0 %v1488_v14 }
  0x43   : > { %1403 = vmatpush3.bf16.msra.mxu1 %v1489_v15  ;;  %1370 = vmatprep.subr.bf16.mxu0 %v1490_v16 }
  0x44   : > { %1404 = vmatprep.subr.bf16.mxu1 %v1491_v17 }
  0x46   : > { %1371 = vmatpush3.bf16.msra.mxu0 %v1492_v18 }
  0x47   : > { %1405 = vmatpush3.bf16.msra.mxu1 %v1493_v19  ;;  %1372 = vmatprep.subr.bf16.mxu0 %v1494_v20 }
  0x48   : > { %1406 = vmatprep.subr.bf16.mxu1 %v1495_v21 }
  0x4a   : > { %1373 = vmatpush3.bf16.msra.mxu0 %v1496_v22 }
  0x4b   : > { %1407 = vmatpush3.bf16.msra.mxu1 %v1497_v23 }
  0x4d   : > { %988 = vmatmul.mubr.bf16.vlgmr.msra.gmra.mxu0 %v1174_v27 }
  0x4e   : > { %1045 = vmatmul.mubr.bf16.vlgmr.msra.gmra.mxu1 %v1176_v32  ;;  %995 = vmatprep.mubr.bf16.mxu0 %v1183_v34 }
  0x4f   : > { %1052 = vmatprep.mubr.bf16.mxu1 %v1185_v37 }
  0x55   : > { %996 = vmatmul.mubr.bf16.gmra.mxu0 %v1182_v42 }
  0x56   : > { %1053 = vmatmul.mubr.bf16.gmra.mxu1 %v1184_v43  ;;  %1003 = vmatprep.mubr.bf16.mxu0 %v1191_v44 }
  0x57   : > { %1060 = vmatprep.mubr.bf16.mxu1 %v1193_v45 }
  0x5d   : > { %1004 = vmatmul.mubr.bf16.gmra.mxu0 %v1190_v46 }
  0x5e   : > { %1061 = vmatmul.mubr.bf16.gmra.mxu1 %v1192_v47 }
  0xed   : > { %v1306_v48 = vpop.f32.mrf.mxu0 }
  0xee   : > { %v1340_v49 = vpop.f32.mrf.mxu1 }
  0xef   : > { %v1307_v50 = vpop.f32.mrf.mxu0 }
  0xf0   : > { %v1341_v51 = vpop.f32.mrf.mxu1  ;;  %v1308_v5 = vadd.f32 %v1307_v50, %v1306_v48 }
  0xf1   : > { %v1309_v52 = vpop.f32.mrf.mxu0  ;;  %v1342_v11 = vadd.f32 %v1341_v51, %v1340_v49 }
  0xf2   : > { %v1343_v53 = vpop.f32.mrf.mxu1  ;;  %v876_v10 = vadd.f32 %v1308_v5, %v1765_v7 }
  0xf3   : > { %v1310_v54 = vpop.f32.mrf.mxu0 }
  0xf4   : > { %v1344_v56 = vpop.f32.mrf.mxu1  ;;  %v1311_v8 = vadd.f32 %v1310_v54, %v1309_v52  ;;  %v933_v17 = vadd.f32 %v1342_v11, %v876_v10 }
  0xf5   : > { %v1312_v55 = vpop.f32.mrf.mxu0  ;;  %v1345_v21 = vadd.f32 %v1344_v56, %v1343_v53 }
  0xf6   : > { %v1346_v58 = vpop.f32.mrf.mxu1  ;;  %v879_v15 = vadd.f32 %v1311_v8, %v1765_v7 }
  0xf7   : > { %v1313_v57 = vpop.f32.mrf.mxu0 }
  0xf8   : > { %v1347_v60 = vpop.f32.mrf.mxu1  ;;  %v1314_v18 = vadd.f32 %v1313_v57, %v1312_v55  ;;  %v936_v25 = vadd.f32 %v1345_v21, %v879_v15 }
  0xf9   : > { %v1315_v59 = vpop.f32.mrf.mxu0  ;;  %v1348_v29 = vadd.f32 %v1347_v60, %v1346_v58 }
  0xfa   : > { %v1349_v62 = vpop.f32.mrf.mxu1  ;;  %v884_v28 = vadd.f32 %v1314_v18, %v1765_v7 }
  0xfb   : > { %v1316_v61 = vpop.f32.mrf.mxu0 }
  0xfc   : > { %v1350_v63 = vpop.f32.mrf.mxu1  ;;  %v1317_v26 = vadd.f32 %v1316_v61, %v1315_v59  ;;  %v941_v42 = vadd.f32 %v1348_v29, %v884_v28 }
  0xfd   : > { %v1318_v0 = vpop.f32.mrf.mxu0  ;;  %v1351_v39 = vadd.f32 %v1350_v63, %v1349_v62 }
  0xfe   : > { %v1352_v1 = vpop.f32.mrf.mxu1  ;;  %v887_v38 = vadd.f32 %v1317_v26, %v1765_v7 }
  0xff   : > { %v1319_v2 = vpop.f32.mrf.mxu0 }
 0x100   : > { %v1353_v3 = vpop.f32.mrf.mxu1  ;;  %v1320_v40 = vadd.f32 %v1319_v2, %v1318_v0  ;;  %v944_v51 = vadd.f32 %v1351_v39, %v887_v38 }
 0x101   : > { %v1321_v4 = vpop.f32.mrf.mxu0  ;;  %v1354_v53 = vadd.f32 %v1353_v3, %v1352_v1 }
 0x102   : > { %v1760_v6 = vpop.f32.mrf.mxu1  ;;  %v892_v52 = vadd.f32 %v1320_v40, %v1765_v7 }
 0x103   : > { %v1322_v9 = vpop.f32.mrf.mxu0 }
 0x104   : > { %v1356_v12 = vpop.f32.mrf.mxu1  ;;  %v1323_v55 = vadd.f32 %v1322_v9, %v1321_v4  ;;  %v949_v2 = vadd.f32 %v1354_v53, %v892_v52 }
 0x105   : > { %v1357_v5 = vadd.f32 %v1356_v12, %v1760_v6 }
 0x106   : > { %v895_v3 = vadd.f32 %v1323_v55, %v1765_v7 }
 0x10d   : > { %v1374_v13 = vpop.f32.mrf.mxu0 }
 0x10e   : > { %v1408_v14 = vpop.f32.mrf.mxu1 }
 0x10f   : > { %v1375_v16 = vpop.f32.mrf.mxu0 }
 0x110   : > { %v1376_v19 = vadd.f32 %v1375_v16, %v1374_v13  ;;  %v1409_v20 = vpop.f32.mrf.mxu1 }
 0x111   : > { %v1377_v22 = vpop.f32.mrf.mxu0  ;;  %v1410_v30 = vadd.f32 %v1409_v20, %v1408_v14 }
 0x112   : > { %v990_v23 = vadd.f32 %v1376_v19, %v933_v17  ;;  %v1411_v24 = vpop.f32.mrf.mxu1  ;;  %v952_v17 = vadd.f32 %v1357_v5, %v895_v3 }
 0x113   : > { %v1378_v27 = vpop.f32.mrf.mxu0 }
 0x114   : > { %v1379_v31 = vadd.f32 %v1378_v27, %v1377_v22  ;;  %v1412_v32 = vpop.f32.mrf.mxu1  ;;  %v1047_v34 = vadd.f32 %v1410_v30, %v990_v23 }
 0x115   : > { %v1380_v33 = vpop.f32.mrf.mxu0  ;;  %v1413_v36 = vadd.f32 %v1412_v32, %v1411_v24 }
 0x116   : > { %v993_v35 = vadd.f32 %v1379_v31, %v936_v25  ;;  %v1414_v37 = vpop.f32.mrf.mxu1  ;;  %v1069_v47 = vmax.f32 %v1047_v34, 0.0 }
 0x117   : > { %v1381_v41 = vpop.f32.mrf.mxu0 }
 0x118   : > { %v1050_v43 = vadd.f32 %v1413_v36, %v993_v35  ;;  %v1382_v44 = vadd.f32 %v1381_v41, %v1380_v33  ;;  %v1415_v45 = vpop.f32.mrf.mxu1 }
 0x119   : > { %v1383_v46 = vpop.f32.mrf.mxu0  ;;  %v1416_v57 = vadd.f32 %v1415_v45, %v1414_v37 }
 0x11a   : > { %v1070_v48 = vmax.f32 %v1050_v43, 0.0  ;;  %v998_v49 = vadd.f32 %v1382_v44, %v941_v42  ;;  %v1417_v50 = vpop.f32.mrf.mxu1 }
 0x11b   : > { %v1384_v54 = vpop.f32.mrf.mxu0 }
 0x11c   : > { %v1276_v56 = vpack.c.bf16 %v1070_v48, %v1069_v47  ;;  %v1385_v58 = vadd.f32 %v1384_v54, %v1383_v46  ;;  %v1418_v59 = vpop.f32.mrf.mxu1  ;;  %v1055_v61 = vadd.f32 %v1416_v57, %v998_v49 }
 0x11d   : > { %v1386_v60 = vpop.f32.mrf.mxu0  ;;  %v1419_v63 = vadd.f32 %v1418_v59, %v1417_v50 }
 0x11e   : > { %1277 = vst [vmem:[%s1776_s28] sm:$0xff] %v1276_v56   ;;  %v1001_v62 = vadd.f32 %v1385_v58, %v944_v51  ;;  %v1420_v0 = vpop.f32.mrf.mxu1  ;;  %v1071_v11 = vmax.f32 %v1055_v61, 0.0 }
 0x11f   : > { %v1387_v1 = vpop.f32.mrf.mxu0 }
 0x120   : > { %v1058_v8 = vadd.f32 %v1419_v63, %v1001_v62  ;;  %v1388_v10 = vadd.f32 %v1387_v1, %v1386_v60  ;;  %v1421_v4 = vpop.f32.mrf.mxu1 }
 0x121   : > { %v1389_v9 = vpop.f32.mrf.mxu0  ;;  %v1422_v19 = vadd.f32 %v1421_v4, %v1420_v0 }
 0x122   : > { %v1072_v13 = vmax.f32 %v1058_v8, 0.0  ;;  %v1006_v14 = vadd.f32 %v1388_v10, %v949_v2  ;;  %v1423_v15 = vpop.f32.mrf.mxu1 }
 0x123   : > { %v1390_v16 = vpop.f32.mrf.mxu0 }
 0x124   : > { %v1281_v18 = vpack.c.bf16 %v1072_v13, %v1071_v11  ;;  %v1391_v20 = vadd.f32 %v1390_v16, %v1389_v9  ;;  %v1424_v21 = vpop.f32.mrf.mxu1  ;;  %v1063_v7 = vadd.f32 %v1422_v19, %v1006_v14 }
 0x125   : > { %v1425_v23 = vadd.f32 %v1424_v21, %v1423_v15 }
 0x126   : > { %1288 = vst [vmem:[%s1776_s28 + $0x8] sm:$0xff] %v1281_v18   ;;  %v1009_v22 = vadd.f32 %v1391_v20, %v952_v17  ;;  %v1073_v12 = vmax.f32 %v1063_v7, 0.0 }
 0x128   : > { %v1066_v6 = vadd.f32 %v1425_v23, %v1009_v22 }
 0x12a   : > { %v1074_v24 = vmax.f32 %v1066_v6, 0.0 }
 0x12c   : > { %v1286_v25 = vpack.c.bf16 %v1074_v24, %v1073_v12 }
 0x12e   : > { %1289 = vst [vmem:[%s1776_s28 + $0x10] sm:$0xff] %v1286_v25  }
 0x12f PF: > { %s13_s12 = sadd.s32 1, %s1504_s12  }
 0x130   : > { %p10_p4 = scmp.ge.s32.totalorder %s13_s12, 4  }
 0x132   :  { %12 = sbr.rel (!%p10_p4) target bundleno = 1 (0x1), region = 62 }

// kernel: dqn_forward.6
= control target key start
LH: loop header
LB: loop body
LE: loop exit
PB: predicated region body
PF: predicated region fallthrough
CT: control target
= control target key end

     0   :  { %s1596_s12 = smov 0   ;;  %s1858_s0 = inlined_call_operand.vmem [shape: bf16[64,1152], index: 0, kind: input, shape index: {}]   ;;  %s1859_s1 = inlined_call_operand.vmem [shape: bf16[1152,128], index: 1, kind: input, shape index: {}]   ;;  %s1860_s2 = inlined_call_operand.vmem [shape: f32[1,128], index: 2, kind: input, shape index: {}]   ;;  %s1861_s3 = inlined_call_operand.vmem [shape: bf16[64,128], index: 3, kind: output, shape index: {}]  }
   0x1 LB: > { %s1198_s13 = sadd.s32 4294967295, %s1574_s12   ;;  %p1202_p0 = scmp.ge.s32.totalorder %s1574_s12, 1  ;;  %s1574_s12 = sphi %s1596_s12, %s13_s12  }
   0x2   : > { %p139_p1 = scmp.lt.s32.totalorder %s1574_s12, 3 }
   0x4   : > { %p140_p2 = pnand %p1202_p0, %p139_p1 }
   0x5   : > { %s1203_s17 = sshll.u32 (!%p140_p2), %s1198_s13, 2 }
   0x6   : > { %143 = sbr.rel (%p140_p2) target bundleno = 314 (0x13a), region = 32  ;;  %p165_p3 = scmp.lt.s32.totalorder (!%p140_p2), %s1203_s17, 7 }
   0xb   : > { %v1470_v0 = vld [vmem:[%s1859_s1 + $0x78] sm:$0xff]   ;;  %v1474_v4 = vld [vmem:[%s1859_s1 + $0x70] sm:$0xff]   ;;  %v1478_v8 = vld [vmem:[%s1859_s1 + $0x68] sm:$0xff]   ;;  %s1863_s17 = smov (!%p165_p3, %s1203_s17), 7 }
   0xc   : > { %v1471_v1 = vld [vmem:[%s1859_s1 + $0x38] sm:$0xff]   ;;  %1319 = vmatprep.subr.bf16.mxu0 %v1470_v0  ;;  %v1475_v5 = vld [vmem:[%s1859_s1 + $0x30] sm:$0xff]   ;;  %v1479_v9 = vld [vmem:[%s1859_s1 + $0x28] sm:$0xff]   ;;  %s1461_s14 = smul.u32 36, %s1863_s17  ;;  %s1206_s16 = sshll.u32 %s1863_s17, 2 }
   0xd   : > { %v1472_v2 = vld [vmem:[%s1859_s1 + $0xf8] sm:$0xff]   ;;  %1320 = vmatpush3.bf16.msra.mxu0 %v1471_v1  ;;  %v1476_v6 = vld [vmem:[%s1859_s1 + $0xf0] sm:$0xff]   ;;  %v1480_v10 = vld [vmem:[%s1859_s1 + $0xe8] sm:$0xff]   ;;  %s175_s20 = scalar_lea.vmem %s1861_s3, %s1206_s16 }
   0xe   : > { %v1473_v3 = vld [vmem:[%s1859_s1 + $0xb8] sm:$0xff]   ;;  %1347 = vmatprep.subr.bf16.mxu1 %v1472_v2  ;;  %1321 = vmatprep.subr.bf16.mxu0 %v1474_v4  ;;  %v1477_v7 = vld [vmem:[%s1859_s1 + $0xb0] sm:$0xff]   ;;  %v1481_v11 = vld [vmem:[%s1859_s1 + $0xa8] sm:$0xff]   ;;  %s1699_s13 = scalar_lea.vmem %s1858_s0, %s1461_s14 }
   0xf   : > { %1348 = vmatpush3.bf16.msra.mxu1 %v1473_v3  ;;  %v1482_v12 = vld [vmem:[%s1859_s1 + $0x60] sm:$0xff]   ;;  %v1486_v16 = vld [vmem:[%s1859_s1 + $0x58] sm:$0xff]   ;;  %v1490_v20 = vld [vmem:[%s1859_s1 + $0x50] sm:$0xff]  }
  0x10   : > { %1349 = vmatprep.subr.bf16.mxu1 %v1476_v6  ;;  %v1483_v13 = vld [vmem:[%s1859_s1 + $0x20] sm:$0xff]   ;;  %v1487_v17 = vld [vmem:[%s1859_s1 + $0x18] sm:$0xff]   ;;  %v1491_v21 = vld [vmem:[%s1859_s1 + $0x10] sm:$0xff]  }
  0x11   : > { %1322 = vmatpush3.bf16.msra.mxu0 %v1475_v5  ;;  %v1484_v14 = vld [vmem:[%s1859_s1 + $0xe0] sm:$0xff]   ;;  %v1488_v18 = vld [vmem:[%s1859_s1 + $0xd8] sm:$0xff]   ;;  %v1492_v22 = vld [vmem:[%s1859_s1 + $0xd0] sm:$0xff]  }
  0x12   : > { %1323 = vmatprep.subr.bf16.mxu0 %v1478_v8  ;;  %v1485_v15 = vld [vmem:[%s1859_s1 + $0xa0] sm:$0xff]   ;;  %v1489_v19 = vld [vmem:[%s1859_s1 + $0x98] sm:$0xff]   ;;  %v1493_v23 = vld [vmem:[%s1859_s1 + $0x90] sm:$0xff]  }
  0x13   : > { %1350 = vmatpush3.bf16.msra.mxu1 %v1477_v7  ;;  %v1494_v24 = vld [vmem:[%s1859_s1 + $0x48] sm:$0xff]   ;;  %v1498_v28 = vld [vmem:[%s1859_s1 + $0x40] sm:$0xff]   ;;  %v1505_v34 = vld [vmem:[%s1859_s1 + $0x178] sm:$0xff]  }
  0x14   : > { %1351 = vmatprep.subr.bf16.mxu1 %v1480_v10  ;;  %v1495_v25 = vld [vmem:[%s1859_s1 + $0x8] sm:$0xff]   ;;  %v1499_v29 = vld [vmem:[%s1859_s1] sm:$0xff]   ;;  %v1509_v37 = vld [vmem:[%s1859_s1 + $0x138] sm:$0xff]  }
  0x15   : > { %1324 = vmatpush3.bf16.msra.mxu0 %v1479_v9  ;;  %v1496_v26 = vld [vmem:[%s1859_s1 + $0xc8] sm:$0xff]   ;;  %v1500_v30 = vld [vmem:[%s1859_s1 + $0xc0] sm:$0xff]   ;;  %v1510_v38 = vld [vmem:[%s1859_s1 + $0x1f8] sm:$0xff]  }
  0x16   : > { %1325 = vmatprep.subr.bf16.mxu0 %v1482_v12  ;;  %v1497_v27 = vld [vmem:[%s1859_s1 + $0x88] sm:$0xff]   ;;  %v1501_v31 = vld [vmem:[%s1699_s13] ss:$36 sps:$4 sm:$0xff]   ;;  %v1511_v39 = vld [vmem:[%s1859_s1 + $0x1b8] sm:$0xff]  }
  0x17   : > { %1352 = vmatpush3.bf16.msra.mxu1 %v1481_v11  ;;  %v1503_v32 = vld [vmem:[%s1699_s13 + $0x4] ss:$36 sps:$4 sm:$0xff]   ;;  %v1508_v36 = vld [vmem:[%s1699_s13 + $0xc] ss:$36 sps:$4 sm:$0xff]   ;;  %v1524_v52 = vld [vmem:[%s1859_s1 + $0x158] sm:$0xff]  }
  0x18   : > { %1353 = vmatprep.subr.bf16.mxu1 %v1484_v14  ;;  %v1504_v33 = vld [vmem:[%s1859_s1 + $0x80] sm:$0xff]   ;;  %905 = vmatprep.mubr.bf16.mxu0 %v1503_v32  ;;  %v1506_v35 = vld [vmem:[%s1699_s13 + $0x8] ss:$36 sps:$4 sm:$0xff]   ;;  %v1512_v40 = vld [vmem:[%s1859_s1 + $0x170] sm:$0xff]  }
  0x19   : > { %1326 = vmatpush3.bf16.msra.mxu0 %v1483_v13  ;;  %954 = vmatprep.mubr.bf16.mxu1 %v1508_v36  ;;  %v1513_v41 = vld [vmem:[%s1859_s1 + $0x130] sm:$0xff]   ;;  %v1516_v44 = vld [vmem:[%s1859_s1 + $0x168] sm:$0xff]   ;;  %v1520_v48 = vld [vmem:[%s1859_s1 + $0x160] sm:$0xff]  }
  0x1a   : > { %1327 = vmatprep.subr.bf16.mxu0 %v1486_v16  ;;  %v1514_v42 = vld [vmem:[%s1859_s1 + $0x1f0] sm:$0xff]   ;;  %v1517_v45 = vld [vmem:[%s1859_s1 + $0x128] sm:$0xff]   ;;  %v1521_v49 = vld [vmem:[%s1859_s1 + $0x120] sm:$0xff]  }
  0x1b   : > { %1354 = vmatpush3.bf16.msra.mxu1 %v1485_v15  ;;  %v1515_v43 = vld [vmem:[%s1859_s1 + $0x1b0] sm:$0xff]   ;;  %v1518_v46 = vld [vmem:[%s1859_s1 + $0x1e8] sm:$0xff]   ;;  %v1522_v50 = vld [vmem:[%s1859_s1 + $0x1e0] sm:$0xff]  }
  0x1c   : > { %1355 = vmatprep.subr.bf16.mxu1 %v1488_v18  ;;  %v1519_v47 = vld [vmem:[%s1859_s1 + $0x1a8] sm:$0xff]   ;;  %v1523_v51 = vld [vmem:[%s1859_s1 + $0x1a0] sm:$0xff]   ;;  %v1525_v53 = vld [vmem:[%s1859_s1 + $0x118] sm:$0xff]  }
  0x1d   : > { %1328 = vmatpush3.bf16.msra.mxu0 %v1487_v17  ;;  %v1526_v54 = vld [vmem:[%s1699_s13 + $0x4c] ss:$36 sps:$4 sm:$0xff]   ;;  %v1528_v55 = vld [vmem:[%s1859_s1 + $0x1d8] sm:$0xff]   ;;  %v1542_v4 = vld [vmem:[%s1859_s1 + $0x140] sm:$0xff]  }
  0x1e   : > { %1329 = vmatprep.subr.bf16.mxu0 %v1490_v20  ;;  %v1529_v56 = vld [vmem:[%s1699_s13 + $0x48] ss:$36 sps:$4 sm:$0xff]   ;;  %v1530_v57 = vld [vmem:[%s1859_s1 + $0x198] sm:$0xff]   ;;  %v1533_v59 = vld [vmem:[%s1859_s1 + $0x150] sm:$0xff]  }
  0x1f   : > { %1356 = vmatpush3.bf16.msra.mxu1 %v1489_v19  ;;  %v1531_v58 = vld [vmem:[%s1699_s13 + $0x54] ss:$36 sps:$4 sm:$0xff]   ;;  %v1538_v0 = vld [vmem:[%s1859_s1 + $0x148] sm:$0xff]   ;;  %v1543_v5 = vld [vmem:[%s1859_s1 + $0x100] sm:$0xff]  }
  0x20   : > { %1357 = vmatprep.subr.bf16.mxu1 %v1492_v22  ;;  %v1534_v60 = vld [vmem:[%s1699_s13 + $0x50] ss:$36 sps:$4 sm:$0xff]   ;;  %v1539_v1 = vld [vmem:[%s1859_s1 + $0x108] sm:$0xff]   ;;  %v1544_v6 = vld [vmem:[%s1859_s1 + $0x1c0] sm:$0xff]  }
  0x21   : > { %1330 = vmatpush3.bf16.msra.mxu0 %v1491_v21  ;;  %v1535_v61 = vld [vmem:[%s1859_s1 + $0x110] sm:$0xff]   ;;  %v1540_v2 = vld [vmem:[%s1859_s1 + $0x1c8] sm:$0xff]   ;;  %v1548_v9 = vld [vmem:[%s1859_s1 + $0x180] sm:$0xff]  }
  0x22   : > { %1331 = vmatprep.subr.bf16.mxu0 %v1494_v24  ;;  %v1536_v62 = vld [vmem:[%s1859_s1 + $0x1d0] sm:$0xff]   ;;  %v1541_v3 = vld [vmem:[%s1859_s1 + $0x188] sm:$0xff]   ;;  %v1549_v10 = vld [vmem:[%s1859_s1 + $0x238] sm:$0xff]  }
  0x23   : > { %1358 = vmatpush3.bf16.msra.mxu1 %v1493_v23  ;;  %v1537_v63 = vld [vmem:[%s1859_s1 + $0x190] sm:$0xff]   ;;  %v1550_v11 = vld [vmem:[%s1699_s13 + $0x18] ss:$36 sps:$4 sm:$0xff]   ;;  %v1557_v16 = vld [vmem:[%s1859_s1 + $0x228] sm:$0xff]  }
  0x24   : > { %1359 = vmatprep.subr.bf16.mxu1 %v1496_v26  ;;  %v1545_v7 = vld [vmem:[%s1699_s13 + $0x10] ss:$36 sps:$4 sm:$0xff]   ;;  %v1552_v12 = vld [vmem:[%s1699_s13 + $0x1c] ss:$36 sps:$4 sm:$0xff]   ;;  %v1558_v17 = vld [vmem:[%s1699_s13 + $0x64] ss:$36 sps:$4 sm:$0xff]  }
  0x25   : > { %1332 = vmatpush3.bf16.msra.mxu0 %v1495_v25  ;;  %v1547_v8 = vld [vmem:[%s1699_s13 + $0x14] ss:$36 sps:$4 sm:$0xff]   ;;  %v1554_v14 = vld [vmem:[%s1699_s13 + $0x5c] ss:$36 sps:$4 sm:$0xff]   ;;  %v1564_v23 = vld [vmem:[%s1859_s1 + $0x208] sm:$0xff]  }
  0x26   : > { %1333 = vmatprep.subr.bf16.mxu0 %v1498_v28  ;;  %v1553_v13 = vld [vmem:[%s1859_s1 + $0x230] sm:$0xff]   ;;  %v1556_v15 = vld [vmem:[%s1699_s13 + $0x58] ss:$36 sps:$4 sm:$0xff]   ;;  %v1560_v18 = vld [vmem:[%s1699_s13 + $0x60] ss:$36 sps:$4 sm:$0xff]  }
  0x27   : > { %1360 = vmatpush3.bf16.msra.mxu1 %v1497_v27  ;;  %v1561_v19 = vld [vmem:[%s1859_s1 + $0x220] sm:$0xff]   ;;  %v1562_v20 = vld [vmem:[%s1859_s1 + $0x218] sm:$0xff]   ;;  %v1563_v22 = vld [vmem:[%s1859_s1 + $0x210] sm:$0xff]  }
  0x28   : > { %1361 = vmatprep.subr.bf16.mxu1 %v1500_v30  ;;  %v1566_v21 = vld [vmem:[%s1699_s13 + $0x20] ss:$36 sps:$4 sm:$0xff]   ;;  %v1567_v25 = vld [vmem:[%s1699_s13 + $0x68] ss:$36 sps:$4 sm:$0xff]  }
  0x29   : > { %1334 = vmatpush3.bf16.msra.mxu0 %v1499_v29  ;;  %v1565_v24 = vld [vmem:[%s1859_s1 + $0x200] sm:$0xff]  }
  0x2a   : > { %1375 = vmatprep.subr.bf16.mxu0 %v1505_v34 }
  0x2b   : > { %1362 = vmatpush3.bf16.msra.mxu1 %v1504_v33 }
  0x2c   : > { %906 = vmatmul.mubr.bf16.vlgmr.msra.gmra.mxu0 %v1501_v31  ;;  %1403 = vmatprep.subr.bf16.mxu1 %v1510_v38 }
  0x2d   : > { %1376 = vmatpush3.bf16.msra.mxu0 %v1509_v37  ;;  %913 = vmatprep.mubr.bf16.mxu0 %v1526_v54 }
  0x2e   : > { %955 = vmatmul.mubr.bf16.vlgmr.msra.gmra.mxu1 %v1506_v35  ;;  %1377 = vmatprep.subr.bf16.mxu0 %v1512_v40 }
  0x2f   : > { %1404 = vmatpush3.bf16.msra.mxu1 %v1511_v39  ;;  %962 = vmatprep.mubr.bf16.mxu1 %v1531_v58 }
  0x30   : > { %1405 = vmatprep.subr.bf16.mxu1 %v1514_v42 }
  0x31   : > { %1378 = vmatpush3.bf16.msra.mxu0 %v1513_v41 }
  0x32   : > { %1379 = vmatprep.subr.bf16.mxu0 %v1516_v44 }
  0x33   : > { %1406 = vmatpush3.bf16.msra.mxu1 %v1515_v43 }
  0x34   : > { %1407 = vmatprep.subr.bf16.mxu1 %v1518_v46  ;;  %914 = vmatmul.mubr.bf16.gmra.mxu0 %v1529_v56 }
  0x35   : > { %1380 = vmatpush3.bf16.msra.mxu0 %v1517_v45  ;;  %1003 = vmatprep.mubr.bf16.mxu0 %v1547_v8 }
  0x36   : > { %1381 = vmatprep.subr.bf16.mxu0 %v1520_v48  ;;  %963 = vmatmul.mubr.bf16.gmra.mxu1 %v1534_v60 }
  0x37   : > { %1408 = vmatpush3.bf16.msra.mxu1 %v1519_v47  ;;  %1052 = vmatprep.mubr.bf16.mxu1 %v1552_v12 }
  0x38   : > { %1409 = vmatprep.subr.bf16.mxu1 %v1522_v50 }
  0x39   : > { %1382 = vmatpush3.bf16.msra.mxu0 %v1521_v49 }
  0x3a   : > { %1383 = vmatprep.subr.bf16.mxu0 %v1524_v52 }
  0x3b   : > { %1410 = vmatpush3.bf16.msra.mxu1 %v1523_v51 }
  0x3c   : > { %1411 = vmatprep.subr.bf16.mxu1 %v1528_v55 }
  0x3d   : > { %1384 = vmatpush3.bf16.msra.mxu0 %v1525_v53 }
  0x3e   : > { %1385 = vmatprep.subr.bf16.mxu0 %v1533_v59 }
  0x3f   : > { %1412 = vmatpush3.bf16.msra.mxu1 %v1530_v57  ;;  %v1207_v57 = vld [vmem:[%s1860_s2] ss:$0 sm:$0xff] }
  0x40   : > { %1413 = vmatprep.subr.bf16.mxu1 %v1536_v62 }
  0x41   : > { %1386 = vmatpush3.bf16.msra.mxu0 %v1535_v61 }
  0x42   : > { %1387 = vmatprep.subr.bf16.mxu0 %v1538_v0 }
  0x43   : > { %1414 = vmatpush3.bf16.msra.mxu1 %v1537_v63 }
  0x44   : > { %1415 = vmatprep.subr.bf16.mxu1 %v1540_v2 }
  0x45   : > { %1388 = vmatpush3.bf16.msra.mxu0 %v1539_v1 }
  0x46   : > { %1389 = vmatprep.subr.bf16.mxu0 %v1542_v4 }
  0x47   : > { %1416 = vmatpush3.bf16.msra.mxu1 %v1541_v3 }
  0x48   : > { %1417 = vmatprep.subr.bf16.mxu1 %v1544_v6 }
  0x49   : > { %1390 = vmatpush3.bf16.msra.mxu0 %v1543_v5 }
  0x4a   : > { %1441 = vmatprep.subr.bf16.mxu0 %v1549_v10 }
  0x4b   : > { %1418 = vmatpush3.bf16.msra.mxu1 %v1548_v9 }
  0x4c   : > { %1004 = vmatmul.mubr.bf16.vlgmr.msra.gmra.mxu0 %v1545_v7 }
  0x4d   : > { %1442 = vmatpush3.bf16.msra.mxu0 %v1549_v10  ;;  %1011 = vmatprep.mubr.bf16.mxu0 %v1554_v14 }
  0x4e   : > { %1053 = vmatmul.mubr.bf16.vlgmr.msra.gmra.mxu1 %v1550_v11  ;;  %1443 = vmatprep.subr.bf16.mxu0 %v1553_v13 }
  0x4f   : > { %1060 = vmatprep.mubr.bf16.mxu1 %v1558_v17 }
  0x51   : > { %1444 = vmatpush3.bf16.msra.mxu0 %v1553_v13 }
  0x52   : > { %1445 = vmatprep.subr.bf16.mxu0 %v1557_v16 }
  0x54   : > { %1012 = vmatmul.mubr.bf16.gmra.mxu0 %v1556_v15 }
  0x55   : > { %1446 = vmatpush3.bf16.msra.mxu0 %v1557_v16  ;;  %1457 = vmatprep.mubr.bf16.mxu0 %v1566_v21 }
  0x56   : > { %1061 = vmatmul.mubr.bf16.gmra.mxu1 %v1560_v18  ;;  %1447 = vmatprep.subr.bf16.mxu0 %v1561_v19 }
  0x59   : > { %1448 = vmatpush3.bf16.msra.mxu0 %v1561_v19 }
  0x5a   : > { %1449 = vmatprep.subr.bf16.mxu0 %v1562_v20 }
  0x5d   : > { %1450 = vmatpush3.bf16.msra.mxu0 %v1562_v20 }
  0x5e   : > { %1451 = vmatprep.subr.bf16.mxu0 %v1563_v22 }
  0x61   : > { %1452 = vmatpush3.bf16.msra.mxu0 %v1563_v22 }
  0x62   : > { %1453 = vmatprep.subr.bf16.mxu0 %v1564_v23 }
  0x65   : > { %1454 = vmatpush3.bf16.msra.mxu0 %v1564_v23 }
  0x66   : > { %1455 = vmatprep.subr.bf16.mxu0 %v1565_v24 }
  0x69   : > { %1456 = vmatpush3.bf16.msra.mxu0 %v1565_v24 }
  0x6c   : > { %1458 = vmatmul.mubr.bf16.vlgmr.msra.gmra.mxu0 %v1567_v25 }
  0xec   : > { %v1335_v26 = vpop.f32.mrf.mxu0 }
  0xee   : > { %v1363_v27 = vpop.f32.mrf.mxu1  ;;  %v1336_v28 = vpop.f32.mrf.mxu0 }
  0xef   : > { %v1337_v55 = vadd.f32 %v1336_v28, %v1335_v26 }
  0xf0   : > { %v1364_v29 = vpop.f32.mrf.mxu1  ;;  %v1338_v30 = vpop.f32.mrf.mxu0 }
  0xf1   : > { %v908_v62 = vadd.f32 %v1337_v55, %v1207_v57  ;;  %v1365_v63 = vadd.f32 %v1364_v29, %v1363_v27 }
  0xf2   : > { %v1366_v31 = vpop.f32.mrf.mxu1  ;;  %v1339_v32 = vpop.f32.mrf.mxu0 }
  0xf3   : > { %v1340_v58 = vadd.f32 %v1339_v32, %v1338_v30  ;;  %v957_v10 = vadd.f32 %v1365_v63, %v908_v62 }
  0xf4   : > { %v1341_v33 = vpop.f32.mrf.mxu0  ;;  %v1367_v34 = vpop.f32.mrf.mxu1 }
  0xf5   : > { %v911_v2 = vadd.f32 %v1340_v58, %v1207_v57  ;;  %v1368_v3 = vadd.f32 %v1367_v34, %v1366_v31 }
  0xf6   : > { %v1369_v35 = vpop.f32.mrf.mxu1  ;;  %v1342_v36 = vpop.f32.mrf.mxu0 }
  0xf7   : > { %v1343_v59 = vadd.f32 %v1342_v36, %v1341_v33  ;;  %v960_v13 = vadd.f32 %v1368_v3, %v911_v2 }
  0xf8   : > { %v1370_v37 = vpop.f32.mrf.mxu1  ;;  %v1344_v38 = vpop.f32.mrf.mxu0 }
  0xf9   : > { %v916_v4 = vadd.f32 %v1343_v59, %v1207_v57  ;;  %v1371_v5 = vadd.f32 %v1370_v37, %v1369_v35 }
  0xfa   : > { %v1372_v39 = vpop.f32.mrf.mxu1  ;;  %v1345_v40 = vpop.f32.mrf.mxu0 }
  0xfb   : > { %v1346_v56 = vadd.f32 %v1345_v40, %v1344_v38  ;;  %v965_v14 = vadd.f32 %v1371_v5, %v916_v4 }
  0xfc   : > { %v1373_v42 = vpop.f32.mrf.mxu1 }
  0xfd   : > { %v919_v0 = vadd.f32 %v1346_v56, %v1207_v57  ;;  %v1374_v1 = vadd.f32 %v1373_v42, %v1372_v39 }
  0xff   : > { %v968_v11 = vadd.f32 %v1374_v1, %v919_v0 }
 0x10c   : > { %v1391_v41 = vpop.f32.mrf.mxu0 }
 0x10e   : > { %v1392_v43 = vpop.f32.mrf.mxu0  ;;  %v1419_v44 = vpop.f32.mrf.mxu1 }
 0x10f   : > { %v1393_v6 = vadd.f32 %v1392_v43, %v1391_v41 }
 0x110   : > { %v1394_v45 = vpop.f32.mrf.mxu0  ;;  %v1420_v46 = vpop.f32.mrf.mxu1 }
 0x111   : > { %v1006_v15 = vadd.f32 %v1393_v6, %v957_v10  ;;  %v1421_v16 = vadd.f32 %v1420_v46, %v1419_v44 }
 0x112   : > { %v1395_v47 = vpop.f32.mrf.mxu0  ;;  %v1422_v48 = vpop.f32.mrf.mxu1 }
 0x113   : > { %v1396_v12 = vadd.f32 %v1395_v47, %v1394_v45  ;;  %v1055_v25 = vadd.f32 %v1421_v16, %v1006_v15 }
 0x114   : > { %v1397_v49 = vpop.f32.mrf.mxu0  ;;  %v1423_v50 = vpop.f32.mrf.mxu1 }
 0x115   : > { %v1009_v22 = vadd.f32 %v1396_v12, %v960_v13  ;;  %v1424_v23 = vadd.f32 %v1423_v50, %v1422_v48 }
 0x116   : > { %v1398_v51 = vpop.f32.mrf.mxu0  ;;  %v1425_v52 = vpop.f32.mrf.mxu1 }
 0x117   : > { %v1399_v8 = vadd.f32 %v1398_v51, %v1397_v49  ;;  %v1058_v31 = vadd.f32 %v1424_v23, %v1009_v22 }
 0x118   : > { %v1400_v53 = vpop.f32.mrf.mxu0  ;;  %v1426_v54 = vpop.f32.mrf.mxu1 }
 0x119   : > { %v1014_v19 = vadd.f32 %v1399_v8, %v965_v14  ;;  %v1427_v20 = vadd.f32 %v1426_v54, %v1425_v52 }
 0x11a   : > { %v1401_v60 = vpop.f32.mrf.mxu0  ;;  %v1428_v61 = vpop.f32.mrf.mxu1 }
 0x11b   : > { %v1402_v7 = vadd.f32 %v1401_v60, %v1400_v53  ;;  %v1063_v27 = vadd.f32 %v1427_v20, %v1014_v19 }
 0x11c   : > { %v1429_v9 = vpop.f32.mrf.mxu1 }
 0x11d   : > { %v1017_v17 = vadd.f32 %v1402_v7, %v968_v11  ;;  %v1430_v18 = vadd.f32 %v1429_v9, %v1428_v61 }
 0x11f   : > { %v1066_v26 = vadd.f32 %v1430_v18, %v1017_v17 }
 0x12c   : > { %v1459_v21 = vpop.f32.mrf.mxu0 }
 0x12d   : > { %v1112_v32 = vadd.f32 %v1459_v21, %v1063_v27 }
 0x12e   : > { %v1103_v24 = vpop.f32.mrf.mxu0 }
 0x12f   : > { %v1104_v29 = vadd.f32 %v1103_v24, %v1055_v25  ;;  %v1120_v38 = vmax.f32 %v1112_v32, 0.0 }
 0x130   : > { %v1460_v28 = vpop.f32.mrf.mxu0 }
 0x131   : > { %v1115_v30 = vadd.f32 %v1460_v28, %v1066_v26  ;;  %v1118_v36 = vmax.f32 %v1104_v29, 0.0 }
 0x132   : > { %v1106_v33 = vpop.f32.mrf.mxu0 }
 0x133   : > { %v1107_v34 = vadd.f32 %v1106_v33, %v1058_v31  ;;  %v1121_v35 = vmax.f32 %v1115_v30, 0.0 }
 0x135   : > { %v1119_v37 = vmax.f32 %v1107_v34, 0.0  ;;  %v1316_v40 = vpack.c.bf16 %v1121_v35, %v1120_v38 }
 0x137   : > { %v1311_v39 = vpack.c.bf16 %v1119_v37, %v1118_v36  ;;  %1318 = vst [vmem:[%s175_s20 + $0x8] sm:$0xff] %v1316_v40  }
 0x139   : > { %1312 = vst [vmem:[%s175_s20] sm:$0xff] %v1311_v39  }
 0x13a PF: > { %s13_s12 = sadd.s32 1, %s1574_s12  }
 0x13b   : > { %p10_p4 = scmp.ge.s32.totalorder %s13_s12, 4  }
 0x13d   :  { %12 = sbr.rel (!%p10_p4) target bundleno = 1 (0x1), region = 62 }

// kernel: dqn_forward.7
= control target key start
LH: loop header
LB: loop body
LE: loop exit
PB: predicated region body
PF: predicated region fallthrough
CT: control target
= control target key end

     0   :  { %s10355_s18 = smov 0   ;;  %s10357_s19 = smov 0   ;;  %s13138_s0 = inlined_call_operand.vmem [shape: bf16[8,3136], index: 0, kind: input, shape index: {}]   ;;  %s13139_s1 = inlined_call_operand.vmem [shape: bf16[3136,1024], index: 1, kind: input, shape index: {}]   ;;  %s13140_s2 = inlined_call_operand.vmem [shape: f32[2,1,512], index: 2, kind: input, shape index: {}]   ;;  %s13141_s3 = inlined_call_operand.vmem [shape: f32[2,512,128], index: 3, kind: input, shape index: {}]   ;;  %s13142_s4 = inlined_call_operand.vmem [shape: f32[2,1,128], index: 4, kind: input, shape index: {}]   ;;  %s13143_s5 = inlined_call_operand.vmem [shape: f32[2,8,128], index: 5, kind: output, shape index: {}]  }
   0x1   :  { %s10359_s20 = smov 0   ;;  %s10361_s21 = smov 0  }
   0x2   :  { %s10363_s22 = smov 0  }
   0x3 LB: > { %s27_s23 = sadd.s32 1, %s10318_s21  ;;  %p67_p1 = scmp.ne.s32.totalorder %s10310_s19, %s10306_s18  ;;  %s10322_s22 = sphi %s10363_s22, %s15_s22   ;;  %s10318_s21 = sphi %s10361_s21, %s13147_s21   ;;  %s10314_s20 = sphi %s10359_s20, %s13146_s20   ;;  %s10310_s19 = sphi %s10357_s19, %s13145_s19   ;;  %s10306_s18 = sphi %s10355_s18, %s13144_s18  }
   0x4   : > { %p29_p0 = scmp.ge.s32.totalorder %s27_s23, 2  ;;  %p68_p2 = scmp.eq.s32.totalorder %s10322_s22, 0 }
   0x5   : > { %s60_s25 = sadd.s32 1, %s10310_s19  ;;  %p8144_p5 = scmp.ge.s32.totalorder %s10322_s22, 2 }
   0x6   : > { %s13149_s23 = smov (%p29_p0, %s27_s23), 0  ;;  %p69_p3 = por %p68_p2, %p67_p1 }
   0x7   : > { %s57_s24 = ssub.s32 %s10318_s21, %s13149_s23  ;;  %207 = sbr.rel (%p8144_p5) target bundleno = 408 (0x198), region = 20 }
   0x8   : > { %p58_p4 = scmp.eq.s32.totalorder %s57_s24, 0 }
   0xa   : > { %s10390_s26 = scalar_select %p58_p4, %s10310_s19, %s60_s25  }
   0xc   : > { %210 = sbr.rel (!%p69_p3) target bundleno = 408 (0x198), region = 24  ;;  %s212_s27 = sand.u32 (%p69_p3), 1, %s10310_s19  }
   0xd   : > { %s8966_s28 = sshll.u32 (%p69_p3), %s10318_s21, 4  ;;  %s9038_s29 = smul.u32 (%p69_p3), 6272, %s212_s27 }
   0xe   : > { %s10398_s7 = scalar_lea.vmem (%p69_p3), %s13139_s1, %s8966_s28 }
   0xf   : > { %v230_v0 = vld [vmem:[%s10398_s7] sm:$0xff] (%p69_p3)  ;;  %v232_v1 = vld [vmem:[%s10398_s7 + $0x8] sm:$0xff] (%p69_p3)  ;;  %s10406_s8 = scalar_lea.vmem (%p69_p3), [#allocation2], %s9038_s29 }
  0x10   : > { %v234_v2 = vld [vmem:[%s10398_s7 + $0x20] sm:$0xff] (%p69_p3)  ;;  %v236_v3 = vld [vmem:[%s10398_s7 + $0x28] sm:$0xff] (%p69_p3)  ;;  %231 = vst [vmem:[%s10406_s8] sm:$0xff] (%p69_p3), %v230_v0  ;;  %233 = vst [vmem:[%s10406_s8 + $0x8] sm:$0xff] (%p69_p3), %v232_v1 }
  0x11   : > { %v238_v4 = vld [vmem:[%s10398_s7 + $0x40] sm:$0xff]  ;;  %v240_v5 = vld [vmem:[%s10398_s7 + $0x48] sm:$0xff]  ;;  %235 = vst [vmem:[%s10406_s8 + $0x10] sm:$0xff] %v234_v2  ;;  %237 = vst [vmem:[%s10406_s8 + $0x18] sm:$0xff] %v236_v3 }
  0x12   : > { %239 = vst [vmem:[%s10406_s8 + $0x20] sm:$0xff] %v238_v4  ;;  %241 = vst [vmem:[%s10406_s8 + $0x28] sm:$0xff] %v240_v5  ;;  %v242_v6 = vld [vmem:[%s10398_s7 + $0x60] sm:$0xff]  ;;  %v244_v7 = vld [vmem:[%s10398_s7 + $0x68] sm:$0xff] }
  0x13   : > { %v246_v8 = vld [vmem:[%s10398_s7 + $0x80] sm:$0xff]  ;;  %243 = vst [vmem:[%s10406_s8 + $0x30] sm:$0xff] %v242_v6  ;;  %245 = vst [vmem:[%s10406_s8 + $0x38] sm:$0xff] %v244_v7  ;;  %v248_v9 = vld [vmem:[%s10398_s7 + $0x88] sm:$0xff] }
  0x14   : > { %247 = vst [vmem:[%s10406_s8 + $0x40] sm:$0xff] %v246_v8  ;;  %v250_v10 = vld [vmem:[%s10398_s7 + $0xa0] sm:$0xff]  ;;  %v252_v11 = vld [vmem:[%s10398_s7 + $0xa8] sm:$0xff]  ;;  %249 = vst [vmem:[%s10406_s8 + $0x48] sm:$0xff] %v248_v9 }
  0x15   : > { %251 = vst [vmem:[%s10406_s8 + $0x50] sm:$0xff] %v250_v10  ;;  %253 = vst [vmem:[%s10406_s8 + $0x58] sm:$0xff] %v252_v11  ;;  %v254_v12 = vld [vmem:[%s10398_s7 + $0xc0] sm:$0xff]  ;;  %v256_v13 = vld [vmem:[%s10398_s7 + $0xc8] sm:$0xff] }
  0x16   : > { %v258_v14 = vld [vmem:[%s10398_s7 + $0xe0] sm:$0xff]  ;;  %255 = vst [vmem:[%s10406_s8 + $0x60] sm:$0xff] %v254_v12  ;;  %257 = vst [vmem:[%s10406_s8 + $0x68] sm:$0xff] %v256_v13  ;;  %v260_v15 = vld [vmem:[%s10398_s7 + $0xe8] sm:$0xff] }
  0x17   : > { %259 = vst [vmem:[%s10406_s8 + $0x70] sm:$0xff] %v258_v14  ;;  %v262_v16 = vld [vmem:[%s10398_s7 + $0x100] sm:$0xff]  ;;  %v264_v17 = vld [vmem:[%s10398_s7 + $0x108] sm:$0xff]  ;;  %261 = vst [vmem:[%s10406_s8 + $0x78] sm:$0xff] %v260_v15 }
  0x18   : > { %263 = vst [vmem:[%s10406_s8 + $0x80] sm:$0xff] %v262_v16  ;;  %265 = vst [vmem:[%s10406_s8 + $0x88] sm:$0xff] %v264_v17  ;;  %v266_v18 = vld [vmem:[%s10398_s7 + $0x120] sm:$0xff]  ;;  %v268_v19 = vld [vmem:[%s10398_s7 + $0x128] sm:$0xff] }
  0x19   : > { %v270_v20 = vld [vmem:[%s10398_s7 + $0x140] sm:$0xff]  ;;  %267 = vst [vmem:[%s10406_s8 + $0x90] sm:$0xff] %v266_v18  ;;  %269 = vst [vmem:[%s10406_s8 + $0x98] sm:$0xff] %v268_v19  ;;  %v272_v21 = vld [vmem:[%s10398_s7 + $0x148] sm:$0xff] }
  0x1a   : > { %271 = vst [vmem:[%s10406_s8 + $0xa0] sm:$0xff] %v270_v20  ;;  %v274_v22 = vld [vmem:[%s10398_s7 + $0x160] sm:$0xff]  ;;  %v276_v23 = vld [vmem:[%s10398_s7 + $0x168] sm:$0xff]  ;;  %273 = vst [vmem:[%s10406_s8 + $0xa8] sm:$0xff] %v272_v21 }
  0x1b   : > { %275 = vst [vmem:[%s10406_s8 + $0xb0] sm:$0xff] %v274_v22  ;;  %277 = vst [vmem:[%s10406_s8 + $0xb8] sm:$0xff] %v276_v23  ;;  %v278_v24 = vld [vmem:[%s10398_s7 + $0x180] sm:$0xff]  ;;  %v280_v25 = vld [vmem:[%s10398_s7 + $0x188] sm:$0xff] }
  0x1c   : > { %v282_v26 = vld [vmem:[%s10398_s7 + $0x1a0] sm:$0xff]  ;;  %279 = vst [vmem:[%s10406_s8 + $0xc0] sm:$0xff] %v278_v24  ;;  %281 = vst [vmem:[%s10406_s8 + $0xc8] sm:$0xff] %v280_v25  ;;  %v284_v27 = vld [vmem:[%s10398_s7 + $0x1a8] sm:$0xff] }
  0x1d   : > { %283 = vst [vmem:[%s10406_s8 + $0xd0] sm:$0xff] %v282_v26  ;;  %v286_v28 = vld [vmem:[%s10398_s7 + $0x1c0] sm:$0xff]  ;;  %v288_v29 = vld [vmem:[%s10398_s7 + $0x1c8] sm:$0xff]  ;;  %285 = vst [vmem:[%s10406_s8 + $0xd8] sm:$0xff] %v284_v27 }
  0x1e   : > { %287 = vst [vmem:[%s10406_s8 + $0xe0] sm:$0xff] %v286_v28  ;;  %289 = vst [vmem:[%s10406_s8 + $0xe8] sm:$0xff] %v288_v29  ;;  %v290_v30 = vld [vmem:[%s10398_s7 + $0x1e0] sm:$0xff]  ;;  %v292_v31 = vld [vmem:[%s10398_s7 + $0x1e8] sm:$0xff] }
  0x1f   : > { %v294_v32 = vld [vmem:[%s10398_s7 + $0x200] sm:$0xff]  ;;  %291 = vst [vmem:[%s10406_s8 + $0xf0] sm:$0xff] %v290_v30  ;;  %293 = vst [vmem:[%s10406_s8 + $0xf8] sm:$0xff] %v292_v31  ;;  %v296_v33 = vld [vmem:[%s10398_s7 + $0x208] sm:$0xff] }
  0x20   : > { %295 = vst [vmem:[%s10406_s8 + $0x100] sm:$0xff] %v294_v32  ;;  %v298_v34 = vld [vmem:[%s10398_s7 + $0x220] sm:$0xff]  ;;  %v300_v35 = vld [vmem:[%s10398_s7 + $0x228] sm:$0xff]  ;;  %297 = vst [vmem:[%s10406_s8 + $0x108] sm:$0xff] %v296_v33 }
  0x21   : > { %299 = vst [vmem:[%s10406_s8 + $0x110] sm:$0xff] %v298_v34  ;;  %301 = vst [vmem:[%s10406_s8 + $0x118] sm:$0xff] %v300_v35  ;;  %v302_v36 = vld [vmem:[%s10398_s7 + $0x240] sm:$0xff]  ;;  %v304_v37 = vld [vmem:[%s10398_s7 + $0x248] sm:$0xff] }
  0x22   : > { %v306_v38 = vld [vmem:[%s10398_s7 + $0x260] sm:$0xff]  ;;  %303 = vst [vmem:[%s10406_s8 + $0x120] sm:$0xff] %v302_v36  ;;  %305 = vst [vmem:[%s10406_s8 + $0x128] sm:$0xff] %v304_v37  ;;  %v308_v39 = vld [vmem:[%s10398_s7 + $0x268] sm:$0xff] }
  0x23   : > { %307 = vst [vmem:[%s10406_s8 + $0x130] sm:$0xff] %v306_v38  ;;  %v310_v40 = vld [vmem:[%s10398_s7 + $0x280] sm:$0xff]  ;;  %v312_v41 = vld [vmem:[%s10398_s7 + $0x288] sm:$0xff]  ;;  %309 = vst [vmem:[%s10406_s8 + $0x138] sm:$0xff] %v308_v39 }
  0x24   : > { %311 = vst [vmem:[%s10406_s8 + $0x140] sm:$0xff] %v310_v40  ;;  %313 = vst [vmem:[%s10406_s8 + $0x148] sm:$0xff] %v312_v41  ;;  %v314_v42 = vld [vmem:[%s10398_s7 + $0x2a0] sm:$0xff]  ;;  %v316_v43 = vld [vmem:[%s10398_s7 + $0x2a8] sm:$0xff] }
  0x25   : > { %v318_v44 = vld [vmem:[%s10398_s7 + $0x2c0] sm:$0xff]  ;;  %315 = vst [vmem:[%s10406_s8 + $0x150] sm:$0xff] %v314_v42  ;;  %317 = vst [vmem:[%s10406_s8 + $0x158] sm:$0xff] %v316_v43  ;;  %v320_v45 = vld [vmem:[%s10398_s7 + $0x2c8] sm:$0xff] }
  0x26   : > { %319 = vst [vmem:[%s10406_s8 + $0x160] sm:$0xff] %v318_v44  ;;  %v322_v46 = vld [vmem:[%s10398_s7 + $0x2e0] sm:$0xff]  ;;  %v324_v47 = vld [vmem:[%s10398_s7 + $0x2e8] sm:$0xff]  ;;  %321 = vst [vmem:[%s10406_s8 + $0x168] sm:$0xff] %v320_v45 }
  0x27   : > { %323 = vst [vmem:[%s10406_s8 + $0x170] sm:$0xff] %v322_v46  ;;  %325 = vst [vmem:[%s10406_s8 + $0x178] sm:$0xff] %v324_v47  ;;  %v326_v48 = vld [vmem:[%s10398_s7 + $0x300] sm:$0xff]  ;;  %v328_v49 = vld [vmem:[%s10398_s7 + $0x308] sm:$0xff] }
  0x28   : > { %v330_v50 = vld [vmem:[%s10398_s7 + $0x320] sm:$0xff]  ;;  %327 = vst [vmem:[%s10406_s8 + $0x180] sm:$0xff] %v326_v48  ;;  %329 = vst [vmem:[%s10406_s8 + $0x188] sm:$0xff] %v328_v49  ;;  %v332_v51 = vld [vmem:[%s10398_s7 + $0x328] sm:$0xff] }
  0x29   : > { %331 = vst [vmem:[%s10406_s8 + $0x190] sm:$0xff] %v330_v50  ;;  %v334_v52 = vld [vmem:[%s10398_s7 + $0x340] sm:$0xff]  ;;  %v336_v53 = vld [vmem:[%s10398_s7 + $0x348] sm:$0xff]  ;;  %333 = vst [vmem:[%s10406_s8 + $0x198] sm:$0xff] %v332_v51 }
  0x2a   : > { %335 = vst [vmem:[%s10406_s8 + $0x1a0] sm:$0xff] %v334_v52  ;;  %337 = vst [vmem:[%s10406_s8 + $0x1a8] sm:$0xff] %v336_v53  ;;  %v338_v54 = vld [vmem:[%s10398_s7 + $0x360] sm:$0xff]  ;;  %v340_v55 = vld [vmem:[%s10398_s7 + $0x368] sm:$0xff] }
  0x2b   : > { %v342_v56 = vld [vmem:[%s10398_s7 + $0x380] sm:$0xff]  ;;  %339 = vst [vmem:[%s10406_s8 + $0x1b0] sm:$0xff] %v338_v54  ;;  %341 = vst [vmem:[%s10406_s8 + $0x1b8] sm:$0xff] %v340_v55  ;;  %v344_v57 = vld [vmem:[%s10398_s7 + $0x388] sm:$0xff] }
  0x2c   : > { %343 = vst [vmem:[%s10406_s8 + $0x1c0] sm:$0xff] %v342_v56  ;;  %v346_v58 = vld [vmem:[%s10398_s7 + $0x3a0] sm:$0xff]  ;;  %v348_v59 = vld [vmem:[%s10398_s7 + $0x3a8] sm:$0xff]  ;;  %345 = vst [vmem:[%s10406_s8 + $0x1c8] sm:$0xff] %v344_v57 }
  0x2d   : > { %347 = vst [vmem:[%s10406_s8 + $0x1d0] sm:$0xff] %v346_v58  ;;  %349 = vst [vmem:[%s10406_s8 + $0x1d8] sm:$0xff] %v348_v59  ;;  %v350_v60 = vld [vmem:[%s10398_s7 + $0x3c0] sm:$0xff]  ;;  %v352_v61 = vld [vmem:[%s10398_s7 + $0x3c8] sm:$0xff] }
  0x2e   : > { %v354_v62 = vld [vmem:[%s10398_s7 + $0x3e0] sm:$0xff]  ;;  %351 = vst [vmem:[%s10406_s8 + $0x1e0] sm:$0xff] %v350_v60  ;;  %353 = vst [vmem:[%s10406_s8 + $0x1e8] sm:$0xff] %v352_v61  ;;  %v356_v63 = vld [vmem:[%s10398_s7 + $0x3e8] sm:$0xff] }
  0x2f   : > { %355 = vst [vmem:[%s10406_s8 + $0x1f0] sm:$0xff] %v354_v62  ;;  %v358_v0 = vld [vmem:[%s10398_s7 + $0x400] sm:$0xff]  ;;  %v360_v1 = vld [vmem:[%s10398_s7 + $0x408] sm:$0xff]  ;;  %357 = vst [vmem:[%s10406_s8 + $0x1f8] sm:$0xff] %v356_v63 }
  0x30   : > { %359 = vst [vmem:[%s10406_s8 + $0x200] sm:$0xff] %v358_v0  ;;  %361 = vst [vmem:[%s10406_s8 + $0x208] sm:$0xff] %v360_v1  ;;  %v362_v2 = vld [vmem:[%s10398_s7 + $0x420] sm:$0xff]  ;;  %v364_v3 = vld [vmem:[%s10398_s7 + $0x428] sm:$0xff] }
  0x31   : > { %v366_v4 = vld [vmem:[%s10398_s7 + $0x440] sm:$0xff]  ;;  %363 = vst [vmem:[%s10406_s8 + $0x210] sm:$0xff] %v362_v2  ;;  %365 = vst [vmem:[%s10406_s8 + $0x218] sm:$0xff] %v364_v3  ;;  %v368_v5 = vld [vmem:[%s10398_s7 + $0x448] sm:$0xff] }
  0x32   : > { %367 = vst [vmem:[%s10406_s8 + $0x220] sm:$0xff] %v366_v4  ;;  %v370_v6 = vld [vmem:[%s10398_s7 + $0x460] sm:$0xff]  ;;  %v372_v7 = vld [vmem:[%s10398_s7 + $0x468] sm:$0xff]  ;;  %369 = vst [vmem:[%s10406_s8 + $0x228] sm:$0xff] %v368_v5 }
  0x33   : > { %371 = vst [vmem:[%s10406_s8 + $0x230] sm:$0xff] %v370_v6  ;;  %373 = vst [vmem:[%s10406_s8 + $0x238] sm:$0xff] %v372_v7  ;;  %v374_v8 = vld [vmem:[%s10398_s7 + $0x480] sm:$0xff]  ;;  %v376_v9 = vld [vmem:[%s10398_s7 + $0x488] sm:$0xff] }
  0x34   : > { %v378_v10 = vld [vmem:[%s10398_s7 + $0x4a0] sm:$0xff]  ;;  %375 = vst [vmem:[%s10406_s8 + $0x240] sm:$0xff] %v374_v8  ;;  %377 = vst [vmem:[%s10406_s8 + $0x248] sm:$0xff] %v376_v9  ;;  %v380_v11 = vld [vmem:[%s10398_s7 + $0x4a8] sm:$0xff] }
  0x35   : > { %379 = vst [vmem:[%s10406_s8 + $0x250] sm:$0xff] %v378_v10  ;;  %v382_v12 = vld [vmem:[%s10398_s7 + $0x4c0] sm:$0xff]  ;;  %v384_v13 = vld [vmem:[%s10398_s7 + $0x4c8] sm:$0xff]  ;;  %381 = vst [vmem:[%s10406_s8 + $0x258] sm:$0xff] %v380_v11 }
  0x36   : > { %383 = vst [vmem:[%s10406_s8 + $0x260] sm:$0xff] %v382_v12  ;;  %385 = vst [vmem:[%s10406_s8 + $0x268] sm:$0xff] %v384_v13  ;;  %v386_v14 = vld [vmem:[%s10398_s7 + $0x4e0] sm:$0xff]  ;;  %v388_v15 = vld [vmem:[%s10398_s7 + $0x4e8] sm:$0xff] }
  0x37   : > { %v390_v16 = vld [vmem:[%s10398_s7 + $0x500] sm:$0xff]  ;;  %387 = vst [vmem:[%s10406_s8 + $0x270] sm:$0xff] %v386_v14  ;;  %389 = vst [vmem:[%s10406_s8 + $0x278] sm:$0xff] %v388_v15  ;;  %v392_v17 = vld [vmem:[%s10398_s7 + $0x508] sm:$0xff] }
  0x38   : > { %391 = vst [vmem:[%s10406_s8 + $0x280] sm:$0xff] %v390_v16  ;;  %v394_v18 = vld [vmem:[%s10398_s7 + $0x520] sm:$0xff]  ;;  %v396_v19 = vld [vmem:[%s10398_s7 + $0x528] sm:$0xff]  ;;  %393 = vst [vmem:[%s10406_s8 + $0x288] sm:$0xff] %v392_v17 }
  0x39   : > { %395 = vst [vmem:[%s10406_s8 + $0x290] sm:$0xff] %v394_v18  ;;  %397 = vst [vmem:[%s10406_s8 + $0x298] sm:$0xff] %v396_v19  ;;  %v398_v20 = vld [vmem:[%s10398_s7 + $0x540] sm:$0xff]  ;;  %v400_v21 = vld [vmem:[%s10398_s7 + $0x548] sm:$0xff] }
  0x3a   : > { %v402_v22 = vld [vmem:[%s10398_s7 + $0x560] sm:$0xff]  ;;  %399 = vst [vmem:[%s10406_s8 + $0x2a0] sm:$0xff] %v398_v20  ;;  %401 = vst [vmem:[%s10406_s8 + $0x2a8] sm:$0xff] %v400_v21  ;;  %v404_v23 = vld [vmem:[%s10398_s7 + $0x568] sm:$0xff] }
  0x3b   : > { %403 = vst [vmem:[%s10406_s8 + $0x2b0] sm:$0xff] %v402_v22  ;;  %v406_v24 = vld [vmem:[%s10398_s7 + $0x580] sm:$0xff]  ;;  %v408_v25 = vld [vmem:[%s10398_s7 + $0x588] sm:$0xff]  ;;  %405 = vst [vmem:[%s10406_s8 + $0x2b8] sm:$0xff] %v404_v23 }
  0x3c   : > { %407 = vst [vmem:[%s10406_s8 + $0x2c0] sm:$0xff] %v406_v24  ;;  %409 = vst [vmem:[%s10406_s8 + $0x2c8] sm:$0xff] %v408_v25  ;;  %v410_v26 = vld [vmem:[%s10398_s7 + $0x5a0] sm:$0xff]  ;;  %v412_v27 = vld [vmem:[%s10398_s7 + $0x5a8] sm:$0xff] }
  0x3d   : > { %v414_v28 = vld [vmem:[%s10398_s7 + $0x5c0] sm:$0xff]  ;;  %411 = vst [vmem:[%s10406_s8 + $0x2d0] sm:$0xff] %v410_v26  ;;  %413 = vst [vmem:[%s10406_s8 + $0x2d8] sm:$0xff] %v412_v27  ;;  %v416_v29 = vld [vmem:[%s10398_s7 + $0x5c8] sm:$0xff] }
  0x3e   : > { %415 = vst [vmem:[%s10406_s8 + $0x2e0] sm:$0xff] %v414_v28  ;;  %v418_v30 = vld [vmem:[%s10398_s7 + $0x5e0] sm:$0xff]  ;;  %v420_v31 = vld [vmem:[%s10398_s7 + $0x5e8] sm:$0xff]  ;;  %417 = vst [vmem:[%s10406_s8 + $0x2e8] sm:$0xff] %v416_v29 }
  0x3f   : > { %419 = vst [vmem:[%s10406_s8 + $0x2f0] sm:$0xff] %v418_v30  ;;  %421 = vst [vmem:[%s10406_s8 + $0x2f8] sm:$0xff] %v420_v31  ;;  %v422_v32 = vld [vmem:[%s10398_s7 + $0x600] sm:$0xff]  ;;  %v424_v33 = vld [vmem:[%s10398_s7 + $0x608] sm:$0xff] }
  0x40   : > { %v426_v34 = vld [vmem:[%s10398_s7 + $0x620] sm:$0xff]  ;;  %423 = vst [vmem:[%s10406_s8 + $0x300] sm:$0xff] %v422_v32  ;;  %425 = vst [vmem:[%s10406_s8 + $0x308] sm:$0xff] %v424_v33  ;;  %v428_v35 = vld [vmem:[%s10398_s7 + $0x628] sm:$0xff] }
  0x41   : > { %427 = vst [vmem:[%s10406_s8 + $0x310] sm:$0xff] %v426_v34  ;;  %v430_v36 = vld [vmem:[%s10398_s7 + $0x640] sm:$0xff]  ;;  %v432_v37 = vld [vmem:[%s10398_s7 + $0x648] sm:$0xff]  ;;  %429 = vst [vmem:[%s10406_s8 + $0x318] sm:$0xff] %v428_v35 }
  0x42   : > { %431 = vst [vmem:[%s10406_s8 + $0x320] sm:$0xff] %v430_v36  ;;  %433 = vst [vmem:[%s10406_s8 + $0x328] sm:$0xff] %v432_v37  ;;  %v434_v38 = vld [vmem:[%s10398_s7 + $0x660] sm:$0xff]  ;;  %v436_v39 = vld [vmem:[%s10398_s7 + $0x668] sm:$0xff] }
  0x43   : > { %v438_v40 = vld [vmem:[%s10398_s7 + $0x680] sm:$0xff]  ;;  %435 = vst [vmem:[%s10406_s8 + $0x330] sm:$0xff] %v434_v38  ;;  %437 = vst [vmem:[%s10406_s8 + $0x338] sm:$0xff] %v436_v39  ;;  %v440_v41 = vld [vmem:[%s10398_s7 + $0x688] sm:$0xff] }
  0x44   : > { %439 = vst [vmem:[%s10406_s8 + $0x340] sm:$0xff] %v438_v40  ;;  %v442_v42 = vld [vmem:[%s10398_s7 + $0x6a0] sm:$0xff]  ;;  %v444_v43 = vld [vmem:[%s10398_s7 + $0x6a8] sm:$0xff]  ;;  %441 = vst [vmem:[%s10406_s8 + $0x348] sm:$0xff] %v440_v41 }
  0x45   : > { %443 = vst [vmem:[%s10406_s8 + $0x350] sm:$0xff] %v442_v42  ;;  %445 = vst [vmem:[%s10406_s8 + $0x358] sm:$0xff] %v444_v43  ;;  %v446_v44 = vld [vmem:[%s10398_s7 + $0x6c0] sm:$0xff]  ;;  %v448_v45 = vld [vmem:[%s10398_s7 + $0x6c8] sm:$0xff] }
  0x46   : > { %v450_v46 = vld [vmem:[%s10398_s7 + $0x6e0] sm:$0xff]  ;;  %447 = vst [vmem:[%s10406_s8 + $0x360] sm:$0xff] %v446_v44  ;;  %449 = vst [vmem:[%s10406_s8 + $0x368] sm:$0xff] %v448_v45  ;;  %v452_v47 = vld [vmem:[%s10398_s7 + $0x6e8] sm:$0xff] }
  0x47   : > { %451 = vst [vmem:[%s10406_s8 + $0x370] sm:$0xff] %v450_v46  ;;  %v454_v48 = vld [vmem:[%s10398_s7 + $0x700] sm:$0xff]  ;;  %v456_v49 = vld [vmem:[%s10398_s7 + $0x708] sm:$0xff]  ;;  %453 = vst [vmem:[%s10406_s8 + $0x378] sm:$0xff] %v452_v47 }
  0x48   : > { %455 = vst [vmem:[%s10406_s8 + $0x380] sm:$0xff] %v454_v48  ;;  %457 = vst [vmem:[%s10406_s8 + $0x388] sm:$0xff] %v456_v49  ;;  %v458_v50 = vld [vmem:[%s10398_s7 + $0x720] sm:$0xff]  ;;  %v460_v51 = vld [vmem:[%s10398_s7 + $0x728] sm:$0xff] }
  0x49   : > { %v462_v52 = vld [vmem:[%s10398_s7 + $0x740] sm:$0xff]  ;;  %459 = vst [vmem:[%s10406_s8 + $0x390] sm:$0xff] %v458_v50  ;;  %461 = vst [vmem:[%s10406_s8 + $0x398] sm:$0xff] %v460_v51  ;;  %v464_v53 = vld [vmem:[%s10398_s7 + $0x748] sm:$0xff] }
  0x4a   : > { %463 = vst [vmem:[%s10406_s8 + $0x3a0] sm:$0xff] %v462_v52  ;;  %v466_v54 = vld [vmem:[%s10398_s7 + $0x760] sm:$0xff]  ;;  %v468_v55 = vld [vmem:[%s10398_s7 + $0x768] sm:$0xff]  ;;  %465 = vst [vmem:[%s10406_s8 + $0x3a8] sm:$0xff] %v464_v53 }
  0x4b   : > { %467 = vst [vmem:[%s10406_s8 + $0x3b0] sm:$0xff] %v466_v54  ;;  %469 = vst [vmem:[%s10406_s8 + $0x3b8] sm:$0xff] %v468_v55  ;;  %v470_v56 = vld [vmem:[%s10398_s7 + $0x780] sm:$0xff]  ;;  %v472_v57 = vld [vmem:[%s10398_s7 + $0x788] sm:$0xff] }
  0x4c   : > { %v474_v58 = vld [vmem:[%s10398_s7 + $0x7a0] sm:$0xff]  ;;  %471 = vst [vmem:[%s10406_s8 + $0x3c0] sm:$0xff] %v470_v56  ;;  %473 = vst [vmem:[%s10406_s8 + $0x3c8] sm:$0xff] %v472_v57  ;;  %v476_v59 = vld [vmem:[%s10398_s7 + $0x7a8] sm:$0xff] }
  0x4d   : > { %475 = vst [vmem:[%s10406_s8 + $0x3d0] sm:$0xff] %v474_v58  ;;  %v478_v60 = vld [vmem:[%s10398_s7 + $0x7c0] sm:$0xff]  ;;  %v480_v61 = vld [vmem:[%s10398_s7 + $0x7c8] sm:$0xff]  ;;  %477 = vst [vmem:[%s10406_s8 + $0x3d8] sm:$0xff] %v476_v59 }
  0x4e   : > { %479 = vst [vmem:[%s10406_s8 + $0x3e0] sm:$0xff] %v478_v60  ;;  %481 = vst [vmem:[%s10406_s8 + $0x3e8] sm:$0xff] %v480_v61  ;;  %v482_v62 = vld [vmem:[%s10398_s7 + $0x7e0] sm:$0xff]  ;;  %v484_v63 = vld [vmem:[%s10398_s7 + $0x7e8] sm:$0xff] }
  0x4f   : > { %v486_v0 = vld [vmem:[%s10398_s7 + $0x800] sm:$0xff]  ;;  %483 = vst [vmem:[%s10406_s8 + $0x3f0] sm:$0xff] %v482_v62  ;;  %485 = vst [vmem:[%s10406_s8 + $0x3f8] sm:$0xff] %v484_v63  ;;  %v488_v1 = vld [vmem:[%s10398_s7 + $0x808] sm:$0xff] }
  0x50   : > { %487 = vst [vmem:[%s10406_s8 + $0x400] sm:$0xff] %v486_v0  ;;  %v490_v2 = vld [vmem:[%s10398_s7 + $0x820] sm:$0xff]  ;;  %v492_v3 = vld [vmem:[%s10398_s7 + $0x828] sm:$0xff]  ;;  %489 = vst [vmem:[%s10406_s8 + $0x408] sm:$0xff] %v488_v1 }
  0x51   : > { %491 = vst [vmem:[%s10406_s8 + $0x410] sm:$0xff] %v490_v2  ;;  %493 = vst [vmem:[%s10406_s8 + $0x418] sm:$0xff] %v492_v3  ;;  %v494_v4 = vld [vmem:[%s10398_s7 + $0x840] sm:$0xff]  ;;  %v496_v5 = vld [vmem:[%s10398_s7 + $0x848] sm:$0xff] }
  0x52   : > { %v498_v6 = vld [vmem:[%s10398_s7 + $0x860] sm:$0xff]  ;;  %495 = vst [vmem:[%s10406_s8 + $0x420] sm:$0xff] %v494_v4  ;;  %497 = vst [vmem:[%s10406_s8 + $0x428] sm:$0xff] %v496_v5  ;;  %v500_v7 = vld [vmem:[%s10398_s7 + $0x868] sm:$0xff] }
  0x53   : > { %499 = vst [vmem:[%s10406_s8 + $0x430] sm:$0xff] %v498_v6  ;;  %v502_v8 = vld [vmem:[%s10398_s7 + $0x880] sm:$0xff]  ;;  %v504_v9 = vld [vmem:[%s10398_s7 + $0x888] sm:$0xff]  ;;  %501 = vst [vmem:[%s10406_s8 + $0x438] sm:$0xff] %v500_v7 }
  0x54   : > { %503 = vst [vmem:[%s10406_s8 + $0x440] sm:$0xff] %v502_v8  ;;  %505 = vst [vmem:[%s10406_s8 + $0x448] sm:$0xff] %v504_v9  ;;  %v506_v10 = vld [vmem:[%s10398_s7 + $0x8a0] sm:$0xff]  ;;  %v508_v11 = vld [vmem:[%s10398_s7 + $0x8a8] sm:$0xff] }
  0x55   : > { %v510_v12 = vld [vmem:[%s10398_s7 + $0x8c0] sm:$0xff]  ;;  %507 = vst [vmem:[%s10406_s8 + $0x450] sm:$0xff] %v506_v10  ;;  %509 = vst [vmem:[%s10406_s8 + $0x458] sm:$0xff] %v508_v11  ;;  %v512_v13 = vld [vmem:[%s10398_s7 + $0x8c8] sm:$0xff] }
  0x56   : > { %511 = vst [vmem:[%s10406_s8 + $0x460] sm:$0xff] %v510_v12  ;;  %v514_v14 = vld [vmem:[%s10398_s7 + $0x8e0] sm:$0xff]  ;;  %v516_v15 = vld [vmem:[%s10398_s7 + $0x8e8] sm:$0xff]  ;;  %513 = vst [vmem:[%s10406_s8 + $0x468] sm:$0xff] %v512_v13 }
  0x57   : > { %515 = vst [vmem:[%s10406_s8 + $0x470] sm:$0xff] %v514_v14  ;;  %517 = vst [vmem:[%s10406_s8 + $0x478] sm:$0xff] %v516_v15  ;;  %v518_v16 = vld [vmem:[%s10398_s7 + $0x900] sm:$0xff]  ;;  %v520_v17 = vld [vmem:[%s10398_s7 + $0x908] sm:$0xff] }
  0x58   : > { %v522_v18 = vld [vmem:[%s10398_s7 + $0x920] sm:$0xff]  ;;  %519 = vst [vmem:[%s10406_s8 + $0x480] sm:$0xff] %v518_v16  ;;  %521 = vst [vmem:[%s10406_s8 + $0x488] sm:$0xff] %v520_v17  ;;  %v524_v19 = vld [vmem:[%s10398_s7 + $0x928] sm:$0xff] }
  0x59   : > { %523 = vst [vmem:[%s10406_s8 + $0x490] sm:$0xff] %v522_v18  ;;  %v526_v20 = vld [vmem:[%s10398_s7 + $0x940] sm:$0xff]  ;;  %v528_v21 = vld [vmem:[%s10398_s7 + $0x948] sm:$0xff]  ;;  %525 = vst [vmem:[%s10406_s8 + $0x498] sm:$0xff] %v524_v19 }
  0x5a   : > { %527 = vst [vmem:[%s10406_s8 + $0x4a0] sm:$0xff] %v526_v20  ;;  %529 = vst [vmem:[%s10406_s8 + $0x4a8] sm:$0xff] %v528_v21  ;;  %v530_v22 = vld [vmem:[%s10398_s7 + $0x960] sm:$0xff]  ;;  %v532_v23 = vld [vmem:[%s10398_s7 + $0x968] sm:$0xff] }
  0x5b   : > { %v534_v24 = vld [vmem:[%s10398_s7 + $0x980] sm:$0xff]  ;;  %531 = vst [vmem:[%s10406_s8 + $0x4b0] sm:$0xff] %v530_v22  ;;  %533 = vst [vmem:[%s10406_s8 + $0x4b8] sm:$0xff] %v532_v23  ;;  %v536_v25 = vld [vmem:[%s10398_s7 + $0x988] sm:$0xff] }
  0x5c   : > { %535 = vst [vmem:[%s10406_s8 + $0x4c0] sm:$0xff] %v534_v24  ;;  %v538_v26 = vld [vmem:[%s10398_s7 + $0x9a0] sm:$0xff]  ;;  %v540_v27 = vld [vmem:[%s10398_s7 + $0x9a8] sm:$0xff]  ;;  %537 = vst [vmem:[%s10406_s8 + $0x4c8] sm:$0xff] %v536_v25 }
  0x5d   : > { %539 = vst [vmem:[%s10406_s8 + $0x4d0] sm:$0xff] %v538_v26  ;;  %541 = vst [vmem:[%s10406_s8 + $0x4d8] sm:$0xff] %v540_v27  ;;  %v542_v28 = vld [vmem:[%s10398_s7 + $0x9c0] sm:$0xff]  ;;  %v544_v29 = vld [vmem:[%s10398_s7 + $0x9c8] sm:$0xff] }
  0x5e   : > { %v546_v30 = vld [vmem:[%s10398_s7 + $0x9e0] sm:$0xff]  ;;  %543 = vst [vmem:[%s10406_s8 + $0x4e0] sm:$0xff] %v542_v28  ;;  %545 = vst [vmem:[%s10406_s8 + $0x4e8] sm:$0xff] %v544_v29  ;;  %v548_v31 = vld [vmem:[%s10398_s7 + $0x9e8] sm:$0xff] }
  0x5f   : > { %547 = vst [vmem:[%s10406_s8 + $0x4f0] sm:$0xff] %v546_v30  ;;  %v550_v32 = vld [vmem:[%s10398_s7 + $0xa00] sm:$0xff]  ;;  %v552_v33 = vld [vmem:[%s10398_s7 + $0xa08] sm:$0xff]  ;;  %549 = vst [vmem:[%s10406_s8 + $0x4f8] sm:$0xff] %v548_v31 }
  0x60   : > { %551 = vst [vmem:[%s10406_s8 + $0x500] sm:$0xff] %v550_v32  ;;  %553 = vst [vmem:[%s10406_s8 + $0x508] sm:$0xff] %v552_v33  ;;  %v554_v34 = vld [vmem:[%s10398_s7 + $0xa20] sm:$0xff]  ;;  %v556_v35 = vld [vmem:[%s10398_s7 + $0xa28] sm:$0xff] }
  0x61   : > { %v558_v36 = vld [vmem:[%s10398_s7 + $0xa40] sm:$0xff]  ;;  %555 = vst [vmem:[%s10406_s8 + $0x510] sm:$0xff] %v554_v34  ;;  %557 = vst [vmem:[%s10406_s8 + $0x518] sm:$0xff] %v556_v35  ;;  %v560_v37 = vld [vmem:[%s10398_s7 + $0xa48] sm:$0xff] }
  0x62   : > { %559 = vst [vmem:[%s10406_s8 + $0x520] sm:$0xff] %v558_v36  ;;  %v562_v38 = vld [vmem:[%s10398_s7 + $0xa60] sm:$0xff]  ;;  %v564_v39 = vld [vmem:[%s10398_s7 + $0xa68] sm:$0xff]  ;;  %561 = vst [vmem:[%s10406_s8 + $0x528] sm:$0xff] %v560_v37 }
  0x63   : > { %563 = vst [vmem:[%s10406_s8 + $0x530] sm:$0xff] %v562_v38  ;;  %565 = vst [vmem:[%s10406_s8 + $0x538] sm:$0xff] %v564_v39  ;;  %v566_v40 = vld [vmem:[%s10398_s7 + $0xa80] sm:$0xff]  ;;  %v568_v41 = vld [vmem:[%s10398_s7 + $0xa88] sm:$0xff] }
  0x64   : > { %v570_v42 = vld [vmem:[%s10398_s7 + $0xaa0] sm:$0xff]  ;;  %567 = vst [vmem:[%s10406_s8 + $0x540] sm:$0xff] %v566_v40  ;;  %569 = vst [vmem:[%s10406_s8 + $0x548] sm:$0xff] %v568_v41  ;;  %v572_v43 = vld [vmem:[%s10398_s7 + $0xaa8] sm:$0xff] }
  0x65   : > { %571 = vst [vmem:[%s10406_s8 + $0x550] sm:$0xff] %v570_v42  ;;  %v574_v44 = vld [vmem:[%s10398_s7 + $0xac0] sm:$0xff]  ;;  %v576_v45 = vld [vmem:[%s10398_s7 + $0xac8] sm:$0xff]  ;;  %573 = vst [vmem:[%s10406_s8 + $0x558] sm:$0xff] %v572_v43 }
  0x66   : > { %575 = vst [vmem:[%s10406_s8 + $0x560] sm:$0xff] %v574_v44  ;;  %577 = vst [vmem:[%s10406_s8 + $0x568] sm:$0xff] %v576_v45  ;;  %v578_v46 = vld [vmem:[%s10398_s7 + $0xae0] sm:$0xff]  ;;  %v580_v47 = vld [vmem:[%s10398_s7 + $0xae8] sm:$0xff] }
  0x67   : > { %v582_v48 = vld [vmem:[%s10398_s7 + $0xb00] sm:$0xff]  ;;  %579 = vst [vmem:[%s10406_s8 + $0x570] sm:$0xff] %v578_v46  ;;  %581 = vst [vmem:[%s10406_s8 + $0x578] sm:$0xff] %v580_v47  ;;  %v584_v49 = vld [vmem:[%s10398_s7 + $0xb08] sm:$0xff] }
  0x68   : > { %583 = vst [vmem:[%s10406_s8 + $0x580] sm:$0xff] %v582_v48  ;;  %v586_v50 = vld [vmem:[%s10398_s7 + $0xb20] sm:$0xff]  ;;  %v588_v51 = vld [vmem:[%s10398_s7 + $0xb28] sm:$0xff]  ;;  %585 = vst [vmem:[%s10406_s8 + $0x588] sm:$0xff] %v584_v49 }
  0x69   : > { %587 = vst [vmem:[%s10406_s8 + $0x590] sm:$0xff] %v586_v50  ;;  %589 = vst [vmem:[%s10406_s8 + $0x598] sm:$0xff] %v588_v51  ;;  %v590_v52 = vld [vmem:[%s10398_s7 + $0xb40] sm:$0xff]  ;;  %v592_v53 = vld [vmem:[%s10398_s7 + $0xb48] sm:$0xff] }
  0x6a   : > { %v594_v54 = vld [vmem:[%s10398_s7 + $0xb60] sm:$0xff]  ;;  %591 = vst [vmem:[%s10406_s8 + $0x5a0] sm:$0xff] %v590_v52  ;;  %593 = vst [vmem:[%s10406_s8 + $0x5a8] sm:$0xff] %v592_v53  ;;  %v596_v55 = vld [vmem:[%s10398_s7 + $0xb68] sm:$0xff] }
  0x6b   : > { %595 = vst [vmem:[%s10406_s8 + $0x5b0] sm:$0xff] %v594_v54  ;;  %v598_v56 = vld [vmem:[%s10398_s7 + $0xb80] sm:$0xff]  ;;  %v600_v57 = vld [vmem:[%s10398_s7 + $0xb88] sm:$0xff]  ;;  %597 = vst [vmem:[%s10406_s8 + $0x5b8] sm:$0xff] %v596_v55 }
  0x6c   : > { %599 = vst [vmem:[%s10406_s8 + $0x5c0] sm:$0xff] %v598_v56  ;;  %601 = vst [vmem:[%s10406_s8 + $0x5c8] sm:$0xff] %v600_v57  ;;  %v602_v58 = vld [vmem:[%s10398_s7 + $0xba0] sm:$0xff]  ;;  %v604_v59 = vld [vmem:[%s10398_s7 + $0xba8] sm:$0xff] }
  0x6d   : > { %v606_v60 = vld [vmem:[%s10398_s7 + $0xbc0] sm:$0xff]  ;;  %603 = vst [vmem:[%s10406_s8 + $0x5d0] sm:$0xff] %v602_v58  ;;  %605 = vst [vmem:[%s10406_s8 + $0x5d8] sm:$0xff] %v604_v59  ;;  %v608_v61 = vld [vmem:[%s10398_s7 + $0xbc8] sm:$0xff] }
  0x6e   : > { %607 = vst [vmem:[%s10406_s8 + $0x5e0] sm:$0xff] %v606_v60  ;;  %v610_v62 = vld [vmem:[%s10398_s7 + $0xbe0] sm:$0xff]  ;;  %v612_v63 = vld [vmem:[%s10398_s7 + $0xbe8] sm:$0xff]  ;;  %609 = vst [vmem:[%s10406_s8 + $0x5e8] sm:$0xff] %v608_v61 }
  0x6f   : > { %611 = vst [vmem:[%s10406_s8 + $0x5f0] sm:$0xff] %v610_v62  ;;  %613 = vst [vmem:[%s10406_s8 + $0x5f8] sm:$0xff] %v612_v63  ;;  %v614_v0 = vld [vmem:[%s10398_s7 + $0xc00] sm:$0xff]  ;;  %v616_v1 = vld [vmem:[%s10398_s7 + $0xc08] sm:$0xff] }
  0x70   : > { %v618_v2 = vld [vmem:[%s10398_s7 + $0xc20] sm:$0xff]  ;;  %615 = vst [vmem:[%s10406_s8 + $0x600] sm:$0xff] %v614_v0  ;;  %617 = vst [vmem:[%s10406_s8 + $0x608] sm:$0xff] %v616_v1  ;;  %v620_v3 = vld [vmem:[%s10398_s7 + $0xc28] sm:$0xff] }
  0x71   : > { %619 = vst [vmem:[%s10406_s8 + $0x610] sm:$0xff] %v618_v2  ;;  %v622_v4 = vld [vmem:[%s10398_s7 + $0xc40] sm:$0xff]  ;;  %v624_v5 = vld [vmem:[%s10398_s7 + $0xc48] sm:$0xff]  ;;  %621 = vst [vmem:[%s10406_s8 + $0x618] sm:$0xff] %v620_v3 }
  0x72   : > { %623 = vst [vmem:[%s10406_s8 + $0x620] sm:$0xff] %v622_v4  ;;  %625 = vst [vmem:[%s10406_s8 + $0x628] sm:$0xff] %v624_v5  ;;  %v626_v6 = vld [vmem:[%s10398_s7 + $0xc60] sm:$0xff]  ;;  %v628_v7 = vld [vmem:[%s10398_s7 + $0xc68] sm:$0xff] }
  0x73   : > { %v630_v8 = vld [vmem:[%s10398_s7 + $0xc80] sm:$0xff]  ;;  %627 = vst [vmem:[%s10406_s8 + $0x630] sm:$0xff] %v626_v6  ;;  %629 = vst [vmem:[%s10406_s8 + $0x638] sm:$0xff] %v628_v7  ;;  %v632_v9 = vld [vmem:[%s10398_s7 + $0xc88] sm:$0xff] }
  0x74   : > { %631 = vst [vmem:[%s10406_s8 + $0x640] sm:$0xff] %v630_v8  ;;  %v634_v10 = vld [vmem:[%s10398_s7 + $0xca0] sm:$0xff]  ;;  %v636_v11 = vld [vmem:[%s10398_s7 + $0xca8] sm:$0xff]  ;;  %633 = vst [vmem:[%s10406_s8 + $0x648] sm:$0xff] %v632_v9 }
  0x75   : > { %635 = vst [vmem:[%s10406_s8 + $0x650] sm:$0xff] %v634_v10  ;;  %637 = vst [vmem:[%s10406_s8 + $0x658] sm:$0xff] %v636_v11  ;;  %v638_v12 = vld [vmem:[%s10398_s7 + $0xcc0] sm:$0xff]  ;;  %v640_v13 = vld [vmem:[%s10398_s7 + $0xcc8] sm:$0xff] }
  0x76   : > { %v642_v14 = vld [vmem:[%s10398_s7 + $0xce0] sm:$0xff]  ;;  %639 = vst [vmem:[%s10406_s8 + $0x660] sm:$0xff] %v638_v12  ;;  %641 = vst [vmem:[%s10406_s8 + $0x668] sm:$0xff] %v640_v13  ;;  %v644_v15 = vld [vmem:[%s10398_s7 + $0xce8] sm:$0xff] }
  0x77   : > { %643 = vst [vmem:[%s10406_s8 + $0x670] sm:$0xff] %v642_v14  ;;  %v646_v16 = vld [vmem:[%s10398_s7 + $0xd00] sm:$0xff]  ;;  %v648_v17 = vld [vmem:[%s10398_s7 + $0xd08] sm:$0xff]  ;;  %645 = vst [vmem:[%s10406_s8 + $0x678] sm:$0xff] %v644_v15 }
  0x78   : > { %647 = vst [vmem:[%s10406_s8 + $0x680] sm:$0xff] %v646_v16  ;;  %649 = vst [vmem:[%s10406_s8 + $0x688] sm:$0xff] %v648_v17  ;;  %v650_v18 = vld [vmem:[%s10398_s7 + $0xd20] sm:$0xff]  ;;  %v652_v19 = vld [vmem:[%s10398_s7 + $0xd28] sm:$0xff] }
  0x79   : > { %v654_v20 = vld [vmem:[%s10398_s7 + $0xd40] sm:$0xff]  ;;  %651 = vst [vmem:[%s10406_s8 + $0x690] sm:$0xff] %v650_v18  ;;  %653 = vst [vmem:[%s10406_s8 + $0x698] sm:$0xff] %v652_v19  ;;  %v656_v21 = vld [vmem:[%s10398_s7 + $0xd48] sm:$0xff] }
  0x7a   : > { %655 = vst [vmem:[%s10406_s8 + $0x6a0] sm:$0xff] %v654_v20  ;;  %v658_v22 = vld [vmem:[%s10398_s7 + $0xd60] sm:$0xff]  ;;  %v660_v23 = vld [vmem:[%s10398_s7 + $0xd68] sm:$0xff]  ;;  %657 = vst [vmem:[%s10406_s8 + $0x6a8] sm:$0xff] %v656_v21 }
  0x7b   : > { %659 = vst [vmem:[%s10406_s8 + $0x6b0] sm:$0xff] %v658_v22  ;;  %661 = vst [vmem:[%s10406_s8 + $0x6b8] sm:$0xff] %v660_v23  ;;  %v662_v24 = vld [vmem:[%s10398_s7 + $0xd80] sm:$0xff]  ;;  %v664_v25 = vld [vmem:[%s10398_s7 + $0xd88] sm:$0xff] }
  0x7c   : > { %v666_v26 = vld [vmem:[%s10398_s7 + $0xda0] sm:$0xff]  ;;  %663 = vst [vmem:[%s10406_s8 + $0x6c0] sm:$0xff] %v662_v24  ;;  %665 = vst [vmem:[%s10406_s8 + $0x6c8] sm:$0xff] %v664_v25  ;;  %v668_v27 = vld [vmem:[%s10398_s7 + $0xda8] sm:$0xff] }
  0x7d   : > { %667 = vst [vmem:[%s10406_s8 + $0x6d0] sm:$0xff] %v666_v26  ;;  %v670_v28 = vld [vmem:[%s10398_s7 + $0xdc0] sm:$0xff]  ;;  %v672_v29 = vld [vmem:[%s10398_s7 + $0xdc8] sm:$0xff]  ;;  %669 = vst [vmem:[%s10406_s8 + $0x6d8] sm:$0xff] %v668_v27 }
  0x7e   : > { %671 = vst [vmem:[%s10406_s8 + $0x6e0] sm:$0xff] %v670_v28  ;;  %673 = vst [vmem:[%s10406_s8 + $0x6e8] sm:$0xff] %v672_v29  ;;  %v674_v30 = vld [vmem:[%s10398_s7 + $0xde0] sm:$0xff]  ;;  %v676_v31 = vld [vmem:[%s10398_s7 + $0xde8] sm:$0xff] }
  0x7f   : > { %v678_v32 = vld [vmem:[%s10398_s7 + $0xe00] sm:$0xff]  ;;  %675 = vst [vmem:[%s10406_s8 + $0x6f0] sm:$0xff] %v674_v30  ;;  %677 = vst [vmem:[%s10406_s8 + $0x6f8] sm:$0xff] %v676_v31  ;;  %v680_v33 = vld [vmem:[%s10398_s7 + $0xe08] sm:$0xff] }
  0x80   : > { %679 = vst [vmem:[%s10406_s8 + $0x700] sm:$0xff] %v678_v32  ;;  %v682_v34 = vld [vmem:[%s10398_s7 + $0xe20] sm:$0xff]  ;;  %v684_v35 = vld [vmem:[%s10398_s7 + $0xe28] sm:$0xff]  ;;  %681 = vst [vmem:[%s10406_s8 + $0x708] sm:$0xff] %v680_v33 }
  0x81   : > { %683 = vst [vmem:[%s10406_s8 + $0x710] sm:$0xff] %v682_v34  ;;  %685 = vst [vmem:[%s10406_s8 + $0x718] sm:$0xff] %v684_v35  ;;  %v686_v36 = vld [vmem:[%s10398_s7 + $0xe40] sm:$0xff]  ;;  %v688_v37 = vld [vmem:[%s10398_s7 + $0xe48] sm:$0xff] }
  0x82   : > { %v690_v38 = vld [vmem:[%s10398_s7 + $0xe60] sm:$0xff]  ;;  %687 = vst [vmem:[%s10406_s8 + $0x720] sm:$0xff] %v686_v36  ;;  %689 = vst [vmem:[%s10406_s8 + $0x728] sm:$0xff] %v688_v37  ;;  %v692_v39 = vld [vmem:[%s10398_s7 + $0xe68] sm:$0xff] }
  0x83   : > { %691 = vst [vmem:[%s10406_s8 + $0x730] sm:$0xff] %v690_v38  ;;  %v694_v40 = vld [vmem:[%s10398_s7 + $0xe80] sm:$0xff]  ;;  %v696_v41 = vld [vmem:[%s10398_s7 + $0xe88] sm:$0xff]  ;;  %693 = vst [vmem:[%s10406_s8 + $0x738] sm:$0xff] %v692_v39 }
  0x84   : > { %695 = vst [vmem:[%s10406_s8 + $0x740] sm:$0xff] %v694_v40  ;;  %697 = vst [vmem:[%s10406_s8 + $0x748] sm:$0xff] %v696_v41  ;;  %v698_v42 = vld [vmem:[%s10398_s7 + $0xea0] sm:$0xff]  ;;  %v700_v43 = vld [vmem:[%s10398_s7 + $0xea8] sm:$0xff] }
  0x85   : > { %v702_v44 = vld [vmem:[%s10398_s7 + $0xec0] sm:$0xff]  ;;  %699 = vst [vmem:[%s10406_s8 + $0x750] sm:$0xff] %v698_v42  ;;  %701 = vst [vmem:[%s10406_s8 + $0x758] sm:$0xff] %v700_v43  ;;  %v704_v45 = vld [vmem:[%s10398_s7 + $0xec8] sm:$0xff] }
  0x86   : > { %703 = vst [vmem:[%s10406_s8 + $0x760] sm:$0xff] %v702_v44  ;;  %v706_v46 = vld [vmem:[%s10398_s7 + $0xee0] sm:$0xff]  ;;  %v708_v47 = vld [vmem:[%s10398_s7 + $0xee8] sm:$0xff]  ;;  %705 = vst [vmem:[%s10406_s8 + $0x768] sm:$0xff] %v704_v45 }
  0x87   : > { %707 = vst [vmem:[%s10406_s8 + $0x770] sm:$0xff] %v706_v46  ;;  %709 = vst [vmem:[%s10406_s8 + $0x778] sm:$0xff] %v708_v47  ;;  %v710_v48 = vld [vmem:[%s10398_s7 + $0xf00] sm:$0xff]  ;;  %v712_v49 = vld [vmem:[%s10398_s7 + $0xf08] sm:$0xff] }
  0x88   : > { %v714_v50 = vld [vmem:[%s10398_s7 + $0xf20] sm:$0xff]  ;;  %711 = vst [vmem:[%s10406_s8 + $0x780] sm:$0xff] %v710_v48  ;;  %713 = vst [vmem:[%s10406_s8 + $0x788] sm:$0xff] %v712_v49  ;;  %v716_v51 = vld [vmem:[%s10398_s7 + $0xf28] sm:$0xff] }
  0x89   : > { %715 = vst [vmem:[%s10406_s8 + $0x790] sm:$0xff] %v714_v50  ;;  %v718_v52 = vld [vmem:[%s10398_s7 + $0xf40] sm:$0xff]  ;;  %v720_v53 = vld [vmem:[%s10398_s7 + $0xf48] sm:$0xff]  ;;  %717 = vst [vmem:[%s10406_s8 + $0x798] sm:$0xff] %v716_v51 }
  0x8a   : > { %719 = vst [vmem:[%s10406_s8 + $0x7a0] sm:$0xff] %v718_v52  ;;  %721 = vst [vmem:[%s10406_s8 + $0x7a8] sm:$0xff] %v720_v53  ;;  %v722_v54 = vld [vmem:[%s10398_s7 + $0xf60] sm:$0xff]  ;;  %v724_v55 = vld [vmem:[%s10398_s7 + $0xf68] sm:$0xff] }
  0x8b   : > { %v726_v56 = vld [vmem:[%s10398_s7 + $0xf80] sm:$0xff]  ;;  %723 = vst [vmem:[%s10406_s8 + $0x7b0] sm:$0xff] %v722_v54  ;;  %725 = vst [vmem:[%s10406_s8 + $0x7b8] sm:$0xff] %v724_v55  ;;  %v728_v57 = vld [vmem:[%s10398_s7 + $0xf88] sm:$0xff] }
  0x8c   : > { %727 = vst [vmem:[%s10406_s8 + $0x7c0] sm:$0xff] %v726_v56  ;;  %v730_v58 = vld [vmem:[%s10398_s7 + $0xfa0] sm:$0xff]  ;;  %v732_v59 = vld [vmem:[%s10398_s7 + $0xfa8] sm:$0xff]  ;;  %729 = vst [vmem:[%s10406_s8 + $0x7c8] sm:$0xff] %v728_v57 }
  0x8d   : > { %731 = vst [vmem:[%s10406_s8 + $0x7d0] sm:$0xff] %v730_v58  ;;  %733 = vst [vmem:[%s10406_s8 + $0x7d8] sm:$0xff] %v732_v59  ;;  %v734_v60 = vld [vmem:[%s10398_s7 + $0xfc0] sm:$0xff]  ;;  %v736_v61 = vld [vmem:[%s10398_s7 + $0xfc8] sm:$0xff] }
  0x8e   : > { %v738_v62 = vld [vmem:[%s10398_s7 + $0xfe0] sm:$0xff]  ;;  %735 = vst [vmem:[%s10406_s8 + $0x7e0] sm:$0xff] %v734_v60  ;;  %737 = vst [vmem:[%s10406_s8 + $0x7e8] sm:$0xff] %v736_v61  ;;  %v740_v63 = vld [vmem:[%s10398_s7 + $0xfe8] sm:$0xff] }
  0x8f   : > { %739 = vst [vmem:[%s10406_s8 + $0x7f0] sm:$0xff] %v738_v62  ;;  %v742_v0 = vld [vmem:[%s10398_s7 + $0x1000] sm:$0xff]  ;;  %v744_v1 = vld [vmem:[%s10398_s7 + $0x1008] sm:$0xff]  ;;  %741 = vst [vmem:[%s10406_s8 + $0x7f8] sm:$0xff] %v740_v63 }
  0x90   : > { %743 = vst [vmem:[%s10406_s8 + $0x800] sm:$0xff] %v742_v0  ;;  %745 = vst [vmem:[%s10406_s8 + $0x808] sm:$0xff] %v744_v1  ;;  %v746_v2 = vld [vmem:[%s10398_s7 + $0x1020] sm:$0xff]  ;;  %v748_v3 = vld [vmem:[%s10398_s7 + $0x1028] sm:$0xff] }
  0x91   : > { %v750_v4 = vld [vmem:[%s10398_s7 + $0x1040] sm:$0xff]  ;;  %747 = vst [vmem:[%s10406_s8 + $0x810] sm:$0xff] %v746_v2  ;;  %749 = vst [vmem:[%s10406_s8 + $0x818] sm:$0xff] %v748_v3  ;;  %v752_v5 = vld [vmem:[%s10398_s7 + $0x1048] sm:$0xff] }
  0x92   : > { %751 = vst [vmem:[%s10406_s8 + $0x820] sm:$0xff] %v750_v4  ;;  %v754_v6 = vld [vmem:[%s10398_s7 + $0x1060] sm:$0xff]  ;;  %v756_v7 = vld [vmem:[%s10398_s7 + $0x1068] sm:$0xff]  ;;  %753 = vst [vmem:[%s10406_s8 + $0x828] sm:$0xff] %v752_v5 }
  0x93   : > { %755 = vst [vmem:[%s10406_s8 + $0x830] sm:$0xff] %v754_v6  ;;  %757 = vst [vmem:[%s10406_s8 + $0x838] sm:$0xff] %v756_v7  ;;  %v758_v8 = vld [vmem:[%s10398_s7 + $0x1080] sm:$0xff]  ;;  %v760_v9 = vld [vmem:[%s10398_s7 + $0x1088] sm:$0xff] }
  0x94   : > { %v762_v10 = vld [vmem:[%s10398_s7 + $0x10a0] sm:$0xff]  ;;  %759 = vst [vmem:[%s10406_s8 + $0x840] sm:$0xff] %v758_v8  ;;  %761 = vst [vmem:[%s10406_s8 + $0x848] sm:$0xff] %v760_v9  ;;  %v764_v11 = vld [vmem:[%s10398_s7 + $0x10a8] sm:$0xff] }
  0x95   : > { %763 = vst [vmem:[%s10406_s8 + $0x850] sm:$0xff] %v762_v10  ;;  %v766_v12 = vld [vmem:[%s10398_s7 + $0x10c0] sm:$0xff]  ;;  %v768_v13 = vld [vmem:[%s10398_s7 + $0x10c8] sm:$0xff]  ;;  %765 = vst [vmem:[%s10406_s8 + $0x858] sm:$0xff] %v764_v11 }
  0x96   : > { %767 = vst [vmem:[%s10406_s8 + $0x860] sm:$0xff] %v766_v12  ;;  %769 = vst [vmem:[%s10406_s8 + $0x868] sm:$0xff] %v768_v13  ;;  %v770_v14 = vld [vmem:[%s10398_s7 + $0x10e0] sm:$0xff]  ;;  %v772_v15 = vld [vmem:[%s10398_s7 + $0x10e8] sm:$0xff] }
  0x97   : > { %v774_v16 = vld [vmem:[%s10398_s7 + $0x1100] sm:$0xff]  ;;  %771 = vst [vmem:[%s10406_s8 + $0x870] sm:$0xff] %v770_v14  ;;  %773 = vst [vmem:[%s10406_s8 + $0x878] sm:$0xff] %v772_v15  ;;  %v776_v17 = vld [vmem:[%s10398_s7 + $0x1108] sm:$0xff] }
  0x98   : > { %775 = vst [vmem:[%s10406_s8 + $0x880] sm:$0xff] %v774_v16  ;;  %v778_v18 = vld [vmem:[%s10398_s7 + $0x1120] sm:$0xff]  ;;  %v780_v19 = vld [vmem:[%s10398_s7 + $0x1128] sm:$0xff]  ;;  %777 = vst [vmem:[%s10406_s8 + $0x888] sm:$0xff] %v776_v17 }
  0x99   : > { %779 = vst [vmem:[%s10406_s8 + $0x890] sm:$0xff] %v778_v18  ;;  %781 = vst [vmem:[%s10406_s8 + $0x898] sm:$0xff] %v780_v19  ;;  %v782_v20 = vld [vmem:[%s10398_s7 + $0x1140] sm:$0xff]  ;;  %v784_v21 = vld [vmem:[%s10398_s7 + $0x1148] sm:$0xff] }
  0x9a   : > { %v786_v22 = vld [vmem:[%s10398_s7 + $0x1160] sm:$0xff]  ;;  %783 = vst [vmem:[%s10406_s8 + $0x8a0] sm:$0xff] %v782_v20  ;;  %785 = vst [vmem:[%s10406_s8 + $0x8a8] sm:$0xff] %v784_v21  ;;  %v788_v23 = vld [vmem:[%s10398_s7 + $0x1168] sm:$0xff] }
  0x9b   : > { %787 = vst [vmem:[%s10406_s8 + $0x8b0] sm:$0xff] %v786_v22  ;;  %v790_v24 = vld [vmem:[%s10398_s7 + $0x1180] sm:$0xff]  ;;  %v792_v25 = vld [vmem:[%s10398_s7 + $0x1188] sm:$0xff]  ;;  %789 = vst [vmem:[%s10406_s8 + $0x8b8] sm:$0xff] %v788_v23 }
  0x9c   : > { %791 = vst [vmem:[%s10406_s8 + $0x8c0] sm:$0xff] %v790_v24  ;;  %793 = vst [vmem:[%s10406_s8 + $0x8c8] sm:$0xff] %v792_v25  ;;  %v794_v26 = vld [vmem:[%s10398_s7 + $0x11a0] sm:$0xff]  ;;  %v796_v27 = vld [vmem:[%s10398_s7 + $0x11a8] sm:$0xff] }
  0x9d   : > { %v798_v28 = vld [vmem:[%s10398_s7 + $0x11c0] sm:$0xff]  ;;  %795 = vst [vmem:[%s10406_s8 + $0x8d0] sm:$0xff] %v794_v26  ;;  %797 = vst [vmem:[%s10406_s8 + $0x8d8] sm:$0xff] %v796_v27  ;;  %v800_v29 = vld [vmem:[%s10398_s7 + $0x11c8] sm:$0xff] }
  0x9e   : > { %799 = vst [vmem:[%s10406_s8 + $0x8e0] sm:$0xff] %v798_v28  ;;  %v802_v30 = vld [vmem:[%s10398_s7 + $0x11e0] sm:$0xff]  ;;  %v804_v31 = vld [vmem:[%s10398_s7 + $0x11e8] sm:$0xff]  ;;  %801 = vst [vmem:[%s10406_s8 + $0x8e8] sm:$0xff] %v800_v29 }
  0x9f   : > { %803 = vst [vmem:[%s10406_s8 + $0x8f0] sm:$0xff] %v802_v30  ;;  %805 = vst [vmem:[%s10406_s8 + $0x8f8] sm:$0xff] %v804_v31  ;;  %v806_v32 = vld [vmem:[%s10398_s7 + $0x1200] sm:$0xff]  ;;  %v808_v33 = vld [vmem:[%s10398_s7 + $0x1208] sm:$0xff] }
  0xa0   : > { %v810_v34 = vld [vmem:[%s10398_s7 + $0x1220] sm:$0xff]  ;;  %807 = vst [vmem:[%s10406_s8 + $0x900] sm:$0xff] %v806_v32  ;;  %809 = vst [vmem:[%s10406_s8 + $0x908] sm:$0xff] %v808_v33  ;;  %v812_v35 = vld [vmem:[%s10398_s7 + $0x1228] sm:$0xff] }
  0xa1   : > { %811 = vst [vmem:[%s10406_s8 + $0x910] sm:$0xff] %v810_v34  ;;  %v814_v36 = vld [vmem:[%s10398_s7 + $0x1240] sm:$0xff]  ;;  %v816_v37 = vld [vmem:[%s10398_s7 + $0x1248] sm:$0xff]  ;;  %813 = vst [vmem:[%s10406_s8 + $0x918] sm:$0xff] %v812_v35 }
  0xa2   : > { %815 = vst [vmem:[%s10406_s8 + $0x920] sm:$0xff] %v814_v36  ;;  %817 = vst [vmem:[%s10406_s8 + $0x928] sm:$0xff] %v816_v37  ;;  %v818_v38 = vld [vmem:[%s10398_s7 + $0x1260] sm:$0xff]  ;;  %v820_v39 = vld [vmem:[%s10398_s7 + $0x1268] sm:$0xff] }
  0xa3   : > { %v822_v40 = vld [vmem:[%s10398_s7 + $0x1280] sm:$0xff]  ;;  %819 = vst [vmem:[%s10406_s8 + $0x930] sm:$0xff] %v818_v38  ;;  %821 = vst [vmem:[%s10406_s8 + $0x938] sm:$0xff] %v820_v39  ;;  %v824_v41 = vld [vmem:[%s10398_s7 + $0x1288] sm:$0xff] }
  0xa4   : > { %823 = vst [vmem:[%s10406_s8 + $0x940] sm:$0xff] %v822_v40  ;;  %v826_v42 = vld [vmem:[%s10398_s7 + $0x12a0] sm:$0xff]  ;;  %v828_v43 = vld [vmem:[%s10398_s7 + $0x12a8] sm:$0xff]  ;;  %825 = vst [vmem:[%s10406_s8 + $0x948] sm:$0xff] %v824_v41 }
  0xa5   : > { %827 = vst [vmem:[%s10406_s8 + $0x950] sm:$0xff] %v826_v42  ;;  %829 = vst [vmem:[%s10406_s8 + $0x958] sm:$0xff] %v828_v43  ;;  %v830_v44 = vld [vmem:[%s10398_s7 + $0x12c0] sm:$0xff]  ;;  %v832_v45 = vld [vmem:[%s10398_s7 + $0x12c8] sm:$0xff] }
  0xa6   : > { %v834_v46 = vld [vmem:[%s10398_s7 + $0x12e0] sm:$0xff]  ;;  %831 = vst [vmem:[%s10406_s8 + $0x960] sm:$0xff] %v830_v44  ;;  %833 = vst [vmem:[%s10406_s8 + $0x968] sm:$0xff] %v832_v45  ;;  %v836_v47 = vld [vmem:[%s10398_s7 + $0x12e8] sm:$0xff] }
  0xa7   : > { %835 = vst [vmem:[%s10406_s8 + $0x970] sm:$0xff] %v834_v46  ;;  %v838_v48 = vld [vmem:[%s10398_s7 + $0x1300] sm:$0xff]  ;;  %v840_v49 = vld [vmem:[%s10398_s7 + $0x1308] sm:$0xff]  ;;  %837 = vst [vmem:[%s10406_s8 + $0x978] sm:$0xff] %v836_v47 }
  0xa8   : > { %839 = vst [vmem:[%s10406_s8 + $0x980] sm:$0xff] %v838_v48  ;;  %841 = vst [vmem:[%s10406_s8 + $0x988] sm:$0xff] %v840_v49  ;;  %v842_v50 = vld [vmem:[%s10398_s7 + $0x1320] sm:$0xff]  ;;  %v844_v51 = vld [vmem:[%s10398_s7 + $0x1328] sm:$0xff] }
  0xa9   : > { %v846_v52 = vld [vmem:[%s10398_s7 + $0x1340] sm:$0xff]  ;;  %843 = vst [vmem:[%s10406_s8 + $0x990] sm:$0xff] %v842_v50  ;;  %845 = vst [vmem:[%s10406_s8 + $0x998] sm:$0xff] %v844_v51  ;;  %v848_v53 = vld [vmem:[%s10398_s7 + $0x1348] sm:$0xff] }
  0xaa   : > { %847 = vst [vmem:[%s10406_s8 + $0x9a0] sm:$0xff] %v846_v52  ;;  %v850_v54 = vld [vmem:[%s10398_s7 + $0x1360] sm:$0xff]  ;;  %v852_v55 = vld [vmem:[%s10398_s7 + $0x1368] sm:$0xff]  ;;  %849 = vst [vmem:[%s10406_s8 + $0x9a8] sm:$0xff] %v848_v53 }
  0xab   : > { %851 = vst [vmem:[%s10406_s8 + $0x9b0] sm:$0xff] %v850_v54  ;;  %853 = vst [vmem:[%s10406_s8 + $0x9b8] sm:$0xff] %v852_v55  ;;  %v854_v56 = vld [vmem:[%s10398_s7 + $0x1380] sm:$0xff]  ;;  %v856_v57 = vld [vmem:[%s10398_s7 + $0x1388] sm:$0xff] }
  0xac   : > { %v858_v58 = vld [vmem:[%s10398_s7 + $0x13a0] sm:$0xff]  ;;  %855 = vst [vmem:[%s10406_s8 + $0x9c0] sm:$0xff] %v854_v56  ;;  %857 = vst [vmem:[%s10406_s8 + $0x9c8] sm:$0xff] %v856_v57  ;;  %v860_v59 = vld [vmem:[%s10398_s7 + $0x13a8] sm:$0xff] }
  0xad   : > { %859 = vst [vmem:[%s10406_s8 + $0x9d0] sm:$0xff] %v858_v58  ;;  %v862_v60 = vld [vmem:[%s10398_s7 + $0x13c0] sm:$0xff]  ;;  %v864_v61 = vld [vmem:[%s10398_s7 + $0x13c8] sm:$0xff]  ;;  %861 = vst [vmem:[%s10406_s8 + $0x9d8] sm:$0xff] %v860_v59 }
  0xae   : > { %863 = vst [vmem:[%s10406_s8 + $0x9e0] sm:$0xff] %v862_v60  ;;  %865 = vst [vmem:[%s10406_s8 + $0x9e8] sm:$0xff] %v864_v61  ;;  %v866_v62 = vld [vmem:[%s10398_s7 + $0x13e0] sm:$0xff]  ;;  %v868_v63 = vld [vmem:[%s10398_s7 + $0x13e8] sm:$0xff] }
  0xaf   : > { %v870_v0 = vld [vmem:[%s10398_s7 + $0x1400] sm:$0xff]  ;;  %867 = vst [vmem:[%s10406_s8 + $0x9f0] sm:$0xff] %v866_v62  ;;  %869 = vst [vmem:[%s10406_s8 + $0x9f8] sm:$0xff] %v868_v63  ;;  %v872_v1 = vld [vmem:[%s10398_s7 + $0x1408] sm:$0xff] }
  0xb0   : > { %871 = vst [vmem:[%s10406_s8 + $0xa00] sm:$0xff] %v870_v0  ;;  %v874_v2 = vld [vmem:[%s10398_s7 + $0x1420] sm:$0xff]  ;;  %v876_v3 = vld [vmem:[%s10398_s7 + $0x1428] sm:$0xff]  ;;  %873 = vst [vmem:[%s10406_s8 + $0xa08] sm:$0xff] %v872_v1 }
  0xb1   : > { %875 = vst [vmem:[%s10406_s8 + $0xa10] sm:$0xff] %v874_v2  ;;  %877 = vst [vmem:[%s10406_s8 + $0xa18] sm:$0xff] %v876_v3  ;;  %v878_v4 = vld [vmem:[%s10398_s7 + $0x1440] sm:$0xff]  ;;  %v880_v5 = vld [vmem:[%s10398_s7 + $0x1448] sm:$0xff] }
  0xb2   : > { %v882_v6 = vld [vmem:[%s10398_s7 + $0x1460] sm:$0xff]  ;;  %879 = vst [vmem:[%s10406_s8 + $0xa20] sm:$0xff] %v878_v4  ;;  %881 = vst [vmem:[%s10406_s8 + $0xa28] sm:$0xff] %v880_v5  ;;  %v884_v7 = vld [vmem:[%s10398_s7 + $0x1468] sm:$0xff] }
  0xb3   : > { %883 = vst [vmem:[%s10406_s8 + $0xa30] sm:$0xff] %v882_v6  ;;  %v886_v8 = vld [vmem:[%s10398_s7 + $0x1480] sm:$0xff]  ;;  %v888_v9 = vld [vmem:[%s10398_s7 + $0x1488] sm:$0xff]  ;;  %885 = vst [vmem:[%s10406_s8 + $0xa38] sm:$0xff] %v884_v7 }
  0xb4   : > { %887 = vst [vmem:[%s10406_s8 + $0xa40] sm:$0xff] %v886_v8  ;;  %889 = vst [vmem:[%s10406_s8 + $0xa48] sm:$0xff] %v888_v9  ;;  %v890_v10 = vld [vmem:[%s10398_s7 + $0x14a0] sm:$0xff]  ;;  %v892_v11 = vld [vmem:[%s10398_s7 + $0x14a8] sm:$0xff] }
  0xb5   : > { %v894_v12 = vld [vmem:[%s10398_s7 + $0x14c0] sm:$0xff]  ;;  %891 = vst [vmem:[%s10406_s8 + $0xa50] sm:$0xff] %v890_v10  ;;  %893 = vst [vmem:[%s10406_s8 + $0xa58] sm:$0xff] %v892_v11  ;;  %v896_v13 = vld [vmem:[%s10398_s7 + $0x14c8] sm:$0xff] }
  0xb6   : > { %895 = vst [vmem:[%s10406_s8 + $0xa60] sm:$0xff] %v894_v12  ;;  %v898_v14 = vld [vmem:[%s10398_s7 + $0x14e0] sm:$0xff]  ;;  %v900_v15 = vld [vmem:[%s10398_s7 + $0x14e8] sm:$0xff]  ;;  %897 = vst [vmem:[%s10406_s8 + $0xa68] sm:$0xff] %v896_v13 }
  0xb7   : > { %899 = vst [vmem:[%s10406_s8 + $0xa70] sm:$0xff] %v898_v14  ;;  %901 = vst [vmem:[%s10406_s8 + $0xa78] sm:$0xff] %v900_v15  ;;  %v902_v16 = vld [vmem:[%s10398_s7 + $0x1500] sm:$0xff]  ;;  %v904_v17 = vld [vmem:[%s10398_s7 + $0x1508] sm:$0xff] }
  0xb8   : > { %v906_v18 = vld [vmem:[%s10398_s7 + $0x1520] sm:$0xff]  ;;  %903 = vst [vmem:[%s10406_s8 + $0xa80] sm:$0xff] %v902_v16  ;;  %905 = vst [vmem:[%s10406_s8 + $0xa88] sm:$0xff] %v904_v17  ;;  %v908_v19 = vld [vmem:[%s10398_s7 + $0x1528] sm:$0xff] }
  0xb9   : > { %907 = vst [vmem:[%s10406_s8 + $0xa90] sm:$0xff] %v906_v18  ;;  %v910_v20 = vld [vmem:[%s10398_s7 + $0x1540] sm:$0xff]  ;;  %v912_v21 = vld [vmem:[%s10398_s7 + $0x1548] sm:$0xff]  ;;  %909 = vst [vmem:[%s10406_s8 + $0xa98] sm:$0xff] %v908_v19 }
  0xba   : > { %911 = vst [vmem:[%s10406_s8 + $0xaa0] sm:$0xff] %v910_v20  ;;  %913 = vst [vmem:[%s10406_s8 + $0xaa8] sm:$0xff] %v912_v21  ;;  %v914_v22 = vld [vmem:[%s10398_s7 + $0x1560] sm:$0xff]  ;;  %v916_v23 = vld [vmem:[%s10398_s7 + $0x1568] sm:$0xff] }
  0xbb   : > { %v918_v24 = vld [vmem:[%s10398_s7 + $0x1580] sm:$0xff]  ;;  %915 = vst [vmem:[%s10406_s8 + $0xab0] sm:$0xff] %v914_v22  ;;  %917 = vst [vmem:[%s10406_s8 + $0xab8] sm:$0xff] %v916_v23  ;;  %v920_v25 = vld [vmem:[%s10398_s7 + $0x1588] sm:$0xff] }
  0xbc   : > { %919 = vst [vmem:[%s10406_s8 + $0xac0] sm:$0xff] %v918_v24  ;;  %v922_v26 = vld [vmem:[%s10398_s7 + $0x15a0] sm:$0xff]  ;;  %v924_v27 = vld [vmem:[%s10398_s7 + $0x15a8] sm:$0xff]  ;;  %921 = vst [vmem:[%s10406_s8 + $0xac8] sm:$0xff] %v920_v25 }
  0xbd   : > { %923 = vst [vmem:[%s10406_s8 + $0xad0] sm:$0xff] %v922_v26  ;;  %925 = vst [vmem:[%s10406_s8 + $0xad8] sm:$0xff] %v924_v27  ;;  %v926_v28 = vld [vmem:[%s10398_s7 + $0x15c0] sm:$0xff]  ;;  %v928_v29 = vld [vmem:[%s10398_s7 + $0x15c8] sm:$0xff] }
  0xbe   : > { %v930_v30 = vld [vmem:[%s10398_s7 + $0x15e0] sm:$0xff]  ;;  %927 = vst [vmem:[%s10406_s8 + $0xae0] sm:$0xff] %v926_v28  ;;  %929 = vst [vmem:[%s10406_s8 + $0xae8] sm:$0xff] %v928_v29  ;;  %v932_v31 = vld [vmem:[%s10398_s7 + $0x15e8] sm:$0xff] }
  0xbf   : > { %931 = vst [vmem:[%s10406_s8 + $0xaf0] sm:$0xff] %v930_v30  ;;  %v934_v32 = vld [vmem:[%s10398_s7 + $0x1600] sm:$0xff]  ;;  %v936_v33 = vld [vmem:[%s10398_s7 + $0x1608] sm:$0xff]  ;;  %933 = vst [vmem:[%s10406_s8 + $0xaf8] sm:$0xff] %v932_v31 }
  0xc0   : > { %935 = vst [vmem:[%s10406_s8 + $0xb00] sm:$0xff] %v934_v32  ;;  %937 = vst [vmem:[%s10406_s8 + $0xb08] sm:$0xff] %v936_v33  ;;  %v938_v34 = vld [vmem:[%s10398_s7 + $0x1620] sm:$0xff]  ;;  %v940_v35 = vld [vmem:[%s10398_s7 + $0x1628] sm:$0xff] }
  0xc1   : > { %v942_v36 = vld [vmem:[%s10398_s7 + $0x1640] sm:$0xff]  ;;  %939 = vst [vmem:[%s10406_s8 + $0xb10] sm:$0xff] %v938_v34  ;;  %941 = vst [vmem:[%s10406_s8 + $0xb18] sm:$0xff] %v940_v35  ;;  %v944_v37 = vld [vmem:[%s10398_s7 + $0x1648] sm:$0xff] }
  0xc2   : > { %943 = vst [vmem:[%s10406_s8 + $0xb20] sm:$0xff] %v942_v36  ;;  %v946_v38 = vld [vmem:[%s10398_s7 + $0x1660] sm:$0xff]  ;;  %v948_v39 = vld [vmem:[%s10398_s7 + $0x1668] sm:$0xff]  ;;  %945 = vst [vmem:[%s10406_s8 + $0xb28] sm:$0xff] %v944_v37 }
  0xc3   : > { %947 = vst [vmem:[%s10406_s8 + $0xb30] sm:$0xff] %v946_v38  ;;  %949 = vst [vmem:[%s10406_s8 + $0xb38] sm:$0xff] %v948_v39  ;;  %v950_v40 = vld [vmem:[%s10398_s7 + $0x1680] sm:$0xff]  ;;  %v952_v41 = vld [vmem:[%s10398_s7 + $0x1688] sm:$0xff] }
  0xc4   : > { %v954_v42 = vld [vmem:[%s10398_s7 + $0x16a0] sm:$0xff]  ;;  %951 = vst [vmem:[%s10406_s8 + $0xb40] sm:$0xff] %v950_v40  ;;  %953 = vst [vmem:[%s10406_s8 + $0xb48] sm:$0xff] %v952_v41  ;;  %v956_v43 = vld [vmem:[%s10398_s7 + $0x16a8] sm:$0xff] }
  0xc5   : > { %955 = vst [vmem:[%s10406_s8 + $0xb50] sm:$0xff] %v954_v42  ;;  %v958_v44 = vld [vmem:[%s10398_s7 + $0x16c0] sm:$0xff]  ;;  %v960_v45 = vld [vmem:[%s10398_s7 + $0x16c8] sm:$0xff]  ;;  %957 = vst [vmem:[%s10406_s8 + $0xb58] sm:$0xff] %v956_v43 }
  0xc6   : > { %959 = vst [vmem:[%s10406_s8 + $0xb60] sm:$0xff] %v958_v44  ;;  %961 = vst [vmem:[%s10406_s8 + $0xb68] sm:$0xff] %v960_v45  ;;  %v962_v46 = vld [vmem:[%s10398_s7 + $0x16e0] sm:$0xff]  ;;  %v964_v47 = vld [vmem:[%s10398_s7 + $0x16e8] sm:$0xff] }
  0xc7   : > { %v966_v48 = vld [vmem:[%s10398_s7 + $0x1700] sm:$0xff]  ;;  %963 = vst [vmem:[%s10406_s8 + $0xb70] sm:$0xff] %v962_v46  ;;  %965 = vst [vmem:[%s10406_s8 + $0xb78] sm:$0xff] %v964_v47  ;;  %v968_v49 = vld [vmem:[%s10398_s7 + $0x1708] sm:$0xff] }
  0xc8   : > { %967 = vst [vmem:[%s10406_s8 + $0xb80] sm:$0xff] %v966_v48  ;;  %v970_v50 = vld [vmem:[%s10398_s7 + $0x1720] sm:$0xff]  ;;  %v972_v51 = vld [vmem:[%s10398_s7 + $0x1728] sm:$0xff]  ;;  %969 = vst [vmem:[%s10406_s8 + $0xb88] sm:$0xff] %v968_v49 }
  0xc9   : > { %971 = vst [vmem:[%s10406_s8 + $0xb90] sm:$0xff] %v970_v50  ;;  %973 = vst [vmem:[%s10406_s8 + $0xb98] sm:$0xff] %v972_v51  ;;  %v974_v52 = vld [vmem:[%s10398_s7 + $0x1740] sm:$0xff]  ;;  %v976_v53 = vld [vmem:[%s10398_s7 + $0x1748] sm:$0xff] }
  0xca   : > { %v978_v54 = vld [vmem:[%s10398_s7 + $0x1760] sm:$0xff]  ;;  %975 = vst [vmem:[%s10406_s8 + $0xba0] sm:$0xff] %v974_v52  ;;  %977 = vst [vmem:[%s10406_s8 + $0xba8] sm:$0xff] %v976_v53  ;;  %v980_v55 = vld [vmem:[%s10398_s7 + $0x1768] sm:$0xff] }
  0xcb   : > { %979 = vst [vmem:[%s10406_s8 + $0xbb0] sm:$0xff] %v978_v54  ;;  %v982_v56 = vld [vmem:[%s10398_s7 + $0x1780] sm:$0xff]  ;;  %v984_v57 = vld [vmem:[%s10398_s7 + $0x1788] sm:$0xff]  ;;  %981 = vst [vmem:[%s10406_s8 + $0xbb8] sm:$0xff] %v980_v55 }
  0xcc   : > { %983 = vst [vmem:[%s10406_s8 + $0xbc0] sm:$0xff] %v982_v56  ;;  %985 = vst [vmem:[%s10406_s8 + $0xbc8] sm:$0xff] %v984_v57  ;;  %v986_v58 = vld [vmem:[%s10398_s7 + $0x17a0] sm:$0xff]  ;;  %v988_v59 = vld [vmem:[%s10398_s7 + $0x17a8] sm:$0xff] }
  0xcd   : > { %v990_v60 = vld [vmem:[%s10398_s7 + $0x17c0] sm:$0xff]  ;;  %987 = vst [vmem:[%s10406_s8 + $0xbd0] sm:$0xff] %v986_v58  ;;  %989 = vst [vmem:[%s10406_s8 + $0xbd8] sm:$0xff] %v988_v59  ;;  %v992_v61 = vld [vmem:[%s10398_s7 + $0x17c8] sm:$0xff] }
  0xce   : > { %991 = vst [vmem:[%s10406_s8 + $0xbe0] sm:$0xff] %v990_v60  ;;  %v994_v62 = vld [vmem:[%s10398_s7 + $0x17e0] sm:$0xff]  ;;  %v996_v63 = vld [vmem:[%s10398_s7 + $0x17e8] sm:$0xff]  ;;  %993 = vst [vmem:[%s10406_s8 + $0xbe8] sm:$0xff] %v992_v61 }
  0xcf   : > { %995 = vst [vmem:[%s10406_s8 + $0xbf0] sm:$0xff] %v994_v62  ;;  %997 = vst [vmem:[%s10406_s8 + $0xbf8] sm:$0xff] %v996_v63  ;;  %v998_v0 = vld [vmem:[%s10398_s7 + $0x1800] sm:$0xff]  ;;  %v1000_v1 = vld [vmem:[%s10398_s7 + $0x1808] sm:$0xff] }
  0xd0   : > { %v1002_v2 = vld [vmem:[%s10398_s7 + $0x1820] sm:$0xff]  ;;  %999 = vst [vmem:[%s10406_s8 + $0xc00] sm:$0xff] %v998_v0  ;;  %1001 = vst [vmem:[%s10406_s8 + $0xc08] sm:$0xff] %v1000_v1  ;;  %v1004_v3 = vld [vmem:[%s10398_s7 + $0x1828] sm:$0xff] }
  0xd1   : > { %1003 = vst [vmem:[%s10406_s8 + $0xc10] sm:$0xff] %v1002_v2  ;;  %v1006_v4 = vld [vmem:[%s10398_s7 + $0x1840] sm:$0xff]  ;;  %v1008_v5 = vld [vmem:[%s10398_s7 + $0x1848] sm:$0xff]  ;;  %1005 = vst [vmem:[%s10406_s8 + $0xc18] sm:$0xff] %v1004_v3 }
  0xd2   : > { %1007 = vst [vmem:[%s10406_s8 + $0xc20] sm:$0xff] %v1006_v4  ;;  %1009 = vst [vmem:[%s10406_s8 + $0xc28] sm:$0xff] %v1008_v5  ;;  %v1010_v6 = vld [vmem:[%s10398_s7 + $0x1860] sm:$0xff]  ;;  %v1012_v7 = vld [vmem:[%s10398_s7 + $0x1868] sm:$0xff] }
  0xd3   : > { %v1014_v8 = vld [vmem:[%s10398_s7 + $0x1880] sm:$0xff]  ;;  %1011 = vst [vmem:[%s10406_s8 + $0xc30] sm:$0xff] %v1010_v6  ;;  %1013 = vst [vmem:[%s10406_s8 + $0xc38] sm:$0xff] %v1012_v7  ;;  %v1016_v9 = vld [vmem:[%s10398_s7 + $0x1888] sm:$0xff] }
  0xd4   : > { %1015 = vst [vmem:[%s10406_s8 + $0xc40] sm:$0xff] %v1014_v8  ;;  %v1018_v10 = vld [vmem:[%s10398_s7 + $0x18a0] sm:$0xff]  ;;  %v1020_v11 = vld [vmem:[%s10398_s7 + $0x18a8] sm:$0xff]  ;;  %1017 = vst [vmem:[%s10406_s8 + $0xc48] sm:$0xff] %v1016_v9 }
  0xd5   : > { %1019 = vst [vmem:[%s10406_s8 + $0xc50] sm:$0xff] %v1018_v10  ;;  %1021 = vst [vmem:[%s10406_s8 + $0xc58] sm:$0xff] %v1020_v11  ;;  %v1022_v12 = vld [vmem:[%s10398_s7 + $0x18c0] sm:$0xff]  ;;  %v1024_v13 = vld [vmem:[%s10398_s7 + $0x18c8] sm:$0xff] }
  0xd6   : > { %v1026_v14 = vld [vmem:[%s10398_s7 + $0x18e0] sm:$0xff]  ;;  %1023 = vst [vmem:[%s10406_s8 + $0xc60] sm:$0xff] %v1022_v12  ;;  %1025 = vst [vmem:[%s10406_s8 + $0xc68] sm:$0xff] %v1024_v13  ;;  %v1028_v15 = vld [vmem:[%s10398_s7 + $0x18e8] sm:$0xff] }
  0xd7   : > { %1027 = vst [vmem:[%s10406_s8 + $0xc70] sm:$0xff] %v1026_v14  ;;  %v1030_v16 = vld [vmem:[%s10398_s7 + $0x1900] sm:$0xff]  ;;  %v1032_v17 = vld [vmem:[%s10398_s7 + $0x1908] sm:$0xff]  ;;  %1029 = vst [vmem:[%s10406_s8 + $0xc78] sm:$0xff] %v1028_v15 }
  0xd8   : > { %1031 = vst [vmem:[%s10406_s8 + $0xc80] sm:$0xff] %v1030_v16  ;;  %1033 = vst [vmem:[%s10406_s8 + $0xc88] sm:$0xff] %v1032_v17  ;;  %v1034_v18 = vld [vmem:[%s10398_s7 + $0x1920] sm:$0xff]  ;;  %v1036_v19 = vld [vmem:[%s10398_s7 + $0x1928] sm:$0xff] }
  0xd9   : > { %v1038_v20 = vld [vmem:[%s10398_s7 + $0x1940] sm:$0xff]  ;;  %1035 = vst [vmem:[%s10406_s8 + $0xc90] sm:$0xff] %v1034_v18  ;;  %1037 = vst [vmem:[%s10406_s8 + $0xc98] sm:$0xff] %v1036_v19  ;;  %v1040_v21 = vld [vmem:[%s10398_s7 + $0x1948] sm:$0xff] }
  0xda   : > { %1039 = vst [vmem:[%s10406_s8 + $0xca0] sm:$0xff] %v1038_v20  ;;  %v1042_v22 = vld [vmem:[%s10398_s7 + $0x1960] sm:$0xff]  ;;  %v1044_v23 = vld [vmem:[%s10398_s7 + $0x1968] sm:$0xff]  ;;  %1041 = vst [vmem:[%s10406_s8 + $0xca8] sm:$0xff] %v1040_v21 }
  0xdb   : > { %1043 = vst [vmem:[%s10406_s8 + $0xcb0] sm:$0xff] %v1042_v22  ;;  %1045 = vst [vmem:[%s10406_s8 + $0xcb8] sm:$0xff] %v1044_v23  ;;  %v1046_v24 = vld [vmem:[%s10398_s7 + $0x1980] sm:$0xff]  ;;  %v1048_v25 = vld [vmem:[%s10398_s7 + $0x1988] sm:$0xff] }
  0xdc   : > { %v1050_v26 = vld [vmem:[%s10398_s7 + $0x19a0] sm:$0xff]  ;;  %1047 = vst [vmem:[%s10406_s8 + $0xcc0] sm:$0xff] %v1046_v24  ;;  %1049 = vst [vmem:[%s10406_s8 + $0xcc8] sm:$0xff] %v1048_v25  ;;  %v1052_v27 = vld [vmem:[%s10398_s7 + $0x19a8] sm:$0xff] }
  0xdd   : > { %1051 = vst [vmem:[%s10406_s8 + $0xcd0] sm:$0xff] %v1050_v26  ;;  %v1054_v28 = vld [vmem:[%s10398_s7 + $0x19c0] sm:$0xff]  ;;  %v1056_v29 = vld [vmem:[%s10398_s7 + $0x19c8] sm:$0xff]  ;;  %1053 = vst [vmem:[%s10406_s8 + $0xcd8] sm:$0xff] %v1052_v27 }
  0xde   : > { %1055 = vst [vmem:[%s10406_s8 + $0xce0] sm:$0xff] %v1054_v28  ;;  %1057 = vst [vmem:[%s10406_s8 + $0xce8] sm:$0xff] %v1056_v29  ;;  %v1058_v30 = vld [vmem:[%s10398_s7 + $0x19e0] sm:$0xff]  ;;  %v1060_v31 = vld [vmem:[%s10398_s7 + $0x19e8] sm:$0xff] }
  0xdf   : > { %v1062_v32 = vld [vmem:[%s10398_s7 + $0x1a00] sm:$0xff]  ;;  %1059 = vst [vmem:[%s10406_s8 + $0xcf0] sm:$0xff] %v1058_v30  ;;  %1061 = vst [vmem:[%s10406_s8 + $0xcf8] sm:$0xff] %v1060_v31  ;;  %v1064_v33 = vld [vmem:[%s10398_s7 + $0x1a08] sm:$0xff] }
  0xe0   : > { %1063 = vst [vmem:[%s10406_s8 + $0xd00] sm:$0xff] %v1062_v32  ;;  %v1066_v34 = vld [vmem:[%s10398_s7 + $0x1a20] sm:$0xff]  ;;  %v1068_v35 = vld [vmem:[%s10398_s7 + $0x1a28] sm:$0xff]  ;;  %1065 = vst [vmem:[%s10406_s8 + $0xd08] sm:$0xff] %v1064_v33 }
  0xe1   : > { %1067 = vst [vmem:[%s10406_s8 + $0xd10] sm:$0xff] %v1066_v34  ;;  %1069 = vst [vmem:[%s10406_s8 + $0xd18] sm:$0xff] %v1068_v35  ;;  %v1070_v36 = vld [vmem:[%s10398_s7 + $0x1a40] sm:$0xff]  ;;  %v1072_v37 = vld [vmem:[%s10398_s7 + $0x1a48] sm:$0xff] }
  0xe2   : > { %v1074_v38 = vld [vmem:[%s10398_s7 + $0x1a60] sm:$0xff]  ;;  %1071 = vst [vmem:[%s10406_s8 + $0xd20] sm:$0xff] %v1070_v36  ;;  %1073 = vst [vmem:[%s10406_s8 + $0xd28] sm:$0xff] %v1072_v37  ;;  %v1076_v39 = vld [vmem:[%s10398_s7 + $0x1a68] sm:$0xff] }
  0xe3   : > { %1075 = vst [vmem:[%s10406_s8 + $0xd30] sm:$0xff] %v1074_v38  ;;  %v1078_v40 = vld [vmem:[%s10398_s7 + $0x1a80] sm:$0xff]  ;;  %v1080_v41 = vld [vmem:[%s10398_s7 + $0x1a88] sm:$0xff]  ;;  %1077 = vst [vmem:[%s10406_s8 + $0xd38] sm:$0xff] %v1076_v39 }
  0xe4   : > { %1079 = vst [vmem:[%s10406_s8 + $0xd40] sm:$0xff] %v1078_v40  ;;  %1081 = vst [vmem:[%s10406_s8 + $0xd48] sm:$0xff] %v1080_v41  ;;  %v1082_v42 = vld [vmem:[%s10398_s7 + $0x1aa0] sm:$0xff]  ;;  %v1084_v43 = vld [vmem:[%s10398_s7 + $0x1aa8] sm:$0xff] }
  0xe5   : > { %v1086_v44 = vld [vmem:[%s10398_s7 + $0x1ac0] sm:$0xff]  ;;  %1083 = vst [vmem:[%s10406_s8 + $0xd50] sm:$0xff] %v1082_v42  ;;  %1085 = vst [vmem:[%s10406_s8 + $0xd58] sm:$0xff] %v1084_v43  ;;  %v1088_v45 = vld [vmem:[%s10398_s7 + $0x1ac8] sm:$0xff] }
  0xe6   : > { %1087 = vst [vmem:[%s10406_s8 + $0xd60] sm:$0xff] %v1086_v44  ;;  %v1090_v46 = vld [vmem:[%s10398_s7 + $0x1ae0] sm:$0xff]  ;;  %v1092_v47 = vld [vmem:[%s10398_s7 + $0x1ae8] sm:$0xff]  ;;  %1089 = vst [vmem:[%s10406_s8 + $0xd68] sm:$0xff] %v1088_v45 }
  0xe7   : > { %1091 = vst [vmem:[%s10406_s8 + $0xd70] sm:$0xff] %v1090_v46  ;;  %1093 = vst [vmem:[%s10406_s8 + $0xd78] sm:$0xff] %v1092_v47  ;;  %v1094_v48 = vld [vmem:[%s10398_s7 + $0x1b00] sm:$0xff]  ;;  %v1096_v49 = vld [vmem:[%s10398_s7 + $0x1b08] sm:$0xff] }
  0xe8   : > { %v1098_v50 = vld [vmem:[%s10398_s7 + $0x1b20] sm:$0xff]  ;;  %1095 = vst [vmem:[%s10406_s8 + $0xd80] sm:$0xff] %v1094_v48  ;;  %1097 = vst [vmem:[%s10406_s8 + $0xd88] sm:$0xff] %v1096_v49  ;;  %v1100_v51 = vld [vmem:[%s10398_s7 + $0x1b28] sm:$0xff] }
  0xe9   : > { %1099 = vst [vmem:[%s10406_s8 + $0xd90] sm:$0xff] %v1098_v50  ;;  %v1102_v52 = vld [vmem:[%s10398_s7 + $0x1b40] sm:$0xff]  ;;  %v1104_v53 = vld [vmem:[%s10398_s7 + $0x1b48] sm:$0xff]  ;;  %1101 = vst [vmem:[%s10406_s8 + $0xd98] sm:$0xff] %v1100_v51 }
  0xea   : > { %1103 = vst [vmem:[%s10406_s8 + $0xda0] sm:$0xff] %v1102_v52  ;;  %1105 = vst [vmem:[%s10406_s8 + $0xda8] sm:$0xff] %v1104_v53  ;;  %v1106_v54 = vld [vmem:[%s10398_s7 + $0x1b60] sm:$0xff]  ;;  %v1108_v55 = vld [vmem:[%s10398_s7 + $0x1b68] sm:$0xff] }
  0xeb   : > { %v1110_v56 = vld [vmem:[%s10398_s7 + $0x1b80] sm:$0xff]  ;;  %1107 = vst [vmem:[%s10406_s8 + $0xdb0] sm:$0xff] %v1106_v54  ;;  %1109 = vst [vmem:[%s10406_s8 + $0xdb8] sm:$0xff] %v1108_v55  ;;  %v1112_v57 = vld [vmem:[%s10398_s7 + $0x1b88] sm:$0xff] }
  0xec   : > { %1111 = vst [vmem:[%s10406_s8 + $0xdc0] sm:$0xff] %v1110_v56  ;;  %v1114_v58 = vld [vmem:[%s10398_s7 + $0x1ba0] sm:$0xff]  ;;  %v1116_v59 = vld [vmem:[%s10398_s7 + $0x1ba8] sm:$0xff]  ;;  %1113 = vst [vmem:[%s10406_s8 + $0xdc8] sm:$0xff] %v1112_v57 }
  0xed   : > { %1115 = vst [vmem:[%s10406_s8 + $0xdd0] sm:$0xff] %v1114_v58  ;;  %1117 = vst [vmem:[%s10406_s8 + $0xdd8] sm:$0xff] %v1116_v59  ;;  %v1118_v60 = vld [vmem:[%s10398_s7 + $0x1bc0] sm:$0xff]  ;;  %v1120_v61 = vld [vmem:[%s10398_s7 + $0x1bc8] sm:$0xff] }
  0xee   : > { %v1122_v62 = vld [vmem:[%s10398_s7 + $0x1be0] sm:$0xff]  ;;  %1119 = vst [vmem:[%s10406_s8 + $0xde0] sm:$0xff] %v1118_v60  ;;  %1121 = vst [vmem:[%s10406_s8 + $0xde8] sm:$0xff] %v1120_v61  ;;  %v1124_v63 = vld [vmem:[%s10398_s7 + $0x1be8] sm:$0xff] }
  0xef   : > { %1123 = vst [vmem:[%s10406_s8 + $0xdf0] sm:$0xff] %v1122_v62  ;;  %v1126_v0 = vld [vmem:[%s10398_s7 + $0x1c00] sm:$0xff]  ;;  %v1128_v1 = vld [vmem:[%s10398_s7 + $0x1c08] sm:$0xff]  ;;  %1125 = vst [vmem:[%s10406_s8 + $0xdf8] sm:$0xff] %v1124_v63 }
  0xf0   : > { %1127 = vst [vmem:[%s10406_s8 + $0xe00] sm:$0xff] %v1126_v0  ;;  %1129 = vst [vmem:[%s10406_s8 + $0xe08] sm:$0xff] %v1128_v1  ;;  %v1130_v2 = vld [vmem:[%s10398_s7 + $0x1c20] sm:$0xff]  ;;  %v1132_v3 = vld [vmem:[%s10398_s7 + $0x1c28] sm:$0xff] }
  0xf1   : > { %v1134_v4 = vld [vmem:[%s10398_s7 + $0x1c40] sm:$0xff]  ;;  %1131 = vst [vmem:[%s10406_s8 + $0xe10] sm:$0xff] %v1130_v2  ;;  %1133 = vst [vmem:[%s10406_s8 + $0xe18] sm:$0xff] %v1132_v3  ;;  %v1136_v5 = vld [vmem:[%s10398_s7 + $0x1c48] sm:$0xff] }
  0xf2   : > { %1135 = vst [vmem:[%s10406_s8 + $0xe20] sm:$0xff] %v1134_v4  ;;  %v1138_v6 = vld [vmem:[%s10398_s7 + $0x1c60] sm:$0xff]  ;;  %v1140_v7 = vld [vmem:[%s10398_s7 + $0x1c68] sm:$0xff]  ;;  %1137 = vst [vmem:[%s10406_s8 + $0xe28] sm:$0xff] %v1136_v5 }
  0xf3   : > { %1139 = vst [vmem:[%s10406_s8 + $0xe30] sm:$0xff] %v1138_v6  ;;  %1141 = vst [vmem:[%s10406_s8 + $0xe38] sm:$0xff] %v1140_v7  ;;  %v1142_v8 = vld [vmem:[%s10398_s7 + $0x1c80] sm:$0xff]  ;;  %v1144_v9 = vld [vmem:[%s10398_s7 + $0x1c88] sm:$0xff] }
  0xf4   : > { %v1146_v10 = vld [vmem:[%s10398_s7 + $0x1ca0] sm:$0xff]  ;;  %1143 = vst [vmem:[%s10406_s8 + $0xe40] sm:$0xff] %v1142_v8  ;;  %1145 = vst [vmem:[%s10406_s8 + $0xe48] sm:$0xff] %v1144_v9  ;;  %v1148_v11 = vld [vmem:[%s10398_s7 + $0x1ca8] sm:$0xff] }
  0xf5   : > { %1147 = vst [vmem:[%s10406_s8 + $0xe50] sm:$0xff] %v1146_v10  ;;  %v1150_v12 = vld [vmem:[%s10398_s7 + $0x1cc0] sm:$0xff]  ;;  %v1152_v13 = vld [vmem:[%s10398_s7 + $0x1cc8] sm:$0xff]  ;;  %1149 = vst [vmem:[%s10406_s8 + $0xe58] sm:$0xff] %v1148_v11 }
  0xf6   : > { %1151 = vst [vmem:[%s10406_s8 + $0xe60] sm:$0xff] %v1150_v12  ;;  %1153 = vst [vmem:[%s10406_s8 + $0xe68] sm:$0xff] %v1152_v13  ;;  %v1154_v14 = vld [vmem:[%s10398_s7 + $0x1ce0] sm:$0xff]  ;;  %v1156_v15 = vld [vmem:[%s10398_s7 + $0x1ce8] sm:$0xff] }
  0xf7   : > { %v1158_v16 = vld [vmem:[%s10398_s7 + $0x1d00] sm:$0xff]  ;;  %1155 = vst [vmem:[%s10406_s8 + $0xe70] sm:$0xff] %v1154_v14  ;;  %1157 = vst [vmem:[%s10406_s8 + $0xe78] sm:$0xff] %v1156_v15  ;;  %v1160_v17 = vld [vmem:[%s10398_s7 + $0x1d08] sm:$0xff] }
  0xf8   : > { %1159 = vst [vmem:[%s10406_s8 + $0xe80] sm:$0xff] %v1158_v16  ;;  %v1162_v18 = vld [vmem:[%s10398_s7 + $0x1d20] sm:$0xff]  ;;  %v1164_v19 = vld [vmem:[%s10398_s7 + $0x1d28] sm:$0xff]  ;;  %1161 = vst [vmem:[%s10406_s8 + $0xe88] sm:$0xff] %v1160_v17 }
  0xf9   : > { %1163 = vst [vmem:[%s10406_s8 + $0xe90] sm:$0xff] %v1162_v18  ;;  %1165 = vst [vmem:[%s10406_s8 + $0xe98] sm:$0xff] %v1164_v19  ;;  %v1166_v20 = vld [vmem:[%s10398_s7 + $0x1d40] sm:$0xff]  ;;  %v1168_v21 = vld [vmem:[%s10398_s7 + $0x1d48] sm:$0xff] }
  0xfa   : > { %v1170_v22 = vld [vmem:[%s10398_s7 + $0x1d60] sm:$0xff]  ;;  %1167 = vst [vmem:[%s10406_s8 + $0xea0] sm:$0xff] %v1166_v20  ;;  %1169 = vst [vmem:[%s10406_s8 + $0xea8] sm:$0xff] %v1168_v21  ;;  %v1172_v23 = vld [vmem:[%s10398_s7 + $0x1d68] sm:$0xff] }
  0xfb   : > { %1171 = vst [vmem:[%s10406_s8 + $0xeb0] sm:$0xff] %v1170_v22  ;;  %v1174_v24 = vld [vmem:[%s10398_s7 + $0x1d80] sm:$0xff]  ;;  %v1176_v25 = vld [vmem:[%s10398_s7 + $0x1d88] sm:$0xff]  ;;  %1173 = vst [vmem:[%s10406_s8 + $0xeb8] sm:$0xff] %v1172_v23 }
  0xfc   : > { %1175 = vst [vmem:[%s10406_s8 + $0xec0] sm:$0xff] %v1174_v24  ;;  %1177 = vst [vmem:[%s10406_s8 + $0xec8] sm:$0xff] %v1176_v25  ;;  %v1178_v26 = vld [vmem:[%s10398_s7 + $0x1da0] sm:$0xff]  ;;  %v1180_v27 = vld [vmem:[%s10398_s7 + $0x1da8] sm:$0xff] }
  0xfd   : > { %v1182_v28 = vld [vmem:[%s10398_s7 + $0x1dc0] sm:$0xff]  ;;  %1179 = vst [vmem:[%s10406_s8 + $0xed0] sm:$0xff] %v1178_v26  ;;  %1181 = vst [vmem:[%s10406_s8 + $0xed8] sm:$0xff] %v1180_v27  ;;  %v1184_v29 = vld [vmem:[%s10398_s7 + $0x1dc8] sm:$0xff] }
  0xfe   : > { %1183 = vst [vmem:[%s10406_s8 + $0xee0] sm:$0xff] %v1182_v28  ;;  %v1186_v30 = vld [vmem:[%s10398_s7 + $0x1de0] sm:$0xff]  ;;  %v1188_v31 = vld [vmem:[%s10398_s7 + $0x1de8] sm:$0xff]  ;;  %1185 = vst [vmem:[%s10406_s8 + $0xee8] sm:$0xff] %v1184_v29 }
  0xff   : > { %1187 = vst [vmem:[%s10406_s8 + $0xef0] sm:$0xff] %v1186_v30  ;;  %1189 = vst [vmem:[%s10406_s8 + $0xef8] sm:$0xff] %v1188_v31  ;;  %v1190_v32 = vld [vmem:[%s10398_s7 + $0x1e00] sm:$0xff]  ;;  %v1192_v33 = vld [vmem:[%s10398_s7 + $0x1e08] sm:$0xff] }
 0x100   : > { %v1194_v34 = vld [vmem:[%s10398_s7 + $0x1e20] sm:$0xff]  ;;  %1191 = vst [vmem:[%s10406_s8 + $0xf00] sm:$0xff] %v1190_v32  ;;  %1193 = vst [vmem:[%s10406_s8 + $0xf08] sm:$0xff] %v1192_v33  ;;  %v1196_v35 = vld [vmem:[%s10398_s7 + $0x1e28] sm:$0xff] }
 0x101   : > { %1195 = vst [vmem:[%s10406_s8 + $0xf10] sm:$0xff] %v1194_v34  ;;  %v1198_v36 = vld [vmem:[%s10398_s7 + $0x1e40] sm:$0xff]  ;;  %v1200_v37 = vld [vmem:[%s10398_s7 + $0x1e48] sm:$0xff]  ;;  %1197 = vst [vmem:[%s10406_s8 + $0xf18] sm:$0xff] %v1196_v35 }
 0x102   : > { %1199 = vst [vmem:[%s10406_s8 + $0xf20] sm:$0xff] %v1198_v36  ;;  %1201 = vst [vmem:[%s10406_s8 + $0xf28] sm:$0xff] %v1200_v37  ;;  %v1202_v38 = vld [vmem:[%s10398_s7 + $0x1e60] sm:$0xff]  ;;  %v1204_v39 = vld [vmem:[%s10398_s7 + $0x1e68] sm:$0xff] }
 0x103   : > { %v1206_v40 = vld [vmem:[%s10398_s7 + $0x1e80] sm:$0xff]  ;;  %1203 = vst [vmem:[%s10406_s8 + $0xf30] sm:$0xff] %v1202_v38  ;;  %1205 = vst [vmem:[%s10406_s8 + $0xf38] sm:$0xff] %v1204_v39  ;;  %v1208_v41 = vld [vmem:[%s10398_s7 + $0x1e88] sm:$0xff] }
 0x104   : > { %1207 = vst [vmem:[%s10406_s8 + $0xf40] sm:$0xff] %v1206_v40  ;;  %v1210_v42 = vld [vmem:[%s10398_s7 + $0x1ea0] sm:$0xff]  ;;  %v1212_v43 = vld [vmem:[%s10398_s7 + $0x1ea8] sm:$0xff]  ;;  %1209 = vst [vmem:[%s10406_s8 + $0xf48] sm:$0xff] %v1208_v41 }
 0x105   : > { %1211 = vst [vmem:[%s10406_s8 + $0xf50] sm:$0xff] %v1210_v42  ;;  %1213 = vst [vmem:[%s10406_s8 + $0xf58] sm:$0xff] %v1212_v43  ;;  %v1214_v44 = vld [vmem:[%s10398_s7 + $0x1ec0] sm:$0xff]  ;;  %v1216_v45 = vld [vmem:[%s10398_s7 + $0x1ec8] sm:$0xff] }
 0x106   : > { %v1218_v46 = vld [vmem:[%s10398_s7 + $0x1ee0] sm:$0xff]  ;;  %1215 = vst [vmem:[%s10406_s8 + $0xf60] sm:$0xff] %v1214_v44  ;;  %1217 = vst [vmem:[%s10406_s8 + $0xf68] sm:$0xff] %v1216_v45  ;;  %v1220_v47 = vld [vmem:[%s10398_s7 + $0x1ee8] sm:$0xff] }
 0x107   : > { %1219 = vst [vmem:[%s10406_s8 + $0xf70] sm:$0xff] %v1218_v46  ;;  %v1222_v48 = vld [vmem:[%s10398_s7 + $0x1f00] sm:$0xff]  ;;  %v1224_v49 = vld [vmem:[%s10398_s7 + $0x1f08] sm:$0xff]  ;;  %1221 = vst [vmem:[%s10406_s8 + $0xf78] sm:$0xff] %v1220_v47 }
 0x108   : > { %1223 = vst [vmem:[%s10406_s8 + $0xf80] sm:$0xff] %v1222_v48  ;;  %1225 = vst [vmem:[%s10406_s8 + $0xf88] sm:$0xff] %v1224_v49  ;;  %v1226_v50 = vld [vmem:[%s10398_s7 + $0x1f20] sm:$0xff]  ;;  %v1228_v51 = vld [vmem:[%s10398_s7 + $0x1f28] sm:$0xff] }
 0x109   : > { %v1230_v52 = vld [vmem:[%s10398_s7 + $0x1f40] sm:$0xff]  ;;  %1227 = vst [vmem:[%s10406_s8 + $0xf90] sm:$0xff] %v1226_v50  ;;  %1229 = vst [vmem:[%s10406_s8 + $0xf98] sm:$0xff] %v1228_v51  ;;  %v1232_v53 = vld [vmem:[%s10398_s7 + $0x1f48] sm:$0xff] }
 0x10a   : > { %1231 = vst [vmem:[%s10406_s8 + $0xfa0] sm:$0xff] %v1230_v52  ;;  %v1234_v54 = vld [vmem:[%s10398_s7 + $0x1f60] sm:$0xff]  ;;  %v1236_v55 = vld [vmem:[%s10398_s7 + $0x1f68] sm:$0xff]  ;;  %1233 = vst [vmem:[%s10406_s8 + $0xfa8] sm:$0xff] %v1232_v53 }
 0x10b   : > { %1235 = vst [vmem:[%s10406_s8 + $0xfb0] sm:$0xff] %v1234_v54  ;;  %1237 = vst [vmem:[%s10406_s8 + $0xfb8] sm:$0xff] %v1236_v55  ;;  %v1238_v56 = vld [vmem:[%s10398_s7 + $0x1f80] sm:$0xff]  ;;  %v1240_v57 = vld [vmem:[%s10398_s7 + $0x1f88] sm:$0xff] }
 0x10c   : > { %v1242_v58 = vld [vmem:[%s10398_s7 + $0x1fa0] sm:$0xff]  ;;  %1239 = vst [vmem:[%s10406_s8 + $0xfc0] sm:$0xff] %v1238_v56  ;;  %1241 = vst [vmem:[%s10406_s8 + $0xfc8] sm:$0xff] %v1240_v57  ;;  %v1244_v59 = vld [vmem:[%s10398_s7 + $0x1fa8] sm:$0xff] }
 0x10d   : > { %1243 = vst [vmem:[%s10406_s8 + $0xfd0] sm:$0xff] %v1242_v58  ;;  %v1246_v60 = vld [vmem:[%s10398_s7 + $0x1fc0] sm:$0xff]  ;;  %v1248_v61 = vld [vmem:[%s10398_s7 + $0x1fc8] sm:$0xff]  ;;  %1245 = vst [vmem:[%s10406_s8 + $0xfd8] sm:$0xff] %v1244_v59 }
 0x10e   : > { %1247 = vst [vmem:[%s10406_s8 + $0xfe0] sm:$0xff] %v1246_v60  ;;  %1249 = vst [vmem:[%s10406_s8 + $0xfe8] sm:$0xff] %v1248_v61  ;;  %v1250_v62 = vld [vmem:[%s10398_s7 + $0x1fe0] sm:$0xff]  ;;  %v1252_v63 = vld [vmem:[%s10398_s7 + $0x1fe8] sm:$0xff] }
 0x10f   : > { %v1254_v0 = vld [vmem:[%s10398_s7 + $0x2000] sm:$0xff]  ;;  %1251 = vst [vmem:[%s10406_s8 + $0xff0] sm:$0xff] %v1250_v62  ;;  %1253 = vst [vmem:[%s10406_s8 + $0xff8] sm:$0xff] %v1252_v63  ;;  %v1256_v1 = vld [vmem:[%s10398_s7 + $0x2008] sm:$0xff] }
 0x110   : > { %1255 = vst [vmem:[%s10406_s8 + $0x1000] sm:$0xff] %v1254_v0  ;;  %v1258_v2 = vld [vmem:[%s10398_s7 + $0x2020] sm:$0xff]  ;;  %v1260_v3 = vld [vmem:[%s10398_s7 + $0x2028] sm:$0xff]  ;;  %1257 = vst [vmem:[%s10406_s8 + $0x1008] sm:$0xff] %v1256_v1 }
 0x111   : > { %1259 = vst [vmem:[%s10406_s8 + $0x1010] sm:$0xff] %v1258_v2  ;;  %1261 = vst [vmem:[%s10406_s8 + $0x1018] sm:$0xff] %v1260_v3  ;;  %v1262_v4 = vld [vmem:[%s10398_s7 + $0x2040] sm:$0xff]  ;;  %v1264_v5 = vld [vmem:[%s10398_s7 + $0x2048] sm:$0xff] }
 0x112   : > { %v1266_v6 = vld [vmem:[%s10398_s7 + $0x2060] sm:$0xff]  ;;  %1263 = vst [vmem:[%s10406_s8 + $0x1020] sm:$0xff] %v1262_v4  ;;  %1265 = vst [vmem:[%s10406_s8 + $0x1028] sm:$0xff] %v1264_v5  ;;  %v1268_v7 = vld [vmem:[%s10398_s7 + $0x2068] sm:$0xff] }
 0x113   : > { %1267 = vst [vmem:[%s10406_s8 + $0x1030] sm:$0xff] %v1266_v6  ;;  %v1270_v8 = vld [vmem:[%s10398_s7 + $0x2080] sm:$0xff]  ;;  %v1272_v9 = vld [vmem:[%s10398_s7 + $0x2088] sm:$0xff]  ;;  %1269 = vst [vmem:[%s10406_s8 + $0x1038] sm:$0xff] %v1268_v7 }
 0x114   : > { %1271 = vst [vmem:[%s10406_s8 + $0x1040] sm:$0xff] %v1270_v8  ;;  %1273 = vst [vmem:[%s10406_s8 + $0x1048] sm:$0xff] %v1272_v9  ;;  %v1274_v10 = vld [vmem:[%s10398_s7 + $0x20a0] sm:$0xff]  ;;  %v1276_v11 = vld [vmem:[%s10398_s7 + $0x20a8] sm:$0xff] }
 0x115   : > { %v1278_v12 = vld [vmem:[%s10398_s7 + $0x20c0] sm:$0xff]  ;;  %1275 = vst [vmem:[%s10406_s8 + $0x1050] sm:$0xff] %v1274_v10  ;;  %1277 = vst [vmem:[%s10406_s8 + $0x1058] sm:$0xff] %v1276_v11  ;;  %v1280_v13 = vld [vmem:[%s10398_s7 + $0x20c8] sm:$0xff] }
 0x116   : > { %1279 = vst [vmem:[%s10406_s8 + $0x1060] sm:$0xff] %v1278_v12  ;;  %v1282_v14 = vld [vmem:[%s10398_s7 + $0x20e0] sm:$0xff]  ;;  %v1284_v15 = vld [vmem:[%s10398_s7 + $0x20e8] sm:$0xff]  ;;  %1281 = vst [vmem:[%s10406_s8 + $0x1068] sm:$0xff] %v1280_v13 }
 0x117   : > { %1283 = vst [vmem:[%s10406_s8 + $0x1070] sm:$0xff] %v1282_v14  ;;  %1285 = vst [vmem:[%s10406_s8 + $0x1078] sm:$0xff] %v1284_v15  ;;  %v1286_v16 = vld [vmem:[%s10398_s7 + $0x2100] sm:$0xff]  ;;  %v1288_v17 = vld [vmem:[%s10398_s7 + $0x2108] sm:$0xff] }
 0x118   : > { %v1290_v18 = vld [vmem:[%s10398_s7 + $0x2120] sm:$0xff]  ;;  %1287 = vst [vmem:[%s10406_s8 + $0x1080] sm:$0xff] %v1286_v16  ;;  %1289 = vst [vmem:[%s10406_s8 + $0x1088] sm:$0xff] %v1288_v17  ;;  %v1292_v19 = vld [vmem:[%s10398_s7 + $0x2128] sm:$0xff] }
 0x119   : > { %1291 = vst [vmem:[%s10406_s8 + $0x1090] sm:$0xff] %v1290_v18  ;;  %v1294_v20 = vld [vmem:[%s10398_s7 + $0x2140] sm:$0xff]  ;;  %v1296_v21 = vld [vmem:[%s10398_s7 + $0x2148] sm:$0xff]  ;;  %1293 = vst [vmem:[%s10406_s8 + $0x1098] sm:$0xff] %v1292_v19 }
 0x11a   : > { %1295 = vst [vmem:[%s10406_s8 + $0x10a0] sm:$0xff] %v1294_v20  ;;  %1297 = vst [vmem:[%s10406_s8 + $0x10a8] sm:$0xff] %v1296_v21  ;;  %v1298_v22 = vld [vmem:[%s10398_s7 + $0x2160] sm:$0xff]  ;;  %v1300_v23 = vld [vmem:[%s10398_s7 + $0x2168] sm:$0xff] }
 0x11b   : > { %v1302_v24 = vld [vmem:[%s10398_s7 + $0x2180] sm:$0xff]  ;;  %1299 = vst [vmem:[%s10406_s8 + $0x10b0] sm:$0xff] %v1298_v22  ;;  %1301 = vst [vmem:[%s10406_s8 + $0x10b8] sm:$0xff] %v1300_v23  ;;  %v1304_v25 = vld [vmem:[%s10398_s7 + $0x2188] sm:$0xff] }
 0x11c   : > { %1303 = vst [vmem:[%s10406_s8 + $0x10c0] sm:$0xff] %v1302_v24  ;;  %v1306_v26 = vld [vmem:[%s10398_s7 + $0x21a0] sm:$0xff]  ;;  %v1308_v27 = vld [vmem:[%s10398_s7 + $0x21a8] sm:$0xff]  ;;  %1305 = vst [vmem:[%s10406_s8 + $0x10c8] sm:$0xff] %v1304_v25 }
 0x11d   : > { %1307 = vst [vmem:[%s10406_s8 + $0x10d0] sm:$0xff] %v1306_v26  ;;  %1309 = vst [vmem:[%s10406_s8 + $0x10d8] sm:$0xff] %v1308_v27  ;;  %v1310_v28 = vld [vmem:[%s10398_s7 + $0x21c0] sm:$0xff]  ;;  %v1312_v29 = vld [vmem:[%s10398_s7 + $0x21c8] sm:$0xff] }
 0x11e   : > { %v1314_v30 = vld [vmem:[%s10398_s7 + $0x21e0] sm:$0xff]  ;;  %1311 = vst [vmem:[%s10406_s8 + $0x10e0] sm:$0xff] %v1310_v28  ;;  %1313 = vst [vmem:[%s10406_s8 + $0x10e8] sm:$0xff] %v1312_v29  ;;  %v1316_v31 = vld [vmem:[%s10398_s7 + $0x21e8] sm:$0xff] }
 0x11f   : > { %1315 = vst [vmem:[%s10406_s8 + $0x10f0] sm:$0xff] %v1314_v30  ;;  %v1318_v32 = vld [vmem:[%s10398_s7 + $0x2200] sm:$0xff]  ;;  %v1320_v33 = vld [vmem:[%s10398_s7 + $0x2208] sm:$0xff]  ;;  %1317 = vst [vmem:[%s10406_s8 + $0x10f8] sm:$0xff] %v1316_v31 }
 0x120   : > { %1319 = vst [vmem:[%s10406_s8 + $0x1100] sm:$0xff] %v1318_v32  ;;  %1321 = vst [vmem:[%s10406_s8 + $0x1108] sm:$0xff] %v1320_v33  ;;  %v1322_v34 = vld [vmem:[%s10398_s7 + $0x2220] sm:$0xff]  ;;  %v1324_v35 = vld [vmem:[%s10398_s7 + $0x2228] sm:$0xff] }
 0x121   : > { %v1326_v36 = vld [vmem:[%s10398_s7 + $0x2240] sm:$0xff]  ;;  %1323 = vst [vmem:[%s10406_s8 + $0x1110] sm:$0xff] %v1322_v34  ;;  %1325 = vst [vmem:[%s10406_s8 + $0x1118] sm:$0xff] %v1324_v35  ;;  %v1328_v37 = vld [vmem:[%s10398_s7 + $0x2248] sm:$0xff] }
 0x122   : > { %1327 = vst [vmem:[%s10406_s8 + $0x1120] sm:$0xff] %v1326_v36  ;;  %v1330_v38 = vld [vmem:[%s10398_s7 + $0x2260] sm:$0xff]  ;;  %v1332_v39 = vld [vmem:[%s10398_s7 + $0x2268] sm:$0xff]  ;;  %1329 = vst [vmem:[%s10406_s8 + $0x1128] sm:$0xff] %v1328_v37 }
 0x123   : > { %1331 = vst [vmem:[%s10406_s8 + $0x1130] sm:$0xff] %v1330_v38  ;;  %1333 = vst [vmem:[%s10406_s8 + $0x1138] sm:$0xff] %v1332_v39  ;;  %v1334_v40 = vld [vmem:[%s10398_s7 + $0x2280] sm:$0xff]  ;;  %v1336_v41 = vld [vmem:[%s10398_s7 + $0x2288] sm:$0xff] }
 0x124   : > { %v1338_v42 = vld [vmem:[%s10398_s7 + $0x22a0] sm:$0xff]  ;;  %1335 = vst [vmem:[%s10406_s8 + $0x1140] sm:$0xff] %v1334_v40  ;;  %1337 = vst [vmem:[%s10406_s8 + $0x1148] sm:$0xff] %v1336_v41  ;;  %v1340_v43 = vld [vmem:[%s10398_s7 + $0x22a8] sm:$0xff] }
 0x125   : > { %1339 = vst [vmem:[%s10406_s8 + $0x1150] sm:$0xff] %v1338_v42  ;;  %v1342_v44 = vld [vmem:[%s10398_s7 + $0x22c0] sm:$0xff]  ;;  %v1344_v45 = vld [vmem:[%s10398_s7 + $0x22c8] sm:$0xff]  ;;  %1341 = vst [vmem:[%s10406_s8 + $0x1158] sm:$0xff] %v1340_v43 }
 0x126   : > { %1343 = vst [vmem:[%s10406_s8 + $0x1160] sm:$0xff] %v1342_v44  ;;  %1345 = vst [vmem:[%s10406_s8 + $0x1168] sm:$0xff] %v1344_v45  ;;  %v1346_v46 = vld [vmem:[%s10398_s7 + $0x22e0] sm:$0xff]  ;;  %v1348_v47 = vld [vmem:[%s10398_s7 + $0x22e8] sm:$0xff] }
 0x127   : > { %v1350_v48 = vld [vmem:[%s10398_s7 + $0x2300] sm:$0xff]  ;;  %1347 = vst [vmem:[%s10406_s8 + $0x1170] sm:$0xff] %v1346_v46  ;;  %1349 = vst [vmem:[%s10406_s8 + $0x1178] sm:$0xff] %v1348_v47  ;;  %v1352_v49 = vld [vmem:[%s10398_s7 + $0x2308] sm:$0xff] }
 0x128   : > { %1351 = vst [vmem:[%s10406_s8 + $0x1180] sm:$0xff] %v1350_v48  ;;  %v1354_v50 = vld [vmem:[%s10398_s7 + $0x2320] sm:$0xff]  ;;  %v1356_v51 = vld [vmem:[%s10398_s7 + $0x2328] sm:$0xff]  ;;  %1353 = vst [vmem:[%s10406_s8 + $0x1188] sm:$0xff] %v1352_v49 }
 0x129   : > { %1355 = vst [vmem:[%s10406_s8 + $0x1190] sm:$0xff] %v1354_v50  ;;  %1357 = vst [vmem:[%s10406_s8 + $0x1198] sm:$0xff] %v1356_v51  ;;  %v1358_v52 = vld [vmem:[%s10398_s7 + $0x2340] sm:$0xff]  ;;  %v1360_v53 = vld [vmem:[%s10398_s7 + $0x2348] sm:$0xff] }
 0x12a   : > { %v1362_v54 = vld [vmem:[%s10398_s7 + $0x2360] sm:$0xff]  ;;  %1359 = vst [vmem:[%s10406_s8 + $0x11a0] sm:$0xff] %v1358_v52  ;;  %1361 = vst [vmem:[%s10406_s8 + $0x11a8] sm:$0xff] %v1360_v53  ;;  %v1364_v55 = vld [vmem:[%s10398_s7 + $0x2368] sm:$0xff] }
 0x12b   : > { %1363 = vst [vmem:[%s10406_s8 + $0x11b0] sm:$0xff] %v1362_v54  ;;  %v1366_v56 = vld [vmem:[%s10398_s7 + $0x2380] sm:$0xff]  ;;  %v1368_v57 = vld [vmem:[%s10398_s7 + $0x2388] sm:$0xff]  ;;  %1365 = vst [vmem:[%s10406_s8 + $0x11b8] sm:$0xff] %v1364_v55 }
 0x12c   : > { %1367 = vst [vmem:[%s10406_s8 + $0x11c0] sm:$0xff] %v1366_v56  ;;  %1369 = vst [vmem:[%s10406_s8 + $0x11c8] sm:$0xff] %v1368_v57  ;;  %v1370_v58 = vld [vmem:[%s10398_s7 + $0x23a0] sm:$0xff]  ;;  %v1372_v59 = vld [vmem:[%s10398_s7 + $0x23a8] sm:$0xff] }
 0x12d   : > { %v1374_v60 = vld [vmem:[%s10398_s7 + $0x23c0] sm:$0xff]  ;;  %1371 = vst [vmem:[%s10406_s8 + $0x11d0] sm:$0xff] %v1370_v58  ;;  %1373 = vst [vmem:[%s10406_s8 + $0x11d8] sm:$0xff] %v1372_v59  ;;  %v1376_v61 = vld [vmem:[%s10398_s7 + $0x23c8] sm:$0xff] }
 0x12e   : > { %1375 = vst [vmem:[%s10406_s8 + $0x11e0] sm:$0xff] %v1374_v60  ;;  %v1378_v62 = vld [vmem:[%s10398_s7 + $0x23e0] sm:$0xff]  ;;  %v1380_v63 = vld [vmem:[%s10398_s7 + $0x23e8] sm:$0xff]  ;;  %1377 = vst [vmem:[%s10406_s8 + $0x11e8] sm:$0xff] %v1376_v61 }
 0x12f   : > { %1379 = vst [vmem:[%s10406_s8 + $0x11f0] sm:$0xff] %v1378_v62  ;;  %1381 = vst [vmem:[%s10406_s8 + $0x11f8] sm:$0xff] %v1380_v63  ;;  %v1382_v0 = vld [vmem:[%s10398_s7 + $0x2400] sm:$0xff]  ;;  %v1384_v1 = vld [vmem:[%s10398_s7 + $0x2408] sm:$0xff] }
 0x130   : > { %v1386_v2 = vld [vmem:[%s10398_s7 + $0x2420] sm:$0xff]  ;;  %1383 = vst [vmem:[%s10406_s8 + $0x1200] sm:$0xff] %v1382_v0  ;;  %1385 = vst [vmem:[%s10406_s8 + $0x1208] sm:$0xff] %v1384_v1  ;;  %v1388_v3 = vld [vmem:[%s10398_s7 + $0x2428] sm:$0xff] }
 0x131   : > { %1387 = vst [vmem:[%s10406_s8 + $0x1210] sm:$0xff] %v1386_v2  ;;  %v1390_v4 = vld [vmem:[%s10398_s7 + $0x2440] sm:$0xff]  ;;  %v1392_v5 = vld [vmem:[%s10398_s7 + $0x2448] sm:$0xff]  ;;  %1389 = vst [vmem:[%s10406_s8 + $0x1218] sm:$0xff] %v1388_v3 }
 0x132   : > { %1391 = vst [vmem:[%s10406_s8 + $0x1220] sm:$0xff] %v1390_v4  ;;  %1393 = vst [vmem:[%s10406_s8 + $0x1228] sm:$0xff] %v1392_v5  ;;  %v1394_v6 = vld [vmem:[%s10398_s7 + $0x2460] sm:$0xff]  ;;  %v1396_v7 = vld [vmem:[%s10398_s7 + $0x2468] sm:$0xff] }
 0x133   : > { %v1398_v8 = vld [vmem:[%s10398_s7 + $0x2480] sm:$0xff]  ;;  %1395 = vst [vmem:[%s10406_s8 + $0x1230] sm:$0xff] %v1394_v6  ;;  %1397 = vst [vmem:[%s10406_s8 + $0x1238] sm:$0xff] %v1396_v7  ;;  %v1400_v9 = vld [vmem:[%s10398_s7 + $0x2488] sm:$0xff] }
 0x134   : > { %1399 = vst [vmem:[%s10406_s8 + $0x1240] sm:$0xff] %v1398_v8  ;;  %v1402_v10 = vld [vmem:[%s10398_s7 + $0x24a0] sm:$0xff]  ;;  %v1404_v11 = vld [vmem:[%s10398_s7 + $0x24a8] sm:$0xff]  ;;  %1401 = vst [vmem:[%s10406_s8 + $0x1248] sm:$0xff] %v1400_v9 }
 0x135   : > { %1403 = vst [vmem:[%s10406_s8 + $0x1250] sm:$0xff] %v1402_v10  ;;  %1405 = vst [vmem:[%s10406_s8 + $0x1258] sm:$0xff] %v1404_v11  ;;  %v1406_v12 = vld [vmem:[%s10398_s7 + $0x24c0] sm:$0xff]  ;;  %v1408_v13 = vld [vmem:[%s10398_s7 + $0x24c8] sm:$0xff] }
 0x136   : > { %v1410_v14 = vld [vmem:[%s10398_s7 + $0x24e0] sm:$0xff]  ;;  %1407 = vst [vmem:[%s10406_s8 + $0x1260] sm:$0xff] %v1406_v12  ;;  %1409 = vst [vmem:[%s10406_s8 + $0x1268] sm:$0xff] %v1408_v13  ;;  %v1412_v15 = vld [vmem:[%s10398_s7 + $0x24e8] sm:$0xff] }
 0x137   : > { %1411 = vst [vmem:[%s10406_s8 + $0x1270] sm:$0xff] %v1410_v14  ;;  %v1414_v16 = vld [vmem:[%s10398_s7 + $0x2500] sm:$0xff]  ;;  %v1416_v17 = vld [vmem:[%s10398_s7 + $0x2508] sm:$0xff]  ;;  %1413 = vst [vmem:[%s10406_s8 + $0x1278] sm:$0xff] %v1412_v15 }
 0x138   : > { %1415 = vst [vmem:[%s10406_s8 + $0x1280] sm:$0xff] %v1414_v16  ;;  %1417 = vst [vmem:[%s10406_s8 + $0x1288] sm:$0xff] %v1416_v17  ;;  %v1418_v18 = vld [vmem:[%s10398_s7 + $0x2520] sm:$0xff]  ;;  %v1420_v19 = vld [vmem:[%s10398_s7 + $0x2528] sm:$0xff] }
 0x139   : > { %v1422_v20 = vld [vmem:[%s10398_s7 + $0x2540] sm:$0xff]  ;;  %1419 = vst [vmem:[%s10406_s8 + $0x1290] sm:$0xff] %v1418_v18  ;;  %1421 = vst [vmem:[%s10406_s8 + $0x1298] sm:$0xff] %v1420_v19  ;;  %v1424_v21 = vld [vmem:[%s10398_s7 + $0x2548] sm:$0xff] }
 0x13a   : > { %1423 = vst [vmem:[%s10406_s8 + $0x12a0] sm:$0xff] %v1422_v20  ;;  %v1426_v22 = vld [vmem:[%s10398_s7 + $0x2560] sm:$0xff]  ;;  %v1428_v23 = vld [vmem:[%s10398_s7 + $0x2568] sm:$0xff]  ;;  %1425 = vst [vmem:[%s10406_s8 + $0x12a8] sm:$0xff] %v1424_v21 }
 0x13b   : > { %1427 = vst [vmem:[%s10406_s8 + $0x12b0] sm:$0xff] %v1426_v22  ;;  %1429 = vst [vmem:[%s10406_s8 + $0x12b8] sm:$0xff] %v1428_v23  ;;  %v1430_v24 = vld [vmem:[%s10398_s7 + $0x2580] sm:$0xff]  ;;  %v1432_v25 = vld [vmem:[%s10398_s7 + $0x2588] sm:$0xff] }
 0x13c   : > { %v1434_v26 = vld [vmem:[%s10398_s7 + $0x25a0] sm:$0xff]  ;;  %1431 = vst [vmem:[%s10406_s8 + $0x12c0] sm:$0xff] %v1430_v24  ;;  %1433 = vst [vmem:[%s10406_s8 + $0x12c8] sm:$0xff] %v1432_v25  ;;  %v1436_v27 = vld [vmem:[%s10398_s7 + $0x25a8] sm:$0xff] }
 0x13d   : > { %1435 = vst [vmem:[%s10406_s8 + $0x12d0] sm:$0xff] %v1434_v26  ;;  %v1438_v28 = vld [vmem:[%s10398_s7 + $0x25c0] sm:$0xff]  ;;  %v1440_v29 = vld [vmem:[%s10398_s7 + $0x25c8] sm:$0xff]  ;;  %1437 = vst [vmem:[%s10406_s8 + $0x12d8] sm:$0xff] %v1436_v27 }
 0x13e   : > { %1439 = vst [vmem:[%s10406_s8 + $0x12e0] sm:$0xff] %v1438_v28  ;;  %1441 = vst [vmem:[%s10406_s8 + $0x12e8] sm:$0xff] %v1440_v29  ;;  %v1442_v30 = vld [vmem:[%s10398_s7 + $0x25e0] sm:$0xff]  ;;  %v1444_v31 = vld [vmem:[%s10398_s7 + $0x25e8] sm:$0xff] }
 0x13f   : > { %v1446_v32 = vld [vmem:[%s10398_s7 + $0x2600] sm:$0xff]  ;;  %1443 = vst [vmem:[%s10406_s8 + $0x12f0] sm:$0xff] %v1442_v30  ;;  %1445 = vst [vmem:[%s10406_s8 + $0x12f8] sm:$0xff] %v1444_v31  ;;  %v1448_v33 = vld [vmem:[%s10398_s7 + $0x2608] sm:$0xff] }
 0x140   : > { %1447 = vst [vmem:[%s10406_s8 + $0x1300] sm:$0xff] %v1446_v32  ;;  %v1450_v34 = vld [vmem:[%s10398_s7 + $0x2620] sm:$0xff]  ;;  %v1452_v35 = vld [vmem:[%s10398_s7 + $0x2628] sm:$0xff]  ;;  %1449 = vst [vmem:[%s10406_s8 + $0x1308] sm:$0xff] %v1448_v33 }
 0x141   : > { %1451 = vst [vmem:[%s10406_s8 + $0x1310] sm:$0xff] %v1450_v34  ;;  %1453 = vst [vmem:[%s10406_s8 + $0x1318] sm:$0xff] %v1452_v35  ;;  %v1454_v36 = vld [vmem:[%s10398_s7 + $0x2640] sm:$0xff]  ;;  %v1456_v37 = vld [vmem:[%s10398_s7 + $0x2648] sm:$0xff] }
 0x142   : > { %v1458_v38 = vld [vmem:[%s10398_s7 + $0x2660] sm:$0xff]  ;;  %1455 = vst [vmem:[%s10406_s8 + $0x1320] sm:$0xff] %v1454_v36  ;;  %1457 = vst [vmem:[%s10406_s8 + $0x1328] sm:$0xff] %v1456_v37  ;;  %v1460_v39 = vld [vmem:[%s10398_s7 + $0x2668] sm:$0xff] }
 0x143   : > { %1459 = vst [vmem:[%s10406_s8 + $0x1330] sm:$0xff] %v1458_v38  ;;  %v1462_v40 = vld [vmem:[%s10398_s7 + $0x2680] sm:$0xff]  ;;  %v1464_v41 = vld [vmem:[%s10398_s7 + $0x2688] sm:$0xff]  ;;  %1461 = vst [vmem:[%s10406_s8 + $0x1338] sm:$0xff] %v1460_v39 }
 0x144   : > { %1463 = vst [vmem:[%s10406_s8 + $0x1340] sm:$0xff] %v1462_v40  ;;  %1465 = vst [vmem:[%s10406_s8 + $0x1348] sm:$0xff] %v1464_v41  ;;  %v1466_v42 = vld [vmem:[%s10398_s7 + $0x26a0] sm:$0xff]  ;;  %v1468_v43 = vld [vmem:[%s10398_s7 + $0x26a8] sm:$0xff] }
 0x145   : > { %v1470_v44 = vld [vmem:[%s10398_s7 + $0x26c0] sm:$0xff]  ;;  %1467 = vst [vmem:[%s10406_s8 + $0x1350] sm:$0xff] %v1466_v42  ;;  %1469 = vst [vmem:[%s10406_s8 + $0x1358] sm:$0xff] %v1468_v43  ;;  %v1472_v45 = vld [vmem:[%s10398_s7 + $0x26c8] sm:$0xff] }
 0x146   : > { %1471 = vst [vmem:[%s10406_s8 + $0x1360] sm:$0xff] %v1470_v44  ;;  %v1474_v46 = vld [vmem:[%s10398_s7 + $0x26e0] sm:$0xff]  ;;  %v1476_v47 = vld [vmem:[%s10398_s7 + $0x26e8] sm:$0xff]  ;;  %1473 = vst [vmem:[%s10406_s8 + $0x1368] sm:$0xff] %v1472_v45 }
 0x147   : > { %1475 = vst [vmem:[%s10406_s8 + $0x1370] sm:$0xff] %v1474_v46  ;;  %1477 = vst [vmem:[%s10406_s8 + $0x1378] sm:$0xff] %v1476_v47  ;;  %v1478_v48 = vld [vmem:[%s10398_s7 + $0x2700] sm:$0xff]  ;;  %v1480_v49 = vld [vmem:[%s10398_s7 + $0x2708] sm:$0xff] }
 0x148   : > { %v1482_v50 = vld [vmem:[%s10398_s7 + $0x2720] sm:$0xff]  ;;  %1479 = vst [vmem:[%s10406_s8 + $0x1380] sm:$0xff] %v1478_v48  ;;  %1481 = vst [vmem:[%s10406_s8 + $0x1388] sm:$0xff] %v1480_v49  ;;  %v1484_v51 = vld [vmem:[%s10398_s7 + $0x2728] sm:$0xff] }
 0x149   : > { %1483 = vst [vmem:[%s10406_s8 + $0x1390] sm:$0xff] %v1482_v50  ;;  %v1486_v52 = vld [vmem:[%s10398_s7 + $0x2740] sm:$0xff]  ;;  %v1488_v53 = vld [vmem:[%s10398_s7 + $0x2748] sm:$0xff]  ;;  %1485 = vst [vmem:[%s10406_s8 + $0x1398] sm:$0xff] %v1484_v51 }
 0x14a   : > { %1487 = vst [vmem:[%s10406_s8 + $0x13a0] sm:$0xff] %v1486_v52  ;;  %1489 = vst [vmem:[%s10406_s8 + $0x13a8] sm:$0xff] %v1488_v53  ;;  %v1490_v54 = vld [vmem:[%s10398_s7 + $0x2760] sm:$0xff]  ;;  %v1492_v55 = vld [vmem:[%s10398_s7 + $0x2768] sm:$0xff] }
 0x14b   : > { %v1494_v56 = vld [vmem:[%s10398_s7 + $0x2780] sm:$0xff]  ;;  %1491 = vst [vmem:[%s10406_s8 + $0x13b0] sm:$0xff] %v1490_v54  ;;  %1493 = vst [vmem:[%s10406_s8 + $0x13b8] sm:$0xff] %v1492_v55  ;;  %v1496_v57 = vld [vmem:[%s10398_s7 + $0x2788] sm:$0xff] }
 0x14c   : > { %1495 = vst [vmem:[%s10406_s8 + $0x13c0] sm:$0xff] %v1494_v56  ;;  %v1498_v58 = vld [vmem:[%s10398_s7 + $0x27a0] sm:$0xff]  ;;  %v1500_v59 = vld [vmem:[%s10398_s7 + $0x27a8] sm:$0xff]  ;;  %1497 = vst [vmem:[%s10406_s8 + $0x13c8] sm:$0xff] %v1496_v57 }
 0x14d   : > { %1499 = vst [vmem:[%s10406_s8 + $0x13d0] sm:$0xff] %v1498_v58  ;;  %1501 = vst [vmem:[%s10406_s8 + $0x13d8] sm:$0xff] %v1500_v59  ;;  %v1502_v60 = vld [vmem:[%s10398_s7 + $0x27c0] sm:$0xff]  ;;  %v1504_v61 = vld [vmem:[%s10398_s7 + $0x27c8] sm:$0xff] }
 0x14e   : > { %v1506_v62 = vld [vmem:[%s10398_s7 + $0x27e0] sm:$0xff]  ;;  %1503 = vst [vmem:[%s10406_s8 + $0x13e0] sm:$0xff] %v1502_v60  ;;  %1505 = vst [vmem:[%s10406_s8 + $0x13e8] sm:$0xff] %v1504_v61  ;;  %v1508_v63 = vld [vmem:[%s10398_s7 + $0x27e8] sm:$0xff] }
 0x14f   : > { %1507 = vst [vmem:[%s10406_s8 + $0x13f0] sm:$0xff] %v1506_v62  ;;  %v1510_v0 = vld [vmem:[%s10398_s7 + $0x2800] sm:$0xff]  ;;  %v1512_v1 = vld [vmem:[%s10398_s7 + $0x2808] sm:$0xff]  ;;  %1509 = vst [vmem:[%s10406_s8 + $0x13f8] sm:$0xff] %v1508_v63 }
 0x150   : > { %1511 = vst [vmem:[%s10406_s8 + $0x1400] sm:$0xff] %v1510_v0  ;;  %1513 = vst [vmem:[%s10406_s8 + $0x1408] sm:$0xff] %v1512_v1  ;;  %v1514_v2 = vld [vmem:[%s10398_s7 + $0x2820] sm:$0xff]  ;;  %v1516_v3 = vld [vmem:[%s10398_s7 + $0x2828] sm:$0xff] }
 0x151   : > { %v1518_v4 = vld [vmem:[%s10398_s7 + $0x2840] sm:$0xff]  ;;  %1515 = vst [vmem:[%s10406_s8 + $0x1410] sm:$0xff] %v1514_v2  ;;  %1517 = vst [vmem:[%s10406_s8 + $0x1418] sm:$0xff] %v1516_v3  ;;  %v1520_v5 = vld [vmem:[%s10398_s7 + $0x2848] sm:$0xff] }
 0x152   : > { %1519 = vst [vmem:[%s10406_s8 + $0x1420] sm:$0xff] %v1518_v4  ;;  %v1522_v6 = vld [vmem:[%s10398_s7 + $0x2860] sm:$0xff]  ;;  %v1524_v7 = vld [vmem:[%s10398_s7 + $0x2868] sm:$0xff]  ;;  %1521 = vst [vmem:[%s10406_s8 + $0x1428] sm:$0xff] %v1520_v5 }
 0x153   : > { %1523 = vst [vmem:[%s10406_s8 + $0x1430] sm:$0xff] %v1522_v6  ;;  %1525 = vst [vmem:[%s10406_s8 + $0x1438] sm:$0xff] %v1524_v7  ;;  %v1526_v8 = vld [vmem:[%s10398_s7 + $0x2880] sm:$0xff]  ;;  %v1528_v9 = vld [vmem:[%s10398_s7 + $0x2888] sm:$0xff] }
 0x154   : > { %v1530_v10 = vld [vmem:[%s10398_s7 + $0x28a0] sm:$0xff]  ;;  %1527 = vst [vmem:[%s10406_s8 + $0x1440] sm:$0xff] %v1526_v8  ;;  %1529 = vst [vmem:[%s10406_s8 + $0x1448] sm:$0xff] %v1528_v9  ;;  %v1532_v11 = vld [vmem:[%s10398_s7 + $0x28a8] sm:$0xff] }
 0x155   : > { %1531 = vst [vmem:[%s10406_s8 + $0x1450] sm:$0xff] %v1530_v10  ;;  %v1534_v12 = vld [vmem:[%s10398_s7 + $0x28c0] sm:$0xff]  ;;  %v1536_v13 = vld [vmem:[%s10398_s7 + $0x28c8] sm:$0xff]  ;;  %1533 = vst [vmem:[%s10406_s8 + $0x1458] sm:$0xff] %v1532_v11 }
 0x156   : > { %1535 = vst [vmem:[%s10406_s8 + $0x1460] sm:$0xff] %v1534_v12  ;;  %1537 = vst [vmem:[%s10406_s8 + $0x1468] sm:$0xff] %v1536_v13  ;;  %v1538_v14 = vld [vmem:[%s10398_s7 + $0x28e0] sm:$0xff]  ;;  %v1540_v15 = vld [vmem:[%s10398_s7 + $0x28e8] sm:$0xff] }
 0x157   : > { %v1542_v16 = vld [vmem:[%s10398_s7 + $0x2900] sm:$0xff]  ;;  %1539 = vst [vmem:[%s10406_s8 + $0x1470] sm:$0xff] %v1538_v14  ;;  %1541 = vst [vmem:[%s10406_s8 + $0x1478] sm:$0xff] %v1540_v15  ;;  %v1544_v17 = vld [vmem:[%s10398_s7 + $0x2908] sm:$0xff] }
 0x158   : > { %1543 = vst [vmem:[%s10406_s8 + $0x1480] sm:$0xff] %v1542_v16  ;;  %v1546_v18 = vld [vmem:[%s10398_s7 + $0x2920] sm:$0xff]  ;;  %v1548_v19 = vld [vmem:[%s10398_s7 + $0x2928] sm:$0xff]  ;;  %1545 = vst [vmem:[%s10406_s8 + $0x1488] sm:$0xff] %v1544_v17 }
 0x159   : > { %1547 = vst [vmem:[%s10406_s8 + $0x1490] sm:$0xff] %v1546_v18  ;;  %1549 = vst [vmem:[%s10406_s8 + $0x1498] sm:$0xff] %v1548_v19  ;;  %v1550_v20 = vld [vmem:[%s10398_s7 + $0x2940] sm:$0xff]  ;;  %v1552_v21 = vld [vmem:[%s10398_s7 + $0x2948] sm:$0xff] }
 0x15a   : > { %v1554_v22 = vld [vmem:[%s10398_s7 + $0x2960] sm:$0xff]  ;;  %1551 = vst [vmem:[%s10406_s8 + $0x14a0] sm:$0xff] %v1550_v20  ;;  %1553 = vst [vmem:[%s10406_s8 + $0x14a8] sm:$0xff] %v1552_v21  ;;  %v1556_v23 = vld [vmem:[%s10398_s7 + $0x2968] sm:$0xff] }
 0x15b   : > { %1555 = vst [vmem:[%s10406_s8 + $0x14b0] sm:$0xff] %v1554_v22  ;;  %v1558_v24 = vld [vmem:[%s10398_s7 + $0x2980] sm:$0xff]  ;;  %v1560_v25 = vld [vmem:[%s10398_s7 + $0x2988] sm:$0xff]  ;;  %1557 = vst [vmem:[%s10406_s8 + $0x14b8] sm:$0xff] %v1556_v23 }
 0x15c   : > { %1559 = vst [vmem:[%s10406_s8 + $0x14c0] sm:$0xff] %v1558_v24  ;;  %1561 = vst [vmem:[%s10406_s8 + $0x14c8] sm:$0xff] %v1560_v25  ;;  %v1562_v26 = vld [vmem:[%s10398_s7 + $0x29a0] sm:$0xff]  ;;  %v1564_v27 = vld [vmem:[%s10398_s7 + $0x29a8] sm:$0xff] }
 0x15d   : > { %v1566_v28 = vld [vmem:[%s10398_s7 + $0x29c0] sm:$0xff]  ;;  %1563 = vst [vmem:[%s10406_s8 + $0x14d0] sm:$0xff] %v1562_v26  ;;  %1565 = vst [vmem:[%s10406_s8 + $0x14d8] sm:$0xff] %v1564_v27  ;;  %v1568_v29 = vld [vmem:[%s10398_s7 + $0x29c8] sm:$0xff] }
 0x15e   : > { %1567 = vst [vmem:[%s10406_s8 + $0x14e0] sm:$0xff] %v1566_v28  ;;  %v1570_v30 = vld [vmem:[%s10398_s7 + $0x29e0] sm:$0xff]  ;;  %v1572_v31 = vld [vmem:[%s10398_s7 + $0x29e8] sm:$0xff]  ;;  %1569 = vst [vmem:[%s10406_s8 + $0x14e8] sm:$0xff] %v1568_v29 }
 0x15f   : > { %1571 = vst [vmem:[%s10406_s8 + $0x14f0] sm:$0xff] %v1570_v30  ;;  %1573 = vst [vmem:[%s10406_s8 + $0x14f8] sm:$0xff] %v1572_v31  ;;  %v1574_v32 = vld [vmem:[%s10398_s7 + $0x2a00] sm:$0xff]  ;;  %v1576_v33 = vld [vmem:[%s10398_s7 + $0x2a08] sm:$0xff] }
 0x160   : > { %v1578_v34 = vld [vmem:[%s10398_s7 + $0x2a20] sm:$0xff]  ;;  %1575 = vst [vmem:[%s10406_s8 + $0x1500] sm:$0xff] %v1574_v32  ;;  %1577 = vst [vmem:[%s10406_s8 + $0x1508] sm:$0xff] %v1576_v33  ;;  %v1580_v35 = vld [vmem:[%s10398_s7 + $0x2a28] sm:$0xff] }
 0x161   : > { %1579 = vst [vmem:[%s10406_s8 + $0x1510] sm:$0xff] %v1578_v34  ;;  %v1582_v36 = vld [vmem:[%s10398_s7 + $0x2a40] sm:$0xff]  ;;  %v1584_v37 = vld [vmem:[%s10398_s7 + $0x2a48] sm:$0xff]  ;;  %1581 = vst [vmem:[%s10406_s8 + $0x1518] sm:$0xff] %v1580_v35 }
 0x162   : > { %1583 = vst [vmem:[%s10406_s8 + $0x1520] sm:$0xff] %v1582_v36  ;;  %1585 = vst [vmem:[%s10406_s8 + $0x1528] sm:$0xff] %v1584_v37  ;;  %v1586_v38 = vld [vmem:[%s10398_s7 + $0x2a60] sm:$0xff]  ;;  %v1588_v39 = vld [vmem:[%s10398_s7 + $0x2a68] sm:$0xff] }
 0x163   : > { %v1590_v40 = vld [vmem:[%s10398_s7 + $0x2a80] sm:$0xff]  ;;  %1587 = vst [vmem:[%s10406_s8 + $0x1530] sm:$0xff] %v1586_v38  ;;  %1589 = vst [vmem:[%s10406_s8 + $0x1538] sm:$0xff] %v1588_v39  ;;  %v1592_v41 = vld [vmem:[%s10398_s7 + $0x2a88] sm:$0xff] }
 0x164   : > { %1591 = vst [vmem:[%s10406_s8 + $0x1540] sm:$0xff] %v1590_v40  ;;  %v1594_v42 = vld [vmem:[%s10398_s7 + $0x2aa0] sm:$0xff]  ;;  %v1596_v43 = vld [vmem:[%s10398_s7 + $0x2aa8] sm:$0xff]  ;;  %1593 = vst [vmem:[%s10406_s8 + $0x1548] sm:$0xff] %v1592_v41 }
 0x165   : > { %1595 = vst [vmem:[%s10406_s8 + $0x1550] sm:$0xff] %v1594_v42  ;;  %1597 = vst [vmem:[%s10406_s8 + $0x1558] sm:$0xff] %v1596_v43  ;;  %v1598_v44 = vld [vmem:[%s10398_s7 + $0x2ac0] sm:$0xff]  ;;  %v1600_v45 = vld [vmem:[%s10398_s7 + $0x2ac8] sm:$0xff] }
 0x166   : > { %v1602_v46 = vld [vmem:[%s10398_s7 + $0x2ae0] sm:$0xff]  ;;  %1599 = vst [vmem:[%s10406_s8 + $0x1560] sm:$0xff] %v1598_v44  ;;  %1601 = vst [vmem:[%s10406_s8 + $0x1568] sm:$0xff] %v1600_v45  ;;  %v1604_v47 = vld [vmem:[%s10398_s7 + $0x2ae8] sm:$0xff] }
 0x167   : > { %1603 = vst [vmem:[%s10406_s8 + $0x1570] sm:$0xff] %v1602_v46  ;;  %v1606_v48 = vld [vmem:[%s10398_s7 + $0x2b00] sm:$0xff]  ;;  %v1608_v49 = vld [vmem:[%s10398_s7 + $0x2b08] sm:$0xff]  ;;  %1605 = vst [vmem:[%s10406_s8 + $0x1578] sm:$0xff] %v1604_v47 }
 0x168   : > { %1607 = vst [vmem:[%s10406_s8 + $0x1580] sm:$0xff] %v1606_v48  ;;  %1609 = vst [vmem:[%s10406_s8 + $0x1588] sm:$0xff] %v1608_v49  ;;  %v1610_v50 = vld [vmem:[%s10398_s7 + $0x2b20] sm:$0xff]  ;;  %v1612_v51 = vld [vmem:[%s10398_s7 + $0x2b28] sm:$0xff] }
 0x169   : > { %v1614_v52 = vld [vmem:[%s10398_s7 + $0x2b40] sm:$0xff]  ;;  %1611 = vst [vmem:[%s10406_s8 + $0x1590] sm:$0xff] %v1610_v50  ;;  %1613 = vst [vmem:[%s10406_s8 + $0x1598] sm:$0xff] %v1612_v51  ;;  %v1616_v53 = vld [vmem:[%s10398_s7 + $0x2b48] sm:$0xff] }
 0x16a   : > { %1615 = vst [vmem:[%s10406_s8 + $0x15a0] sm:$0xff] %v1614_v52  ;;  %v1618_v54 = vld [vmem:[%s10398_s7 + $0x2b60] sm:$0xff]  ;;  %v1620_v55 = vld [vmem:[%s10398_s7 + $0x2b68] sm:$0xff]  ;;  %1617 = vst [vmem:[%s10406_s8 + $0x15a8] sm:$0xff] %v1616_v53 }
 0x16b   : > { %1619 = vst [vmem:[%s10406_s8 + $0x15b0] sm:$0xff] %v1618_v54  ;;  %1621 = vst [vmem:[%s10406_s8 + $0x15b8] sm:$0xff] %v1620_v55  ;;  %v1622_v56 = vld [vmem:[%s10398_s7 + $0x2b80] sm:$0xff]  ;;  %v1624_v57 = vld [vmem:[%s10398_s7 + $0x2b88] sm:$0xff] }
 0x16c   : > { %v1626_v58 = vld [vmem:[%s10398_s7 + $0x2ba0] sm:$0xff]  ;;  %1623 = vst [vmem:[%s10406_s8 + $0x15c0] sm:$0xff] %v1622_v56  ;;  %1625 = vst [vmem:[%s10406_s8 + $0x15c8] sm:$0xff] %v1624_v57  ;;  %v1628_v59 = vld [vmem:[%s10398_s7 + $0x2ba8] sm:$0xff] }
 0x16d   : > { %1627 = vst [vmem:[%s10406_s8 + $0x15d0] sm:$0xff] %v1626_v58  ;;  %v1630_v60 = vld [vmem:[%s10398_s7 + $0x2bc0] sm:$0xff]  ;;  %v1632_v61 = vld [vmem:[%s10398_s7 + $0x2bc8] sm:$0xff]  ;;  %1629 = vst [vmem:[%s10406_s8 + $0x15d8] sm:$0xff] %v1628_v59 }
 0x16e   : > { %1631 = vst [vmem:[%s10406_s8 + $0x15e0] sm:$0xff] %v1630_v60  ;;  %1633 = vst [vmem:[%s10406_s8 + $0x15e8] sm:$0xff] %v1632_v61  ;;  %v1634_v62 = vld [vmem:[%s10398_s7 + $0x2be0] sm:$0xff]  ;;  %v1636_v63 = vld [vmem:[%s10398_s7 + $0x2be8] sm:$0xff] }
 0x16f   : > { %v1638_v0 = vld [vmem:[%s10398_s7 + $0x2c00] sm:$0xff]  ;;  %1635 = vst [vmem:[%s10406_s8 + $0x15f0] sm:$0xff] %v1634_v62  ;;  %1637 = vst [vmem:[%s10406_s8 + $0x15f8] sm:$0xff] %v1636_v63  ;;  %v1640_v1 = vld [vmem:[%s10398_s7 + $0x2c08] sm:$0xff] }
 0x170   : > { %1639 = vst [vmem:[%s10406_s8 + $0x1600] sm:$0xff] %v1638_v0  ;;  %v1642_v2 = vld [vmem:[%s10398_s7 + $0x2c20] sm:$0xff]  ;;  %v1644_v3 = vld [vmem:[%s10398_s7 + $0x2c28] sm:$0xff]  ;;  %1641 = vst [vmem:[%s10406_s8 + $0x1608] sm:$0xff] %v1640_v1 }
 0x171   : > { %1643 = vst [vmem:[%s10406_s8 + $0x1610] sm:$0xff] %v1642_v2  ;;  %1645 = vst [vmem:[%s10406_s8 + $0x1618] sm:$0xff] %v1644_v3  ;;  %v1646_v4 = vld [vmem:[%s10398_s7 + $0x2c40] sm:$0xff]  ;;  %v1648_v5 = vld [vmem:[%s10398_s7 + $0x2c48] sm:$0xff] }
 0x172   : > { %v1650_v6 = vld [vmem:[%s10398_s7 + $0x2c60] sm:$0xff]  ;;  %1647 = vst [vmem:[%s10406_s8 + $0x1620] sm:$0xff] %v1646_v4  ;;  %1649 = vst [vmem:[%s10406_s8 + $0x1628] sm:$0xff] %v1648_v5  ;;  %v1652_v7 = vld [vmem:[%s10398_s7 + $0x2c68] sm:$0xff] }
 0x173   : > { %1651 = vst [vmem:[%s10406_s8 + $0x1630] sm:$0xff] %v1650_v6  ;;  %v1654_v8 = vld [vmem:[%s10398_s7 + $0x2c80] sm:$0xff]  ;;  %v1656_v9 = vld [vmem:[%s10398_s7 + $0x2c88] sm:$0xff]  ;;  %1653 = vst [vmem:[%s10406_s8 + $0x1638] sm:$0xff] %v1652_v7 }
 0x174   : > { %1655 = vst [vmem:[%s10406_s8 + $0x1640] sm:$0xff] %v1654_v8  ;;  %1657 = vst [vmem:[%s10406_s8 + $0x1648] sm:$0xff] %v1656_v9  ;;  %v1658_v10 = vld [vmem:[%s10398_s7 + $0x2ca0] sm:$0xff]  ;;  %v1660_v11 = vld [vmem:[%s10398_s7 + $0x2ca8] sm:$0xff] }
 0x175   : > { %v1662_v12 = vld [vmem:[%s10398_s7 + $0x2cc0] sm:$0xff]  ;;  %1659 = vst [vmem:[%s10406_s8 + $0x1650] sm:$0xff] %v1658_v10  ;;  %1661 = vst [vmem:[%s10406_s8 + $0x1658] sm:$0xff] %v1660_v11  ;;  %v1664_v13 = vld [vmem:[%s10398_s7 + $0x2cc8] sm:$0xff] }
 0x176   : > { %1663 = vst [vmem:[%s10406_s8 + $0x1660] sm:$0xff] %v1662_v12  ;;  %v1666_v14 = vld [vmem:[%s10398_s7 + $0x2ce0] sm:$0xff]  ;;  %v1668_v15 = vld [vmem:[%s10398_s7 + $0x2ce8] sm:$0xff]  ;;  %1665 = vst [vmem:[%s10406_s8 + $0x1668] sm:$0xff] %v1664_v13 }
 0x177   : > { %1667 = vst [vmem:[%s10406_s8 + $0x1670] sm:$0xff] %v1666_v14  ;;  %1669 = vst [vmem:[%s10406_s8 + $0x1678] sm:$0xff] %v1668_v15  ;;  %v1670_v16 = vld [vmem:[%s10398_s7 + $0x2d00] sm:$0xff]  ;;  %v1672_v17 = vld [vmem:[%s10398_s7 + $0x2d08] sm:$0xff] }
 0x178   : > { %v1674_v18 = vld [vmem:[%s10398_s7 + $0x2d20] sm:$0xff]  ;;  %1671 = vst [vmem:[%s10406_s8 + $0x1680] sm:$0xff] %v1670_v16  ;;  %1673 = vst [vmem:[%s10406_s8 + $0x1688] sm:$0xff] %v1672_v17  ;;  %v1676_v19 = vld [vmem:[%s10398_s7 + $0x2d28] sm:$0xff] }
 0x179   : > { %1675 = vst [vmem:[%s10406_s8 + $0x1690] sm:$0xff] %v1674_v18  ;;  %v1678_v20 = vld [vmem:[%s10398_s7 + $0x2d40] sm:$0xff]  ;;  %v1680_v21 = vld [vmem:[%s10398_s7 + $0x2d48] sm:$0xff]  ;;  %1677 = vst [vmem:[%s10406_s8 + $0x1698] sm:$0xff] %v1676_v19 }
 0x17a   : > { %1679 = vst [vmem:[%s10406_s8 + $0x16a0] sm:$0xff] %v1678_v20  ;;  %1681 = vst [vmem:[%s10406_s8 + $0x16a8] sm:$0xff] %v1680_v21  ;;  %v1682_v22 = vld [vmem:[%s10398_s7 + $0x2d60] sm:$0xff]  ;;  %v1684_v23 = vld [vmem:[%s10398_s7 + $0x2d68] sm:$0xff] }
 0x17b   : > { %v1686_v24 = vld [vmem:[%s10398_s7 + $0x2d80] sm:$0xff]  ;;  %1683 = vst [vmem:[%s10406_s8 + $0x16b0] sm:$0xff] %v1682_v22  ;;  %1685 = vst [vmem:[%s10406_s8 + $0x16b8] sm:$0xff] %v1684_v23  ;;  %v1688_v25 = vld [vmem:[%s10398_s7 + $0x2d88] sm:$0xff] }
 0x17c   : > { %1687 = vst [vmem:[%s10406_s8 + $0x16c0] sm:$0xff] %v1686_v24  ;;  %v1690_v26 = vld [vmem:[%s10398_s7 + $0x2da0] sm:$0xff]  ;;  %v1692_v27 = vld [vmem:[%s10398_s7 + $0x2da8] sm:$0xff]  ;;  %1689 = vst [vmem:[%s10406_s8 + $0x16c8] sm:$0xff] %v1688_v25 }
 0x17d   : > { %1691 = vst [vmem:[%s10406_s8 + $0x16d0] sm:$0xff] %v1690_v26  ;;  %1693 = vst [vmem:[%s10406_s8 + $0x16d8] sm:$0xff] %v1692_v27  ;;  %v1694_v28 = vld [vmem:[%s10398_s7 + $0x2dc0] sm:$0xff]  ;;  %v1696_v29 = vld [vmem:[%s10398_s7 + $0x2dc8] sm:$0xff] }
 0x17e   : > { %v1698_v30 = vld [vmem:[%s10398_s7 + $0x2de0] sm:$0xff]  ;;  %1695 = vst [vmem:[%s10406_s8 + $0x16e0] sm:$0xff] %v1694_v28  ;;  %1697 = vst [vmem:[%s10406_s8 + $0x16e8] sm:$0xff] %v1696_v29  ;;  %v1700_v31 = vld [vmem:[%s10398_s7 + $0x2de8] sm:$0xff] }
 0x17f   : > { %1699 = vst [vmem:[%s10406_s8 + $0x16f0] sm:$0xff] %v1698_v30  ;;  %v1702_v32 = vld [vmem:[%s10398_s7 + $0x2e00] sm:$0xff]  ;;  %v1704_v33 = vld [vmem:[%s10398_s7 + $0x2e08] sm:$0xff]  ;;  %1701 = vst [vmem:[%s10406_s8 + $0x16f8] sm:$0xff] %v1700_v31 }
 0x180   : > { %1703 = vst [vmem:[%s10406_s8 + $0x1700] sm:$0xff] %v1702_v32  ;;  %1705 = vst [vmem:[%s10406_s8 + $0x1708] sm:$0xff] %v1704_v33  ;;  %v1706_v34 = vld [vmem:[%s10398_s7 + $0x2e20] sm:$0xff]  ;;  %v1708_v35 = vld [vmem:[%s10398_s7 + $0x2e28] sm:$0xff] }
 0x181   : > { %v1710_v36 = vld [vmem:[%s10398_s7 + $0x2e40] sm:$0xff]  ;;  %1707 = vst [vmem:[%s10406_s8 + $0x1710] sm:$0xff] %v1706_v34  ;;  %1709 = vst [vmem:[%s10406_s8 + $0x1718] sm:$0xff] %v1708_v35  ;;  %v1712_v37 = vld [vmem:[%s10398_s7 + $0x2e48] sm:$0xff] }
 0x182   : > { %1711 = vst [vmem:[%s10406_s8 + $0x1720] sm:$0xff] %v1710_v36  ;;  %v1714_v38 = vld [vmem:[%s10398_s7 + $0x2e60] sm:$0xff]  ;;  %v1716_v39 = vld [vmem:[%s10398_s7 + $0x2e68] sm:$0xff]  ;;  %1713 = vst [vmem:[%s10406_s8 + $0x1728] sm:$0xff] %v1712_v37 }
 0x183   : > { %1715 = vst [vmem:[%s10406_s8 + $0x1730] sm:$0xff] %v1714_v38  ;;  %1717 = vst [vmem:[%s10406_s8 + $0x1738] sm:$0xff] %v1716_v39  ;;  %v1718_v40 = vld [vmem:[%s10398_s7 + $0x2e80] sm:$0xff]  ;;  %v1720_v41 = vld [vmem:[%s10398_s7 + $0x2e88] sm:$0xff] }
 0x184   : > { %v1722_v42 = vld [vmem:[%s10398_s7 + $0x2ea0] sm:$0xff]  ;;  %1719 = vst [vmem:[%s10406_s8 + $0x1740] sm:$0xff] %v1718_v40  ;;  %1721 = vst [vmem:[%s10406_s8 + $0x1748] sm:$0xff] %v1720_v41  ;;  %v1724_v43 = vld [vmem:[%s10398_s7 + $0x2ea8] sm:$0xff] }
 0x185   : > { %1723 = vst [vmem:[%s10406_s8 + $0x1750] sm:$0xff] %v1722_v42  ;;  %v1726_v44 = vld [vmem:[%s10398_s7 + $0x2ec0] sm:$0xff]  ;;  %v1728_v45 = vld [vmem:[%s10398_s7 + $0x2ec8] sm:$0xff]  ;;  %1725 = vst [vmem:[%s10406_s8 + $0x1758] sm:$0xff] %v1724_v43 }
 0x186   : > { %1727 = vst [vmem:[%s10406_s8 + $0x1760] sm:$0xff] %v1726_v44  ;;  %1729 = vst [vmem:[%s10406_s8 + $0x1768] sm:$0xff] %v1728_v45  ;;  %v1730_v46 = vld [vmem:[%s10398_s7 + $0x2ee0] sm:$0xff]  ;;  %v1732_v47 = vld [vmem:[%s10398_s7 + $0x2ee8] sm:$0xff] }
 0x187   : > { %v1734_v48 = vld [vmem:[%s10398_s7 + $0x2f00] sm:$0xff]  ;;  %1731 = vst [vmem:[%s10406_s8 + $0x1770] sm:$0xff] %v1730_v46  ;;  %1733 = vst [vmem:[%s10406_s8 + $0x1778] sm:$0xff] %v1732_v47  ;;  %v1736_v49 = vld [vmem:[%s10398_s7 + $0x2f08] sm:$0xff] }
 0x188   : > { %1735 = vst [vmem:[%s10406_s8 + $0x1780] sm:$0xff] %v1734_v48  ;;  %v1738_v50 = vld [vmem:[%s10398_s7 + $0x2f20] sm:$0xff]  ;;  %v1740_v51 = vld [vmem:[%s10398_s7 + $0x2f28] sm:$0xff]  ;;  %1737 = vst [vmem:[%s10406_s8 + $0x1788] sm:$0xff] %v1736_v49 }
 0x189   : > { %1739 = vst [vmem:[%s10406_s8 + $0x1790] sm:$0xff] %v1738_v50  ;;  %1741 = vst [vmem:[%s10406_s8 + $0x1798] sm:$0xff] %v1740_v51  ;;  %v1742_v52 = vld [vmem:[%s10398_s7 + $0x2f40] sm:$0xff]  ;;  %v1744_v53 = vld [vmem:[%s10398_s7 + $0x2f48] sm:$0xff] }
 0x18a   : > { %v1746_v54 = vld [vmem:[%s10398_s7 + $0x2f60] sm:$0xff]  ;;  %1743 = vst [vmem:[%s10406_s8 + $0x17a0] sm:$0xff] %v1742_v52  ;;  %1745 = vst [vmem:[%s10406_s8 + $0x17a8] sm:$0xff] %v1744_v53  ;;  %v1748_v55 = vld [vmem:[%s10398_s7 + $0x2f68] sm:$0xff] }
 0x18b   : > { %1747 = vst [vmem:[%s10406_s8 + $0x17b0] sm:$0xff] %v1746_v54  ;;  %v1750_v56 = vld [vmem:[%s10398_s7 + $0x2f80] sm:$0xff]  ;;  %v1752_v57 = vld [vmem:[%s10398_s7 + $0x2f88] sm:$0xff]  ;;  %1749 = vst [vmem:[%s10406_s8 + $0x17b8] sm:$0xff] %v1748_v55 }
 0x18c   : > { %1751 = vst [vmem:[%s10406_s8 + $0x17c0] sm:$0xff] %v1750_v56  ;;  %1753 = vst [vmem:[%s10406_s8 + $0x17c8] sm:$0xff] %v1752_v57  ;;  %v1754_v58 = vld [vmem:[%s10398_s7 + $0x2fa0] sm:$0xff]  ;;  %v1756_v59 = vld [vmem:[%s10398_s7 + $0x2fa8] sm:$0xff] }
 0x18d   : > { %v1758_v60 = vld [vmem:[%s10398_s7 + $0x2fc0] sm:$0xff]  ;;  %1755 = vst [vmem:[%s10406_s8 + $0x17d0] sm:$0xff] %v1754_v58  ;;  %1757 = vst [vmem:[%s10406_s8 + $0x17d8] sm:$0xff] %v1756_v59  ;;  %v1760_v61 = vld [vmem:[%s10398_s7 + $0x2fc8] sm:$0xff] }
 0x18e   : > { %1759 = vst [vmem:[%s10406_s8 + $0x17e0] sm:$0xff] %v1758_v60  ;;  %v1762_v62 = vld [vmem:[%s10398_s7 + $0x2fe0] sm:$0xff]  ;;  %v1764_v63 = vld [vmem:[%s10398_s7 + $0x2fe8] sm:$0xff]  ;;  %1761 = vst [vmem:[%s10406_s8 + $0x17e8] sm:$0xff] %v1760_v61 }
 0x18f   : > { %1763 = vst [vmem:[%s10406_s8 + $0x17f0] sm:$0xff] %v1762_v62  ;;  %1765 = vst [vmem:[%s10406_s8 + $0x17f8] sm:$0xff] %v1764_v63  ;;  %v1766_v0 = vld [vmem:[%s10398_s7 + $0x3000] sm:$0xff]  ;;  %v1768_v1 = vld [vmem:[%s10398_s7 + $0x3008] sm:$0xff] }
 0x190   : > { %v1770_v2 = vld [vmem:[%s10398_s7 + $0x3020] sm:$0xff]  ;;  %1767 = vst [vmem:[%s10406_s8 + $0x1800] sm:$0xff] %v1766_v0  ;;  %1769 = vst [vmem:[%s10406_s8 + $0x1808] sm:$0xff] %v1768_v1  ;;  %v1772_v3 = vld [vmem:[%s10398_s7 + $0x3028] sm:$0xff] }
 0x191   : > { %1771 = vst [vmem:[%s10406_s8 + $0x1810] sm:$0xff] %v1770_v2  ;;  %v1774_v4 = vld [vmem:[%s10398_s7 + $0x3040] sm:$0xff]  ;;  %v1776_v5 = vld [vmem:[%s10398_s7 + $0x3048] sm:$0xff]  ;;  %1773 = vst [vmem:[%s10406_s8 + $0x1818] sm:$0xff] %v1772_v3 }
 0x192   : > { %1775 = vst [vmem:[%s10406_s8 + $0x1820] sm:$0xff] %v1774_v4  ;;  %1777 = vst [vmem:[%s10406_s8 + $0x1828] sm:$0xff] %v1776_v5  ;;  %v1778_v6 = vld [vmem:[%s10398_s7 + $0x3060] sm:$0xff]  ;;  %v1780_v7 = vld [vmem:[%s10398_s7 + $0x3068] sm:$0xff] }
 0x193   : > { %v1782_v8 = vld [vmem:[%s10398_s7 + $0x3080] sm:$0xff]  ;;  %1779 = vst [vmem:[%s10406_s8 + $0x1830] sm:$0xff] %v1778_v6  ;;  %1781 = vst [vmem:[%s10406_s8 + $0x1838] sm:$0xff] %v1780_v7  ;;  %v1784_v9 = vld [vmem:[%s10398_s7 + $0x3088] sm:$0xff] }
 0x194   : > { %1783 = vst [vmem:[%s10406_s8 + $0x1840] sm:$0xff] %v1782_v8  ;;  %v1786_v10 = vld [vmem:[%s10398_s7 + $0x30a0] sm:$0xff]  ;;  %v1788_v11 = vld [vmem:[%s10398_s7 + $0x30a8] sm:$0xff]  ;;  %1785 = vst [vmem:[%s10406_s8 + $0x1848] sm:$0xff] %v1784_v9 }
 0x195   : > { %1787 = vst [vmem:[%s10406_s8 + $0x1850] sm:$0xff] %v1786_v10  ;;  %1789 = vst [vmem:[%s10406_s8 + $0x1858] sm:$0xff] %v1788_v11  ;;  %v1790_v12 = vld [vmem:[%s10398_s7 + $0x30c0] sm:$0xff]  ;;  %v1792_v13 = vld [vmem:[%s10398_s7 + $0x30c8] sm:$0xff] }
 0x196   : > { %v1794_v14 = vld [vmem:[%s10398_s7 + $0x30e0] sm:$0xff]  ;;  %1791 = vst [vmem:[%s10406_s8 + $0x1860] sm:$0xff] %v1790_v12  ;;  %1793 = vst [vmem:[%s10406_s8 + $0x1868] sm:$0xff] %v1792_v13  ;;  %v1796_v15 = vld [vmem:[%s10398_s7 + $0x30e8] sm:$0xff] }
 0x197   : > { %1795 = vst [vmem:[%s10406_s8 + $0x1870] sm:$0xff] %v1794_v14  ;;  %1797 = vst [vmem:[%s10406_s8 + $0x1878] sm:$0xff] %v1796_v15 }
 0x198 PF: > { %p8147_p6 = scmp.ge.s32.totalorder %s10322_s22, 1  ;;  %p1823_p7 = scmp.lt.s32.totalorder %s10322_s22, 3 }
 0x19a   : > { %p1824_p8 = pnand %p8147_p6, %p1823_p7 }
 0x19b   : > { %s1830_s9 = sand.u32 (!%p1824_p8), 1, %s10306_s18   ;;  %p1882_p9 = scmp.lt.s32.totalorder (!%p1824_p8), %s10314_s20, 1 }
 0x19c   : > { %1827 = sbr.rel (%p1824_p8) target bundleno = 1606 (0x646), region = 59 }
 0x19d   : > { %s9039_s14 = smul.u32 (!%p1824_p8), 6272, %s1830_s9 }
 0x19f   : > { %s11993_s15 = scalar_lea.vmem (!%p1824_p8), [#allocation2], %s9039_s14 }
 0x1a1   : > { %v11976_v16 = vld [vmem:[%s13138_s0] sm:$0xff]  ;;  %v11981_v17 = vld [vmem:[%s13138_s0 + $0x8] sm:$0xff]  ;;  %s13151_s20 = smov (!%p1882_p9, %s10314_s20), 1  ;;  %vm6728_vm0 = vcmask 523264  }
 0x1a2   : > { %v11985_v18 = vcombine.high %v11976_v16, %v11976_v16  ;;  %v11989_v19 = vcombine.high %v11981_v17, %v11981_v17  ;;  %v9081_v20 = vld [vmem:[%s11993_s15 + $0xe4] ss:$16 sps:$4 sm:$0xff]   ;;  %v9085_v22 = vld [vmem:[%s11993_s15 + $0xe0] ss:$16 sps:$4 sm:$0xff]   ;;  %s8148_s9 = sshll.u32 %s13151_s20, 2  ;;  %s8967_s30 = sshll.u32 %s13151_s20, 9 }
 0x1a3   : > { %v9083_v21 = vld [vmem:[%s11993_s15 + $0x2e4] ss:$16 sps:$4 sm:$0xff]   ;;  %6732 = vmatprep.subr.bf16.mxu0 %v9081_v20  ;;  %v9086_v23 = vld [vmem:[%s11993_s15 + $0x2e0] ss:$16 sps:$4 sm:$0xff]   ;;  %s12349_s12 = scalar_lea.vmem %s13140_s2, %s8148_s9  ;;  %s13034_s8 = scalar_lea.vmem %s13141_s3, %s8967_s30 }
 0x1a4   : > { %6764 = vmatprep.mubr.bf16.mxu0 %v11985_v18  ;;  %6805 = vmatprep.mubr.bf16.mxu1 %v11989_v19  ;;  %v9087_v24 = vld [vmem:[%s11993_s15 + $0xc4] ss:$16 sps:$4 sm:$0xff]   ;;  %v9091_v26 = vld [vmem:[%s11993_s15 + $0xc0] ss:$16 sps:$4 sm:$0xff]   ;;  %s8151_s13 = sshll.u32 %s13151_s20, 3 }
 0x1a5   : > { %6773 = vmatprep.subr.bf16.mxu1 %v9083_v21  ;;  %6733 = vmatpush1.bf16.msra.mxu0 %v9085_v22  ;;  %v9089_v25 = vld [vmem:[%s11993_s15 + $0x2c4] ss:$16 sps:$4 sm:$0xff]   ;;  %v9092_v27 = vld [vmem:[%s11993_s15 + $0x2c0] ss:$16 sps:$4 sm:$0xff]   ;;  %s1900_s17 = scalar_lea.vmem %s13143_s5, %s8151_s13 }
 0x1a6   : > { %6774 = vmatpush1.bf16.msra.mxu1 %v9086_v23  ;;  %6734 = vmatprep.subr.bf16.mxu0 %v9087_v24  ;;  %v9093_v28 = vld [vmem:[%s11993_s15 + $0xa4] ss:$16 sps:$4 sm:$0xff]   ;;  %v9097_v30 = vld [vmem:[%s11993_s15 + $0xa0] ss:$16 sps:$4 sm:$0xff]  }
 0x1a7   : > { %6775 = vmatprep.subr.bf16.mxu1 %v9089_v25  ;;  %v9095_v29 = vld [vmem:[%s11993_s15 + $0x2a4] ss:$16 sps:$4 sm:$0xff]   ;;  %v9098_v31 = vld [vmem:[%s11993_s15 + $0x2a0] ss:$16 sps:$4 sm:$0xff]  }
 0x1a8   : > { %v9099_v32 = vld [vmem:[%s11993_s15 + $0x84] ss:$16 sps:$4 sm:$0xff]   ;;  %v9103_v34 = vld [vmem:[%s11993_s15 + $0x80] ss:$16 sps:$4 sm:$0xff]  }
 0x1a9   : > { %6735 = vmatpush1.bf16.msra.mxu0 %v9091_v26  ;;  %v9101_v33 = vld [vmem:[%s11993_s15 + $0x284] ss:$16 sps:$4 sm:$0xff]   ;;  %v9104_v35 = vld [vmem:[%s11993_s15 + $0x280] ss:$16 sps:$4 sm:$0xff]  }
 0x1aa   : > { %6776 = vmatpush1.bf16.msra.mxu1 %v9092_v27  ;;  %6736 = vmatprep.subr.bf16.mxu0 %v9093_v28  ;;  %v9105_v36 = vld [vmem:[%s11993_s15 + $0x64] ss:$16 sps:$4 sm:$0xff]   ;;  %v9109_v38 = vld [vmem:[%s11993_s15 + $0x60] ss:$16 sps:$4 sm:$0xff]   ;;  %v12069_v27 = vld [vmem:[%s13138_s0 + $0x18] sm:$0xff]  ;;  %v12073_v28 = vcombine.low %v11976_v16, %v11976_v16 }
 0x1ab   : > { %6777 = vmatprep.subr.bf16.mxu1 %v9095_v29  ;;  %v9107_v37 = vld [vmem:[%s11993_s15 + $0x264] ss:$16 sps:$4 sm:$0xff]   ;;  %v9110_v39 = vld [vmem:[%s11993_s15 + $0x260] ss:$16 sps:$4 sm:$0xff]   ;;  %v12077_v29 = vcombine.low %v11981_v17, %v11981_v17  ;;  %v12089_v17 = vcombine.high %v12069_v27, %v12069_v27 }
 0x1ac   : > { %v9111_v40 = vld [vmem:[%s11993_s15 + $0x44] ss:$16 sps:$4 sm:$0xff]   ;;  %v9115_v42 = vld [vmem:[%s11993_s15 + $0x40] ss:$16 sps:$4 sm:$0xff]  }
 0x1ad   : > { %6737 = vmatpush1.bf16.msra.mxu0 %v9097_v30  ;;  %v9113_v41 = vld [vmem:[%s11993_s15 + $0x244] ss:$16 sps:$4 sm:$0xff]   ;;  %v9116_v43 = vld [vmem:[%s11993_s15 + $0x240] ss:$16 sps:$4 sm:$0xff]  }
 0x1ae   : > { %6778 = vmatpush1.bf16.msra.mxu1 %v9098_v31  ;;  %6738 = vmatprep.subr.bf16.mxu0 %v9099_v32  ;;  %v9117_v44 = vld [vmem:[%s11993_s15 + $0x24] ss:$16 sps:$4 sm:$0xff]   ;;  %v9121_v46 = vld [vmem:[%s11993_s15 + $0x20] ss:$16 sps:$4 sm:$0xff]  }
 0x1af   : > { %6779 = vmatprep.subr.bf16.mxu1 %v9101_v33  ;;  %v9119_v45 = vld [vmem:[%s11993_s15 + $0x224] ss:$16 sps:$4 sm:$0xff]   ;;  %v9122_v47 = vld [vmem:[%s11993_s15 + $0x220] ss:$16 sps:$4 sm:$0xff]  }
 0x1b0   : > { %v9123_v48 = vld [vmem:[%s11993_s15 + $0x4] ss:$16 sps:$4 sm:$0xff]   ;;  %v9127_v50 = vld [vmem:[%s11993_s15] ss:$16 sps:$4 sm:$0xff]  }
 0x1b1   : > { %6739 = vmatpush1.bf16.msra.mxu0 %v9103_v34  ;;  %v9125_v49 = vld [vmem:[%s11993_s15 + $0x204] ss:$16 sps:$4 sm:$0xff]   ;;  %v9128_v51 = vld [vmem:[%s11993_s15 + $0x200] ss:$16 sps:$4 sm:$0xff]  }
 0x1b2   : > { %6780 = vmatpush1.bf16.msra.mxu1 %v9104_v35  ;;  %6740 = vmatprep.subr.bf16.mxu0 %v9105_v36  ;;  %v9129_v52 = vld [vmem:[%s11993_s15 + $0x1e4] ss:$16 sps:$4 sm:$0xff]   ;;  %v9133_v54 = vld [vmem:[%s11993_s15 + $0x1e0] ss:$16 sps:$4 sm:$0xff]  }
 0x1b3   : > { %6781 = vmatprep.subr.bf16.mxu1 %v9107_v37  ;;  %v9131_v53 = vld [vmem:[%s11993_s15 + $0x3e4] ss:$16 sps:$4 sm:$0xff]   ;;  %v9134_v55 = vld [vmem:[%s11993_s15 + $0x3e0] ss:$16 sps:$4 sm:$0xff]  }
 0x1b4   : > { %v9135_v56 = vld [vmem:[%s11993_s15 + $0x1c4] ss:$16 sps:$4 sm:$0xff]   ;;  %v9139_v58 = vld [vmem:[%s11993_s15 + $0x1c0] ss:$16 sps:$4 sm:$0xff]  }
 0x1b5   : > { %6741 = vmatpush1.bf16.msra.mxu0 %v9109_v38  ;;  %v9137_v57 = vld [vmem:[%s11993_s15 + $0x3c4] ss:$16 sps:$4 sm:$0xff]   ;;  %v9140_v59 = vld [vmem:[%s11993_s15 + $0x3c0] ss:$16 sps:$4 sm:$0xff]  }
 0x1b6   : > { %6782 = vmatpush1.bf16.msra.mxu1 %v9110_v39  ;;  %6742 = vmatprep.subr.bf16.mxu0 %v9111_v40  ;;  %v9141_v60 = vld [vmem:[%s11993_s15 + $0x1a4] ss:$16 sps:$4 sm:$0xff]   ;;  %v9145_v62 = vld [vmem:[%s11993_s15 + $0x1a0] ss:$16 sps:$4 sm:$0xff]  }
 0x1b7   : > { %6783 = vmatprep.subr.bf16.mxu1 %v9113_v41  ;;  %v9143_v61 = vld [vmem:[%s11993_s15 + $0x3a4] ss:$16 sps:$4 sm:$0xff]   ;;  %v9146_v63 = vld [vmem:[%s11993_s15 + $0x3a0] ss:$16 sps:$4 sm:$0xff]  }
 0x1b8   : > { %v9147_v0 = vld [vmem:[%s11993_s15 + $0x184] ss:$16 sps:$4 sm:$0xff]   ;;  %v9151_v2 = vld [vmem:[%s11993_s15 + $0x180] ss:$16 sps:$4 sm:$0xff]  }
 0x1b9   : > { %6743 = vmatpush1.bf16.msra.mxu0 %v9115_v42  ;;  %v9149_v1 = vld [vmem:[%s11993_s15 + $0x384] ss:$16 sps:$4 sm:$0xff]   ;;  %v9152_v3 = vld [vmem:[%s11993_s15 + $0x380] ss:$16 sps:$4 sm:$0xff]  }
 0x1ba   : > { %6784 = vmatpush1.bf16.msra.mxu1 %v9116_v43  ;;  %6744 = vmatprep.subr.bf16.mxu0 %v9117_v44  ;;  %v9153_v4 = vld [vmem:[%s11993_s15 + $0x164] ss:$16 sps:$4 sm:$0xff]   ;;  %v9157_v6 = vld [vmem:[%s11993_s15 + $0x160] ss:$16 sps:$4 sm:$0xff]  }
 0x1bb   : > { %6785 = vmatprep.subr.bf16.mxu1 %v9119_v45  ;;  %v9155_v5 = vld [vmem:[%s11993_s15 + $0x364] ss:$16 sps:$4 sm:$0xff]   ;;  %v9158_v7 = vld [vmem:[%s11993_s15 + $0x360] ss:$16 sps:$4 sm:$0xff]  }
 0x1bc   : > { %v9159_v8 = vld [vmem:[%s11993_s15 + $0x144] ss:$16 sps:$4 sm:$0xff]   ;;  %v9163_v10 = vld [vmem:[%s11993_s15 + $0x140] ss:$16 sps:$4 sm:$0xff]  }
 0x1bd   : > { %6745 = vmatpush1.bf16.msra.mxu0 %v9121_v46  ;;  %v9161_v9 = vld [vmem:[%s11993_s15 + $0x344] ss:$16 sps:$4 sm:$0xff]   ;;  %v9164_v11 = vld [vmem:[%s11993_s15 + $0x340] ss:$16 sps:$4 sm:$0xff]  }
 0x1be   : > { %6786 = vmatpush1.bf16.msra.mxu1 %v9122_v47  ;;  %6746 = vmatprep.subr.bf16.mxu0 %v9123_v48  ;;  %v9165_v12 = vld [vmem:[%s11993_s15 + $0x124] ss:$16 sps:$4 sm:$0xff]   ;;  %v9169_v14 = vld [vmem:[%s11993_s15 + $0x120] ss:$16 sps:$4 sm:$0xff]  }
 0x1bf   : > { %6787 = vmatprep.subr.bf16.mxu1 %v9125_v49  ;;  %v9167_v13 = vld [vmem:[%s11993_s15 + $0x324] ss:$16 sps:$4 sm:$0xff]   ;;  %v9170_v15 = vld [vmem:[%s11993_s15 + $0x320] ss:$16 sps:$4 sm:$0xff]  }
 0x1c0   : > { %v9171_v20 = vld [vmem:[%s11993_s15 + $0x104] ss:$16 sps:$4 sm:$0xff]   ;;  %v9175_v22 = vld [vmem:[%s11993_s15 + $0x100] ss:$16 sps:$4 sm:$0xff]  }
 0x1c1   : > { %6747 = vmatpush1.bf16.msra.mxu0 %v9127_v50  ;;  %v9173_v21 = vld [vmem:[%s11993_s15 + $0x304] ss:$16 sps:$4 sm:$0xff]   ;;  %v9176_v23 = vld [vmem:[%s11993_s15 + $0x300] ss:$16 sps:$4 sm:$0xff]  }
 0x1c2   : > { %6788 = vmatpush1.bf16.msra.mxu1 %v9128_v51  ;;  %6748 = vmatprep.subr.bf16.mxu0 %v9129_v52  ;;  %v9183_v24 = vld [vmem:[%s11993_s15 + $0x4e4] ss:$16 sps:$4 sm:$0xff]   ;;  %v9181_v30 = vld [vmem:[%s11993_s15 + $0x4e0] ss:$16 sps:$4 sm:$0xff]  }
 0x1c3   : > { %6789 = vmatprep.subr.bf16.mxu1 %v9131_v53  ;;  %v9186_v25 = vld [vmem:[%s11993_s15 + $0x6e4] ss:$16 sps:$4 sm:$0xff]   ;;  %v9184_v31 = vld [vmem:[%s11993_s15 + $0x6e0] ss:$16 sps:$4 sm:$0xff]  }
 0x1c4   : > { %v12064_v26 = vld [vmem:[%s13138_s0 + $0x10] sm:$0xff] }
 0x1c5   : > { %6749 = vmatpush2.bf16.msra.mxu0 %v9133_v54  ;;  %v9189_v32 = vld [vmem:[%s11993_s15 + $0x4c4] ss:$16 sps:$4 sm:$0xff]   ;;  %v12085_v16 = vcombine.high %v12064_v26, %v12064_v26  ;;  %v9187_v34 = vld [vmem:[%s11993_s15 + $0x4c0] ss:$16 sps:$4 sm:$0xff]  }
 0x1c6   : > { %6790 = vmatpush2.bf16.msra.mxu1 %v9134_v55  ;;  %6750 = vmatprep.subr.bf16.mxu0 %v9135_v56  ;;  %v9192_v33 = vld [vmem:[%s11993_s15 + $0x6c4] ss:$16 sps:$4 sm:$0xff]   ;;  %v9190_v35 = vld [vmem:[%s11993_s15 + $0x6c0] ss:$16 sps:$4 sm:$0xff]  }
 0x1c7   : > { %6791 = vmatprep.subr.bf16.mxu1 %v9137_v57  ;;  %v9195_v36 = vld [vmem:[%s11993_s15 + $0x4a4] ss:$16 sps:$4 sm:$0xff]   ;;  %v9193_v38 = vld [vmem:[%s11993_s15 + $0x4a0] ss:$16 sps:$4 sm:$0xff]  }
 0x1c8   : > { %v9198_v37 = vld [vmem:[%s11993_s15 + $0x6a4] ss:$16 sps:$4 sm:$0xff]   ;;  %v9196_v39 = vld [vmem:[%s11993_s15 + $0x6a0] ss:$16 sps:$4 sm:$0xff]  }
 0x1c9   : > { %6751 = vmatpush2.bf16.msra.mxu0 %v9139_v58  ;;  %v9201_v40 = vld [vmem:[%s11993_s15 + $0x484] ss:$16 sps:$4 sm:$0xff]   ;;  %v9199_v42 = vld [vmem:[%s11993_s15 + $0x480] ss:$16 sps:$4 sm:$0xff]  }
 0x1ca   : > { %6792 = vmatpush2.bf16.msra.mxu1 %v9140_v59  ;;  %6752 = vmatprep.subr.bf16.mxu0 %v9141_v60  ;;  %v9204_v41 = vld [vmem:[%s11993_s15 + $0x684] ss:$16 sps:$4 sm:$0xff]   ;;  %v9202_v43 = vld [vmem:[%s11993_s15 + $0x680] ss:$16 sps:$4 sm:$0xff]  }
 0x1cb   : > { %6793 = vmatprep.subr.bf16.mxu1 %v9143_v61  ;;  %v9207_v44 = vld [vmem:[%s11993_s15 + $0x464] ss:$16 sps:$4 sm:$0xff]   ;;  %v9205_v46 = vld [vmem:[%s11993_s15 + $0x460] ss:$16 sps:$4 sm:$0xff]  }
 0x1cc   : > { %v9210_v45 = vld [vmem:[%s11993_s15 + $0x664] ss:$16 sps:$4 sm:$0xff]   ;;  %v9208_v47 = vld [vmem:[%s11993_s15 + $0x660] ss:$16 sps:$4 sm:$0xff]  }
 0x1cd   : > { %6753 = vmatpush2.bf16.msra.mxu0 %v9145_v62  ;;  %v9213_v48 = vld [vmem:[%s11993_s15 + $0x444] ss:$16 sps:$4 sm:$0xff]   ;;  %v9211_v50 = vld [vmem:[%s11993_s15 + $0x440] ss:$16 sps:$4 sm:$0xff]  }
 0x1ce   : > { %6794 = vmatpush2.bf16.msra.mxu1 %v9146_v63  ;;  %6754 = vmatprep.subr.bf16.mxu0 %v9147_v0  ;;  %v9216_v49 = vld [vmem:[%s11993_s15 + $0x644] ss:$16 sps:$4 sm:$0xff]   ;;  %v9214_v51 = vld [vmem:[%s11993_s15 + $0x640] ss:$16 sps:$4 sm:$0xff]  }
 0x1cf   : > { %6795 = vmatprep.subr.bf16.mxu1 %v9149_v1  ;;  %v9219_v52 = vld [vmem:[%s11993_s15 + $0x424] ss:$16 sps:$4 sm:$0xff]   ;;  %v9217_v54 = vld [vmem:[%s11993_s15 + $0x420] ss:$16 sps:$4 sm:$0xff]  }
 0x1d0   : > { %v9222_v53 = vld [vmem:[%s11993_s15 + $0x624] ss:$16 sps:$4 sm:$0xff]   ;;  %v9220_v55 = vld [vmem:[%s11993_s15 + $0x620] ss:$16 sps:$4 sm:$0xff]  }
 0x1d1   : > { %6755 = vmatpush2.bf16.msra.mxu0 %v9151_v2  ;;  %v9225_v56 = vld [vmem:[%s11993_s15 + $0x404] ss:$16 sps:$4 sm:$0xff]   ;;  %v9223_v58 = vld [vmem:[%s11993_s15 + $0x400] ss:$16 sps:$4 sm:$0xff]  }
 0x1d2   : > { %6796 = vmatpush2.bf16.msra.mxu1 %v9152_v3  ;;  %6756 = vmatprep.subr.bf16.mxu0 %v9153_v4  ;;  %v9228_v57 = vld [vmem:[%s11993_s15 + $0x604] ss:$16 sps:$4 sm:$0xff]   ;;  %v9226_v59 = vld [vmem:[%s11993_s15 + $0x600] ss:$16 sps:$4 sm:$0xff]  }
 0x1d3   : > { %6797 = vmatprep.subr.bf16.mxu1 %v9155_v5  ;;  %v9231_v60 = vld [vmem:[%s11993_s15 + $0x5e4] ss:$16 sps:$4 sm:$0xff]   ;;  %v9229_v62 = vld [vmem:[%s11993_s15 + $0x5e0] ss:$16 sps:$4 sm:$0xff]  }
 0x1d4   : > { %v9234_v61 = vld [vmem:[%s11993_s15 + $0x7e4] ss:$16 sps:$4 sm:$0xff]   ;;  %v9232_v63 = vld [vmem:[%s11993_s15 + $0x7e0] ss:$16 sps:$4 sm:$0xff]  }
 0x1d5   : > { %6757 = vmatpush2.bf16.msra.mxu0 %v9157_v6  ;;  %v9237_v0 = vld [vmem:[%s11993_s15 + $0x5c4] ss:$16 sps:$4 sm:$0xff]   ;;  %v9235_v2 = vld [vmem:[%s11993_s15 + $0x5c0] ss:$16 sps:$4 sm:$0xff]  }
 0x1d6   : > { %6798 = vmatpush2.bf16.msra.mxu1 %v9158_v7  ;;  %6758 = vmatprep.subr.bf16.mxu0 %v9159_v8  ;;  %v9240_v1 = vld [vmem:[%s11993_s15 + $0x7c4] ss:$16 sps:$4 sm:$0xff]   ;;  %v9238_v3 = vld [vmem:[%s11993_s15 + $0x7c0] ss:$16 sps:$4 sm:$0xff]  }
 0x1d7   : > { %6799 = vmatprep.subr.bf16.mxu1 %v9161_v9  ;;  %v9243_v4 = vld [vmem:[%s11993_s15 + $0x5a4] ss:$16 sps:$4 sm:$0xff]   ;;  %v9241_v6 = vld [vmem:[%s11993_s15 + $0x5a0] ss:$16 sps:$4 sm:$0xff]  }
 0x1d8   : > { %v9246_v5 = vld [vmem:[%s11993_s15 + $0x7a4] ss:$16 sps:$4 sm:$0xff]   ;;  %v9244_v7 = vld [vmem:[%s11993_s15 + $0x7a0] ss:$16 sps:$4 sm:$0xff]  }
 0x1d9   : > { %6759 = vmatpush2.bf16.msra.mxu0 %v9163_v10  ;;  %v9249_v8 = vld [vmem:[%s11993_s15 + $0x584] ss:$16 sps:$4 sm:$0xff]   ;;  %v9247_v10 = vld [vmem:[%s11993_s15 + $0x580] ss:$16 sps:$4 sm:$0xff]  }
 0x1da   : > { %6800 = vmatpush2.bf16.msra.mxu1 %v9164_v11  ;;  %6760 = vmatprep.subr.bf16.mxu0 %v9165_v12  ;;  %v9252_v9 = vld [vmem:[%s11993_s15 + $0x784] ss:$16 sps:$4 sm:$0xff]   ;;  %v9250_v11 = vld [vmem:[%s11993_s15 + $0x780] ss:$16 sps:$4 sm:$0xff]  }
 0x1db   : > { %6801 = vmatprep.subr.bf16.mxu1 %v9167_v13  ;;  %v9255_v12 = vld [vmem:[%s11993_s15 + $0x564] ss:$16 sps:$4 sm:$0xff]  }
 0x1dc   : > { %v9258_v13 = vld [vmem:[%s11993_s15 + $0x764] ss:$16 sps:$4 sm:$0xff]  }
 0x1dd   : > { %6761 = vmatpush2.bf16.msra.mxu0 %v9169_v14  ;;  %v9253_v14 = vld [vmem:[%s11993_s15 + $0x560] ss:$16 sps:$4 sm:$0xff]  }
 0x1de   : > { %6802 = vmatpush2.bf16.msra.mxu1 %v9170_v15  ;;  %6762 = vmatprep.subr.bf16.mxu0 %v9171_v20  ;;  %v9256_v15 = vld [vmem:[%s11993_s15 + $0x760] ss:$16 sps:$4 sm:$0xff]   ;;  %v9261_v20 = vld [vmem:[%s11993_s15 + $0x544] ss:$16 sps:$4 sm:$0xff]  }
 0x1df   : > { %6803 = vmatprep.subr.bf16.mxu1 %v9173_v21  ;;  %v9264_v21 = vld [vmem:[%s11993_s15 + $0x744] ss:$16 sps:$4 sm:$0xff]  }
 0x1e1   : > { %6763 = vmatpush2.bf16.msra.mxu0 %v9175_v22  ;;  %v9259_v22 = vld [vmem:[%s11993_s15 + $0x540] ss:$16 sps:$4 sm:$0xff]  }
 0x1e2   : > { %6804 = vmatpush2.bf16.msra.mxu1 %v9176_v23  ;;  %6814 = vmatprep.subr.bf16.mxu0 %v9183_v24  ;;  %v9262_v23 = vld [vmem:[%s11993_s15 + $0x740] ss:$16 sps:$4 sm:$0xff]   ;;  %v9267_v24 = vld [vmem:[%s11993_s15 + $0x524] ss:$16 sps:$4 sm:$0xff]  }
 0x1e3   : > { %6855 = vmatprep.subr.bf16.mxu1 %v9186_v25  ;;  %v9270_v25 = vld [vmem:[%s11993_s15 + $0x724] ss:$16 sps:$4 sm:$0xff]  }
 0x1e4   : > { %6765 = vmatmul.mubr.bf16.vlgmr.msra.gmra.mxu0 %v12073_v28 }
 0x1e5   : > { %6806 = vmatmul.mubr.bf16.vlgmr.msra.gmra.mxu1 %v12077_v29  ;;  %6815 = vmatpush1.bf16.msra.mxu0 %v9181_v30  ;;  %v9265_v30 = vld [vmem:[%s11993_s15 + $0x520] ss:$16 sps:$4 sm:$0xff]  }
 0x1e6   : > { %6856 = vmatpush1.bf16.msra.mxu1 %v9184_v31  ;;  %6816 = vmatprep.subr.bf16.mxu0 %v9189_v32  ;;  %v9268_v31 = vld [vmem:[%s11993_s15 + $0x720] ss:$16 sps:$4 sm:$0xff]   ;;  %v9273_v32 = vld [vmem:[%s11993_s15 + $0x504] ss:$16 sps:$4 sm:$0xff]  }
 0x1e7   : > { %6857 = vmatprep.subr.bf16.mxu1 %v9192_v33  ;;  %6846 = vmatprep.mubr.bf16.mxu0 %v12085_v16  ;;  %v9276_v33 = vld [vmem:[%s11993_s15 + $0x704] ss:$16 sps:$4 sm:$0xff]  }
 0x1e8   : > { %6887 = vmatprep.mubr.bf16.mxu1 %v12089_v17 }
 0x1e9   : > { %6817 = vmatpush1.bf16.msra.mxu0 %v9187_v34  ;;  %v9271_v34 = vld [vmem:[%s11993_s15 + $0x500] ss:$16 sps:$4 sm:$0xff]  }
 0x1ea   : > { %6858 = vmatpush1.bf16.msra.mxu1 %v9190_v35  ;;  %6818 = vmatprep.subr.bf16.mxu0 %v9195_v36  ;;  %v9274_v35 = vld [vmem:[%s11993_s15 + $0x700] ss:$16 sps:$4 sm:$0xff]   ;;  %v9283_v36 = vld [vmem:[%s11993_s15 + $0x8e4] ss:$16 sps:$4 sm:$0xff]  }
 0x1eb   : > { %6859 = vmatprep.subr.bf16.mxu1 %v9198_v37  ;;  %v9286_v37 = vld [vmem:[%s11993_s15 + $0xae4] ss:$16 sps:$4 sm:$0xff]  }
 0x1ed   : > { %6819 = vmatpush1.bf16.msra.mxu0 %v9193_v38  ;;  %v12157_v38 = vcombine.low %v12064_v26, %v12064_v26  ;;  %v12173_v26 = vld [vmem:[%s13138_s0 + $0x28] sm:$0xff] }
 0x1ee   : > { %6860 = vmatpush1.bf16.msra.mxu1 %v9196_v39  ;;  %6820 = vmatprep.subr.bf16.mxu0 %v9201_v40  ;;  %v12161_v39 = vcombine.low %v12069_v27, %v12069_v27  ;;  %v9281_v40 = vld [vmem:[%s11993_s15 + $0x8e0] ss:$16 sps:$4 sm:$0xff]   ;;  %v9289_v27 = vld [vmem:[%s11993_s15 + $0x8c4] ss:$16 sps:$4 sm:$0xff]  }
 0x1ef   : > { %6861 = vmatprep.subr.bf16.mxu1 %v9204_v41  ;;  %v9284_v41 = vld [vmem:[%s11993_s15 + $0xae0] ss:$16 sps:$4 sm:$0xff]  }
 0x1f1   : > { %6821 = vmatpush1.bf16.msra.mxu0 %v9199_v42  ;;  %v12168_v42 = vld [vmem:[%s13138_s0 + $0x20] sm:$0xff] }
 0x1f2   : > { %6862 = vmatpush1.bf16.msra.mxu1 %v9202_v43  ;;  %6822 = vmatprep.subr.bf16.mxu0 %v9207_v44  ;;  %v9292_v43 = vld [vmem:[%s11993_s15 + $0xac4] ss:$16 sps:$4 sm:$0xff]   ;;  %v12179_v44 = vcombine.high %v12168_v42, %v12168_v42 }
 0x1f3   : > { %6863 = vmatprep.subr.bf16.mxu1 %v9210_v45  ;;  %v12183_v45 = vcombine.high %v12173_v26, %v12173_v26 }
 0x1f5   : > { %6823 = vmatpush1.bf16.msra.mxu0 %v9205_v46  ;;  %v9287_v46 = vld [vmem:[%s11993_s15 + $0x8c0] ss:$16 sps:$4 sm:$0xff]  }
 0x1f6   : > { %6864 = vmatpush1.bf16.msra.mxu1 %v9208_v47  ;;  %6824 = vmatprep.subr.bf16.mxu0 %v9213_v48  ;;  %v9290_v47 = vld [vmem:[%s11993_s15 + $0xac0] ss:$16 sps:$4 sm:$0xff]   ;;  %v9295_v48 = vld [vmem:[%s11993_s15 + $0x8a4] ss:$16 sps:$4 sm:$0xff]  }
 0x1f7   : > { %6865 = vmatprep.subr.bf16.mxu1 %v9216_v49  ;;  %v9298_v49 = vld [vmem:[%s11993_s15 + $0xaa4] ss:$16 sps:$4 sm:$0xff]  }
 0x1f9   : > { %6825 = vmatpush1.bf16.msra.mxu0 %v9211_v50  ;;  %v9293_v50 = vld [vmem:[%s11993_s15 + $0x8a0] ss:$16 sps:$4 sm:$0xff]  }
 0x1fa   : > { %6866 = vmatpush1.bf16.msra.mxu1 %v9214_v51  ;;  %6826 = vmatprep.subr.bf16.mxu0 %v9219_v52  ;;  %v9296_v51 = vld [vmem:[%s11993_s15 + $0xaa0] ss:$16 sps:$4 sm:$0xff]   ;;  %v9301_v52 = vld [vmem:[%s11993_s15 + $0x884] ss:$16 sps:$4 sm:$0xff]  }
 0x1fb   : > { %6867 = vmatprep.subr.bf16.mxu1 %v9222_v53  ;;  %v9304_v53 = vld [vmem:[%s11993_s15 + $0xa84] ss:$16 sps:$4 sm:$0xff]  }
 0x1fd   : > { %6827 = vmatpush1.bf16.msra.mxu0 %v9217_v54  ;;  %v9299_v54 = vld [vmem:[%s11993_s15 + $0x880] ss:$16 sps:$4 sm:$0xff]  }
 0x1fe   : > { %6868 = vmatpush1.bf16.msra.mxu1 %v9220_v55  ;;  %6828 = vmatprep.subr.bf16.mxu0 %v9225_v56  ;;  %v9302_v55 = vld [vmem:[%s11993_s15 + $0xa80] ss:$16 sps:$4 sm:$0xff]   ;;  %v9307_v56 = vld [vmem:[%s11993_s15 + $0x864] ss:$16 sps:$4 sm:$0xff]  }
 0x1ff   : > { %6869 = vmatprep.subr.bf16.mxu1 %v9228_v57  ;;  %v9310_v57 = vld [vmem:[%s11993_s15 + $0xa64] ss:$16 sps:$4 sm:$0xff]  }
 0x201   : > { %6829 = vmatpush1.bf16.msra.mxu0 %v9223_v58  ;;  %v9305_v58 = vld [vmem:[%s11993_s15 + $0x860] ss:$16 sps:$4 sm:$0xff]  }
 0x202   : > { %6870 = vmatpush1.bf16.msra.mxu1 %v9226_v59  ;;  %6830 = vmatprep.subr.bf16.mxu0 %v9231_v60  ;;  %v9308_v59 = vld [vmem:[%s11993_s15 + $0xa60] ss:$16 sps:$4 sm:$0xff]   ;;  %v9313_v60 = vld [vmem:[%s11993_s15 + $0x844] ss:$16 sps:$4 sm:$0xff]  }
 0x203   : > { %6871 = vmatprep.subr.bf16.mxu1 %v9234_v61  ;;  %v9316_v61 = vld [vmem:[%s11993_s15 + $0xa44] ss:$16 sps:$4 sm:$0xff]  }
 0x205   : > { %6831 = vmatpush2.bf16.msra.mxu0 %v9229_v62  ;;  %v9311_v62 = vld [vmem:[%s11993_s15 + $0x840] ss:$16 sps:$4 sm:$0xff]  }
 0x206   : > { %6872 = vmatpush2.bf16.msra.mxu1 %v9232_v63  ;;  %6832 = vmatprep.subr.bf16.mxu0 %v9237_v0  ;;  %v9314_v63 = vld [vmem:[%s11993_s15 + $0xa40] ss:$16 sps:$4 sm:$0xff]   ;;  %v9319_v0 = vld [vmem:[%s11993_s15 + $0x824] ss:$16 sps:$4 sm:$0xff]  }
 0x207   : > { %6873 = vmatprep.subr.bf16.mxu1 %v9240_v1  ;;  %v9322_v1 = vld [vmem:[%s11993_s15 + $0xa24] ss:$16 sps:$4 sm:$0xff]  }
 0x209   : > { %6833 = vmatpush2.bf16.msra.mxu0 %v9235_v2  ;;  %v9317_v2 = vld [vmem:[%s11993_s15 + $0x820] ss:$16 sps:$4 sm:$0xff]  }
 0x20a   : > { %6874 = vmatpush2.bf16.msra.mxu1 %v9238_v3  ;;  %6834 = vmatprep.subr.bf16.mxu0 %v9243_v4  ;;  %v9320_v3 = vld [vmem:[%s11993_s15 + $0xa20] ss:$16 sps:$4 sm:$0xff]   ;;  %v9325_v4 = vld [vmem:[%s11993_s15 + $0x804] ss:$16 sps:$4 sm:$0xff]  }
 0x20b   : > { %6875 = vmatprep.subr.bf16.mxu1 %v9246_v5  ;;  %v9328_v5 = vld [vmem:[%s11993_s15 + $0xa04] ss:$16 sps:$4 sm:$0xff]  }
 0x20d   : > { %6835 = vmatpush2.bf16.msra.mxu0 %v9241_v6  ;;  %v9323_v6 = vld [vmem:[%s11993_s15 + $0x800] ss:$16 sps:$4 sm:$0xff]  }
 0x20e   : > { %6876 = vmatpush2.bf16.msra.mxu1 %v9244_v7  ;;  %6836 = vmatprep.subr.bf16.mxu0 %v9249_v8  ;;  %v9326_v7 = vld [vmem:[%s11993_s15 + $0xa00] ss:$16 sps:$4 sm:$0xff]   ;;  %v9331_v8 = vld [vmem:[%s11993_s15 + $0x9e4] ss:$16 sps:$4 sm:$0xff]  }
 0x20f   : > { %6877 = vmatprep.subr.bf16.mxu1 %v9252_v9  ;;  %v9334_v9 = vld [vmem:[%s11993_s15 + $0xbe4] ss:$16 sps:$4 sm:$0xff]  }
 0x211   : > { %6837 = vmatpush2.bf16.msra.mxu0 %v9247_v10  ;;  %v9329_v10 = vld [vmem:[%s11993_s15 + $0x9e0] ss:$16 sps:$4 sm:$0xff]  }
 0x212   : > { %6878 = vmatpush2.bf16.msra.mxu1 %v9250_v11  ;;  %6838 = vmatprep.subr.bf16.mxu0 %v9255_v12  ;;  %v9332_v11 = vld [vmem:[%s11993_s15 + $0xbe0] ss:$16 sps:$4 sm:$0xff]   ;;  %v9337_v12 = vld [vmem:[%s11993_s15 + $0x9c4] ss:$16 sps:$4 sm:$0xff]  }
 0x213   : > { %6879 = vmatprep.subr.bf16.mxu1 %v9258_v13  ;;  %v9340_v13 = vld [vmem:[%s11993_s15 + $0xbc4] ss:$16 sps:$4 sm:$0xff]  }
 0x215   : > { %6839 = vmatpush2.bf16.msra.mxu0 %v9253_v14  ;;  %v9335_v14 = vld [vmem:[%s11993_s15 + $0x9c0] ss:$16 sps:$4 sm:$0xff]  }
 0x216   : > { %6880 = vmatpush2.bf16.msra.mxu1 %v9256_v15  ;;  %6840 = vmatprep.subr.bf16.mxu0 %v9261_v20  ;;  %v9338_v15 = vld [vmem:[%s11993_s15 + $0xbc0] ss:$16 sps:$4 sm:$0xff]   ;;  %v9343_v20 = vld [vmem:[%s11993_s15 + $0x9a4] ss:$16 sps:$4 sm:$0xff]  }
 0x217   : > { %6881 = vmatprep.subr.bf16.mxu1 %v9264_v21  ;;  %v9346_v21 = vld [vmem:[%s11993_s15 + $0xba4] ss:$16 sps:$4 sm:$0xff]  }
 0x219   : > { %6841 = vmatpush2.bf16.msra.mxu0 %v9259_v22  ;;  %v9341_v22 = vld [vmem:[%s11993_s15 + $0x9a0] ss:$16 sps:$4 sm:$0xff]  }
 0x21a   : > { %6882 = vmatpush2.bf16.msra.mxu1 %v9262_v23  ;;  %6842 = vmatprep.subr.bf16.mxu0 %v9267_v24  ;;  %v9344_v23 = vld [vmem:[%s11993_s15 + $0xba0] ss:$16 sps:$4 sm:$0xff]   ;;  %v9349_v24 = vld [vmem:[%s11993_s15 + $0x984] ss:$16 sps:$4 sm:$0xff]  }
 0x21b   : > { %6883 = vmatprep.subr.bf16.mxu1 %v9270_v25  ;;  %v9352_v25 = vld [vmem:[%s11993_s15 + $0xb84] ss:$16 sps:$4 sm:$0xff]  }
 0x21d   : > { %6843 = vmatpush2.bf16.msra.mxu0 %v9265_v30  ;;  %v9347_v30 = vld [vmem:[%s11993_s15 + $0x980] ss:$16 sps:$4 sm:$0xff]  }
 0x21e   : > { %6884 = vmatpush2.bf16.msra.mxu1 %v9268_v31  ;;  %6844 = vmatprep.subr.bf16.mxu0 %v9273_v32  ;;  %v9350_v31 = vld [vmem:[%s11993_s15 + $0xb80] ss:$16 sps:$4 sm:$0xff]   ;;  %v9355_v32 = vld [vmem:[%s11993_s15 + $0x964] ss:$16 sps:$4 sm:$0xff]  }
 0x21f   : > { %6885 = vmatprep.subr.bf16.mxu1 %v9276_v33  ;;  %v9358_v33 = vld [vmem:[%s11993_s15 + $0xb64] ss:$16 sps:$4 sm:$0xff]  }
 0x221   : > { %6845 = vmatpush2.bf16.msra.mxu0 %v9271_v34  ;;  %v9353_v34 = vld [vmem:[%s11993_s15 + $0x960] ss:$16 sps:$4 sm:$0xff]  }
 0x222   : > { %6886 = vmatpush2.bf16.msra.mxu1 %v9274_v35  ;;  %6896 = vmatprep.subr.bf16.mxu0 %v9283_v36  ;;  %v9356_v35 = vld [vmem:[%s11993_s15 + $0xb60] ss:$16 sps:$4 sm:$0xff]   ;;  %v9361_v36 = vld [vmem:[%s11993_s15 + $0x944] ss:$16 sps:$4 sm:$0xff]  }
 0x223   : > { %6937 = vmatprep.subr.bf16.mxu1 %v9286_v37  ;;  %v9364_v37 = vld [vmem:[%s11993_s15 + $0xb44] ss:$16 sps:$4 sm:$0xff]  }
 0x224   : > { %6847 = vmatmul.mubr.bf16.vlgmr.msra.gmra.mxu0 %v12157_v38 }
 0x225   : > { %6888 = vmatmul.mubr.bf16.vlgmr.msra.gmra.mxu1 %v12161_v39  ;;  %6897 = vmatpush1.bf16.msra.mxu0 %v9281_v40  ;;  %v9359_v40 = vld [vmem:[%s11993_s15 + $0x940] ss:$16 sps:$4 sm:$0xff]  }
 0x226   : > { %6938 = vmatpush1.bf16.msra.mxu1 %v9284_v41  ;;  %6898 = vmatprep.subr.bf16.mxu0 %v9289_v27  ;;  %v9362_v41 = vld [vmem:[%s11993_s15 + $0xb40] ss:$16 sps:$4 sm:$0xff]   ;;  %v9367_v27 = vld [vmem:[%s11993_s15 + $0x924] ss:$16 sps:$4 sm:$0xff]  }
 0x227   : > { %6939 = vmatprep.subr.bf16.mxu1 %v9292_v43  ;;  %6928 = vmatprep.mubr.bf16.mxu0 %v12179_v44  ;;  %v9370_v43 = vld [vmem:[%s11993_s15 + $0xb24] ss:$16 sps:$4 sm:$0xff]  }
 0x228   : > { %6969 = vmatprep.mubr.bf16.mxu1 %v12183_v45 }
 0x229   : > { %6899 = vmatpush1.bf16.msra.mxu0 %v9287_v46  ;;  %v9365_v46 = vld [vmem:[%s11993_s15 + $0x920] ss:$16 sps:$4 sm:$0xff]  }
 0x22a   : > { %6940 = vmatpush1.bf16.msra.mxu1 %v9290_v47  ;;  %6900 = vmatprep.subr.bf16.mxu0 %v9295_v48  ;;  %v9368_v47 = vld [vmem:[%s11993_s15 + $0xb20] ss:$16 sps:$4 sm:$0xff]   ;;  %v9373_v48 = vld [vmem:[%s11993_s15 + $0x904] ss:$16 sps:$4 sm:$0xff]  }
 0x22b   : > { %6941 = vmatprep.subr.bf16.mxu1 %v9298_v49  ;;  %v9376_v49 = vld [vmem:[%s11993_s15 + $0xb04] ss:$16 sps:$4 sm:$0xff]  }
 0x22d   : > { %6901 = vmatpush1.bf16.msra.mxu0 %v9293_v50  ;;  %v9371_v50 = vld [vmem:[%s11993_s15 + $0x900] ss:$16 sps:$4 sm:$0xff]  }
 0x22e   : > { %6942 = vmatpush1.bf16.msra.mxu1 %v9296_v51  ;;  %6902 = vmatprep.subr.bf16.mxu0 %v9301_v52  ;;  %v9374_v51 = vld [vmem:[%s11993_s15 + $0xb00] ss:$16 sps:$4 sm:$0xff]   ;;  %v9383_v52 = vld [vmem:[%s11993_s15 + $0xce4] ss:$16 sps:$4 sm:$0xff]  }
 0x22f   : > { %6943 = vmatprep.subr.bf16.mxu1 %v9304_v53  ;;  %v9386_v53 = vld [vmem:[%s11993_s15 + $0xee4] ss:$16 sps:$4 sm:$0xff]  }
 0x231   : > { %6903 = vmatpush1.bf16.msra.mxu0 %v9299_v54  ;;  %v9381_v54 = vld [vmem:[%s11993_s15 + $0xce0] ss:$16 sps:$4 sm:$0xff]  }
 0x232   : > { %6944 = vmatpush1.bf16.msra.mxu1 %v9302_v55  ;;  %6904 = vmatprep.subr.bf16.mxu0 %v9307_v56  ;;  %v12253_v55 = vld [vmem:[%s13138_s0 + $0x30] sm:$0xff]  ;;  %v12257_v56 = vcombine.low %v12168_v42, %v12168_v42 }
 0x233   : > { %6945 = vmatprep.subr.bf16.mxu1 %v9310_v57  ;;  %v12261_v57 = vcombine.low %v12173_v26, %v12173_v26  ;;  %v9392_v42 = vld [vmem:[%s11993_s15 + $0xec4] ss:$16 sps:$4 sm:$0xff]   ;;  %v12273_v26 = vcombine.high %v12253_v55, %v12253_v55 }
 0x235   : > { %6905 = vmatpush1.bf16.msra.mxu0 %v9305_v58  ;;  %v12266_v58 = vld [vmem:[%s13138_s0 + $0x38] sm:$0xff] }
 0x236   : > { %6946 = vmatpush1.bf16.msra.mxu1 %v9308_v59  ;;  %6906 = vmatprep.subr.bf16.mxu0 %v9313_v60  ;;  %v9384_v59 = vld [vmem:[%s11993_s15 + $0xee0] ss:$16 sps:$4 sm:$0xff]   ;;  %v9389_v60 = vld [vmem:[%s11993_s15 + $0xcc4] ss:$16 sps:$4 sm:$0xff]  }
 0x237   : > { %6947 = vmatprep.subr.bf16.mxu1 %v9316_v61  ;;  %v12277_v61 = vcombine.high %v12266_v58, %v12266_v58 }
 0x239   : > { %6907 = vmatpush1.bf16.msra.mxu0 %v9311_v62  ;;  %v9387_v62 = vld [vmem:[%s11993_s15 + $0xcc0] ss:$16 sps:$4 sm:$0xff]  }
 0x23a   : > { %6948 = vmatpush1.bf16.msra.mxu1 %v9314_v63  ;;  %6908 = vmatprep.subr.bf16.mxu0 %v9319_v0  ;;  %v9390_v63 = vld [vmem:[%s11993_s15 + $0xec0] ss:$16 sps:$4 sm:$0xff]   ;;  %v9395_v0 = vld [vmem:[%s11993_s15 + $0xca4] ss:$16 sps:$4 sm:$0xff]  }
 0x23b   : > { %6949 = vmatprep.subr.bf16.mxu1 %v9322_v1  ;;  %v9398_v1 = vld [vmem:[%s11993_s15 + $0xea4] ss:$16 sps:$4 sm:$0xff]  }
 0x23d   : > { %6909 = vmatpush1.bf16.msra.mxu0 %v9317_v2  ;;  %v9393_v2 = vld [vmem:[%s11993_s15 + $0xca0] ss:$16 sps:$4 sm:$0xff]  }
 0x23e   : > { %6950 = vmatpush1.bf16.msra.mxu1 %v9320_v3  ;;  %6910 = vmatprep.subr.bf16.mxu0 %v9325_v4  ;;  %v9396_v3 = vld [vmem:[%s11993_s15 + $0xea0] ss:$16 sps:$4 sm:$0xff]   ;;  %v9401_v4 = vld [vmem:[%s11993_s15 + $0xc84] ss:$16 sps:$4 sm:$0xff]  }
 0x23f   : > { %6951 = vmatprep.subr.bf16.mxu1 %v9328_v5  ;;  %v9404_v5 = vld [vmem:[%s11993_s15 + $0xe84] ss:$16 sps:$4 sm:$0xff]  }
 0x241   : > { %6911 = vmatpush1.bf16.msra.mxu0 %v9323_v6  ;;  %v9399_v6 = vld [vmem:[%s11993_s15 + $0xc80] ss:$16 sps:$4 sm:$0xff]  }
 0x242   : > { %6952 = vmatpush1.bf16.msra.mxu1 %v9326_v7  ;;  %6912 = vmatprep.subr.bf16.mxu0 %v9331_v8  ;;  %v9402_v7 = vld [vmem:[%s11993_s15 + $0xe80] ss:$16 sps:$4 sm:$0xff]   ;;  %v9407_v8 = vld [vmem:[%s11993_s15 + $0xc64] ss:$16 sps:$4 sm:$0xff]  }
 0x243   : > { %6953 = vmatprep.subr.bf16.mxu1 %v9334_v9  ;;  %v9410_v9 = vld [vmem:[%s11993_s15 + $0xe64] ss:$16 sps:$4 sm:$0xff]  }
 0x245   : > { %6913 = vmatpush2.bf16.msra.mxu0 %v9329_v10  ;;  %v9405_v10 = vld [vmem:[%s11993_s15 + $0xc60] ss:$16 sps:$4 sm:$0xff]  }
 0x246   : > { %6954 = vmatpush2.bf16.msra.mxu1 %v9332_v11  ;;  %6914 = vmatprep.subr.bf16.mxu0 %v9337_v12  ;;  %v9408_v11 = vld [vmem:[%s11993_s15 + $0xe60] ss:$16 sps:$4 sm:$0xff]   ;;  %v9413_v12 = vld [vmem:[%s11993_s15 + $0xc44] ss:$16 sps:$4 sm:$0xff]  }
 0x247   : > { %6955 = vmatprep.subr.bf16.mxu1 %v9340_v13  ;;  %v9416_v13 = vld [vmem:[%s11993_s15 + $0xe44] ss:$16 sps:$4 sm:$0xff]  }
 0x249   : > { %6915 = vmatpush2.bf16.msra.mxu0 %v9335_v14  ;;  %v9411_v14 = vld [vmem:[%s11993_s15 + $0xc40] ss:$16 sps:$4 sm:$0xff]  }
 0x24a   : > { %6956 = vmatpush2.bf16.msra.mxu1 %v9338_v15  ;;  %6916 = vmatprep.subr.bf16.mxu0 %v9343_v20  ;;  %v9414_v15 = vld [vmem:[%s11993_s15 + $0xe40] ss:$16 sps:$4 sm:$0xff]   ;;  %v9419_v20 = vld [vmem:[%s11993_s15 + $0xc24] ss:$16 sps:$4 sm:$0xff]  }
 0x24b   : > { %6957 = vmatprep.subr.bf16.mxu1 %v9346_v21  ;;  %v9422_v21 = vld [vmem:[%s11993_s15 + $0xe24] ss:$16 sps:$4 sm:$0xff]  }
 0x24d   : > { %6917 = vmatpush2.bf16.msra.mxu0 %v9341_v22  ;;  %v9417_v22 = vld [vmem:[%s11993_s15 + $0xc20] ss:$16 sps:$4 sm:$0xff]  }
 0x24e   : > { %6958 = vmatpush2.bf16.msra.mxu1 %v9344_v23  ;;  %6918 = vmatprep.subr.bf16.mxu0 %v9349_v24  ;;  %v9420_v23 = vld [vmem:[%s11993_s15 + $0xe20] ss:$16 sps:$4 sm:$0xff]   ;;  %v9425_v24 = vld [vmem:[%s11993_s15 + $0xc04] ss:$16 sps:$4 sm:$0xff]  }
 0x24f   : > { %6959 = vmatprep.subr.bf16.mxu1 %v9352_v25  ;;  %v9428_v25 = vld [vmem:[%s11993_s15 + $0xe04] ss:$16 sps:$4 sm:$0xff]  }
 0x251   : > { %6919 = vmatpush2.bf16.msra.mxu0 %v9347_v30  ;;  %v9423_v30 = vld [vmem:[%s11993_s15 + $0xc00] ss:$16 sps:$4 sm:$0xff]  }
 0x252   : > { %6960 = vmatpush2.bf16.msra.mxu1 %v9350_v31  ;;  %6920 = vmatprep.subr.bf16.mxu0 %v9355_v32  ;;  %v9426_v31 = vld [vmem:[%s11993_s15 + $0xe00] ss:$16 sps:$4 sm:$0xff]   ;;  %v9431_v32 = vld [vmem:[%s11993_s15 + $0xde4] ss:$16 sps:$4 sm:$0xff]  }
 0x253   : > { %6961 = vmatprep.subr.bf16.mxu1 %v9358_v33  ;;  %v9434_v33 = vld [vmem:[%s11993_s15 + $0xfe4] ss:$16 sps:$4 sm:$0xff]  }
 0x255   : > { %6921 = vmatpush2.bf16.msra.mxu0 %v9353_v34  ;;  %v9429_v34 = vld [vmem:[%s11993_s15 + $0xde0] ss:$16 sps:$4 sm:$0xff]  }
 0x256   : > { %6962 = vmatpush2.bf16.msra.mxu1 %v9356_v35  ;;  %6922 = vmatprep.subr.bf16.mxu0 %v9361_v36  ;;  %v9432_v35 = vld [vmem:[%s11993_s15 + $0xfe0] ss:$16 sps:$4 sm:$0xff]   ;;  %v9437_v36 = vld [vmem:[%s11993_s15 + $0xdc4] ss:$16 sps:$4 sm:$0xff]  }
 0x257   : > { %6963 = vmatprep.subr.bf16.mxu1 %v9364_v37  ;;  %v9440_v37 = vld [vmem:[%s11993_s15 + $0xfc4] ss:$16 sps:$4 sm:$0xff]  }
 0x259   : > { %6923 = vmatpush2.bf16.msra.mxu0 %v9359_v40  ;;  %v9435_v40 = vld [vmem:[%s11993_s15 + $0xdc0] ss:$16 sps:$4 sm:$0xff]  }
 0x25a   : > { %6964 = vmatpush2.bf16.msra.mxu1 %v9362_v41  ;;  %6924 = vmatprep.subr.bf16.mxu0 %v9367_v27  ;;  %v9438_v41 = vld [vmem:[%s11993_s15 + $0xfc0] ss:$16 sps:$4 sm:$0xff]   ;;  %v9443_v27 = vld [vmem:[%s11993_s15 + $0xda4] ss:$16 sps:$4 sm:$0xff]  }
 0x25b   : > { %6965 = vmatprep.subr.bf16.mxu1 %v9370_v43  ;;  %v9446_v43 = vld [vmem:[%s11993_s15 + $0xfa4] ss:$16 sps:$4 sm:$0xff]  }
 0x25d   : > { %6925 = vmatpush2.bf16.msra.mxu0 %v9365_v46  ;;  %v9441_v46 = vld [vmem:[%s11993_s15 + $0xda0] ss:$16 sps:$4 sm:$0xff]  }
 0x25e   : > { %6966 = vmatpush2.bf16.msra.mxu1 %v9368_v47  ;;  %6926 = vmatprep.subr.bf16.mxu0 %v9373_v48  ;;  %v9444_v47 = vld [vmem:[%s11993_s15 + $0xfa0] ss:$16 sps:$4 sm:$0xff]   ;;  %v9449_v48 = vld [vmem:[%s11993_s15 + $0xd84] ss:$16 sps:$4 sm:$0xff]  }
 0x25f   : > { %6967 = vmatprep.subr.bf16.mxu1 %v9376_v49  ;;  %v9452_v49 = vld [vmem:[%s11993_s15 + $0xf84] ss:$16 sps:$4 sm:$0xff]  }
 0x261   : > { %6927 = vmatpush2.bf16.msra.mxu0 %v9371_v50  ;;  %v9447_v50 = vld [vmem:[%s11993_s15 + $0xd80] ss:$16 sps:$4 sm:$0xff]  }
 0x262   : > { %6968 = vmatpush2.bf16.msra.mxu1 %v9374_v51  ;;  %6978 = vmatprep.subr.bf16.mxu0 %v9383_v52  ;;  %v9450_v51 = vld [vmem:[%s11993_s15 + $0xf80] ss:$16 sps:$4 sm:$0xff]   ;;  %v9455_v52 = vld [vmem:[%s11993_s15 + $0xd64] ss:$16 sps:$4 sm:$0xff]  }
 0x263   : > { %7019 = vmatprep.subr.bf16.mxu1 %v9386_v53  ;;  %v9458_v53 = vld [vmem:[%s11993_s15 + $0xf64] ss:$16 sps:$4 sm:$0xff]  }
 0x264   : > { %6929 = vmatmul.mubr.bf16.vlgmr.msra.gmra.mxu0 %v12257_v56 }
 0x265   : > { %6970 = vmatmul.mubr.bf16.vlgmr.msra.gmra.mxu1 %v12261_v57  ;;  %6979 = vmatpush1.bf16.msra.mxu0 %v9381_v54  ;;  %v9453_v54 = vld [vmem:[%s11993_s15 + $0xd60] ss:$16 sps:$4 sm:$0xff]  }
 0x266   : > { %7020 = vmatpush1.bf16.msra.mxu1 %v9384_v59  ;;  %6980 = vmatprep.subr.bf16.mxu0 %v9389_v60  ;;  %v9456_v59 = vld [vmem:[%s11993_s15 + $0xf60] ss:$16 sps:$4 sm:$0xff]   ;;  %v9461_v60 = vld [vmem:[%s11993_s15 + $0xd44] ss:$16 sps:$4 sm:$0xff]  }
 0x267   : > { %7021 = vmatprep.subr.bf16.mxu1 %v9392_v42  ;;  %7010 = vmatprep.mubr.bf16.mxu0 %v12273_v26  ;;  %v9464_v42 = vld [vmem:[%s11993_s15 + $0xf44] ss:$16 sps:$4 sm:$0xff]  }
 0x268   : > { %7051 = vmatprep.mubr.bf16.mxu1 %v12277_v61 }
 0x269   : > { %6981 = vmatpush1.bf16.msra.mxu0 %v9387_v62  ;;  %v9459_v62 = vld [vmem:[%s11993_s15 + $0xd40] ss:$16 sps:$4 sm:$0xff]  }
 0x26a   : > { %7022 = vmatpush1.bf16.msra.mxu1 %v9390_v63  ;;  %6982 = vmatprep.subr.bf16.mxu0 %v9395_v0  ;;  %v9462_v63 = vld [vmem:[%s11993_s15 + $0xf40] ss:$16 sps:$4 sm:$0xff]   ;;  %v9467_v0 = vld [vmem:[%s11993_s15 + $0xd24] ss:$16 sps:$4 sm:$0xff]  }
 0x26b   : > { %7023 = vmatprep.subr.bf16.mxu1 %v9398_v1  ;;  %v2701_v1 = vlaneseq }
 0x26d   : > { %6983 = vmatpush1.bf16.msra.mxu0 %v9393_v2  ;;  %v9470_v2 = vld [vmem:[%s11993_s15 + $0xf24] ss:$16 sps:$4 sm:$0xff]  }
 0x26e   : > { %7024 = vmatpush1.bf16.msra.mxu1 %v9396_v3  ;;  %6984 = vmatprep.subr.bf16.mxu0 %v9401_v4  ;;  %v9465_v3 = vld [vmem:[%s11993_s15 + $0xd20] ss:$16 sps:$4 sm:$0xff]  }
 0x26f   : > { %7025 = vmatprep.subr.bf16.mxu1 %v9404_v5  ;;  %v9468_v4 = vld [vmem:[%s11993_s15 + $0xf20] ss:$16 sps:$4 sm:$0xff]   ;;  %v9473_v5 = vld [vmem:[%s11993_s15 + $0xd04] ss:$16 sps:$4 sm:$0xff]  }
 0x271   : > { %6985 = vmatpush1.bf16.msra.mxu0 %v9399_v6  ;;  %v12343_v6 = vshrl.u32 %v2701_v1, 7  ;;  %v9505_v1 = vld [vmem:[%s11993_s15 + $0x1060] ss:$16 sps:$4 sm:$0xff]  }
 0x272   : > { %7026 = vmatpush1.bf16.msra.mxu1 %v9402_v7  ;;  %6986 = vmatprep.subr.bf16.mxu0 %v9407_v8  ;;  %v9476_v7 = vld [vmem:[%s11993_s15 + $0xf04] ss:$16 sps:$4 sm:$0xff]   ;;  %v9471_v8 = vld [vmem:[%s11993_s15 + $0xd00] ss:$16 sps:$4 sm:$0xff]  }
 0x273   : > { %7027 = vmatprep.subr.bf16.mxu1 %v9410_v9  ;;  %v9474_v9 = vld [vmem:[%s11993_s15 + $0xf00] ss:$16 sps:$4 sm:$0xff]  }
 0x275   : > { %6987 = vmatpush1.bf16.msra.mxu0 %v9405_v10  ;;  %v2699_v10 = vld [vmem:[%s12349_s12] sm:$0xf] }
 0x276   : > { %7028 = vmatpush1.bf16.msra.mxu1 %v9408_v11  ;;  %6988 = vmatprep.subr.bf16.mxu0 %v9413_v12  ;;  %v2703_v11 = vsub.s32 0, %v12343_v6  ;;  %v9483_v12 = vld [vmem:[%s11993_s15 + $0x10e4] ss:$16 sps:$4 sm:$0xff]  }
 0x277   : > { %7029 = vmatprep.subr.bf16.mxu1 %v9416_v13  ;;  %v9486_v13 = vld [vmem:[%s11993_s15 + $0x12e4] ss:$16 sps:$4 sm:$0xff]  }
 0x279   : > { %6989 = vmatpush1.bf16.msra.mxu0 %v9411_v14  ;;  %v9481_v14 = vld [vmem:[%s11993_s15 + $0x10e0] ss:$16 sps:$4 sm:$0xff]  }
 0x27a   : > { %7030 = vmatpush1.bf16.msra.mxu1 %v9414_v15  ;;  %6990 = vmatprep.subr.bf16.mxu0 %v9419_v20  ;;  %v2707_v15 = vsub.s32 1, %v12343_v6  ;;  %v12361_v20 = vcombine.low %v12253_v55, %v12253_v55  ;;  %v9484_v55 = vld [vmem:[%s11993_s15 + $0x12e0] ss:$16 sps:$4 sm:$0xff]  }
 0x27b   : > { %7031 = vmatprep.subr.bf16.mxu1 %v9422_v21  ;;  %v12365_v21 = vcombine.low %v12266_v58, %v12266_v58  ;;  %v9492_v58 = vld [vmem:[%s11993_s15 + $0x12c4] ss:$16 sps:$4 sm:$0xff]  }
 0x27d   : > { %6991 = vmatpush1.bf16.msra.mxu0 %v9417_v22  ;;  %v12370_v22 = vld [vmem:[%s13138_s0 + $0x40] sm:$0xff] }
 0x27e   : > { %7032 = vmatpush1.bf16.msra.mxu1 %v9420_v23  ;;  %6992 = vmatprep.subr.bf16.mxu0 %v9425_v24  ;;  %v12375_v23 = vld [vmem:[%s13138_s0 + $0x48] sm:$0xff]  ;;  %v2704_v24 = vrot.slane %v2699_v10, %v2703_v11  ;;  %v9520_v11 = vld [vmem:[%s11993_s15 + $0x1220] ss:$16 sps:$4 sm:$0xff]  }
 0x27f   : > { %7033 = vmatprep.subr.bf16.mxu1 %v9428_v25  ;;  %v9489_v25 = vld [vmem:[%s11993_s15 + $0x10c4] ss:$16 sps:$4 sm:$0xff]  }
 0x281   : > { %6993 = vmatpush1.bf16.msra.mxu0 %v9423_v30  ;;  %v2708_v30 = vrot.slane %v2699_v10, %v2707_v15  ;;  %v9517_v10 = vld [vmem:[%s11993_s15 + $0x1020] ss:$16 sps:$4 sm:$0xff]  }
 0x282   : > { %7034 = vmatpush1.bf16.msra.mxu1 %v9426_v31  ;;  %6994 = vmatprep.subr.bf16.mxu0 %v9431_v32  ;;  %v12382_v31 = vcombine.high %v12370_v22, %v12370_v22  ;;  %v12386_v32 = vcombine.high %v12375_v23, %v12375_v23  ;;  %v9526_v15 = vld [vmem:[%s11993_s15 + $0x1200] ss:$16 sps:$4 sm:$0xff]  }
 0x283   : > { %7035 = vmatprep.subr.bf16.mxu1 %v9434_v33 }
 0x285   : > { %6995 = vmatpush2.bf16.msra.mxu0 %v9429_v34 }
 0x286   : > { %7036 = vmatpush2.bf16.msra.mxu1 %v9432_v35  ;;  %6996 = vmatprep.subr.bf16.mxu0 %v9437_v36  ;;  %v9487_v35 = vld [vmem:[%s11993_s15 + $0x10c0] ss:$16 sps:$4 sm:$0xff]  }
 0x287   : > { %7037 = vmatprep.subr.bf16.mxu1 %v9440_v37  ;;  %v9490_v37 = vld [vmem:[%s11993_s15 + $0x12c0] ss:$16 sps:$4 sm:$0xff]  }
 0x289   : > { %6997 = vmatpush2.bf16.msra.mxu0 %v9435_v40 }
 0x28a   : > { %7038 = vmatpush2.bf16.msra.mxu1 %v9438_v41  ;;  %6998 = vmatprep.subr.bf16.mxu0 %v9443_v27  ;;  %v9495_v27 = vld [vmem:[%s11993_s15 + $0x10a4] ss:$16 sps:$4 sm:$0xff]  }
 0x28b   : > { %7039 = vmatprep.subr.bf16.mxu1 %v9446_v43  ;;  %v9498_v43 = vld [vmem:[%s11993_s15 + $0x12a4] ss:$16 sps:$4 sm:$0xff]  }
 0x28d   : > { %6999 = vmatpush2.bf16.msra.mxu0 %v9441_v46 }
 0x28e   : > { %7040 = vmatpush2.bf16.msra.mxu1 %v9444_v47  ;;  %7000 = vmatprep.subr.bf16.mxu0 %v9449_v48 }
 0x28f   : > { %7041 = vmatprep.subr.bf16.mxu1 %v9452_v49 }
 0x291   : > { %7001 = vmatpush2.bf16.msra.mxu0 %v9447_v50  ;;  %v9493_v50 = vld [vmem:[%s11993_s15 + $0x10a0] ss:$16 sps:$4 sm:$0xff]  }
 0x292   : > { %7042 = vmatpush2.bf16.msra.mxu1 %v9450_v51  ;;  %7002 = vmatprep.subr.bf16.mxu0 %v9455_v52  ;;  %v9496_v52 = vld [vmem:[%s11993_s15 + $0x12a0] ss:$16 sps:$4 sm:$0xff]  }
 0x293   : > { %7043 = vmatprep.subr.bf16.mxu1 %v9458_v53 }
 0x295   : > { %7003 = vmatpush2.bf16.msra.mxu0 %v9453_v54 }
 0x296   : > { %7044 = vmatpush2.bf16.msra.mxu1 %v9456_v59  ;;  %7004 = vmatprep.subr.bf16.mxu0 %v9461_v60  ;;  %v9501_v59 = vld [vmem:[%s11993_s15 + $0x1084] ss:$16 sps:$4 sm:$0xff]  }
 0x297   : > { %7045 = vmatprep.subr.bf16.mxu1 %v9464_v42  ;;  %v9504_v60 = vld [vmem:[%s11993_s15 + $0x1284] ss:$16 sps:$4 sm:$0xff]   ;;  %v9499_v42 = vld [vmem:[%s11993_s15 + $0x1080] ss:$16 sps:$4 sm:$0xff]  }
 0x299   : > { %7005 = vmatpush2.bf16.msra.mxu0 %v9459_v62  ;;  %v9502_v62 = vld [vmem:[%s11993_s15 + $0x1280] ss:$16 sps:$4 sm:$0xff]  }
 0x29a   : > { %7046 = vmatpush2.bf16.msra.mxu1 %v9462_v63  ;;  %7006 = vmatprep.subr.bf16.mxu0 %v9467_v0  ;;  %v9507_v63 = vld [vmem:[%s11993_s15 + $0x1064] ss:$16 sps:$4 sm:$0xff]  }
 0x29b   : > { %7047 = vmatprep.subr.bf16.mxu1 %v9470_v2  ;;  %v9510_v0 = vld [vmem:[%s11993_s15 + $0x1264] ss:$16 sps:$4 sm:$0xff]   ;;  %v9508_v2 = vld [vmem:[%s11993_s15 + $0x1260] ss:$16 sps:$4 sm:$0xff]  }
 0x29d   : > { %7007 = vmatpush2.bf16.msra.mxu0 %v9465_v3  ;;  %v9513_v3 = vld [vmem:[%s11993_s15 + $0x1044] ss:$16 sps:$4 sm:$0xff]  }
 0x29e   : > { %7048 = vmatpush2.bf16.msra.mxu1 %v9468_v4  ;;  %7008 = vmatprep.subr.bf16.mxu0 %v9473_v5  ;;  %v9516_v4 = vld [vmem:[%s11993_s15 + $0x1244] ss:$16 sps:$4 sm:$0xff]   ;;  %v9511_v5 = vld [vmem:[%s11993_s15 + $0x1040] ss:$16 sps:$4 sm:$0xff]  }
 0x29f   : > { %7049 = vmatprep.subr.bf16.mxu1 %v9476_v7  ;;  %v9514_v7 = vld [vmem:[%s11993_s15 + $0x1240] ss:$16 sps:$4 sm:$0xff]  }
 0x2a1   : > { %7009 = vmatpush2.bf16.msra.mxu0 %v9471_v8  ;;  %v9519_v8 = vld [vmem:[%s11993_s15 + $0x1024] ss:$16 sps:$4 sm:$0xff]  }
 0x2a2   : > { %7050 = vmatpush2.bf16.msra.mxu1 %v9474_v9  ;;  %7060 = vmatprep.subr.bf16.mxu0 %v9483_v12  ;;  %v9522_v9 = vld [vmem:[%s11993_s15 + $0x1224] ss:$16 sps:$4 sm:$0xff]  }
 0x2a3   : > { %7101 = vmatprep.subr.bf16.mxu1 %v9486_v13  ;;  %v9525_v12 = vld [vmem:[%s11993_s15 + $0x1004] ss:$16 sps:$4 sm:$0xff]  }
 0x2a4   : > { %v6766_v33 = vpop.f32.mrf.mxu0  ;;  %7011 = vmatmul.mubr.bf16.vlgmr.msra.gmra.mxu0 %v12361_v20  ;;  %v9528_v13 = vld [vmem:[%s11993_s15 + $0x1204] ss:$16 sps:$4 sm:$0xff]  }
 0x2a5   : > { %v6807_v34 = vpop.f32.mrf.mxu1  ;;  %7052 = vmatmul.mubr.bf16.vlgmr.msra.gmra.mxu1 %v12365_v21  ;;  %v6767_v36 = vadd.f32 %v6766_v33, %v2704_v24  ;;  %7061 = vmatpush1.bf16.msra.mxu0 %v9481_v14  ;;  %v9523_v14 = vld [vmem:[%s11993_s15 + $0x1000] ss:$16 sps:$4 sm:$0xff]   ;;  %v9531_v24 = vld [vmem:[%s11993_s15 + $0x11e4] ss:$16 sps:$4 sm:$0xff]  }
 0x2a6   : > { %7102 = vmatpush1.bf16.msra.mxu1 %v9484_v55  ;;  %v6768_v40 = vpop.f32.mrf.mxu0  ;;  %7062 = vmatprep.subr.bf16.mxu0 %v9489_v25  ;;  %v9534_v55 = vld [vmem:[%s11993_s15 + $0x13e4] ss:$16 sps:$4 sm:$0xff]   ;;  %v9529_v25 = vld [vmem:[%s11993_s15 + $0x11e0] ss:$16 sps:$4 sm:$0xff]  }
 0x2a7   : > { %v6809_v41 = vpop.f32.mrf.mxu1  ;;  %7103 = vmatprep.subr.bf16.mxu1 %v9492_v58  ;;  %v12394_v46 = vadd.f32 %v6807_v34, %v6767_v36  ;;  %v6769_v47 = vadd.f32 %v6768_v40, %v2708_v30  ;;  %7092 = vmatprep.mubr.bf16.mxu0 %v12382_v31  ;;  %v9532_v58 = vld [vmem:[%s11993_s15 + $0x13e0] ss:$16 sps:$4 sm:$0xff]   ;;  %v9537_v30 = vld [vmem:[%s11993_s15 + $0x11c4] ss:$16 sps:$4 sm:$0xff]  }
 0x2a8   : > { %7133 = vmatprep.mubr.bf16.mxu1 %v12386_v32  ;;  %v6770_v48 = vpop.f32.mrf.mxu0  ;;  %v9540_v33 = vld [vmem:[%s11993_s15 + $0x13c4] ss:$16 sps:$4 sm:$0xff]   ;;  %v9535_v34 = vld [vmem:[%s11993_s15 + $0x11c0] ss:$16 sps:$4 sm:$0xff]  }
 0x2a9   : > { %v6811_v49 = vpop.f32.mrf.mxu1  ;;  %v12399_v51 = vadd.f32 %v6809_v41, %v6769_v47  ;;  %7063 = vmatpush1.bf16.msra.mxu0 %v9487_v35  ;;  %v9538_v35 = vld [vmem:[%s11993_s15 + $0x13c0] ss:$16 sps:$4 sm:$0xff]   ;;  %v9543_v36 = vld [vmem:[%s11993_s15 + $0x11a4] ss:$16 sps:$4 sm:$0xff]  }
 0x2aa   : > { %7104 = vmatpush1.bf16.msra.mxu1 %v9490_v37  ;;  %v6771_v53 = vpop.f32.mrf.mxu0  ;;  %7064 = vmatprep.subr.bf16.mxu0 %v9495_v27  ;;  %v9546_v37 = vld [vmem:[%s11993_s15 + $0x13a4] ss:$16 sps:$4 sm:$0xff]   ;;  %v9541_v40 = vld [vmem:[%s11993_s15 + $0x11a0] ss:$16 sps:$4 sm:$0xff]  }
 0x2ab   : > { %v6812_v54 = vpop.f32.mrf.mxu1  ;;  %7105 = vmatprep.subr.bf16.mxu1 %v9498_v43  ;;  %v9544_v41 = vld [vmem:[%s11993_s15 + $0x13a0] ss:$16 sps:$4 sm:$0xff]   ;;  %v9549_v27 = vld [vmem:[%s11993_s15 + $0x1184] ss:$16 sps:$4 sm:$0xff]  }
 0x2ac   : > { %v9552_v43 = vld [vmem:[%s11993_s15 + $0x1384] ss:$16 sps:$4 sm:$0xff]   ;;  %v9547_v47 = vld [vmem:[%s11993_s15 + $0x1180] ss:$16 sps:$4 sm:$0xff]  }
 0x2ad   : > { %7065 = vmatpush1.bf16.msra.mxu0 %v9493_v50  ;;  %v9550_v48 = vld [vmem:[%s11993_s15 + $0x1380] ss:$16 sps:$4 sm:$0xff]   ;;  %v9555_v49 = vld [vmem:[%s11993_s15 + $0x1164] ss:$16 sps:$4 sm:$0xff]  }
 0x2ae   : > { %7106 = vmatpush1.bf16.msra.mxu1 %v9496_v52  ;;  %7066 = vmatprep.subr.bf16.mxu0 %v9501_v59  ;;  %v9558_v50 = vld [vmem:[%s11993_s15 + $0x1364] ss:$16 sps:$4 sm:$0xff]   ;;  %v9553_v52 = vld [vmem:[%s11993_s15 + $0x1160] ss:$16 sps:$4 sm:$0xff]  }
 0x2af   : > { %7107 = vmatprep.subr.bf16.mxu1 %v9504_v60  ;;  %v9556_v53 = vld [vmem:[%s11993_s15 + $0x1360] ss:$16 sps:$4 sm:$0xff]   ;;  %v9561_v54 = vld [vmem:[%s11993_s15 + $0x1144] ss:$16 sps:$4 sm:$0xff]  }
 0x2b0   : > { %v9564_v59 = vld [vmem:[%s11993_s15 + $0x1344] ss:$16 sps:$4 sm:$0xff]   ;;  %v9559_v60 = vld [vmem:[%s11993_s15 + $0x1140] ss:$16 sps:$4 sm:$0xff]  }
 0x2b1   : > { %7067 = vmatpush1.bf16.msra.mxu0 %v9499_v42  ;;  %v9562_v42 = vld [vmem:[%s11993_s15 + $0x1340] ss:$16 sps:$4 sm:$0xff]  }
 0x2b2   : > { %7108 = vmatpush1.bf16.msra.mxu1 %v9502_v62  ;;  %7068 = vmatprep.subr.bf16.mxu0 %v9507_v63  ;;  %v9567_v62 = vld [vmem:[%s11993_s15 + $0x1124] ss:$16 sps:$4 sm:$0xff]  }
 0x2b3   : > { %7109 = vmatprep.subr.bf16.mxu1 %v9510_v0  ;;  %v9570_v63 = vld [vmem:[%s11993_s15 + $0x1324] ss:$16 sps:$4 sm:$0xff]   ;;  %v9565_v0 = vld [vmem:[%s11993_s15 + $0x1120] ss:$16 sps:$4 sm:$0xff]  }
 0x2b5   : > { %7069 = vmatpush1.bf16.msra.mxu0 %v9505_v1  ;;  %v9568_v1 = vld [vmem:[%s11993_s15 + $0x1320] ss:$16 sps:$4 sm:$0xff]  }
 0x2b6   : > { %7110 = vmatpush1.bf16.msra.mxu1 %v9508_v2  ;;  %7070 = vmatprep.subr.bf16.mxu0 %v9513_v3  ;;  %v9573_v2 = vld [vmem:[%s11993_s15 + $0x1104] ss:$16 sps:$4 sm:$0xff]  }
 0x2b7   : > { %7111 = vmatprep.subr.bf16.mxu1 %v9516_v4  ;;  %v9576_v3 = vld [vmem:[%s11993_s15 + $0x1304] ss:$16 sps:$4 sm:$0xff]   ;;  %v9571_v4 = vld [vmem:[%s11993_s15 + $0x1100] ss:$16 sps:$4 sm:$0xff]  }
 0x2b9   : > { %7071 = vmatpush1.bf16.msra.mxu0 %v9511_v5  ;;  %v9574_v5 = vld [vmem:[%s11993_s15 + $0x1300] ss:$16 sps:$4 sm:$0xff]  }
 0x2ba   : > { %7112 = vmatpush1.bf16.msra.mxu1 %v9514_v7  ;;  %7072 = vmatprep.subr.bf16.mxu0 %v9519_v8  ;;  %v9583_v7 = vld [vmem:[%s11993_s15 + $0x14e4] ss:$16 sps:$4 sm:$0xff]  }
 0x2bb   : > { %7113 = vmatprep.subr.bf16.mxu1 %v9522_v9  ;;  %v9586_v8 = vld [vmem:[%s11993_s15 + $0x16e4] ss:$16 sps:$4 sm:$0xff]  }
 0x2bc   : > { %v12459_v9 = vld [vmem:[%s13138_s0 + $0x50] sm:$0xff] }
 0x2bd   : > { %7073 = vmatpush1.bf16.msra.mxu0 %v9517_v10  ;;  %v12464_v10 = vld [vmem:[%s13138_s0 + $0x58] sm:$0xff] }
 0x2be   : > { %7114 = vmatpush1.bf16.msra.mxu1 %v9520_v11  ;;  %7074 = vmatprep.subr.bf16.mxu0 %v9525_v12  ;;  %v9581_v11 = vld [vmem:[%s11993_s15 + $0x14e0] ss:$16 sps:$4 sm:$0xff]  }
 0x2bf   : > { %7115 = vmatprep.subr.bf16.mxu1 %v9528_v13  ;;  %v9584_v12 = vld [vmem:[%s11993_s15 + $0x16e0] ss:$16 sps:$4 sm:$0xff]   ;;  %v12470_v13 = vcombine.low %v12370_v22, %v12370_v22  ;;  %v12486_v22 = vcombine.high %v12464_v10, %v12464_v10 }
 0x2c1   : > { %7075 = vmatpush1.bf16.msra.mxu0 %v9523_v14  ;;  %v12474_v14 = vcombine.low %v12375_v23, %v12375_v23 }
 0x2c2   : > { %7116 = vmatpush1.bf16.msra.mxu1 %v9526_v15  ;;  %7076 = vmatprep.subr.bf16.mxu0 %v9531_v24  ;;  %v9589_v15 = vld [vmem:[%s11993_s15 + $0x14c4] ss:$16 sps:$4 sm:$0xff]  }
 0x2c3   : > { %7117 = vmatprep.subr.bf16.mxu1 %v9534_v55  ;;  %v9592_v24 = vld [vmem:[%s11993_s15 + $0x16c4] ss:$16 sps:$4 sm:$0xff]   ;;  %v9587_v55 = vld [vmem:[%s11993_s15 + $0x14c0] ss:$16 sps:$4 sm:$0xff]  }
 0x2c5   : > { %7077 = vmatpush2.bf16.msra.mxu0 %v9529_v25  ;;  %v9590_v25 = vld [vmem:[%s11993_s15 + $0x16c0] ss:$16 sps:$4 sm:$0xff]  }
 0x2c6   : > { %7118 = vmatpush2.bf16.msra.mxu1 %v9532_v58  ;;  %7078 = vmatprep.subr.bf16.mxu0 %v9537_v30  ;;  %v12482_v58 = vcombine.high %v12459_v9, %v12459_v9 }
 0x2c7   : > { %7119 = vmatprep.subr.bf16.mxu1 %v9540_v33 }
 0x2c9   : > { %7079 = vmatpush2.bf16.msra.mxu0 %v9535_v34 }
 0x2ca   : > { %7120 = vmatpush2.bf16.msra.mxu1 %v9538_v35  ;;  %7080 = vmatprep.subr.bf16.mxu0 %v9543_v36  ;;  %v9595_v36 = vld [vmem:[%s11993_s15 + $0x14a4] ss:$16 sps:$4 sm:$0xff]  }
 0x2cb   : > { %7121 = vmatprep.subr.bf16.mxu1 %v9546_v37  ;;  %v9598_v37 = vld [vmem:[%s11993_s15 + $0x16a4] ss:$16 sps:$4 sm:$0xff]  }
 0x2cd   : > { %7081 = vmatpush2.bf16.msra.mxu0 %v9541_v40 }
 0x2ce   : > { %7122 = vmatpush2.bf16.msra.mxu1 %v9544_v41  ;;  %7082 = vmatprep.subr.bf16.mxu0 %v9549_v27  ;;  %v9593_v27 = vld [vmem:[%s11993_s15 + $0x14a0] ss:$16 sps:$4 sm:$0xff]  }
 0x2cf   : > { %7123 = vmatprep.subr.bf16.mxu1 %v9552_v43  ;;  %v9596_v43 = vld [vmem:[%s11993_s15 + $0x16a0] ss:$16 sps:$4 sm:$0xff]  }
 0x2d1   : > { %7083 = vmatpush2.bf16.msra.mxu0 %v9547_v47 }
 0x2d2   : > { %7124 = vmatpush2.bf16.msra.mxu1 %v9550_v48  ;;  %7084 = vmatprep.subr.bf16.mxu0 %v9555_v49 }
 0x2d3   : > { %7125 = vmatprep.subr.bf16.mxu1 %v9558_v50  ;;  %v9601_v50 = vld [vmem:[%s11993_s15 + $0x1484] ss:$16 sps:$4 sm:$0xff]  }
 0x2d5   : > { %7085 = vmatpush2.bf16.msra.mxu0 %v9553_v52  ;;  %v9604_v52 = vld [vmem:[%s11993_s15 + $0x1684] ss:$16 sps:$4 sm:$0xff]  }
 0x2d6   : > { %7126 = vmatpush2.bf16.msra.mxu1 %v9556_v53  ;;  %7086 = vmatprep.subr.bf16.mxu0 %v9561_v54  ;;  %v9599_v53 = vld [vmem:[%s11993_s15 + $0x1480] ss:$16 sps:$4 sm:$0xff]  }
 0x2d7   : > { %7127 = vmatprep.subr.bf16.mxu1 %v9564_v59  ;;  %v9602_v54 = vld [vmem:[%s11993_s15 + $0x1680] ss:$16 sps:$4 sm:$0xff]   ;;  %v9607_v59 = vld [vmem:[%s11993_s15 + $0x1464] ss:$16 sps:$4 sm:$0xff]  }
 0x2d9   : > { %7087 = vmatpush2.bf16.msra.mxu0 %v9559_v60  ;;  %v9610_v60 = vld [vmem:[%s11993_s15 + $0x1664] ss:$16 sps:$4 sm:$0xff]  }
 0x2da   : > { %7128 = vmatpush2.bf16.msra.mxu1 %v9562_v42  ;;  %7088 = vmatprep.subr.bf16.mxu0 %v9567_v62  ;;  %v9605_v42 = vld [vmem:[%s11993_s15 + $0x1460] ss:$16 sps:$4 sm:$0xff]  }
 0x2db   : > { %7129 = vmatprep.subr.bf16.mxu1 %v9570_v63  ;;  %v9608_v62 = vld [vmem:[%s11993_s15 + $0x1660] ss:$16 sps:$4 sm:$0xff]   ;;  %v9613_v63 = vld [vmem:[%s11993_s15 + $0x1444] ss:$16 sps:$4 sm:$0xff]  }
 0x2dd   : > { %7089 = vmatpush2.bf16.msra.mxu0 %v9565_v0  ;;  %v9616_v0 = vld [vmem:[%s11993_s15 + $0x1644] ss:$16 sps:$4 sm:$0xff]  }
 0x2de   : > { %7130 = vmatpush2.bf16.msra.mxu1 %v9568_v1  ;;  %7090 = vmatprep.subr.bf16.mxu0 %v9573_v2  ;;  %v9611_v1 = vld [vmem:[%s11993_s15 + $0x1440] ss:$16 sps:$4 sm:$0xff]  }
 0x2df   : > { %7131 = vmatprep.subr.bf16.mxu1 %v9576_v3  ;;  %v9614_v2 = vld [vmem:[%s11993_s15 + $0x1640] ss:$16 sps:$4 sm:$0xff]   ;;  %v9619_v3 = vld [vmem:[%s11993_s15 + $0x1424] ss:$16 sps:$4 sm:$0xff]  }
 0x2e1   : > { %7091 = vmatpush2.bf16.msra.mxu0 %v9571_v4  ;;  %v9622_v4 = vld [vmem:[%s11993_s15 + $0x1624] ss:$16 sps:$4 sm:$0xff]  }
 0x2e2   : > { %7132 = vmatpush2.bf16.msra.mxu1 %v9574_v5  ;;  %7142 = vmatprep.subr.bf16.mxu0 %v9583_v7  ;;  %v9617_v5 = vld [vmem:[%s11993_s15 + $0x1420] ss:$16 sps:$4 sm:$0xff]  }
 0x2e3   : > { %7183 = vmatprep.subr.bf16.mxu1 %v9586_v8  ;;  %v9620_v7 = vld [vmem:[%s11993_s15 + $0x1620] ss:$16 sps:$4 sm:$0xff]   ;;  %v9625_v8 = vld [vmem:[%s11993_s15 + $0x1404] ss:$16 sps:$4 sm:$0xff]  }
 0x2e4   : > { %v6848_v23 = vpop.f32.mrf.mxu0  ;;  %7093 = vmatmul.mubr.bf16.vlgmr.msra.gmra.mxu0 %v12470_v13 }
 0x2e5   : > { %v6889_v30 = vpop.f32.mrf.mxu1  ;;  %7134 = vmatmul.mubr.bf16.vlgmr.msra.gmra.mxu1 %v12474_v14  ;;  %v6849_v33 = vadd.f32 %v6848_v23, %v12394_v46  ;;  %7143 = vmatpush1.bf16.msra.mxu0 %v9581_v11  ;;  %v9628_v11 = vld [vmem:[%s11993_s15 + $0x1604] ss:$16 sps:$4 sm:$0xff]   ;;  %v9632_v23 = vld [vmem:[%s11993_s15 + $0x17e0] ss:$16 sps:$4 sm:$0xff]  }
 0x2e6   : > { %7184 = vmatpush1.bf16.msra.mxu1 %v9584_v12  ;;  %v6850_v34 = vpop.f32.mrf.mxu0  ;;  %7144 = vmatprep.subr.bf16.mxu0 %v9589_v15  ;;  %v9623_v12 = vld [vmem:[%s11993_s15 + $0x1400] ss:$16 sps:$4 sm:$0xff]  }
 0x2e7   : > { %v6891_v35 = vpop.f32.mrf.mxu1  ;;  %7185 = vmatprep.subr.bf16.mxu1 %v9592_v24  ;;  %v12493_v40 = vadd.f32 %v6889_v30, %v6849_v33  ;;  %v6851_v41 = vadd.f32 %v6850_v34, %v12399_v51  ;;  %7174 = vmatprep.mubr.bf16.mxu0 %v12482_v58  ;;  %v9626_v15 = vld [vmem:[%s11993_s15 + $0x1600] ss:$16 sps:$4 sm:$0xff]   ;;  %v9631_v24 = vld [vmem:[%s11993_s15 + $0x15e4] ss:$16 sps:$4 sm:$0xff]  }
 0x2e8   : > { %7215 = vmatprep.mubr.bf16.mxu1 %v12486_v22  ;;  %v6852_v46 = vpop.f32.mrf.mxu0  ;;  %v9637_v30 = vld [vmem:[%s11993_s15 + $0x15c4] ss:$16 sps:$4 sm:$0xff]   ;;  %v9635_v34 = vld [vmem:[%s11993_s15 + $0x15c0] ss:$16 sps:$4 sm:$0xff]  }
 0x2e9   : > { %v6893_v47 = vpop.f32.mrf.mxu1  ;;  %v12500_v48 = vadd.f32 %v6891_v35, %v6851_v41  ;;  %7145 = vmatpush1.bf16.msra.mxu0 %v9587_v55  ;;  %v9634_v55 = vld [vmem:[%s11993_s15 + $0x17e4] ss:$16 sps:$4 sm:$0xff]   ;;  %v9638_v35 = vld [vmem:[%s11993_s15 + $0x17c0] ss:$16 sps:$4 sm:$0xff]  }
 0x2ea   : > { %7186 = vmatpush1.bf16.msra.mxu1 %v9590_v25  ;;  %v6853_v49 = vpop.f32.mrf.mxu0  ;;  %7146 = vmatprep.subr.bf16.mxu0 %v9595_v36  ;;  %v9629_v25 = vld [vmem:[%s11993_s15 + $0x15e0] ss:$16 sps:$4 sm:$0xff]   ;;  %v9640_v33 = vld [vmem:[%s11993_s15 + $0x17c4] ss:$16 sps:$4 sm:$0xff]  }
 0x2eb   : > { %v6894_v51 = vpop.f32.mrf.mxu1  ;;  %7187 = vmatprep.subr.bf16.mxu1 %v9598_v37  ;;  %v9643_v36 = vld [vmem:[%s11993_s15 + $0x15a4] ss:$16 sps:$4 sm:$0xff]   ;;  %v9641_v41 = vld [vmem:[%s11993_s15 + $0x15a0] ss:$16 sps:$4 sm:$0xff]  }
 0x2ec   : > { %v9646_v37 = vld [vmem:[%s11993_s15 + $0x17a4] ss:$16 sps:$4 sm:$0xff]   ;;  %v9647_v47 = vld [vmem:[%s11993_s15 + $0x1580] ss:$16 sps:$4 sm:$0xff]  }
 0x2ed   : > { %7147 = vmatpush1.bf16.msra.mxu0 %v9593_v27  ;;  %v9644_v27 = vld [vmem:[%s11993_s15 + $0x17a0] ss:$16 sps:$4 sm:$0xff]   ;;  %v9652_v46 = vld [vmem:[%s11993_s15 + $0x1784] ss:$16 sps:$4 sm:$0xff]  }
 0x2ee   : > { %7188 = vmatpush1.bf16.msra.mxu1 %v9596_v43  ;;  %7148 = vmatprep.subr.bf16.mxu0 %v9601_v50  ;;  %v9649_v43 = vld [vmem:[%s11993_s15 + $0x1584] ss:$16 sps:$4 sm:$0xff]   ;;  %v9650_v49 = vld [vmem:[%s11993_s15 + $0x1780] ss:$16 sps:$4 sm:$0xff]  }
 0x2ef   : > { %7189 = vmatprep.subr.bf16.mxu1 %v9604_v52  ;;  %v9655_v51 = vld [vmem:[%s11993_s15 + $0x1564] ss:$16 sps:$4 sm:$0xff]   ;;  %v9653_v52 = vld [vmem:[%s11993_s15 + $0x1560] ss:$16 sps:$4 sm:$0xff]  }
 0x2f0   : > { %v9658_v50 = vld [vmem:[%s11993_s15 + $0x1764] ss:$16 sps:$4 sm:$0xff]  }
 0x2f1   : > { %7149 = vmatpush1.bf16.msra.mxu0 %v9599_v53  ;;  %v9656_v53 = vld [vmem:[%s11993_s15 + $0x1760] ss:$16 sps:$4 sm:$0xff]  }
 0x2f2   : > { %7190 = vmatpush1.bf16.msra.mxu1 %v9602_v54  ;;  %7150 = vmatprep.subr.bf16.mxu0 %v9607_v59  ;;  %v9661_v54 = vld [vmem:[%s11993_s15 + $0x1544] ss:$16 sps:$4 sm:$0xff]  }
 0x2f3   : > { %7191 = vmatprep.subr.bf16.mxu1 %v9610_v60  ;;  %v9664_v59 = vld [vmem:[%s11993_s15 + $0x1744] ss:$16 sps:$4 sm:$0xff]   ;;  %v9659_v60 = vld [vmem:[%s11993_s15 + $0x1540] ss:$16 sps:$4 sm:$0xff]  }
 0x2f5   : > { %7151 = vmatpush1.bf16.msra.mxu0 %v9605_v42  ;;  %v9662_v42 = vld [vmem:[%s11993_s15 + $0x1740] ss:$16 sps:$4 sm:$0xff]  }
 0x2f6   : > { %7192 = vmatpush1.bf16.msra.mxu1 %v9608_v62  ;;  %7152 = vmatprep.subr.bf16.mxu0 %v9613_v63  ;;  %v9667_v62 = vld [vmem:[%s11993_s15 + $0x1524] ss:$16 sps:$4 sm:$0xff]  }
 0x2f7   : > { %7193 = vmatprep.subr.bf16.mxu1 %v9616_v0  ;;  %v9670_v63 = vld [vmem:[%s11993_s15 + $0x1724] ss:$16 sps:$4 sm:$0xff]   ;;  %v9665_v0 = vld [vmem:[%s11993_s15 + $0x1520] ss:$16 sps:$4 sm:$0xff]  }
 0x2f9   : > { %7153 = vmatpush1.bf16.msra.mxu0 %v9611_v1  ;;  %v9668_v1 = vld [vmem:[%s11993_s15 + $0x1720] ss:$16 sps:$4 sm:$0xff]  }
 0x2fa   : > { %7194 = vmatpush1.bf16.msra.mxu1 %v9614_v2  ;;  %7154 = vmatprep.subr.bf16.mxu0 %v9619_v3  ;;  %v9673_v2 = vld [vmem:[%s11993_s15 + $0x1504] ss:$16 sps:$4 sm:$0xff]  }
 0x2fb   : > { %7195 = vmatprep.subr.bf16.mxu1 %v9622_v4  ;;  %v9676_v3 = vld [vmem:[%s11993_s15 + $0x1704] ss:$16 sps:$4 sm:$0xff]   ;;  %v9671_v4 = vld [vmem:[%s11993_s15 + $0x1500] ss:$16 sps:$4 sm:$0xff]  }
 0x2fd   : > { %7155 = vmatpush1.bf16.msra.mxu0 %v9617_v5  ;;  %v9674_v5 = vld [vmem:[%s11993_s15 + $0x1700] ss:$16 sps:$4 sm:$0xff]  }
 0x2fe   : > { %7196 = vmatpush1.bf16.msra.mxu1 %v9620_v7  ;;  %7156 = vmatprep.subr.bf16.mxu0 %v9625_v8  ;;  %v9683_v7 = vld [vmem:[%s11993_s15 + $0x1864] ss:$16 sps:$4 sm:$0xff]   ;;  %v9686_v8 = vld [vmem:[%s11993_s15 + $0xec] ss:$16 sps:$4 sm:$0xff]  }
 0x2ff   : > { %7197 = vmatprep.subr.bf16.mxu1 %v9628_v11  ;;  %v9681_v11 = vld [vmem:[%s11993_s15 + $0x1860] ss:$16 sps:$4 sm:$0xff]  }
 0x301   : > { %7157 = vmatpush1.bf16.msra.mxu0 %v9623_v12  ;;  %v9684_v12 = vld [vmem:[%s11993_s15 + $0xe8] ss:$16 sps:$4 sm:$0xff]  }
 0x302   : > { %7198 = vmatpush1.bf16.msra.mxu1 %v9626_v15  ;;  %7158 = vmatprep.subr.bf16.mxu0 %v9631_v24  ;;  %v12560_v15 = vcombine.low %v12459_v9, %v12459_v9  ;;  %v12564_v24 = vcombine.low %v12464_v10, %v12464_v10 }
 0x303   : > { %7199 = vmatprep.subr.bf16.mxu1 %v9634_v55  ;;  %v9689_v55 = vld [vmem:[%s11993_s15 + $0x1844] ss:$16 sps:$4 sm:$0xff]  }
 0x305   : > { %7159 = vmatpush2.bf16.msra.mxu0 %v9629_v25  ;;  %v9692_v25 = vld [vmem:[%s11993_s15 + $0xcc] ss:$16 sps:$4 sm:$0xff]  }
 0x306   : > { %7200 = vmatpush2.bf16.msra.mxu1 %v9632_v23  ;;  %7160 = vmatprep.subr.bf16.mxu0 %v9637_v30  ;;  %v9687_v23 = vld [vmem:[%s11993_s15 + $0x1840] ss:$16 sps:$4 sm:$0xff]   ;;  %v9690_v30 = vld [vmem:[%s11993_s15 + $0xc8] ss:$16 sps:$4 sm:$0xff]  }
 0x307   : > { %7201 = vmatprep.subr.bf16.mxu1 %v9640_v33 }
 0x309   : > { %7161 = vmatpush2.bf16.msra.mxu0 %v9635_v34 }
 0x30a   : > { %7202 = vmatpush2.bf16.msra.mxu1 %v9638_v35  ;;  %7162 = vmatprep.subr.bf16.mxu0 %v9643_v36  ;;  %v9695_v36 = vld [vmem:[%s11993_s15 + $0x1824] ss:$16 sps:$4 sm:$0xff]  }
 0x30b   : > { %7203 = vmatprep.subr.bf16.mxu1 %v9646_v37  ;;  %v9698_v37 = vld [vmem:[%s11993_s15 + $0xac] ss:$16 sps:$4 sm:$0xff]  }
 0x30d   : > { %7163 = vmatpush2.bf16.msra.mxu0 %v9641_v41 }
 0x30e   : > { %7204 = vmatpush2.bf16.msra.mxu1 %v9644_v27  ;;  %7164 = vmatprep.subr.bf16.mxu0 %v9649_v43  ;;  %v9693_v43 = vld [vmem:[%s11993_s15 + $0x1820] ss:$16 sps:$4 sm:$0xff]  }
 0x30f   : > { %7205 = vmatprep.subr.bf16.mxu1 %v9652_v46  ;;  %v9696_v46 = vld [vmem:[%s11993_s15 + $0xa8] ss:$16 sps:$4 sm:$0xff]  }
 0x311   : > { %7165 = vmatpush2.bf16.msra.mxu0 %v9647_v47  ;;  %v10324_v47 = vmov 0  }
 0x312   : > { %7206 = vmatpush2.bf16.msra.mxu1 %v9650_v49  ;;  %7166 = vmatprep.subr.bf16.mxu0 %v9655_v51 }
 0x313   : > { %7207 = vmatprep.subr.bf16.mxu1 %v9658_v50 }
 0x315   : > { %7167 = vmatpush2.bf16.msra.mxu0 %v9653_v52  ;;  %v9701_v52 = vld [vmem:[%s11993_s15 + $0x1804] ss:$16 sps:$4 sm:$0xff]  }
 0x316   : > { %7208 = vmatpush2.bf16.msra.mxu1 %v9656_v53  ;;  %7168 = vmatprep.subr.bf16.mxu0 %v9661_v54  ;;  %v9704_v53 = vld [vmem:[%s11993_s15 + $0x8c] ss:$16 sps:$4 sm:$0xff]   ;;  %v9702_v54 = vld [vmem:[%s11993_s15 + $0x88] ss:$16 sps:$4 sm:$0xff]  }
 0x317   : > { %7209 = vmatprep.subr.bf16.mxu1 %v9664_v59  ;;  %v9705_v59 = vld [vmem:[%s13138_s0 + $0x60] ss:$0 sps:$4 sm:$0xff]  }
 0x319   : > { %7169 = vmatpush2.bf16.msra.mxu0 %v9659_v60  ;;  %v9708_v60 = vld [vmem:[%s11993_s15 + $0x6c] ss:$16 sps:$4 sm:$0xff]  }
 0x31a   : > { %7210 = vmatpush2.bf16.msra.mxu1 %v9662_v42  ;;  %7170 = vmatprep.subr.bf16.mxu0 %v9667_v62  ;;  %v9711_v42 = vld [vmem:[%s11993_s15 + $0x2ec] ss:$16 sps:$4 sm:$0xff]   ;;  %v9706_v62 = vld [vmem:[%s11993_s15 + $0x68] ss:$16 sps:$4 sm:$0xff]  }
 0x31b   : > { %7211 = vmatprep.subr.bf16.mxu1 %v9670_v63  ;;  %v9709_v63 = vld [vmem:[%s11993_s15 + $0x2e8] ss:$16 sps:$4 sm:$0xff]  }
 0x31d   : > { %7171 = vmatpush2.bf16.msra.mxu0 %v9665_v0  ;;  %v9714_v0 = vld [vmem:[%s11993_s15 + $0x4c] ss:$16 sps:$4 sm:$0xff]  }
 0x31e   : > { %7212 = vmatpush2.bf16.msra.mxu1 %v9668_v1  ;;  %7172 = vmatprep.subr.bf16.mxu0 %v9673_v2  ;;  %v9717_v1 = vld [vmem:[%s11993_s15 + $0x2cc] ss:$16 sps:$4 sm:$0xff]   ;;  %v9712_v2 = vld [vmem:[%s11993_s15 + $0x48] ss:$16 sps:$4 sm:$0xff]  }
 0x31f   : > { %7213 = vmatprep.subr.bf16.mxu1 %v9676_v3  ;;  %v9715_v3 = vld [vmem:[%s11993_s15 + $0x2c8] ss:$16 sps:$4 sm:$0xff]  }
 0x321   : > { %7173 = vmatpush2.bf16.msra.mxu0 %v9671_v4  ;;  %v9720_v4 = vld [vmem:[%s11993_s15 + $0x2c] ss:$16 sps:$4 sm:$0xff]  }
 0x322   : > { %7214 = vmatpush2.bf16.msra.mxu1 %v9674_v5  ;;  %7232 = vmatprep.subr.bf16.mxu0 %v9683_v7  ;;  %v9723_v5 = vld [vmem:[%s11993_s15 + $0x2ac] ss:$16 sps:$4 sm:$0xff]   ;;  %v9718_v7 = vld [vmem:[%s11993_s15 + $0x28] ss:$16 sps:$4 sm:$0xff]  }
 0x323   : > { %7265 = vmatprep.subr.bf16.mxu1 %v9686_v8  ;;  %v9721_v8 = vld [vmem:[%s11993_s15 + $0x2a8] ss:$16 sps:$4 sm:$0xff]  }
 0x324   : > { %v6930_v33 = vpop.f32.mrf.mxu0  ;;  %7175 = vmatmul.mubr.bf16.vlgmr.msra.gmra.mxu0 %v12560_v15 }
 0x325   : > { %v6971_v34 = vpop.f32.mrf.mxu1  ;;  %7216 = vmatmul.mubr.bf16.vlgmr.msra.gmra.mxu1 %v12564_v24  ;;  %v6931_v9 = vadd.f32 %v6930_v33, %v12493_v40  ;;  %7233 = vmatpush1.bf16.msra.mxu0 %v9681_v11  ;;  %v9726_v11 = vld [vmem:[%s11993_s15 + $0xc] ss:$16 sps:$4 sm:$0xff]   ;;  %v9733_v33 = vld [vmem:[%s11993_s15 + $0x268] ss:$16 sps:$4 sm:$0xff]  }
 0x326   : > { %7266 = vmatpush1.bf16.msra.mxu1 %v9684_v12  ;;  %v6932_v10 = vpop.f32.mrf.mxu0  ;;  %7234 = vmatprep.subr.bf16.mxu0 %v9689_v55  ;;  %v9729_v12 = vld [vmem:[%s11993_s15 + $0x28c] ss:$16 sps:$4 sm:$0xff]   ;;  %v9724_v55 = vld [vmem:[%s11993_s15 + $0x8] ss:$16 sps:$4 sm:$0xff]  }
 0x327   : > { %v6973_v35 = vpop.f32.mrf.mxu1  ;;  %7267 = vmatprep.subr.bf16.mxu1 %v9692_v25  ;;  %v12575_v41 = vadd.f32 %v6971_v34, %v6931_v9  ;;  %v6933_v27 = vadd.f32 %v6932_v10, %v12500_v48  ;;  %7256 = vmatprep.mubr.bf16.mxu0 %v10324_v47  ;;  %v9727_v25 = vld [vmem:[%s11993_s15 + $0x288] ss:$16 sps:$4 sm:$0xff]   ;;  %v9738_v34 = vld [vmem:[%s11993_s15 + $0x1cc] ss:$16 sps:$4 sm:$0xff]  }
 0x328   : > { %7297 = vmatprep.mubr.bf16.mxu1 %v11985_v18  ;;  %v6934_v40 = vpop.f32.mrf.mxu0  ;;  %v9699_v18 = vld [vmem:[%s11993_s15 + $0x1800] ss:$16 sps:$4 sm:$0xff]   ;;  %v9741_v9 = vld [vmem:[%s11993_s15 + $0x24c] ss:$16 sps:$4 sm:$0xff]   ;;  %v9736_v10 = vld [vmem:[%s11993_s15 + $0x1c8] ss:$16 sps:$4 sm:$0xff]  }
 0x329   : > { %v6975_v49 = vpop.f32.mrf.mxu1  ;;  %v12582_v51 = vadd.f32 %v6973_v35, %v6933_v27  ;;  %7235 = vmatpush1.bf16.msra.mxu0 %v9687_v23  ;;  %v9735_v23 = vld [vmem:[%s11993_s15 + $0x26c] ss:$16 sps:$4 sm:$0xff]   ;;  %v9739_v35 = vld [vmem:[%s11993_s15 + $0x248] ss:$16 sps:$4 sm:$0xff]  }
 0x32a   : > { %7268 = vmatpush1.bf16.msra.mxu1 %v9690_v30  ;;  %v6935_v48 = vpop.f32.mrf.mxu0  ;;  %7236 = vmatprep.subr.bf16.mxu0 %v9695_v36  ;;  %v9730_v30 = vld [vmem:[%s11993_s15 + $0x1e8] ss:$16 sps:$4 sm:$0xff]   ;;  %v9744_v36 = vld [vmem:[%s11993_s15 + $0x1ac] ss:$16 sps:$4 sm:$0xff]  }
 0x32b   : > { %v6976_v50 = vpop.f32.mrf.mxu1  ;;  %7269 = vmatprep.subr.bf16.mxu1 %v9698_v37  ;;  %v9747_v37 = vld [vmem:[%s11993_s15 + $0x22c] ss:$16 sps:$4 sm:$0xff]   ;;  %v9742_v27 = vld [vmem:[%s11993_s15 + $0x1a8] ss:$16 sps:$4 sm:$0xff]  }
 0x32c   : > { %v9753_v40 = vld [vmem:[%s11993_s15 + $0x20c] ss:$16 sps:$4 sm:$0xff]   ;;  %v9748_v49 = vld [vmem:[%s11993_s15 + $0x188] ss:$16 sps:$4 sm:$0xff]  }
 0x32d   : > { %7237 = vmatpush1.bf16.msra.mxu0 %v9693_v43  ;;  %v9745_v43 = vld [vmem:[%s11993_s15 + $0x228] ss:$16 sps:$4 sm:$0xff]   ;;  %v9756_v50 = vld [vmem:[%s11993_s15 + $0x16c] ss:$16 sps:$4 sm:$0xff]  }
 0x32e   : > { %7270 = vmatpush1.bf16.msra.mxu1 %v9696_v46  ;;  %7238 = vmatprep.subr.bf16.mxu0 %v9701_v52  ;;  %v9750_v46 = vld [vmem:[%s11993_s15 + $0x18c] ss:$16 sps:$4 sm:$0xff]   ;;  %v9751_v48 = vld [vmem:[%s11993_s15 + $0x208] ss:$16 sps:$4 sm:$0xff]  }
 0x32f   : > { %7271 = vmatprep.subr.bf16.mxu1 %v9704_v53  ;;  %v9759_v52 = vld [vmem:[%s11993_s15 + $0x3ec] ss:$16 sps:$4 sm:$0xff]   ;;  %v9754_v53 = vld [vmem:[%s11993_s15 + $0x168] ss:$16 sps:$4 sm:$0xff]  }
 0x331   : > { %7239 = vmatpush1.bf16.msra.mxu0 %v9699_v18  ;;  %v9757_v18 = vld [vmem:[%s11993_s15 + $0x3e8] ss:$16 sps:$4 sm:$0xff]  }
 0x332   : > { %7272 = vmatpush1.bf16.msra.mxu1 %v9702_v54  ;;  %7306 = vmatprep.subr.bf16.mxu0 %v9711_v42  ;;  %v9762_v54 = vld [vmem:[%s11993_s15 + $0x14c] ss:$16 sps:$4 sm:$0xff]   ;;  %v9763_v42 = vld [vmem:[%s11993_s15 + $0x3c8] ss:$16 sps:$4 sm:$0xff]  }
 0x333   : > { %7273 = vmatprep.subr.bf16.mxu1 %v9708_v60  ;;  %v9760_v60 = vld [vmem:[%s11993_s15 + $0x148] ss:$16 sps:$4 sm:$0xff]  }
 0x334   : > { %8961 = vmatmul.mubr.msk.bf16.vlgmr.msra.gmra.mxu0 %vm6728_vm0, %v9705_v59  ;;  %v9765_v59 = vld [vmem:[%s11993_s15 + $0x3cc] ss:$16 sps:$4 sm:$0xff]  }
 0x335   : > { %7307 = vmatpush1.bf16.msra.mxu0 %v9709_v63  ;;  %7338 = vmatprep.mubr.bf16.mxu0 %v11989_v19  ;;  %v9732_v19 = vld [vmem:[%s11993_s15 + $0x1ec] ss:$16 sps:$4 sm:$0xff]  }
 0x336   : > { %7274 = vmatpush1.bf16.msra.mxu1 %v9706_v62  ;;  %7308 = vmatprep.subr.bf16.mxu0 %v9717_v1  ;;  %v9768_v62 = vld [vmem:[%s11993_s15 + $0x12c] ss:$16 sps:$4 sm:$0xff]   ;;  %v9769_v1 = vld [vmem:[%s11993_s15 + $0x3a8] ss:$16 sps:$4 sm:$0xff]  }
 0x337   : > { %7275 = vmatprep.subr.bf16.mxu1 %v9714_v0  ;;  %v9771_v63 = vld [vmem:[%s11993_s15 + $0x3ac] ss:$16 sps:$4 sm:$0xff]   ;;  %v9766_v0 = vld [vmem:[%s11993_s15 + $0x128] ss:$16 sps:$4 sm:$0xff]  }
 0x339   : > { %7309 = vmatpush1.bf16.msra.mxu0 %v9715_v3  ;;  %v9777_v3 = vld [vmem:[%s11993_s15 + $0x38c] ss:$16 sps:$4 sm:$0xff]  }
 0x33a   : > { %7276 = vmatpush1.bf16.msra.mxu1 %v9712_v2  ;;  %7310 = vmatprep.subr.bf16.mxu0 %v9723_v5  ;;  %v9774_v2 = vld [vmem:[%s11993_s15 + $0x10c] ss:$16 sps:$4 sm:$0xff]   ;;  %v9775_v5 = vld [vmem:[%s11993_s15 + $0x388] ss:$16 sps:$4 sm:$0xff]  }
 0x33b   : > { %7277 = vmatprep.subr.bf16.mxu1 %v9720_v4  ;;  %v9772_v4 = vld [vmem:[%s11993_s15 + $0x108] ss:$16 sps:$4 sm:$0xff]  }
 0x33d   : > { %7311 = vmatpush1.bf16.msra.mxu0 %v9721_v8  ;;  %v9783_v8 = vld [vmem:[%s11993_s15 + $0x4ec] ss:$16 sps:$4 sm:$0xff]  }
 0x33e   : > { %7278 = vmatpush1.bf16.msra.mxu1 %v9718_v7  ;;  %7312 = vmatprep.subr.bf16.mxu0 %v9729_v12  ;;  %v9780_v7 = vld [vmem:[%s11993_s15 + $0x36c] ss:$16 sps:$4 sm:$0xff]   ;;  %v9781_v12 = vld [vmem:[%s11993_s15 + $0x4e8] ss:$16 sps:$4 sm:$0xff]  }
 0x33f   : > { %7279 = vmatprep.subr.bf16.mxu1 %v9726_v11  ;;  %v9778_v11 = vld [vmem:[%s11993_s15 + $0x368] ss:$16 sps:$4 sm:$0xff]  }
 0x341   : > { %7313 = vmatpush1.bf16.msra.mxu0 %v9727_v25  ;;  %v9789_v25 = vld [vmem:[%s11993_s15 + $0x4cc] ss:$16 sps:$4 sm:$0xff]  }
 0x342   : > { %7280 = vmatpush1.bf16.msra.mxu1 %v9724_v55  ;;  %7314 = vmatprep.subr.bf16.mxu0 %v9735_v23  ;;  %v9786_v55 = vld [vmem:[%s11993_s15 + $0x34c] ss:$16 sps:$4 sm:$0xff]   ;;  %v9787_v23 = vld [vmem:[%s11993_s15 + $0x4c8] ss:$16 sps:$4 sm:$0xff]  }
 0x343   : > { %7281 = vmatprep.subr.bf16.mxu1 %v9732_v19  ;;  %v9784_v19 = vld [vmem:[%s11993_s15 + $0x348] ss:$16 sps:$4 sm:$0xff]  }
 0x345   : > { %7315 = vmatpush1.bf16.msra.mxu0 %v9733_v33 }
 0x346   : > { %7282 = vmatpush2.bf16.msra.mxu1 %v9730_v30  ;;  %7316 = vmatprep.subr.bf16.mxu0 %v9741_v9 }
 0x347   : > { %7283 = vmatprep.subr.bf16.mxu1 %v9738_v34 }
 0x349   : > { %7317 = vmatpush1.bf16.msra.mxu0 %v9739_v35  ;;  %v9792_v35 = vld [vmem:[%s11993_s15 + $0x32c] ss:$16 sps:$4 sm:$0xff]  }
 0x34a   : > { %7284 = vmatpush2.bf16.msra.mxu1 %v9736_v10  ;;  %7318 = vmatprep.subr.bf16.mxu0 %v9747_v37 }
 0x34b   : > { %7285 = vmatprep.subr.bf16.mxu1 %v9744_v36  ;;  %v9795_v36 = vld [vmem:[%s11993_s15 + $0x4ac] ss:$16 sps:$4 sm:$0xff]  }
 0x34d   : > { %7319 = vmatpush1.bf16.msra.mxu0 %v9745_v43  ;;  %v9790_v43 = vld [vmem:[%s11993_s15 + $0x328] ss:$16 sps:$4 sm:$0xff]  }
 0x34e   : > { %7286 = vmatpush2.bf16.msra.mxu1 %v9742_v27  ;;  %7320 = vmatprep.subr.bf16.mxu0 %v9753_v40 }
 0x34f   : > { %7287 = vmatprep.subr.bf16.mxu1 %v9750_v46  ;;  %v9793_v46 = vld [vmem:[%s11993_s15 + $0x4a8] ss:$16 sps:$4 sm:$0xff]  }
 0x351   : > { %7321 = vmatpush1.bf16.msra.mxu0 %v9751_v48 }
 0x352   : > { %7288 = vmatpush2.bf16.msra.mxu1 %v9748_v49  ;;  %7322 = vmatprep.subr.bf16.mxu0 %v9759_v52  ;;  %v9799_v52 = vld [vmem:[%s11993_s15 + $0x488] ss:$16 sps:$4 sm:$0xff]  }
 0x353   : > { %7289 = vmatprep.subr.bf16.mxu1 %v9756_v50  ;;  %v9801_v50 = vld [vmem:[%s11993_s15 + $0x48c] ss:$16 sps:$4 sm:$0xff]  }
 0x355   : > { %7323 = vmatpush2.bf16.msra.mxu0 %v9757_v18  ;;  %v9807_v18 = vld [vmem:[%s11993_s15 + $0x6ec] ss:$16 sps:$4 sm:$0xff]  }
 0x356   : > { %7290 = vmatpush2.bf16.msra.mxu1 %v9754_v53  ;;  %7324 = vmatprep.subr.bf16.mxu0 %v9765_v59  ;;  %v9804_v53 = vld [vmem:[%s11993_s15 + $0x46c] ss:$16 sps:$4 sm:$0xff]   ;;  %v9805_v59 = vld [vmem:[%s11993_s15 + $0x6e8] ss:$16 sps:$4 sm:$0xff]  }
 0x357   : > { %7291 = vmatprep.subr.bf16.mxu1 %v9762_v54  ;;  %v9802_v54 = vld [vmem:[%s11993_s15 + $0x468] ss:$16 sps:$4 sm:$0xff]  }
 0x359   : > { %7325 = vmatpush2.bf16.msra.mxu0 %v9763_v42  ;;  %v9813_v42 = vld [vmem:[%s11993_s15 + $0x6cc] ss:$16 sps:$4 sm:$0xff]  }
 0x35a   : > { %7292 = vmatpush2.bf16.msra.mxu1 %v9760_v60  ;;  %7326 = vmatprep.subr.bf16.mxu0 %v9771_v63  ;;  %v9810_v60 = vld [vmem:[%s11993_s15 + $0x44c] ss:$16 sps:$4 sm:$0xff]   ;;  %v9811_v63 = vld [vmem:[%s11993_s15 + $0x6c8] ss:$16 sps:$4 sm:$0xff]  }
 0x35b   : > { %7293 = vmatprep.subr.bf16.mxu1 %v9768_v62  ;;  %v9808_v62 = vld [vmem:[%s11993_s15 + $0x448] ss:$16 sps:$4 sm:$0xff]  }
 0x35d   : > { %7327 = vmatpush2.bf16.msra.mxu0 %v9769_v1  ;;  %v9819_v1 = vld [vmem:[%s11993_s15 + $0x6ac] ss:$16 sps:$4 sm:$0xff]  }
 0x35e   : > { %7294 = vmatpush2.bf16.msra.mxu1 %v9766_v0  ;;  %7328 = vmatprep.subr.bf16.mxu0 %v9777_v3  ;;  %v9816_v0 = vld [vmem:[%s11993_s15 + $0x42c] ss:$16 sps:$4 sm:$0xff]  }
 0x35f   : > { %7295 = vmatprep.subr.bf16.mxu1 %v9774_v2  ;;  %v9814_v2 = vld [vmem:[%s11993_s15 + $0x428] ss:$16 sps:$4 sm:$0xff]   ;;  %v9822_v3 = vld [vmem:[%s11993_s15 + $0x40c] ss:$16 sps:$4 sm:$0xff]  }
 0x361   : > { %7329 = vmatpush2.bf16.msra.mxu0 %v9775_v5  ;;  %v9820_v5 = vld [vmem:[%s11993_s15 + $0x408] ss:$16 sps:$4 sm:$0xff]  }
 0x362   : > { %7296 = vmatpush2.bf16.msra.mxu1 %v9772_v4  ;;  %7330 = vmatprep.subr.bf16.mxu0 %v9780_v7  ;;  %v9825_v4 = vld [vmem:[%s11993_s15 + $0x68c] ss:$16 sps:$4 sm:$0xff]   ;;  %v9823_v7 = vld [vmem:[%s11993_s15 + $0x688] ss:$16 sps:$4 sm:$0xff]  }
 0x363   : > { %7347 = vmatprep.subr.bf16.mxu1 %v9783_v8  ;;  %v9831_v8 = vld [vmem:[%s11993_s15 + $0x66c] ss:$16 sps:$4 sm:$0xff]  }
 0x364   : > { %v7012_v30 = vpop.f32.mrf.mxu0 }
 0x365   : > { %v7053_v33 = vpop.f32.mrf.mxu1  ;;  %7298 = vmatmul.mubr.bf16.vlgmr.msra.gmra.mxu1 %v12073_v28  ;;  %v7013_v34 = vadd.f32 %v7012_v30, %v12575_v41  ;;  %7331 = vmatpush2.bf16.msra.mxu0 %v9778_v11  ;;  %v9826_v11 = vld [vmem:[%s11993_s15 + $0x5e8] ss:$16 sps:$4 sm:$0xff]   ;;  %v9840_v30 = vld [vmem:[%s11993_s15 + $0x5ac] ss:$16 sps:$4 sm:$0xff]  }
 0x366   : > { %7348 = vmatpush1.bf16.msra.mxu1 %v9781_v12  ;;  %v7014_v9 = vpop.f32.mrf.mxu0  ;;  %7332 = vmatprep.subr.bf16.mxu0 %v9786_v55  ;;  %v9829_v12 = vld [vmem:[%s11993_s15 + $0x668] ss:$16 sps:$4 sm:$0xff]   ;;  %v9834_v55 = vld [vmem:[%s11993_s15 + $0x5cc] ss:$16 sps:$4 sm:$0xff]  }
 0x367   : > { %v7055_v10 = vpop.f32.mrf.mxu1  ;;  %7349 = vmatprep.subr.bf16.mxu1 %v9789_v25  ;;  %v12653_v37 = vadd.f32 %v7053_v33, %v7013_v34  ;;  %v7015_v27 = vadd.f32 %v7014_v9, %v12582_v51  ;;  %7379 = vmatprep.mubr.bf16.mxu1 %v12085_v16  ;;  %v9798_v51 = vld [vmem:[%s11993_s15 + $0x30c] ss:$16 sps:$4 sm:$0xff]   ;;  %v9796_v16 = vld [vmem:[%s11993_s15 + $0x308] ss:$16 sps:$4 sm:$0xff]  }
 0x368   : > { %v7016_v28 = vpop.f32.mrf.mxu0  ;;  %v9837_v25 = vld [vmem:[%s11993_s15 + $0x64c] ss:$16 sps:$4 sm:$0xff]   ;;  %v9838_v34 = vld [vmem:[%s11993_s15 + $0x5a8] ss:$16 sps:$4 sm:$0xff]  }
 0x369   : > { %v7057_v41 = vpop.f32.mrf.mxu1  ;;  %v12659_v40 = vadd.f32 %v7055_v10, %v7015_v27  ;;  %7333 = vmatpush2.bf16.msra.mxu0 %v9784_v19  ;;  %v9832_v19 = vld [vmem:[%s11993_s15 + $0x5c8] ss:$16 sps:$4 sm:$0xff]   ;;  %v9843_v33 = vld [vmem:[%s11993_s15 + $0x62c] ss:$16 sps:$4 sm:$0xff]  }
 0x36a   : > { %7350 = vmatpush1.bf16.msra.mxu1 %v9787_v23  ;;  %v7017_v49 = vpop.f32.mrf.mxu0  ;;  %7334 = vmatprep.subr.bf16.mxu0 %v9792_v35  ;;  %v9835_v23 = vld [vmem:[%s11993_s15 + $0x648] ss:$16 sps:$4 sm:$0xff]   ;;  %v9846_v10 = vld [vmem:[%s11993_s15 + $0x58c] ss:$16 sps:$4 sm:$0xff]  }
 0x36b   : > { %v7058_v48 = vpop.f32.mrf.mxu1  ;;  %7351 = vmatprep.subr.bf16.mxu1 %v9795_v36  ;;  %v9841_v9 = vld [vmem:[%s11993_s15 + $0x628] ss:$16 sps:$4 sm:$0xff]   ;;  %v9849_v35 = vld [vmem:[%s11993_s15 + $0x60c] ss:$16 sps:$4 sm:$0xff]  }
 0x36c   : > { %v9844_v36 = vld [vmem:[%s11993_s15 + $0x588] ss:$16 sps:$4 sm:$0xff]   ;;  %v9858_v49 = vld [vmem:[%s11993_s15 + $0x54c] ss:$16 sps:$4 sm:$0xff]  }
 0x36d   : > { %7335 = vmatpush2.bf16.msra.mxu0 %v9790_v43  ;;  %v9847_v27 = vld [vmem:[%s11993_s15 + $0x608] ss:$16 sps:$4 sm:$0xff]   ;;  %v9852_v43 = vld [vmem:[%s11993_s15 + $0x56c] ss:$16 sps:$4 sm:$0xff]  }
 0x36e   : > { %7352 = vmatpush1.bf16.msra.mxu1 %v9793_v46  ;;  %7336 = vmatprep.subr.bf16.mxu0 %v9798_v51  ;;  %v9855_v46 = vld [vmem:[%s11993_s15 + $0x7ec] ss:$16 sps:$4 sm:$0xff]   ;;  %v9850_v28 = vld [vmem:[%s11993_s15 + $0x568] ss:$16 sps:$4 sm:$0xff]  }
 0x36f   : > { %7353 = vmatprep.subr.bf16.mxu1 %v9801_v50  ;;  %v9853_v41 = vld [vmem:[%s11993_s15 + $0x7e8] ss:$16 sps:$4 sm:$0xff]   ;;  %v9861_v48 = vld [vmem:[%s11993_s15 + $0x7cc] ss:$16 sps:$4 sm:$0xff]  }
 0x370   : > { %v9856_v51 = vld [vmem:[%s11993_s15 + $0x548] ss:$16 sps:$4 sm:$0xff]  }
 0x371   : > { %7337 = vmatpush2.bf16.msra.mxu0 %v9796_v16  ;;  %v9859_v50 = vld [vmem:[%s11993_s15 + $0x7c8] ss:$16 sps:$4 sm:$0xff]   ;;  %v9864_v16 = vld [vmem:[%s11993_s15 + $0x52c] ss:$16 sps:$4 sm:$0xff]  }
 0x372   : > { %7354 = vmatpush1.bf16.msra.mxu1 %v9799_v52  ;;  %7388 = vmatprep.subr.bf16.mxu0 %v9807_v18  ;;  %v9867_v52 = vld [vmem:[%s11993_s15 + $0x7ac] ss:$16 sps:$4 sm:$0xff]   ;;  %v9865_v18 = vld [vmem:[%s11993_s15 + $0x7a8] ss:$16 sps:$4 sm:$0xff]  }
 0x373   : > { %7355 = vmatprep.subr.bf16.mxu1 %v9804_v53  ;;  %v9862_v53 = vld [vmem:[%s11993_s15 + $0x528] ss:$16 sps:$4 sm:$0xff]  }
 0x374   : > { %7339 = vmatmul.mubr.bf16.vlgmr.msra.gmra.mxu0 %v12077_v29  ;;  %v9817_v29 = vld [vmem:[%s11993_s15 + $0x6a8] ss:$16 sps:$4 sm:$0xff]  }
 0x375   : > { %7389 = vmatpush1.bf16.msra.mxu0 %v9805_v59  ;;  %7420 = vmatprep.mubr.bf16.mxu0 %v12089_v17  ;;  %v9828_v17 = vld [vmem:[%s11993_s15 + $0x5ec] ss:$16 sps:$4 sm:$0xff]  }
 0x376   : > { %7356 = vmatpush1.bf16.msra.mxu1 %v9802_v54  ;;  %7390 = vmatprep.subr.bf16.mxu0 %v9813_v42  ;;  %v9870_v54 = vld [vmem:[%s11993_s15 + $0x50c] ss:$16 sps:$4 sm:$0xff]   ;;  %v9871_v42 = vld [vmem:[%s11993_s15 + $0x788] ss:$16 sps:$4 sm:$0xff]  }
 0x377   : > { %7357 = vmatprep.subr.bf16.mxu1 %v9810_v60  ;;  %v9873_v59 = vld [vmem:[%s11993_s15 + $0x78c] ss:$16 sps:$4 sm:$0xff]   ;;  %v9868_v60 = vld [vmem:[%s11993_s15 + $0x508] ss:$16 sps:$4 sm:$0xff]  }
 0x379   : > { %7391 = vmatpush1.bf16.msra.mxu0 %v9811_v63  ;;  %v9879_v63 = vld [vmem:[%s11993_s15 + $0x8ec] ss:$16 sps:$4 sm:$0xff]  }
 0x37a   : > { %7358 = vmatpush1.bf16.msra.mxu1 %v9808_v62  ;;  %7392 = vmatprep.subr.bf16.mxu0 %v9819_v1  ;;  %v9876_v62 = vld [vmem:[%s11993_s15 + $0x76c] ss:$16 sps:$4 sm:$0xff]   ;;  %v9877_v1 = vld [vmem:[%s11993_s15 + $0x8e8] ss:$16 sps:$4 sm:$0xff]  }
 0x37b   : > { %7359 = vmatprep.subr.bf16.mxu1 %v9816_v0  ;;  %v9874_v0 = vld [vmem:[%s11993_s15 + $0x768] ss:$16 sps:$4 sm:$0xff]  }
 0x37d   : > { %7393 = vmatpush1.bf16.msra.mxu0 %v9817_v29  ;;  %v9885_v29 = vld [vmem:[%s11993_s15 + $0x8cc] ss:$16 sps:$4 sm:$0xff]  }
 0x37e   : > { %7360 = vmatpush1.bf16.msra.mxu1 %v9814_v2  ;;  %7394 = vmatprep.subr.bf16.mxu0 %v9825_v4  ;;  %v9882_v2 = vld [vmem:[%s11993_s15 + $0x74c] ss:$16 sps:$4 sm:$0xff]  }
 0x37f   : > { %7361 = vmatprep.subr.bf16.mxu1 %v9822_v3 }
 0x381   : > { %7395 = vmatpush1.bf16.msra.mxu0 %v9823_v7  ;;  %v9880_v7 = vld [vmem:[%s11993_s15 + $0x748] ss:$16 sps:$4 sm:$0xff]  }
 0x382   : > { %7362 = vmatpush1.bf16.msra.mxu1 %v9820_v5  ;;  %7396 = vmatprep.subr.bf16.mxu0 %v9831_v8 }
 0x383   : > { %7363 = vmatprep.subr.bf16.mxu1 %v9828_v17  ;;  %v9883_v17 = vld [vmem:[%s11993_s15 + $0x8c8] ss:$16 sps:$4 sm:$0xff]  }
 0x385   : > { %7397 = vmatpush1.bf16.msra.mxu0 %v9829_v12  ;;  %v9888_v12 = vld [vmem:[%s11993_s15 + $0x72c] ss:$16 sps:$4 sm:$0xff]  }
 0x386   : > { %7364 = vmatpush2.bf16.msra.mxu1 %v9826_v11  ;;  %7398 = vmatprep.subr.bf16.mxu0 %v9837_v25 }
 0x387   : > { %7365 = vmatprep.subr.bf16.mxu1 %v9834_v55  ;;  %v9891_v55 = vld [vmem:[%s11993_s15 + $0x8ac] ss:$16 sps:$4 sm:$0xff]  }
 0x389   : > { %7399 = vmatpush1.bf16.msra.mxu0 %v9835_v23 }
 0x38a   : > { %7366 = vmatpush2.bf16.msra.mxu1 %v9832_v19  ;;  %7400 = vmatprep.subr.bf16.mxu0 %v9843_v33  ;;  %v9889_v33 = vld [vmem:[%s11993_s15 + $0x8a8] ss:$16 sps:$4 sm:$0xff]  }
 0x38b   : > { %7367 = vmatprep.subr.bf16.mxu1 %v9840_v30  ;;  %v9886_v30 = vld [vmem:[%s11993_s15 + $0x728] ss:$16 sps:$4 sm:$0xff]  }
 0x38d   : > { %7401 = vmatpush1.bf16.msra.mxu0 %v9841_v9 }
 0x38e   : > { %7368 = vmatpush2.bf16.msra.mxu1 %v9838_v34  ;;  %7402 = vmatprep.subr.bf16.mxu0 %v9849_v35  ;;  %v9895_v35 = vld [vmem:[%s11993_s15 + $0x888] ss:$16 sps:$4 sm:$0xff]  }
 0x38f   : > { %7369 = vmatprep.subr.bf16.mxu1 %v9846_v10  ;;  %v9892_v10 = vld [vmem:[%s11993_s15 + $0x708] ss:$16 sps:$4 sm:$0xff]  }
 0x391   : > { %7403 = vmatpush1.bf16.msra.mxu0 %v9847_v27  ;;  %v9903_v27 = vld [vmem:[%s11993_s15 + $0xaec] ss:$16 sps:$4 sm:$0xff]  }
 0x392   : > { %7370 = vmatpush2.bf16.msra.mxu1 %v9844_v36  ;;  %7404 = vmatprep.subr.bf16.mxu0 %v9855_v46  ;;  %v9900_v36 = vld [vmem:[%s11993_s15 + $0x86c] ss:$16 sps:$4 sm:$0xff]   ;;  %v9901_v46 = vld [vmem:[%s11993_s15 + $0xae8] ss:$16 sps:$4 sm:$0xff]  }
 0x393   : > { %7371 = vmatprep.subr.bf16.mxu1 %v9852_v43  ;;  %v9898_v43 = vld [vmem:[%s11993_s15 + $0x868] ss:$16 sps:$4 sm:$0xff]  }
 0x395   : > { %7405 = vmatpush2.bf16.msra.mxu0 %v9853_v41  ;;  %v9909_v41 = vld [vmem:[%s11993_s15 + $0xacc] ss:$16 sps:$4 sm:$0xff]  }
 0x396   : > { %7372 = vmatpush2.bf16.msra.mxu1 %v9850_v28  ;;  %7406 = vmatprep.subr.bf16.mxu0 %v9861_v48  ;;  %v9906_v28 = vld [vmem:[%s11993_s15 + $0x84c] ss:$16 sps:$4 sm:$0xff]   ;;  %v9907_v48 = vld [vmem:[%s11993_s15 + $0xac8] ss:$16 sps:$4 sm:$0xff]  }
 0x397   : > { %7373 = vmatprep.subr.bf16.mxu1 %v9858_v49  ;;  %v9904_v49 = vld [vmem:[%s11993_s15 + $0x848] ss:$16 sps:$4 sm:$0xff]  }
 0x399   : > { %7407 = vmatpush2.bf16.msra.mxu0 %v9859_v50  ;;  %v9915_v50 = vld [vmem:[%s11993_s15 + $0xaac] ss:$16 sps:$4 sm:$0xff]  }
 0x39a   : > { %7374 = vmatpush2.bf16.msra.mxu1 %v9856_v51  ;;  %7408 = vmatprep.subr.bf16.mxu0 %v9867_v52  ;;  %v9912_v51 = vld [vmem:[%s11993_s15 + $0x82c] ss:$16 sps:$4 sm:$0xff]  }
 0x39b   : > { %7375 = vmatprep.subr.bf16.mxu1 %v9864_v16  ;;  %v9910_v16 = vld [vmem:[%s11993_s15 + $0x828] ss:$16 sps:$4 sm:$0xff]   ;;  %v9918_v52 = vld [vmem:[%s11993_s15 + $0x80c] ss:$16 sps:$4 sm:$0xff]  }
 0x39d   : > { %7409 = vmatpush2.bf16.msra.mxu0 %v9865_v18  ;;  %v9916_v18 = vld [vmem:[%s11993_s15 + $0x808] ss:$16 sps:$4 sm:$0xff]  }
 0x39e   : > { %7376 = vmatpush2.bf16.msra.mxu1 %v9862_v53  ;;  %7410 = vmatprep.subr.bf16.mxu0 %v9873_v59  ;;  %v9921_v53 = vld [vmem:[%s11993_s15 + $0xa8c] ss:$16 sps:$4 sm:$0xff]  }
 0x39f   : > { %7377 = vmatprep.subr.bf16.mxu1 %v9870_v54  ;;  %v9919_v54 = vld [vmem:[%s11993_s15 + $0xa88] ss:$16 sps:$4 sm:$0xff]   ;;  %v9927_v59 = vld [vmem:[%s11993_s15 + $0xa6c] ss:$16 sps:$4 sm:$0xff]  }
 0x3a1   : > { %7411 = vmatpush2.bf16.msra.mxu0 %v9871_v42  ;;  %v9925_v42 = vld [vmem:[%s11993_s15 + $0xa68] ss:$16 sps:$4 sm:$0xff]  }
 0x3a2   : > { %7378 = vmatpush2.bf16.msra.mxu1 %v9868_v60  ;;  %7412 = vmatprep.subr.bf16.mxu0 %v9876_v62  ;;  %v9922_v60 = vld [vmem:[%s11993_s15 + $0x9e8] ss:$16 sps:$4 sm:$0xff]   ;;  %v9930_v62 = vld [vmem:[%s11993_s15 + $0x9cc] ss:$16 sps:$4 sm:$0xff]  }
 0x3a3   : > { %7429 = vmatprep.subr.bf16.mxu1 %v9879_v63  ;;  %v9933_v63 = vld [vmem:[%s11993_s15 + $0xa4c] ss:$16 sps:$4 sm:$0xff]  }
 0x3a4   : > { %v7094_v3 = vpop.f32.mrf.mxu0 }
 0x3a5   : > { %v7135_v4 = vpop.f32.mrf.mxu1  ;;  %7380 = vmatmul.mubr.bf16.vlgmr.msra.gmra.mxu1 %v12157_v38  ;;  %v7095_v5 = vadd.f32 %v7094_v3, %v12653_v37  ;;  %7413 = vmatpush2.bf16.msra.mxu0 %v9874_v0  ;;  %v9928_v0 = vld [vmem:[%s11993_s15 + $0x9c8] ss:$16 sps:$4 sm:$0xff]  }
 0x3a6   : > { %7430 = vmatpush1.bf16.msra.mxu1 %v9877_v1  ;;  %v7096_v8 = vpop.f32.mrf.mxu0  ;;  %7414 = vmatprep.subr.bf16.mxu0 %v9882_v2  ;;  %v9931_v1 = vld [vmem:[%s11993_s15 + $0xa48] ss:$16 sps:$4 sm:$0xff]   ;;  %v9936_v2 = vld [vmem:[%s11993_s15 + $0x9ac] ss:$16 sps:$4 sm:$0xff]  }
 0x3a7   : > { %v7137_v11 = vpop.f32.mrf.mxu1  ;;  %7431 = vmatprep.subr.bf16.mxu1 %v9885_v29  ;;  %v12727_v25 = vadd.f32 %v7135_v4, %v7095_v5  ;;  %v7097_v38 = vadd.f32 %v7096_v8, %v12659_v40  ;;  %7461 = vmatprep.mubr.bf16.mxu1 %v12179_v44  ;;  %v9894_v40 = vld [vmem:[%s11993_s15 + $0x70c] ss:$16 sps:$4 sm:$0xff]   ;;  %v9934_v3 = vld [vmem:[%s11993_s15 + $0x9a8] ss:$16 sps:$4 sm:$0xff]  }
 0x3a8   : > { %v7098_v37 = vpop.f32.mrf.mxu0  ;;  %v9897_v44 = vld [vmem:[%s11993_s15 + $0x88c] ss:$16 sps:$4 sm:$0xff]   ;;  %v9937_v4 = vld [vmem:[%s11993_s15 + $0xa28] ss:$16 sps:$4 sm:$0xff]  }
 0x3a9   : > { %v7139_v19 = vpop.f32.mrf.mxu1  ;;  %v12731_v23 = vadd.f32 %v7137_v11, %v7097_v38  ;;  %7415 = vmatpush2.bf16.msra.mxu0 %v9880_v7  ;;  %v9939_v29 = vld [vmem:[%s11993_s15 + $0xa2c] ss:$16 sps:$4 sm:$0xff]   ;;  %v9943_v8 = vld [vmem:[%s11993_s15 + $0xa08] ss:$16 sps:$4 sm:$0xff]  }
 0x3aa   : > { %7432 = vmatpush1.bf16.msra.mxu1 %v9883_v17  ;;  %v7099_v34 = vpop.f32.mrf.mxu0  ;;  %7416 = vmatprep.subr.bf16.mxu0 %v9888_v12  ;;  %v9942_v5 = vld [vmem:[%s11993_s15 + $0x98c] ss:$16 sps:$4 sm:$0xff]   ;;  %v9940_v17 = vld [vmem:[%s11993_s15 + $0x988] ss:$16 sps:$4 sm:$0xff]  }
 0x3ab   : > { %v7140_v9 = vpop.f32.mrf.mxu1  ;;  %7433 = vmatprep.subr.bf16.mxu1 %v9891_v55  ;;  %v9945_v7 = vld [vmem:[%s11993_s15 + $0xa0c] ss:$16 sps:$4 sm:$0xff]   ;;  %v9946_v55 = vld [vmem:[%s11993_s15 + $0x968] ss:$16 sps:$4 sm:$0xff]  }
 0x3ac   : > { %v9948_v11 = vld [vmem:[%s11993_s15 + $0x96c] ss:$16 sps:$4 sm:$0xff]   ;;  %v9949_v38 = vld [vmem:[%s11993_s15 + $0xbe8] ss:$16 sps:$4 sm:$0xff]  }
 0x3ad   : > { %7417 = vmatpush2.bf16.msra.mxu0 %v9886_v30  ;;  %v9951_v12 = vld [vmem:[%s11993_s15 + $0xbec] ss:$16 sps:$4 sm:$0xff]   ;;  %v9952_v30 = vld [vmem:[%s11993_s15 + $0x948] ss:$16 sps:$4 sm:$0xff]  }
 0x3ae   : > { %7434 = vmatpush1.bf16.msra.mxu1 %v9889_v33  ;;  %7418 = vmatprep.subr.bf16.mxu0 %v9894_v40  ;;  %v9954_v37 = vld [vmem:[%s11993_s15 + $0x94c] ss:$16 sps:$4 sm:$0xff]   ;;  %v9955_v33 = vld [vmem:[%s11993_s15 + $0xbc8] ss:$16 sps:$4 sm:$0xff]  }
 0x3af   : > { %7435 = vmatprep.subr.bf16.mxu1 %v9897_v44  ;;  %v9957_v19 = vld [vmem:[%s11993_s15 + $0xbcc] ss:$16 sps:$4 sm:$0xff]   ;;  %v9958_v40 = vld [vmem:[%s11993_s15 + $0x928] ss:$16 sps:$4 sm:$0xff]  }
 0x3b0   : > { %v9960_v34 = vld [vmem:[%s11993_s15 + $0x92c] ss:$16 sps:$4 sm:$0xff]   ;;  %v9961_v44 = vld [vmem:[%s11993_s15 + $0xba8] ss:$16 sps:$4 sm:$0xff]  }
 0x3b1   : > { %7419 = vmatpush2.bf16.msra.mxu0 %v9892_v10  ;;  %v9963_v9 = vld [vmem:[%s11993_s15 + $0xbac] ss:$16 sps:$4 sm:$0xff]  }
 0x3b2   : > { %7436 = vmatpush1.bf16.msra.mxu1 %v9895_v35  ;;  %7470 = vmatprep.subr.bf16.mxu0 %v9903_v27  ;;  %v9966_v10 = vld [vmem:[%s11993_s15 + $0x90c] ss:$16 sps:$4 sm:$0xff]   ;;  %v9967_v27 = vld [vmem:[%s11993_s15 + $0xb88] ss:$16 sps:$4 sm:$0xff]  }
 0x3b3   : > { %7437 = vmatprep.subr.bf16.mxu1 %v9900_v36  ;;  %v9969_v35 = vld [vmem:[%s11993_s15 + $0xb8c] ss:$16 sps:$4 sm:$0xff]   ;;  %v9964_v36 = vld [vmem:[%s11993_s15 + $0x908] ss:$16 sps:$4 sm:$0xff]  }
 0x3b4   : > { %7421 = vmatmul.mubr.bf16.vlgmr.msra.gmra.mxu0 %v12161_v39  ;;  %v9913_v39 = vld [vmem:[%s11993_s15 + $0xaa8] ss:$16 sps:$4 sm:$0xff]  }
 0x3b5   : > { %7471 = vmatpush1.bf16.msra.mxu0 %v9901_v46  ;;  %7502 = vmatprep.mubr.bf16.mxu0 %v12183_v45  ;;  %v9924_v45 = vld [vmem:[%s11993_s15 + $0x9ec] ss:$16 sps:$4 sm:$0xff]  }
 0x3b6   : > { %7438 = vmatpush1.bf16.msra.mxu1 %v9898_v43  ;;  %7472 = vmatprep.subr.bf16.mxu0 %v9909_v41  ;;  %v9972_v43 = vld [vmem:[%s11993_s15 + $0xb6c] ss:$16 sps:$4 sm:$0xff]   ;;  %v9973_v41 = vld [vmem:[%s11993_s15 + $0xce8] ss:$16 sps:$4 sm:$0xff]  }
 0x3b7   : > { %7439 = vmatprep.subr.bf16.mxu1 %v9906_v28  ;;  %v9975_v46 = vld [vmem:[%s11993_s15 + $0xcec] ss:$16 sps:$4 sm:$0xff]   ;;  %v9970_v28 = vld [vmem:[%s11993_s15 + $0xb68] ss:$16 sps:$4 sm:$0xff]  }
 0x3b9   : > { %7473 = vmatpush1.bf16.msra.mxu0 %v9907_v48  ;;  %v9981_v48 = vld [vmem:[%s11993_s15 + $0xccc] ss:$16 sps:$4 sm:$0xff]  }
 0x3ba   : > { %7440 = vmatpush1.bf16.msra.mxu1 %v9904_v49  ;;  %7474 = vmatprep.subr.bf16.mxu0 %v9915_v50  ;;  %v9978_v49 = vld [vmem:[%s11993_s15 + $0xb4c] ss:$16 sps:$4 sm:$0xff]  }
 0x3bb   : > { %7441 = vmatprep.subr.bf16.mxu1 %v9912_v51 }
 0x3bd   : > { %7475 = vmatpush1.bf16.msra.mxu0 %v9913_v39  ;;  %v9976_v39 = vld [vmem:[%s11993_s15 + $0xb48] ss:$16 sps:$4 sm:$0xff]  }
 0x3be   : > { %7442 = vmatpush1.bf16.msra.mxu1 %v9910_v16  ;;  %7476 = vmatprep.subr.bf16.mxu0 %v9921_v53 }
 0x3bf   : > { %7443 = vmatprep.subr.bf16.mxu1 %v9918_v52  ;;  %v9979_v52 = vld [vmem:[%s11993_s15 + $0xcc8] ss:$16 sps:$4 sm:$0xff]  }
 0x3c1   : > { %7477 = vmatpush1.bf16.msra.mxu0 %v9919_v54  ;;  %v9984_v54 = vld [vmem:[%s11993_s15 + $0xb2c] ss:$16 sps:$4 sm:$0xff]  }
 0x3c2   : > { %7444 = vmatpush1.bf16.msra.mxu1 %v9916_v18  ;;  %7478 = vmatprep.subr.bf16.mxu0 %v9927_v59 }
 0x3c3   : > { %7445 = vmatprep.subr.bf16.mxu1 %v9924_v45  ;;  %v9987_v45 = vld [vmem:[%s11993_s15 + $0xcac] ss:$16 sps:$4 sm:$0xff]  }
 0x3c5   : > { %7479 = vmatpush1.bf16.msra.mxu0 %v9925_v42 }
 0x3c6   : > { %7446 = vmatpush2.bf16.msra.mxu1 %v9922_v60  ;;  %7480 = vmatprep.subr.bf16.mxu0 %v9933_v63  ;;  %v9985_v63 = vld [vmem:[%s11993_s15 + $0xca8] ss:$16 sps:$4 sm:$0xff]  }
 0x3c7   : > { %7447 = vmatprep.subr.bf16.mxu1 %v9930_v62  ;;  %v9982_v62 = vld [vmem:[%s11993_s15 + $0xb28] ss:$16 sps:$4 sm:$0xff]  }
 0x3c9   : > { %7481 = vmatpush1.bf16.msra.mxu0 %v9931_v1 }
 0x3ca   : > { %7448 = vmatpush2.bf16.msra.mxu1 %v9928_v0  ;;  %7482 = vmatprep.subr.bf16.mxu0 %v9939_v29  ;;  %v9991_v29 = vld [vmem:[%s11993_s15 + $0xc88] ss:$16 sps:$4 sm:$0xff]  }
 0x3cb   : > { %7449 = vmatprep.subr.bf16.mxu1 %v9936_v2  ;;  %v9988_v2 = vld [vmem:[%s11993_s15 + $0xb08] ss:$16 sps:$4 sm:$0xff]  }
 0x3cd   : > { %7483 = vmatpush1.bf16.msra.mxu0 %v9937_v4  ;;  %v9999_v4 = vld [vmem:[%s11993_s15 + $0xeec] ss:$16 sps:$4 sm:$0xff]  }
 0x3ce   : > { %7450 = vmatpush2.bf16.msra.mxu1 %v9934_v3  ;;  %7484 = vmatprep.subr.bf16.mxu0 %v9945_v7  ;;  %v9996_v3 = vld [vmem:[%s11993_s15 + $0xc6c] ss:$16 sps:$4 sm:$0xff]   ;;  %v9997_v7 = vld [vmem:[%s11993_s15 + $0xee8] ss:$16 sps:$4 sm:$0xff]  }
 0x3cf   : > { %7451 = vmatprep.subr.bf16.mxu1 %v9942_v5  ;;  %v9994_v5 = vld [vmem:[%s11993_s15 + $0xc68] ss:$16 sps:$4 sm:$0xff]  }
 0x3d1   : > { %7485 = vmatpush1.bf16.msra.mxu0 %v9943_v8  ;;  %v10005_v8 = vld [vmem:[%s11993_s15 + $0xecc] ss:$16 sps:$4 sm:$0xff]  }
 0x3d2   : > { %7452 = vmatpush2.bf16.msra.mxu1 %v9940_v17  ;;  %7486 = vmatprep.subr.bf16.mxu0 %v9951_v12  ;;  %v10002_v17 = vld [vmem:[%s11993_s15 + $0xc4c] ss:$16 sps:$4 sm:$0xff]  }
 0x3d3   : > { %7453 = vmatprep.subr.bf16.mxu1 %v9948_v11 }
 0x3d5   : > { %7487 = vmatpush2.bf16.msra.mxu0 %v9949_v38  ;;  %v10003_v38 = vld [vmem:[%s11993_s15 + $0xec8] ss:$16 sps:$4 sm:$0xff]  }
 0x3d6   : > { %7454 = vmatpush2.bf16.msra.mxu1 %v9946_v55  ;;  %7488 = vmatprep.subr.bf16.mxu0 %v9957_v19  ;;  %v10000_v55 = vld [vmem:[%s11993_s15 + $0xc48] ss:$16 sps:$4 sm:$0xff]   ;;  %v10008_v19 = vld [vmem:[%s11993_s15 + $0xc2c] ss:$16 sps:$4 sm:$0xff]  }
 0x3d7   : > { %7455 = vmatprep.subr.bf16.mxu1 %v9954_v37 }
 0x3d9   : > { %7489 = vmatpush2.bf16.msra.mxu0 %v9955_v33 }
 0x3da   : > { %7456 = vmatpush2.bf16.msra.mxu1 %v9952_v30  ;;  %7490 = vmatprep.subr.bf16.mxu0 %v9963_v9  ;;  %v10011_v30 = vld [vmem:[%s11993_s15 + $0xeac] ss:$16 sps:$4 sm:$0xff]   ;;  %v10009_v9 = vld [vmem:[%s11993_s15 + $0xea8] ss:$16 sps:$4 sm:$0xff]  }
 0x3db   : > { %7457 = vmatprep.subr.bf16.mxu1 %v9960_v34  ;;  %v10006_v34 = vld [vmem:[%s11993_s15 + $0xc28] ss:$16 sps:$4 sm:$0xff]  }
 0x3dd   : > { %7491 = vmatpush2.bf16.msra.mxu0 %v9961_v44  ;;  %v10014_v44 = vld [vmem:[%s11993_s15 + $0xc0c] ss:$16 sps:$4 sm:$0xff]  }
 0x3de   : > { %7458 = vmatpush2.bf16.msra.mxu1 %v9958_v40  ;;  %7492 = vmatprep.subr.bf16.mxu0 %v9969_v35  ;;  %v10012_v35 = vld [vmem:[%s11993_s15 + $0xc08] ss:$16 sps:$4 sm:$0xff]  }
 0x3df   : > { %7459 = vmatprep.subr.bf16.mxu1 %v9966_v10  ;;  %v10017_v10 = vld [vmem:[%s11993_s15 + $0xe8c] ss:$16 sps:$4 sm:$0xff]  }
 0x3e1   : > { %7493 = vmatpush2.bf16.msra.mxu0 %v9967_v27  ;;  %v10023_v27 = vld [vmem:[%s11993_s15 + $0xe6c] ss:$16 sps:$4 sm:$0xff]  }
 0x3e2   : > { %7460 = vmatpush2.bf16.msra.mxu1 %v9964_v36  ;;  %7494 = vmatprep.subr.bf16.mxu0 %v9972_v43  ;;  %v10020_v36 = vld [vmem:[%s11993_s15 + $0xdec] ss:$16 sps:$4 sm:$0xff]   ;;  %v10018_v43 = vld [vmem:[%s11993_s15 + $0xde8] ss:$16 sps:$4 sm:$0xff]  }
 0x3e3   : > { %7511 = vmatprep.subr.bf16.mxu1 %v9975_v46  ;;  %v10021_v46 = vld [vmem:[%s11993_s15 + $0xe68] ss:$16 sps:$4 sm:$0xff]  }
 0x3e4   : > { %v7176_v51 = vpop.f32.mrf.mxu0 }
 0x3e5   : > { %v7217_v50 = vpop.f32.mrf.mxu1  ;;  %7462 = vmatmul.mubr.bf16.vlgmr.msra.gmra.mxu1 %v12257_v56  ;;  %v7177_v16 = vadd.f32 %v7176_v51, %v12727_v25  ;;  %7495 = vmatpush2.bf16.msra.mxu0 %v9970_v28  ;;  %v10026_v28 = vld [vmem:[%s11993_s15 + $0xdcc] ss:$16 sps:$4 sm:$0xff]  }
 0x3e6   : > { %7512 = vmatpush1.bf16.msra.mxu1 %v9973_v41  ;;  %v7178_v53 = vpop.f32.mrf.mxu0  ;;  %7496 = vmatprep.subr.bf16.mxu0 %v9978_v49  ;;  %v10029_v41 = vld [vmem:[%s11993_s15 + $0xe4c] ss:$16 sps:$4 sm:$0xff]   ;;  %v10024_v49 = vld [vmem:[%s11993_s15 + $0xdc8] ss:$16 sps:$4 sm:$0xff]  }
 0x3e7   : > { %v7219_v18 = vpop.f32.mrf.mxu1  ;;  %7513 = vmatprep.subr.bf16.mxu1 %v9981_v48  ;;  %v7218_v59 = vadd.f32 %v7217_v50, %v7177_v16  ;;  %v7179_v60 = vadd.f32 %v7178_v53, %v12731_v23  ;;  %7543 = vmatprep.mubr.bf16.mxu1 %v12273_v26  ;;  %v9990_v23 = vld [vmem:[%s11993_s15 + $0xb0c] ss:$16 sps:$4 sm:$0xff]   ;;  %v10027_v48 = vld [vmem:[%s11993_s15 + $0xe48] ss:$16 sps:$4 sm:$0xff]  }
 0x3e8   : > { %v7180_v56 = vpop.f32.mrf.mxu0  ;;  %v9993_v26 = vld [vmem:[%s11993_s15 + $0xc8c] ss:$16 sps:$4 sm:$0xff]   ;;  %v10030_v16 = vld [vmem:[%s11993_s15 + $0xda8] ss:$16 sps:$4 sm:$0xff]  }
 0x3e9   : > { %v7221_v25 = vpop.f32.mrf.mxu1  ;;  %v7220_v42 = vadd.f32 %v7219_v18, %v7179_v60  ;;  %7497 = vmatpush2.bf16.msra.mxu0 %v9976_v39  ;;  %v10032_v51 = vld [vmem:[%s11993_s15 + $0xdac] ss:$16 sps:$4 sm:$0xff]   ;;  %v10033_v39 = vld [vmem:[%s11993_s15 + $0xe28] ss:$16 sps:$4 sm:$0xff]  }
 0x3ea   : > { %7514 = vmatpush1.bf16.msra.mxu1 %v9979_v52  ;;  %v7181_v0 = vpop.f32.mrf.mxu0  ;;  %7498 = vmatprep.subr.bf16.mxu0 %v9984_v54  ;;  %v10035_v50 = vld [vmem:[%s11993_s15 + $0xe2c] ss:$16 sps:$4 sm:$0xff]   ;;  %v10036_v18 = vld [vmem:[%s11993_s15 + $0xd88] ss:$16 sps:$4 sm:$0xff]  }
 0x3eb   : > { %v7222_v1 = vpop.f32.mrf.mxu1  ;;  %7515 = vmatprep.subr.bf16.mxu1 %v9987_v45  ;;  %v10038_v52 = vld [vmem:[%s11993_s15 + $0xd8c] ss:$16 sps:$4 sm:$0xff]   ;;  %v10039_v54 = vld [vmem:[%s11993_s15 + $0xe08] ss:$16 sps:$4 sm:$0xff]  }
 0x3ec   : > { %v10041_v53 = vld [vmem:[%s11993_s15 + $0xe0c] ss:$16 sps:$4 sm:$0xff]   ;;  %v10042_v60 = vld [vmem:[%s11993_s15 + $0xd68] ss:$16 sps:$4 sm:$0xff]  }
 0x3ed   : > { %7499 = vmatpush2.bf16.msra.mxu0 %v9982_v62  ;;  %v10044_v45 = vld [vmem:[%s11993_s15 + $0xd6c] ss:$16 sps:$4 sm:$0xff]   ;;  %v10045_v56 = vld [vmem:[%s11993_s15 + $0xfe8] ss:$16 sps:$4 sm:$0xff]  }
 0x3ee   : > { %7516 = vmatpush1.bf16.msra.mxu1 %v9985_v63  ;;  %7500 = vmatprep.subr.bf16.mxu0 %v9990_v23  ;;  %v10050_v25 = vld [vmem:[%s11993_s15 + $0xd4c] ss:$16 sps:$4 sm:$0xff]   ;;  %v10048_v62 = vld [vmem:[%s11993_s15 + $0xd48] ss:$16 sps:$4 sm:$0xff]  }
 0x3ef   : > { %7517 = vmatprep.subr.bf16.mxu1 %v9993_v26  ;;  %v10051_v63 = vld [vmem:[%s11993_s15 + $0xfc8] ss:$16 sps:$4 sm:$0xff]   ;;  %v10056_v0 = vld [vmem:[%s11993_s15 + $0xd2c] ss:$16 sps:$4 sm:$0xff]  }
 0x3f0   : > { %v10059_v1 = vld [vmem:[%s11993_s15 + $0xfac] ss:$16 sps:$4 sm:$0xff]   ;;  %v10054_v23 = vld [vmem:[%s11993_s15 + $0xd28] ss:$16 sps:$4 sm:$0xff]  }
 0x3f1   : > { %7501 = vmatpush2.bf16.msra.mxu0 %v9988_v2  ;;  %v10057_v26 = vld [vmem:[%s11993_s15 + $0xfa8] ss:$16 sps:$4 sm:$0xff]   ;;  %v10062_v2 = vld [vmem:[%s11993_s15 + $0xd0c] ss:$16 sps:$4 sm:$0xff]  }
 0x3f2   : > { %7518 = vmatpush1.bf16.msra.mxu1 %v9991_v29  ;;  %7552 = vmatprep.subr.bf16.mxu0 %v9999_v4  ;;  %v10065_v29 = vld [vmem:[%s11993_s15 + $0xf8c] ss:$16 sps:$4 sm:$0xff]   ;;  %v10063_v4 = vld [vmem:[%s11993_s15 + $0xf88] ss:$16 sps:$4 sm:$0xff]  }
 0x3f3   : > { %7519 = vmatprep.subr.bf16.mxu1 %v9996_v3  ;;  %v10060_v3 = vld [vmem:[%s11993_s15 + $0xd08] ss:$16 sps:$4 sm:$0xff]  }
 0x3f4   : > { %v7258_v11 = vpop.f32.mrf.mxu0  ;;  %7503 = vmatmul.mubr.bf16.vlgmr.msra.gmra.mxu0 %v12261_v57 }
 0x3f5   : > { %v12816_v12 = vadd.f32 %v7258_v11, %v7218_v59  ;;  %7553 = vmatpush1.bf16.msra.mxu0 %v9997_v7  ;;  %7584 = vmatprep.mubr.bf16.mxu0 %v12277_v61  ;;  %v10015_v61 = vld [vmem:[%s11993_s15 + $0xe88] ss:$16 sps:$4 sm:$0xff]   ;;  %v10047_v59 = vld [vmem:[%s11993_s15 + $0xfec] ss:$16 sps:$4 sm:$0xff]  }
 0x3f6   : > { %7520 = vmatpush1.bf16.msra.mxu1 %v9994_v5  ;;  %v7260_v37 = vpop.f32.mrf.mxu0  ;;  %7554 = vmatprep.subr.bf16.mxu0 %v10005_v8  ;;  %v10068_v5 = vld [vmem:[%s11993_s15 + $0xf6c] ss:$16 sps:$4 sm:$0xff]   ;;  %v10069_v8 = vld [vmem:[%s11993_s15 + $0x10e8] ss:$16 sps:$4 sm:$0xff]  }
 0x3f7   : > { %7521 = vmatprep.subr.bf16.mxu1 %v10002_v17  ;;  %v12822_v33 = vadd.f32 %v7260_v37, %v7220_v42  ;;  %v10053_v42 = vld [vmem:[%s11993_s15 + $0xfcc] ss:$16 sps:$4 sm:$0xff]   ;;  %v10066_v17 = vld [vmem:[%s11993_s15 + $0xf68] ss:$16 sps:$4 sm:$0xff]  }
 0x3f8   : > { %v7262_v57 = vpop.f32.mrf.mxu0  ;;  %v10071_v7 = vld [vmem:[%s11993_s15 + $0x10ec] ss:$16 sps:$4 sm:$0xff]   ;;  %v10072_v37 = vld [vmem:[%s11993_s15 + $0xf48] ss:$16 sps:$4 sm:$0xff]  }
 0x3f9   : > { %7555 = vmatpush1.bf16.msra.mxu0 %v10003_v38  ;;  %v10074_v11 = vld [vmem:[%s11993_s15 + $0xf4c] ss:$16 sps:$4 sm:$0xff]  }
 0x3fa   : > { %7522 = vmatpush1.bf16.msra.mxu1 %v10000_v55  ;;  %v7263_v40 = vpop.f32.mrf.mxu0  ;;  %7556 = vmatprep.subr.bf16.mxu0 %v10011_v30  ;;  %v10077_v55 = vld [vmem:[%s11993_s15 + $0x10cc] ss:$16 sps:$4 sm:$0xff]  }
 0x3fb   : > { %7523 = vmatprep.subr.bf16.mxu1 %v10008_v19  ;;  %v10075_v19 = vld [vmem:[%s11993_s15 + $0x10c8] ss:$16 sps:$4 sm:$0xff]   ;;  %v10080_v57 = vld [vmem:[%s11993_s15 + $0xf2c] ss:$16 sps:$4 sm:$0xff]  }
 0x3fc   : > { %v10081_v40 = vld [vmem:[%s11993_s15 + $0x10a8] ss:$16 sps:$4 sm:$0xff]  }
 0x3fd   : > { %7557 = vmatpush1.bf16.msra.mxu0 %v10009_v9 }
 0x3fe   : > { %7524 = vmatpush1.bf16.msra.mxu1 %v10006_v34  ;;  %7558 = vmatprep.subr.bf16.mxu0 %v10017_v10  ;;  %v10083_v34 = vld [vmem:[%s11993_s15 + $0x10ac] ss:$16 sps:$4 sm:$0xff]  }
 0x3ff   : > { %7525 = vmatprep.subr.bf16.mxu1 %v10014_v44  ;;  %v10086_v10 = vld [vmem:[%s11993_s15 + $0xf0c] ss:$16 sps:$4 sm:$0xff]  }
 0x401   : > { %7559 = vmatpush1.bf16.msra.mxu0 %v10015_v61  ;;  %v2711_v61 = vsub.s32 2, %v12343_v6 }
 0x402   : > { %7526 = vmatpush1.bf16.msra.mxu1 %v10012_v35  ;;  %7560 = vmatprep.subr.bf16.mxu0 %v10023_v27  ;;  %v10089_v35 = vld [vmem:[%s11993_s15 + $0x108c] ss:$16 sps:$4 sm:$0xff]   ;;  %v10087_v27 = vld [vmem:[%s11993_s15 + $0x1088] ss:$16 sps:$4 sm:$0xff]  }
 0x403   : > { %7527 = vmatprep.subr.bf16.mxu1 %v10020_v36  ;;  %v10084_v36 = vld [vmem:[%s11993_s15 + $0xf08] ss:$16 sps:$4 sm:$0xff]  }
 0x405   : > { %7561 = vmatpush1.bf16.msra.mxu0 %v10021_v46  ;;  %v10095_v46 = vld [vmem:[%s11993_s15 + $0x12ec] ss:$16 sps:$4 sm:$0xff]  }
 0x406   : > { %7528 = vmatpush2.bf16.msra.mxu1 %v10018_v43  ;;  %7562 = vmatprep.subr.bf16.mxu0 %v10029_v41  ;;  %v10092_v43 = vld [vmem:[%s11993_s15 + $0x106c] ss:$16 sps:$4 sm:$0xff]  }
 0x407   : > { %7529 = vmatprep.subr.bf16.mxu1 %v10026_v28  ;;  %v10282_v28 = vld [vmem:[%s12349_s12] sm:$0xf]  ;;  %s1893_s12 = scalar_lea.vmem %s13142_s4, %s13151_s20 }
 0x408   : > { %v2712_v41 = vrot.slane %v10282_v28, %v2711_v61  ;;  %v10152_v61 = vld [vmem:[%s11993_s15 + $0x112c] ss:$16 sps:$4 sm:$0xff]  }
 0x409   : > { %7563 = vmatpush1.bf16.msra.mxu0 %v10027_v48  ;;  %v10090_v48 = vld [vmem:[%s11993_s15 + $0x1068] ss:$16 sps:$4 sm:$0xff]  }
 0x40a   : > { %7530 = vmatpush2.bf16.msra.mxu1 %v10024_v49  ;;  %7564 = vmatprep.subr.bf16.mxu0 %v10035_v50  ;;  %v10101_v50 = vld [vmem:[%s11993_s15 + $0x12cc] ss:$16 sps:$4 sm:$0xff]  }
 0x40b   : > { %7531 = vmatprep.subr.bf16.mxu1 %v10032_v51  ;;  %v10093_v51 = vld [vmem:[%s11993_s15 + $0x12e8] ss:$16 sps:$4 sm:$0xff]  }
 0x40d   : > { %7565 = vmatpush1.bf16.msra.mxu0 %v10033_v39 }
 0x40e   : > { %7532 = vmatpush2.bf16.msra.mxu1 %v10030_v16  ;;  %7566 = vmatprep.subr.bf16.mxu0 %v10041_v53 }
 0x40f   : > { %7533 = vmatprep.subr.bf16.mxu1 %v10038_v52 }
 0x411   : > { %7567 = vmatpush1.bf16.msra.mxu0 %v10039_v54  ;;  %v10099_v54 = vld [vmem:[%s11993_s15 + $0x12c8] ss:$16 sps:$4 sm:$0xff]  }
 0x412   : > { %7534 = vmatpush2.bf16.msra.mxu1 %v10036_v18  ;;  %7568 = vmatprep.subr.bf16.mxu0 %v10047_v59  ;;  %v10096_v18 = vld [vmem:[%s11993_s15 + $0x1048] ss:$16 sps:$4 sm:$0xff]   ;;  %v10104_v59 = vld [vmem:[%s11993_s15 + $0x102c] ss:$16 sps:$4 sm:$0xff]  }
 0x413   : > { %7535 = vmatprep.subr.bf16.mxu1 %v10044_v45 }
 0x415   : > { %7569 = vmatpush2.bf16.msra.mxu0 %v10045_v56 }
 0x416   : > { %7536 = vmatpush2.bf16.msra.mxu1 %v10042_v60  ;;  %7570 = vmatprep.subr.bf16.mxu0 %v10053_v42  ;;  %v10107_v60 = vld [vmem:[%s11993_s15 + $0x12ac] ss:$16 sps:$4 sm:$0xff]   ;;  %v10105_v42 = vld [vmem:[%s11993_s15 + $0x12a8] ss:$16 sps:$4 sm:$0xff]  }
 0x417   : > { %7537 = vmatprep.subr.bf16.mxu1 %v10050_v25  ;;  %v10102_v25 = vld [vmem:[%s11993_s15 + $0x1028] ss:$16 sps:$4 sm:$0xff]  }
 0x419   : > { %7571 = vmatpush2.bf16.msra.mxu0 %v10051_v63  ;;  %v10110_v63 = vld [vmem:[%s11993_s15 + $0x100c] ss:$16 sps:$4 sm:$0xff]  }
 0x41a   : > { %7538 = vmatpush2.bf16.msra.mxu1 %v10048_v62  ;;  %7572 = vmatprep.subr.bf16.mxu0 %v10059_v1  ;;  %v10108_v1 = vld [vmem:[%s11993_s15 + $0x1008] ss:$16 sps:$4 sm:$0xff]  }
 0x41b   : > { %7539 = vmatprep.subr.bf16.mxu1 %v10056_v0  ;;  %v10113_v0 = vld [vmem:[%s11993_s15 + $0x128c] ss:$16 sps:$4 sm:$0xff]  }
 0x41d   : > { %7573 = vmatpush2.bf16.msra.mxu0 %v10057_v26  ;;  %v10119_v26 = vld [vmem:[%s11993_s15 + $0x126c] ss:$16 sps:$4 sm:$0xff]  }
 0x41e   : > { %7540 = vmatpush2.bf16.msra.mxu1 %v10054_v23  ;;  %7574 = vmatprep.subr.bf16.mxu0 %v10065_v29  ;;  %v10116_v23 = vld [vmem:[%s11993_s15 + $0x11ec] ss:$16 sps:$4 sm:$0xff]   ;;  %v10117_v29 = vld [vmem:[%s11993_s15 + $0x1268] ss:$16 sps:$4 sm:$0xff]  }
 0x41f   : > { %7541 = vmatprep.subr.bf16.mxu1 %v10062_v2  ;;  %v10114_v2 = vld [vmem:[%s11993_s15 + $0x11e8] ss:$16 sps:$4 sm:$0xff]  }
 0x421   : > { %7575 = vmatpush2.bf16.msra.mxu0 %v10063_v4  ;;  %v10125_v4 = vld [vmem:[%s11993_s15 + $0x124c] ss:$16 sps:$4 sm:$0xff]  }
 0x422   : > { %7542 = vmatpush2.bf16.msra.mxu1 %v10060_v3  ;;  %7576 = vmatprep.subr.bf16.mxu0 %v10068_v5  ;;  %v10122_v3 = vld [vmem:[%s11993_s15 + $0x11cc] ss:$16 sps:$4 sm:$0xff]   ;;  %v10120_v5 = vld [vmem:[%s11993_s15 + $0x11c8] ss:$16 sps:$4 sm:$0xff]  }
 0x423   : > { %7593 = vmatprep.subr.bf16.mxu1 %v10071_v7  ;;  %v10123_v7 = vld [vmem:[%s11993_s15 + $0x1248] ss:$16 sps:$4 sm:$0xff]  }
 0x425   : > { %v7299_v38 = vpop.f32.mrf.mxu1  ;;  %7544 = vmatmul.mubr.bf16.vlgmr.msra.gmra.mxu1 %v12361_v20  ;;  %7577 = vmatpush2.bf16.msra.mxu0 %v10066_v17  ;;  %v10078_v20 = vld [vmem:[%s11993_s15 + $0xf28] ss:$16 sps:$4 sm:$0xff]   ;;  %v10128_v17 = vld [vmem:[%s11993_s15 + $0x11ac] ss:$16 sps:$4 sm:$0xff]  }
 0x426   : > { %7594 = vmatpush1.bf16.msra.mxu1 %v10069_v8  ;;  %7578 = vmatprep.subr.bf16.mxu0 %v10074_v11  ;;  %v7300_v16 = vadd.f32 %v7299_v38, %v2712_v41  ;;  %v10131_v8 = vld [vmem:[%s11993_s15 + $0x122c] ss:$16 sps:$4 sm:$0xff]   ;;  %v10126_v11 = vld [vmem:[%s11993_s15 + $0x11a8] ss:$16 sps:$4 sm:$0xff]  }
 0x427   : > { %v7301_v30 = vpop.f32.mrf.mxu1  ;;  %7595 = vmatprep.subr.bf16.mxu1 %v10077_v55  ;;  %7625 = vmatprep.mubr.bf16.mxu1 %v12382_v31  ;;  %v2715_v31 = vsub.s32 3, %v12343_v6  ;;  %v10098_v6 = vld [vmem:[%s11993_s15 + $0x104c] ss:$16 sps:$4 sm:$0xff]   ;;  %v10129_v55 = vld [vmem:[%s11993_s15 + $0x1228] ss:$16 sps:$4 sm:$0xff]  }
 0x428   : > { %v10134_v38 = vld [vmem:[%s11993_s15 + $0x118c] ss:$16 sps:$4 sm:$0xff]   ;;  %v10159_v41 = vld [vmem:[%s11993_s15 + $0x1388] ss:$16 sps:$4 sm:$0xff]  }
 0x429   : > { %v7303_v9 = vpop.f32.mrf.mxu1  ;;  %7579 = vmatpush2.bf16.msra.mxu0 %v10072_v37  ;;  %v2716_v49 = vrot.slane %v10282_v28, %v2715_v31  ;;  %v10137_v37 = vld [vmem:[%s11993_s15 + $0x120c] ss:$16 sps:$4 sm:$0xff]   ;;  %v10156_v28 = vld [vmem:[%s11993_s15 + $0x1108] ss:$16 sps:$4 sm:$0xff]  }
 0x42a   : > { %7596 = vmatpush1.bf16.msra.mxu1 %v10075_v19  ;;  %7580 = vmatprep.subr.bf16.mxu0 %v10080_v57  ;;  %v10132_v19 = vld [vmem:[%s11993_s15 + $0x1188] ss:$16 sps:$4 sm:$0xff]   ;;  %v10140_v57 = vld [vmem:[%s11993_s15 + $0x116c] ss:$16 sps:$4 sm:$0xff]  }
 0x42b   : > { %v7304_v44 = vpop.f32.mrf.mxu1  ;;  %7597 = vmatprep.subr.bf16.mxu1 %v10083_v34  ;;  %v7302_v52 = vadd.f32 %v7301_v30, %v2716_v49  ;;  %v10135_v30 = vld [vmem:[%s11993_s15 + $0x1208] ss:$16 sps:$4 sm:$0xff]   ;;  %v10143_v34 = vld [vmem:[%s11993_s15 + $0x13ec] ss:$16 sps:$4 sm:$0xff]  }
 0x42c   : > { %v10138_v9 = vld [vmem:[%s11993_s15 + $0x1168] ss:$16 sps:$4 sm:$0xff]   ;;  %v10149_v44 = vld [vmem:[%s11993_s15 + $0x13cc] ss:$16 sps:$4 sm:$0xff]  }
 0x42d   : > { %7581 = vmatpush2.bf16.msra.mxu0 %v10078_v20  ;;  %v10141_v20 = vld [vmem:[%s11993_s15 + $0x13e8] ss:$16 sps:$4 sm:$0xff]   ;;  %v10155_v31 = vld [vmem:[%s11993_s15 + $0x13ac] ss:$16 sps:$4 sm:$0xff]  }
 0x42e   : > { %7598 = vmatpush1.bf16.msra.mxu1 %v10081_v40  ;;  %7582 = vmatprep.subr.bf16.mxu0 %v10086_v10  ;;  %v10146_v40 = vld [vmem:[%s11993_s15 + $0x114c] ss:$16 sps:$4 sm:$0xff]   ;;  %v10144_v10 = vld [vmem:[%s11993_s15 + $0x1148] ss:$16 sps:$4 sm:$0xff]  }
 0x42f   : > { %7599 = vmatprep.subr.bf16.mxu1 %v10089_v35  ;;  %v10147_v35 = vld [vmem:[%s11993_s15 + $0x13c8] ss:$16 sps:$4 sm:$0xff]   ;;  %v10164_v49 = vld [vmem:[%s11993_s15 + $0x136c] ss:$16 sps:$4 sm:$0xff]  }
 0x431   : > { %7583 = vmatpush2.bf16.msra.mxu0 %v10084_v36  ;;  %v10150_v36 = vld [vmem:[%s11993_s15 + $0x1128] ss:$16 sps:$4 sm:$0xff]  }
 0x432   : > { %7600 = vmatpush1.bf16.msra.mxu1 %v10087_v27  ;;  %7634 = vmatprep.subr.bf16.mxu0 %v10095_v46  ;;  %v10153_v27 = vld [vmem:[%s11993_s15 + $0x13a8] ss:$16 sps:$4 sm:$0xff]   ;;  %v10161_v46 = vld [vmem:[%s11993_s15 + $0x138c] ss:$16 sps:$4 sm:$0xff]  }
 0x433   : > { %7601 = vmatprep.subr.bf16.mxu1 %v10092_v43  ;;  %v10158_v43 = vld [vmem:[%s11993_s15 + $0x110c] ss:$16 sps:$4 sm:$0xff]  }
 0x434   : > { %v7340_v39 = vpop.f32.mrf.mxu0  ;;  %7585 = vmatmul.mubr.bf16.vlgmr.msra.gmra.mxu0 %v12365_v21 }
 0x435   : > { %v12891_v53 = vadd.f32 %v7340_v39, %v7300_v16  ;;  %7635 = vmatpush1.bf16.msra.mxu0 %v10093_v51  ;;  %7666 = vmatprep.mubr.bf16.mxu0 %v12386_v32  ;;  %v10111_v32 = vld [vmem:[%s11993_s15 + $0x1288] ss:$16 sps:$4 sm:$0xff]   ;;  %v10173_v16 = vld [vmem:[%s11993_s15 + $0x14cc] ss:$16 sps:$4 sm:$0xff]  }
 0x436   : > { %7602 = vmatpush1.bf16.msra.mxu1 %v10090_v48  ;;  %v7342_v45 = vpop.f32.mrf.mxu0  ;;  %7636 = vmatprep.subr.bf16.mxu0 %v10101_v50  ;;  %v10167_v48 = vld [vmem:[%s11993_s15 + $0x14ec] ss:$16 sps:$4 sm:$0xff]   ;;  %v10162_v51 = vld [vmem:[%s11993_s15 + $0x1368] ss:$16 sps:$4 sm:$0xff]  }
 0x437   : > { %7603 = vmatprep.subr.bf16.mxu1 %v10098_v6  ;;  %v12897_v56 = vadd.f32 %v7342_v45, %v7302_v52  ;;  %v10165_v6 = vld [vmem:[%s11993_s15 + $0x14e8] ss:$16 sps:$4 sm:$0xff]   ;;  %v10170_v50 = vld [vmem:[%s11993_s15 + $0x134c] ss:$16 sps:$4 sm:$0xff]  }
 0x438   : > { %v7344_v21 = vpop.f32.mrf.mxu0 }
 0x439   : > { %7637 = vmatpush1.bf16.msra.mxu0 %v10099_v54  ;;  %v10171_v54 = vld [vmem:[%s11993_s15 + $0x14c8] ss:$16 sps:$4 sm:$0xff]  }
 0x43a   : > { %7604 = vmatpush1.bf16.msra.mxu1 %v10096_v18  ;;  %v7345_v62 = vpop.f32.mrf.mxu0  ;;  %7638 = vmatprep.subr.bf16.mxu0 %v10107_v60  ;;  %v10168_v18 = vld [vmem:[%s11993_s15 + $0x1348] ss:$16 sps:$4 sm:$0xff]   ;;  %v10179_v60 = vld [vmem:[%s11993_s15 + $0x14ac] ss:$16 sps:$4 sm:$0xff]  }
 0x43b   : > { %7605 = vmatprep.subr.bf16.mxu1 %v10104_v59  ;;  %v10176_v59 = vld [vmem:[%s11993_s15 + $0x132c] ss:$16 sps:$4 sm:$0xff]  }
 0x43c   : > { %v10182_v62 = vld [vmem:[%s11993_s15 + $0x130c] ss:$16 sps:$4 sm:$0xff]  }
 0x43d   : > { %7639 = vmatpush1.bf16.msra.mxu0 %v10105_v42 }
 0x43e   : > { %7606 = vmatpush1.bf16.msra.mxu1 %v10102_v25  ;;  %7640 = vmatprep.subr.bf16.mxu0 %v10113_v0  ;;  %v10177_v25 = vld [vmem:[%s11993_s15 + $0x14a8] ss:$16 sps:$4 sm:$0xff]   ;;  %v10188_v0 = vld [vmem:[%s11993_s15 + $0x146c] ss:$16 sps:$4 sm:$0xff]  }
 0x43f   : > { %7607 = vmatprep.subr.bf16.mxu1 %v10110_v63  ;;  %v10185_v63 = vld [vmem:[%s11993_s15 + $0x148c] ss:$16 sps:$4 sm:$0xff]  }
 0x441   : > { %7641 = vmatpush1.bf16.msra.mxu0 %v10111_v32  ;;  %v10186_v32 = vld [vmem:[%s11993_s15 + $0x1468] ss:$16 sps:$4 sm:$0xff]  }
 0x442   : > { %7608 = vmatpush1.bf16.msra.mxu1 %v10108_v1  ;;  %7642 = vmatprep.subr.bf16.mxu0 %v10119_v26  ;;  %v10191_v1 = vld [vmem:[%s11993_s15 + $0x16ec] ss:$16 sps:$4 sm:$0xff]  }
 0x443   : > { %7609 = vmatprep.subr.bf16.mxu1 %v10116_v23  ;;  %v10189_v23 = vld [vmem:[%s11993_s15 + $0x16e8] ss:$16 sps:$4 sm:$0xff]   ;;  %v10194_v26 = vld [vmem:[%s11993_s15 + $0x144c] ss:$16 sps:$4 sm:$0xff]  }
 0x445   : > { %7643 = vmatpush1.bf16.msra.mxu0 %v10117_v29 }
 0x446   : > { %7610 = vmatpush2.bf16.msra.mxu1 %v10114_v2  ;;  %7644 = vmatprep.subr.bf16.mxu0 %v10125_v4  ;;  %v10197_v2 = vld [vmem:[%s11993_s15 + $0x16cc] ss:$16 sps:$4 sm:$0xff]   ;;  %v10192_v4 = vld [vmem:[%s11993_s15 + $0x1448] ss:$16 sps:$4 sm:$0xff]  }
 0x447   : > { %7611 = vmatprep.subr.bf16.mxu1 %v10122_v3 }
 0x449   : > { %7645 = vmatpush1.bf16.msra.mxu0 %v10123_v7 }
 0x44a   : > { %7612 = vmatpush2.bf16.msra.mxu1 %v10120_v5  ;;  %7646 = vmatprep.subr.bf16.mxu0 %v10131_v8  ;;  %v10195_v5 = vld [vmem:[%s11993_s15 + $0x16c8] ss:$16 sps:$4 sm:$0xff]   ;;  %v10203_v8 = vld [vmem:[%s11993_s15 + $0x16ac] ss:$16 sps:$4 sm:$0xff]  }
 0x44b   : > { %7613 = vmatprep.subr.bf16.mxu1 %v10128_v17  ;;  %v10200_v17 = vld [vmem:[%s11993_s15 + $0x142c] ss:$16 sps:$4 sm:$0xff]  }
 0x44d   : > { %7647 = vmatpush1.bf16.msra.mxu0 %v10129_v55  ;;  %v10198_v55 = vld [vmem:[%s11993_s15 + $0x1428] ss:$16 sps:$4 sm:$0xff]  }
 0x44e   : > { %7614 = vmatpush2.bf16.msra.mxu1 %v10126_v11  ;;  %7648 = vmatprep.subr.bf16.mxu0 %v10137_v37 }
 0x44f   : > { %7615 = vmatprep.subr.bf16.mxu1 %v10134_v38  ;;  %v10201_v38 = vld [vmem:[%s11993_s15 + $0x16a8] ss:$16 sps:$4 sm:$0xff]  }
 0x451   : > { %7649 = vmatpush1.bf16.msra.mxu0 %v10135_v30  ;;  %v10209_v30 = vld [vmem:[%s11993_s15 + $0x168c] ss:$16 sps:$4 sm:$0xff]  }
 0x452   : > { %7616 = vmatpush2.bf16.msra.mxu1 %v10132_v19  ;;  %7650 = vmatprep.subr.bf16.mxu0 %v10143_v34  ;;  %v10206_v19 = vld [vmem:[%s11993_s15 + $0x140c] ss:$16 sps:$4 sm:$0xff]  }
 0x453   : > { %7617 = vmatprep.subr.bf16.mxu1 %v10140_v57  ;;  %v10204_v57 = vld [vmem:[%s11993_s15 + $0x1408] ss:$16 sps:$4 sm:$0xff]   ;;  %v10212_v34 = vld [vmem:[%s11993_s15 + $0x15ec] ss:$16 sps:$4 sm:$0xff]  }
 0x455   : > { %7651 = vmatpush2.bf16.msra.mxu0 %v10141_v20  ;;  %v10210_v20 = vld [vmem:[%s11993_s15 + $0x15e8] ss:$16 sps:$4 sm:$0xff]  }
 0x456   : > { %7618 = vmatpush2.bf16.msra.mxu1 %v10138_v9  ;;  %7652 = vmatprep.subr.bf16.mxu0 %v10149_v44  ;;  %v10215_v9 = vld [vmem:[%s11993_s15 + $0x166c] ss:$16 sps:$4 sm:$0xff]  }
 0x457   : > { %7619 = vmatprep.subr.bf16.mxu1 %v10146_v40  ;;  %v10213_v40 = vld [vmem:[%s11993_s15 + $0x1668] ss:$16 sps:$4 sm:$0xff]   ;;  %v10218_v44 = vld [vmem:[%s11993_s15 + $0x15cc] ss:$16 sps:$4 sm:$0xff]  }
 0x459   : > { %7653 = vmatpush2.bf16.msra.mxu0 %v10147_v35  ;;  %v10216_v35 = vld [vmem:[%s11993_s15 + $0x15c8] ss:$16 sps:$4 sm:$0xff]  }
 0x45a   : > { %7620 = vmatpush2.bf16.msra.mxu1 %v10144_v10  ;;  %7654 = vmatprep.subr.bf16.mxu0 %v10155_v31  ;;  %v10221_v10 = vld [vmem:[%s11993_s15 + $0x164c] ss:$16 sps:$4 sm:$0xff]  }
 0x45b   : > { %7621 = vmatprep.subr.bf16.mxu1 %v10152_v61  ;;  %v10219_v61 = vld [vmem:[%s11993_s15 + $0x1648] ss:$16 sps:$4 sm:$0xff]   ;;  %v10224_v31 = vld [vmem:[%s11993_s15 + $0x15ac] ss:$16 sps:$4 sm:$0xff]  }
 0x45d   : > { %7655 = vmatpush2.bf16.msra.mxu0 %v10153_v27  ;;  %v10222_v27 = vld [vmem:[%s11993_s15 + $0x15a8] ss:$16 sps:$4 sm:$0xff]  }
 0x45e   : > { %7622 = vmatpush2.bf16.msra.mxu1 %v10150_v36  ;;  %7656 = vmatprep.subr.bf16.mxu0 %v10161_v46  ;;  %v10227_v36 = vld [vmem:[%s11993_s15 + $0x162c] ss:$16 sps:$4 sm:$0xff]  }
 0x45f   : > { %7623 = vmatprep.subr.bf16.mxu1 %v10158_v43  ;;  %v10225_v43 = vld [vmem:[%s11993_s15 + $0x1628] ss:$16 sps:$4 sm:$0xff]   ;;  %v10230_v46 = vld [vmem:[%s11993_s15 + $0x158c] ss:$16 sps:$4 sm:$0xff]  }
 0x461   : > { %7657 = vmatpush2.bf16.msra.mxu0 %v10159_v41  ;;  %v10228_v41 = vld [vmem:[%s11993_s15 + $0x1588] ss:$16 sps:$4 sm:$0xff]  }
 0x462   : > { %7624 = vmatpush2.bf16.msra.mxu1 %v10156_v28  ;;  %7658 = vmatprep.subr.bf16.mxu0 %v10164_v49  ;;  %v10233_v28 = vld [vmem:[%s11993_s15 + $0x160c] ss:$16 sps:$4 sm:$0xff]   ;;  %v10231_v49 = vld [vmem:[%s11993_s15 + $0x1608] ss:$16 sps:$4 sm:$0xff]  }
 0x463   : > { %7675 = vmatprep.subr.bf16.mxu1 %v10167_v48  ;;  %v10236_v48 = vld [vmem:[%s11993_s15 + $0x156c] ss:$16 sps:$4 sm:$0xff]  }
 0x465   : > { %v7381_v39 = vpop.f32.mrf.mxu1  ;;  %7626 = vmatmul.mubr.bf16.vlgmr.msra.gmra.mxu1 %v12470_v13  ;;  %7659 = vmatpush2.bf16.msra.mxu0 %v10162_v51  ;;  %v10239_v51 = vld [vmem:[%s11993_s15 + $0x17ec] ss:$16 sps:$4 sm:$0xff]  }
 0x466   : > { %v7382_v52 = vadd.f32 %v7381_v39, %v12891_v53  ;;  %7676 = vmatpush1.bf16.msra.mxu1 %v10165_v6  ;;  %7660 = vmatprep.subr.bf16.mxu0 %v10170_v50  ;;  %v10174_v53 = vld [vmem:[%s11993_s15 + $0x1328] ss:$16 sps:$4 sm:$0xff]   ;;  %v10245_v39 = vld [vmem:[%s11993_s15 + $0x17cc] ss:$16 sps:$4 sm:$0xff]  }
 0x467   : > { %v7383_v45 = vpop.f32.mrf.mxu1  ;;  %7677 = vmatprep.subr.bf16.mxu1 %v10173_v16  ;;  %7707 = vmatprep.mubr.bf16.mxu1 %v12482_v58  ;;  %v10183_v58 = vld [vmem:[%s11993_s15 + $0x1488] ss:$16 sps:$4 sm:$0xff]   ;;  %v10242_v16 = vld [vmem:[%s11993_s15 + $0x154c] ss:$16 sps:$4 sm:$0xff]  }
 0x468   : > { %v7384_v21 = vadd.f32 %v7383_v45, %v12897_v56  ;;  %v10180_v56 = vld [vmem:[%s11993_s15 + $0x1308] ss:$16 sps:$4 sm:$0xff]   ;;  %v10251_v45 = vld [vmem:[%s11993_s15 + $0x17ac] ss:$16 sps:$4 sm:$0xff]  }
 0x469   : > { %v7385_v13 = vpop.f32.mrf.mxu1  ;;  %7661 = vmatpush2.bf16.msra.mxu0 %v10168_v18  ;;  %v10234_v6 = vld [vmem:[%s11993_s15 + $0x1568] ss:$16 sps:$4 sm:$0xff]  }
 0x46a   : > { %7678 = vmatpush1.bf16.msra.mxu1 %v10171_v54  ;;  %7662 = vmatprep.subr.bf16.mxu0 %v10176_v59  ;;  %v10237_v50 = vld [vmem:[%s11993_s15 + $0x17e8] ss:$16 sps:$4 sm:$0xff]   ;;  %v10248_v54 = vld [vmem:[%s11993_s15 + $0x152c] ss:$16 sps:$4 sm:$0xff]  }
 0x46b   : > { %v7386_v42 = vpop.f32.mrf.mxu1  ;;  %7679 = vmatprep.subr.bf16.mxu1 %v10179_v60  ;;  %v10243_v18 = vld [vmem:[%s11993_s15 + $0x17c8] ss:$16 sps:$4 sm:$0xff]   ;;  %v10257_v13 = vld [vmem:[%s11993_s15 + $0x178c] ss:$16 sps:$4 sm:$0xff]  }
 0x46c   : > { %v10246_v59 = vld [vmem:[%s11993_s15 + $0x1528] ss:$16 sps:$4 sm:$0xff]   ;;  %v10260_v42 = vld [vmem:[%s11993_s15 + $0x176c] ss:$16 sps:$4 sm:$0xff]  }
 0x46d   : > { %7663 = vmatpush2.bf16.msra.mxu0 %v10174_v53  ;;  %v10249_v60 = vld [vmem:[%s11993_s15 + $0x17a8] ss:$16 sps:$4 sm:$0xff]  }
 0x46e   : > { %7680 = vmatpush1.bf16.msra.mxu1 %v10177_v25  ;;  %7664 = vmatprep.subr.bf16.mxu0 %v10182_v62  ;;  %v10252_v53 = vld [vmem:[%s11993_s15 + $0x1508] ss:$16 sps:$4 sm:$0xff]   ;;  %v10263_v62 = vld [vmem:[%s11993_s15 + $0x186c] ss:$16 sps:$4 sm:$0xff]  }
 0x46f   : > { %7681 = vmatprep.subr.bf16.mxu1 %v10185_v63  ;;  %v10255_v25 = vld [vmem:[%s11993_s15 + $0x1788] ss:$16 sps:$4 sm:$0xff]  }
 0x470   : > { %v10258_v63 = vld [vmem:[%s11993_s15 + $0x1768] ss:$16 sps:$4 sm:$0xff]  }
 0x471   : > { %7665 = vmatpush2.bf16.msra.mxu0 %v10180_v56  ;;  %v10261_v56 = vld [vmem:[%s11993_s15 + $0x1868] ss:$16 sps:$4 sm:$0xff]  }
 0x472   : > { %7682 = vmatpush1.bf16.msra.mxu1 %v10183_v58  ;;  %7716 = vmatprep.subr.bf16.mxu0 %v10191_v1  ;;  %v10266_v58 = vld [vmem:[%s11993_s15 + $0x174c] ss:$16 sps:$4 sm:$0xff]  }
 0x473   : > { %7683 = vmatprep.subr.bf16.mxu1 %v10188_v0  ;;  %v10269_v0 = vld [vmem:[%s11993_s15 + $0x184c] ss:$16 sps:$4 sm:$0xff]  }
 0x474   : > { %v7422_v29 = vpop.f32.mrf.mxu0  ;;  %7667 = vmatmul.mubr.bf16.vlgmr.msra.gmra.mxu0 %v12474_v14 }
 0x475   : > { %v12965_v3 = vadd.f32 %v7422_v29, %v7382_v52  ;;  %7717 = vmatpush1.bf16.msra.mxu0 %v10189_v23  ;;  %7748 = vmatprep.mubr.bf16.mxu0 %v12486_v22  ;;  %v10207_v22 = vld [vmem:[%s11993_s15 + $0x1688] ss:$16 sps:$4 sm:$0xff]   ;;  %v10272_v29 = vld [vmem:[%s11993_s15 + $0x172c] ss:$16 sps:$4 sm:$0xff]  }
 0x476   : > { %7684 = vmatpush1.bf16.msra.mxu1 %v10186_v32  ;;  %v7424_v7 = vpop.f32.mrf.mxu0  ;;  %7718 = vmatprep.subr.bf16.mxu0 %v10197_v2  ;;  %v10240_v52 = vld [vmem:[%s11993_s15 + $0x1548] ss:$16 sps:$4 sm:$0xff]  }
 0x477   : > { %7685 = vmatprep.subr.bf16.mxu1 %v10194_v26  ;;  %v12971_v11 = vadd.f32 %v7424_v7, %v7384_v21  ;;  %v10254_v21 = vld [vmem:[%s11993_s15 + $0x150c] ss:$16 sps:$4 sm:$0xff]   ;;  %v10264_v23 = vld [vmem:[%s11993_s15 + $0x1748] ss:$16 sps:$4 sm:$0xff]  }
 0x478   : > { %v7426_v14 = vpop.f32.mrf.mxu0  ;;  %v10267_v26 = vld [vmem:[%s11993_s15 + $0x1848] ss:$16 sps:$4 sm:$0xff]  }
 0x479   : > { %7719 = vmatpush1.bf16.msra.mxu0 %v10195_v5  ;;  %v10273_v7 = vld [vmem:[%s11993_s15 + $0x1828] ss:$16 sps:$4 sm:$0xff]   ;;  %v10281_v14 = vld [vmem:[%s11993_s15 + $0x180c] ss:$16 sps:$4 sm:$0xff]  }
 0x47a   : > { %7686 = vmatpush1.bf16.msra.mxu1 %v10192_v4  ;;  %v7427_v37 = vpop.f32.mrf.mxu0  ;;  %7720 = vmatprep.subr.bf16.mxu0 %v10203_v8  ;;  %v10275_v4 = vld [vmem:[%s11993_s15 + $0x182c] ss:$16 sps:$4 sm:$0xff]  }
 0x47b   : > { %7687 = vmatprep.subr.bf16.mxu1 %v10200_v17  ;;  %v10278_v8 = vld [vmem:[%s11993_s15 + $0x170c] ss:$16 sps:$4 sm:$0xff]   ;;  %v7799_v37 = vmax.f32 %v12822_v33, 0.0 }
 0x47c   : > { %v7831_v33 = vld [vmem:[%s13034_s8 + $0xe8] sm:$0xff] }
 0x47d   : > { %7721 = vmatpush1.bf16.msra.mxu0 %v10201_v38  ;;  %v7817_v38 = vld [vmem:[%s13034_s8 + $0x78] sm:$0xff] }
 0x47e   : > { %7688 = vmatpush1.bf16.msra.mxu1 %v10198_v55  ;;  %7722 = vmatprep.subr.bf16.mxu0 %v10209_v30  ;;  %v7833_v55 = vld [vmem:[%s13034_s8 + $0xf8] sm:$0xff] }
 0x47f   : > { %7689 = vmatprep.subr.bf16.mxu1 %v10206_v19  ;;  %v7832_v19 = vld [vmem:[%s13034_s8 + $0xf0] sm:$0xff] }
 0x481   : > { %7723 = vmatpush1.bf16.msra.mxu0 %v10207_v22  ;;  %v7816_v22 = vld [vmem:[%s13034_s8 + $0x70] sm:$0xff] }
 0x482   : > { %7690 = vmatpush1.bf16.msra.mxu1 %v10204_v57  ;;  %7724 = vmatprep.subr.bf16.mxu0 %v10215_v9  ;;  %v10283_v57 = vld [vmem:[%s13138_s0 + $0x60] ss:$0 sps:$4 sm:$0xff]  }
 0x483   : > { %7691 = vmatprep.subr.bf16.mxu1 %v10212_v34 }
 0x485   : > { %7725 = vmatpush1.bf16.msra.mxu0 %v10213_v40  ;;  %v7830_v40 = vld [vmem:[%s13034_s8 + $0xe0] sm:$0xff] }
 0x486   : > { %7692 = vmatpush2.bf16.msra.mxu1 %v10210_v20  ;;  %7726 = vmatprep.subr.bf16.mxu0 %v10221_v10  ;;  %v7814_v10 = vld [vmem:[%s13034_s8 + $0x60] sm:$0xff] }
 0x487   : > { %7693 = vmatprep.subr.bf16.mxu1 %v10218_v44 }
 0x489   : > { %7727 = vmatpush1.bf16.msra.mxu0 %v10219_v61  ;;  %v7813_v61 = vld [vmem:[%s13034_s8 + $0x58] sm:$0xff] }
 0x48a   : > { %7694 = vmatpush2.bf16.msra.mxu1 %v10216_v35  ;;  %7728 = vmatprep.subr.bf16.mxu0 %v10227_v36  ;;  %v7829_v35 = vld [vmem:[%s13034_s8 + $0xd8] sm:$0xff] }
 0x48b   : > { %7695 = vmatprep.subr.bf16.mxu1 %v10224_v31  ;;  %v7865_v36 = vld [vmem:[%s13034_s8 + $0x1f8] sm:$0xff] }
 0x48d   : > { %7729 = vmatpush1.bf16.msra.mxu0 %v10225_v43  ;;  %v7864_v43 = vld [vmem:[%s13034_s8 + $0x1f0] sm:$0xff] }
 0x48e   : > { %7696 = vmatpush2.bf16.msra.mxu1 %v10222_v27  ;;  %7730 = vmatprep.subr.bf16.mxu0 %v10233_v28  ;;  %v7849_v27 = vld [vmem:[%s13034_s8 + $0x178] sm:$0xff]  ;;  %v7848_v28 = vld [vmem:[%s13034_s8 + $0x170] sm:$0xff] }
 0x48f   : > { %7697 = vmatprep.subr.bf16.mxu1 %v10230_v46  ;;  %v7828_v46 = vld [vmem:[%s13034_s8 + $0xd0] sm:$0xff] }
 0x491   : > { %7731 = vmatpush1.bf16.msra.mxu0 %v10231_v49  ;;  %v7863_v49 = vld [vmem:[%s13034_s8 + $0x1e8] sm:$0xff] }
 0x492   : > { %7698 = vmatpush2.bf16.msra.mxu1 %v10228_v41  ;;  %7732 = vmatprep.subr.bf16.mxu0 %v10239_v51  ;;  %v7812_v41 = vld [vmem:[%s13034_s8 + $0x50] sm:$0xff]  ;;  %v7847_v51 = vld [vmem:[%s13034_s8 + $0x168] sm:$0xff] }
 0x493   : > { %7699 = vmatprep.subr.bf16.mxu1 %v10236_v48  ;;  %v7827_v48 = vld [vmem:[%s13034_s8 + $0xc8] sm:$0xff] }
 0x495   : > { %7733 = vmatpush2.bf16.msra.mxu0 %v10237_v50  ;;  %v7826_v50 = vld [vmem:[%s13034_s8 + $0xc0] sm:$0xff] }
 0x496   : > { %7700 = vmatpush2.bf16.msra.mxu1 %v10234_v6  ;;  %7734 = vmatprep.subr.bf16.mxu0 %v10245_v39  ;;  %v7811_v6 = vld [vmem:[%s13034_s8 + $0x48] sm:$0xff]  ;;  %v7825_v39 = vld [vmem:[%s13034_s8 + $0xb8] sm:$0xff] }
 0x497   : > { %7701 = vmatprep.subr.bf16.mxu1 %v10242_v16  ;;  %v7810_v16 = vld [vmem:[%s13034_s8 + $0x40] sm:$0xff] }
 0x499   : > { %7735 = vmatpush2.bf16.msra.mxu0 %v10243_v18  ;;  %v7824_v18 = vld [vmem:[%s13034_s8 + $0xb0] sm:$0xff] }
 0x49a   : > { %7702 = vmatpush2.bf16.msra.mxu1 %v10240_v52  ;;  %7736 = vmatprep.subr.bf16.mxu0 %v10251_v45  ;;  %v7809_v52 = vld [vmem:[%s13034_s8 + $0x38] sm:$0xff]  ;;  %v7823_v45 = vld [vmem:[%s13034_s8 + $0xa8] sm:$0xff] }
 0x49b   : > { %7703 = vmatprep.subr.bf16.mxu1 %v10248_v54  ;;  %v7808_v54 = vld [vmem:[%s13034_s8 + $0x30] sm:$0xff] }
 0x49d   : > { %7737 = vmatpush2.bf16.msra.mxu0 %v10249_v60  ;;  %v7822_v60 = vld [vmem:[%s13034_s8 + $0xa0] sm:$0xff] }
 0x49e   : > { %7704 = vmatpush2.bf16.msra.mxu1 %v10246_v59  ;;  %7738 = vmatprep.subr.bf16.mxu0 %v10257_v13  ;;  %v7807_v59 = vld [vmem:[%s13034_s8 + $0x28] sm:$0xff]  ;;  %v7821_v13 = vld [vmem:[%s13034_s8 + $0x98] sm:$0xff] }
 0x49f   : > { %7705 = vmatprep.subr.bf16.mxu1 %v10254_v21  ;;  %v7806_v21 = vld [vmem:[%s13034_s8 + $0x20] sm:$0xff] }
 0x4a1   : > { %7739 = vmatpush2.bf16.msra.mxu0 %v10255_v25  ;;  %v7820_v25 = vld [vmem:[%s13034_s8 + $0x90] sm:$0xff] }
 0x4a2   : > { %7706 = vmatpush2.bf16.msra.mxu1 %v10252_v53  ;;  %7740 = vmatprep.subr.bf16.mxu0 %v10260_v42  ;;  %v7805_v53 = vld [vmem:[%s13034_s8 + $0x18] sm:$0xff]  ;;  %v7804_v42 = vld [vmem:[%s13034_s8 + $0x10] sm:$0xff] }
 0x4a3   : > { %7765 = vmatprep.subr.bf16.mxu1 %v10263_v62  ;;  %v7819_v62 = vld [vmem:[%s13034_s8 + $0x88] sm:$0xff] }
 0x4a5   : > { %v7463_v1 = vpop.f32.mrf.mxu1  ;;  %7708 = vmatmul.mubr.bf16.vlgmr.msra.gmra.mxu1 %v12560_v15  ;;  %7741 = vmatpush2.bf16.msra.mxu0 %v10258_v63  ;;  %v7803_v63 = vld [vmem:[%s13034_s8 + $0x8] sm:$0xff] }
 0x4a6   : > { %v7464_v32 = vadd.f32 %v7463_v1, %v12965_v3  ;;  %7766 = vmatpush1.bf16.msra.mxu1 %v10261_v56  ;;  %7742 = vmatprep.subr.bf16.mxu0 %v10266_v58  ;;  %v10270_v3 = vld [vmem:[%s11993_s15 + $0x1728] ss:$16 sps:$4 sm:$0xff]   ;;  %v7818_v56 = vld [vmem:[%s13034_s8 + $0x80] sm:$0xff] }
 0x4a7   : > { %v7465_v2 = vpop.f32.mrf.mxu1  ;;  %7767 = vmatprep.subr.bf16.mxu1 %v10269_v0  ;;  %7789 = vmatprep.mubr.bf16.mxu1 %v10324_v47  ;;  %v10276_v47 = vld [vmem:[%s11993_s15 + $0x1708] ss:$16 sps:$4 sm:$0xff]   ;;  %v7802_v58 = vld [vmem:[%s13034_s8] sm:$0xff]  ;;  %v7798_v0 = vmax.f32 %v12816_v12, 0.0 }
 0x4a8   : > { %v7466_v5 = vadd.f32 %v7465_v2, %v12971_v11  ;;  %v10279_v11 = vld [vmem:[%s11993_s15 + $0x1808] ss:$16 sps:$4 sm:$0xff]   ;;  %v7862_v1 = vld [vmem:[%s13034_s8 + $0x1e0] sm:$0xff] }
 0x4a9   : > { %v7467_v15 = vpop.f32.mrf.mxu1  ;;  %7743 = vmatpush2.bf16.msra.mxu0 %v10264_v23  ;;  %v7846_v23 = vld [vmem:[%s13034_s8 + $0x160] sm:$0xff]  ;;  %v7861_v2 = vld [vmem:[%s13034_s8 + $0x1d8] sm:$0xff] }
 0x4aa   : > { %7768 = vmatpush1.bf16.msra.mxu1 %v10267_v26  ;;  %7744 = vmatprep.subr.bf16.mxu0 %v10272_v29  ;;  %v7845_v12 = vld [vmem:[%s13034_s8 + $0x158] sm:$0xff] }
 0x4ab   : > { %v7468_v17 = vpop.f32.mrf.mxu1  ;;  %7769 = vmatprep.subr.bf16.mxu1 %v10275_v4 }
 0x4ad   : > { %7745 = vmatpush2.bf16.msra.mxu0 %v10270_v3  ;;  %v7844_v3 = vld [vmem:[%s13034_s8 + $0x150] sm:$0xff] }
 0x4ae   : > { %7770 = vmatpush1.bf16.msra.mxu1 %v10273_v7  ;;  %7746 = vmatprep.subr.bf16.mxu0 %v10278_v8  ;;  %v7859_v7 = vld [vmem:[%s13034_s8 + $0x1c8] sm:$0xff] }
 0x4af   : > { %7771 = vmatprep.subr.bf16.mxu1 %v10281_v14  ;;  %v7843_v8 = vld [vmem:[%s13034_s8 + $0x148] sm:$0xff]  ;;  %v7858_v14 = vld [vmem:[%s13034_s8 + $0x1c0] sm:$0xff] }
 0x4b1   : > { %7747 = vmatpush2.bf16.msra.mxu0 %v10276_v47  ;;  %v7842_v47 = vld [vmem:[%s13034_s8 + $0x140] sm:$0xff] }
 0x4b2   : > { %7772 = vmatpush1.bf16.msra.mxu1 %v10279_v11  ;;  %8968 = vmatprep.subr.mxu0 %v7833_v55  ;;  %v7857_v11 = vld [vmem:[%s13034_s8 + $0x1b8] sm:$0xff] }
 0x4b3   : > { %9003 = vmatprep.subr.mxu1 %v7865_v36  ;;  %v7841_v55 = vld [vmem:[%s13034_s8 + $0x138] sm:$0xff]  ;;  %v7835_v36 = vld [vmem:[%s13034_s8 + $0x108] sm:$0xff] }
 0x4b4   : > { %v7504_v30 = vpop.f32.mrf.mxu0  ;;  %7749 = vmatmul.mubr.bf16.vlgmr.msra.gmra.mxu0 %v12564_v24  ;;  %v7815_v24 = vld [vmem:[%s13034_s8 + $0x68] sm:$0xff] }
 0x4b5   : > { %8962 = vmatmul.mubr.msk.bf16.vlgmr.msra.gmra.mxu1 %vm6728_vm0, %v10283_v57  ;;  %v13048_v34 = vadd.f32 %v7504_v30, %v7464_v32  ;;  %8969 = vmatpush3.msra.mxu0 %v7817_v38  ;;  %v7856_v38 = vld [vmem:[%s13034_s8 + $0x1b0] sm:$0xff]  ;;  %v7839_v30 = vld [vmem:[%s13034_s8 + $0x128] sm:$0xff]  ;;  %v7854_v57 = vld [vmem:[%s13034_s8 + $0x1a0] sm:$0xff] }
 0x4b6   : > { %7937 = vmatprep.mubr.f32.mxu0 %v7799_v37  ;;  %v7506_v9 = vpop.f32.mrf.mxu0  ;;  %8970 = vmatprep.subr.mxu0 %v7832_v19  ;;  %v7840_v37 = vld [vmem:[%s13034_s8 + $0x130] sm:$0xff]  ;;  %v7855_v19 = vld [vmem:[%s13034_s8 + $0x1a8] sm:$0xff] }
 0x4b7   : > { %v13052_v20 = vadd.f32 %v7506_v9, %v7466_v5  ;;  %8971 = vmatpush3.msra.mxu0 %v7816_v22  ;;  %9004 = vmatpush3.msra.mxu1 %v7849_v27  ;;  %v7860_v5 = vld [vmem:[%s13034_s8 + $0x1d0] sm:$0xff]  ;;  %v7853_v9 = vld [vmem:[%s13034_s8 + $0x198] sm:$0xff]  ;;  %v7850_v27 = vld [vmem:[%s13034_s8 + $0x180] sm:$0xff] }
 0x4b8   : > { %v7508_v44 = vpop.f32.mrf.mxu0  ;;  %8972 = vmatprep.subr.mxu0 %v7831_v33  ;;  %9005 = vmatprep.subr.mxu1 %v7864_v43  ;;  %v7834_v43 = vld [vmem:[%s13034_s8 + $0x100] sm:$0xff] }
 0x4b9   : > { %8973 = vmatpush3.msra.mxu0 %v7815_v24  ;;  %9006 = vmatpush3.msra.mxu1 %v7848_v28  ;;  %v7852_v44 = vld [vmem:[%s13034_s8 + $0x190] sm:$0xff] }
 0x4ba   : > { %v7509_v31 = vpop.f32.mrf.mxu0  ;;  %8974 = vmatprep.subr.mxu0 %v7830_v40  ;;  %9007 = vmatprep.subr.mxu1 %v7863_v49 }
 0x4bb   : > { %8975 = vmatpush3.msra.mxu0 %v7814_v10  ;;  %9008 = vmatpush3.msra.mxu1 %v7847_v51 }
 0x4bc   : > { %8976 = vmatprep.subr.mxu0 %v7829_v35  ;;  %9009 = vmatprep.subr.mxu1 %v7862_v1  ;;  %v7836_v35 = vld [vmem:[%s13034_s8 + $0x110] sm:$0xff] }
 0x4bd   : > { %8977 = vmatpush3.msra.mxu0 %v7813_v61  ;;  %9010 = vmatpush3.msra.mxu1 %v7846_v23  ;;  %v7851_v61 = vld [vmem:[%s13034_s8 + $0x188] sm:$0xff] }
 0x4be   : > { %8978 = vmatprep.subr.mxu0 %v7828_v46  ;;  %9011 = vmatprep.subr.mxu1 %v7861_v2 }
 0x4bf   : > { %8979 = vmatpush3.msra.mxu0 %v7812_v41  ;;  %9012 = vmatpush3.msra.mxu1 %v7845_v12 }
 0x4c0   : > { %8980 = vmatprep.subr.mxu0 %v7827_v48  ;;  %9013 = vmatprep.subr.mxu1 %v7860_v5 }
 0x4c1   : > { %8981 = vmatpush3.msra.mxu0 %v7811_v6  ;;  %9014 = vmatpush3.msra.mxu1 %v7844_v3 }
 0x4c2   : > { %8982 = vmatprep.subr.mxu0 %v7826_v50  ;;  %9015 = vmatprep.subr.mxu1 %v7859_v7 }
 0x4c3   : > { %8983 = vmatpush3.msra.mxu0 %v7810_v16  ;;  %9016 = vmatpush3.msra.mxu1 %v7843_v8 }
 0x4c4   : > { %8984 = vmatprep.subr.mxu0 %v7825_v39  ;;  %9017 = vmatprep.subr.mxu1 %v7858_v14 }
 0x4c5   : > { %8985 = vmatpush3.msra.mxu0 %v7809_v52  ;;  %9018 = vmatpush3.msra.mxu1 %v7842_v47 }
 0x4c6   : > { %8986 = vmatprep.subr.mxu0 %v7824_v18  ;;  %9019 = vmatprep.subr.mxu1 %v7857_v11 }
 0x4c7   : > { %8987 = vmatpush3.msra.mxu0 %v7808_v54  ;;  %9020 = vmatpush3.msra.mxu1 %v7841_v55 }
 0x4c8   : > { %8988 = vmatprep.subr.mxu0 %v7823_v45  ;;  %9021 = vmatprep.subr.mxu1 %v7856_v38 }
 0x4c9   : > { %8989 = vmatpush3.msra.mxu0 %v7807_v59  ;;  %9022 = vmatpush3.msra.mxu1 %v7840_v37 }
 0x4ca   : > { %8990 = vmatprep.subr.mxu0 %v7822_v60  ;;  %9023 = vmatprep.subr.mxu1 %v7855_v19 }
 0x4cb   : > { %8991 = vmatpush3.msra.mxu0 %v7806_v21  ;;  %9024 = vmatpush3.msra.mxu1 %v7839_v30 }
 0x4cc   : > { %8992 = vmatprep.subr.mxu0 %v7821_v13  ;;  %9025 = vmatprep.subr.mxu1 %v7854_v57 }
 0x4cd   : > { %8993 = vmatpush3.msra.mxu0 %v7805_v53 }
 0x4ce   : > { %8994 = vmatprep.subr.mxu0 %v7820_v25 }
 0x4cf   : > { %8995 = vmatpush3.msra.mxu0 %v7804_v42 }
 0x4d0   : > { %8996 = vmatprep.subr.mxu0 %v7819_v62 }
 0x4d1   : > { %8997 = vmatpush3.msra.mxu0 %v7803_v63 }
 0x4d2   : > { %8998 = vmatprep.subr.mxu0 %v7818_v56 }
 0x4d3   : > { %8999 = vmatpush3.msra.mxu0 %v7802_v58 }
 0x4d4   : > { %7938 = vmatmul.mubr.f32.vlgmr.msra.gmra.mxu0 %v7798_v0 }
 0x4e5   : > { %v7545_v32 = vpop.f32.mrf.mxu1 }
 0x4e6   : > { %v7546_v26 = vadd.f32 %v7545_v32, %v13048_v34  ;;  %v7838_v34 = vld [vmem:[%s13034_s8 + $0x120] sm:$0xff] }
 0x4e7   : > { %v7547_v29 = vpop.f32.mrf.mxu1  ;;  %9026 = vmatpush3.msra.mxu1 %v7838_v34 }
 0x4e8   : > { %v7548_v4 = vadd.f32 %v7547_v29, %v13052_v20  ;;  %9027 = vmatprep.subr.mxu1 %v7853_v9  ;;  %v7837_v20 = vld [vmem:[%s13034_s8 + $0x118] sm:$0xff] }
 0x4e9   : > { %v7549_v15 = vpop.f32.mrf.mxu1  ;;  %9028 = vmatpush3.msra.mxu1 %v7837_v20 }
 0x4ea   : > { %9029 = vmatprep.subr.mxu1 %v7852_v44  ;;  %v8963_v15 = vld [vmem:[%s1893_s12] ss:$0 sm:$0xff] }
 0x4eb   : > { %v7550_v17 = vpop.f32.mrf.mxu1  ;;  %9030 = vmatpush3.msra.mxu1 %v7836_v35 }
 0x4ec   : > { %9031 = vmatprep.subr.mxu1 %v7851_v61 }
 0x4ed   : > { %9032 = vmatpush3.msra.mxu1 %v7835_v36 }
 0x4ee   : > { %9033 = vmatprep.subr.mxu1 %v7850_v27 }
 0x4ef   : > { %9034 = vmatpush3.msra.mxu1 %v7834_v43 }
 0x4f4   : > { %v7586_v22 = vpop.f32.mrf.mxu0 }
 0x4f5   : > { %v7587_v33 = vadd.f32 %v7586_v22, %v7546_v26 }
 0x4f6   : > { %v7588_v24 = vpop.f32.mrf.mxu0 }
 0x4f7   : > { %v7589_v40 = vadd.f32 %v7588_v24, %v7548_v4 }
 0x4f8   : > { %v7590_v10 = vpop.f32.mrf.mxu0 }
 0x4fa   : > { %v7591_v31 = vpop.f32.mrf.mxu0 }
 0x525   : > { %v7627_v46 = vpop.f32.mrf.mxu1 }
 0x526   : > { %v7628_v28 = vadd.f32 %v7627_v46, %v7587_v33 }
 0x527   : > { %v7629_v41 = vpop.f32.mrf.mxu1 }
 0x528   : > { %v7630_v49 = vadd.f32 %v7629_v41, %v7589_v40 }
 0x529   : > { %v7631_v48 = vpop.f32.mrf.mxu1 }
 0x52b   : > { %v7632_v51 = vpop.f32.mrf.mxu1 }
 0x534   : > { %v7668_v6 = vpop.f32.mrf.mxu0 }
 0x535   : > { %v7669_v59 = vadd.f32 %v7668_v6, %v7628_v28 }
 0x536   : > { %v7670_v50 = vpop.f32.mrf.mxu0 }
 0x537   : > { %v7671_v60 = vadd.f32 %v7670_v50, %v7630_v49 }
 0x538   : > { %v7672_v16 = vpop.f32.mrf.mxu0 }
 0x53a   : > { %v7673_v39 = vpop.f32.mrf.mxu0 }
 0x565   : > { %v7709_v52 = vpop.f32.mrf.mxu1 }
 0x566   : > { %v7710_v21 = vadd.f32 %v7709_v52, %v7669_v59 }
 0x567   : > { %v7711_v18 = vpop.f32.mrf.mxu1 }
 0x568   : > { %v7712_v25 = vadd.f32 %v7711_v18, %v7671_v60 }
 0x569   : > { %v7713_v54 = vpop.f32.mrf.mxu1 }
 0x56b   : > { %v7714_v45 = vpop.f32.mrf.mxu1 }
 0x574   : > { %v7750_v13 = vpop.f32.mrf.mxu0 }
 0x575   : > { %v7791_v53 = vpop.f32.mrf.mxu1  ;;  %v7751_v42 = vadd.f32 %v7750_v13, %v7710_v21 }
 0x576   : > { %v7752_v62 = vpop.f32.mrf.mxu0 }
 0x577   : > { %v7793_v63 = vpop.f32.mrf.mxu1  ;;  %v7753_v56 = vadd.f32 %v7752_v62, %v7712_v25  ;;  %v7792_v58 = vadd.f32 %v7791_v53, %v7751_v42 }
 0x578   : > { %v7754_v0 = vpop.f32.mrf.mxu0 }
 0x579   : > { %v7795_v1 = vpop.f32.mrf.mxu1  ;;  %v7794_v32 = vadd.f32 %v7793_v63, %v7753_v56  ;;  %v7800_v29 = vmax.f32 %v7792_v58, 0.0 }
 0x57a   : > { %v7755_v23 = vpop.f32.mrf.mxu0 }
 0x57b   : > { %v7796_v26 = vpop.f32.mrf.mxu1  ;;  %v7801_v2 = vmax.f32 %v7794_v32, 0.0 }
 0x57d   : > { %8007 = vmatprep.mubr.f32.mxu1 %v7801_v2 }
 0x57e   : > { %8008 = vmatmul.mubr.f32.vlgmr.msra.gmra.mxu1 %v7800_v29 }
 0x594   : > { %v9000_v12 = vpop.f32.mrf.mxu0 }
 0x596   : > { %v9001_v4 = vpop.f32.mrf.mxu0 }
 0x597   : > { %v9002_v5 = vadd.f32 %v9001_v4, %v9000_v12 }
 0x599   : > { %v7940_v17 = vadd.f32 %v9002_v5, %v8963_v15 }
 0x63e   : > { %v9035_v3 = vpop.f32.mrf.mxu1 }
 0x640   : > { %v9036_v7 = vpop.f32.mrf.mxu1 }
 0x641   : > { %v9037_v8 = vadd.f32 %v9036_v7, %v9035_v3 }
 0x643   : > { %v8010_v14 = vadd.f32 %v9037_v8, %v7940_v17 }
 0x645   : > { %8013 = vst [vmem:[%s1900_s17] sm:$0xff] %v8010_v14 }
 0x646 PF: > { %s15_s22 = sadd.s32 1, %s10322_s22   ;;  %s13144_s18 = smov %s10310_s19 }
 0x647   : > { %p12_p10 = scmp.ge.s32.totalorder %s15_s22, 4   ;;  %s13145_s19 = smov %s10390_s26 }
 0x648   : > { %s13146_s20 = smov %s10318_s21  ;;  %s13147_s21 = smov %s13149_s23 }
 0x649   :  { %14 = sbr.rel (!%p12_p10) target bundleno = 3 (0x3), region = 110 }

</bundles_post_ra>
